<compile_context>
chip_gen: v7x
topology: tpu7x:2x2x1
jax: 0.10.0
libtpu: 0.0.40
codegen_flags: <defaults>
</compile_context>

<pallas_src>
import numpy as np
import jax
import jax.numpy as jnp
from jax import lax
from jax.experimental import pallas as pl
from jax.experimental.pallas import tpu as pltpu


POOL_POS = ((0, 0), (0, 1), (1, 0), (1, 1))   # (a, b) offsets inside a 2x2 pool window
NI = 8                                        # images per fused-conv grid step (8..32 ok)


# ---------------------------------------------------------------------------
# Kernels
# ---------------------------------------------------------------------------
def fused_conv_kernel(cols1_ref, w1_ref, s1_ref, b1_ref,
                      w2_ref, s2_ref, b2_ref, masks_ref,
                      o_ref, h1s_ref, cols2_ref):
    """Both conv blocks for NI images, entirely in VMEM.

    cols1_ref : (NI,56,64) bf16  conv1 patches. Row ih*7+iw = 7x7 super-pixel (rows
                49..55 are zero pad), col u*8+v = x_pad[4*ih+u, 4*iw+v] (8x8 window).
    w1_ref    : (64,256)  bf16  conv1 weights, block-structured: cols = pool j (4) x
                h1-parity q (4) x cout (16).
    s1_ref,b1_ref : (1,256) f32 folded BN1 scale/bias tiled over the 16 blocks.
    w2_ref    : (576,128) bf16  conv2 weights: rows = 9 (su,sv) shifts x 4 parities x
                16 cin; cols = 4 pool positions x 32 cout.
    s2_ref,b2_ref : (1,128) f32 folded BN2 scale/bias tiled.
    masks_ref : (9,56,64) f32   shift-validity masks (rows 49..55 are 0).
    o_ref     : (NI,49,32) bf16 pooled layer-2 output (rows = 7x7 pixels, row-major).
    h1s_ref   : (NI,72,64) f32  scratch: row-padded, parity-in-lanes h1.
    cols2_ref : (NI,56,576) bf16 scratch: in-VMEM im2col for conv2.
    """
    ni = cols1_ref.shape[0]

    # ---- layer 1: one matmul folds the 4 pool positions x 4 parities into N=256 ------
    c1 = cols1_ref[...].reshape(ni * 56, 64)
    y1 = jnp.dot(c1, w1_ref[...], preferred_element_type=jnp.float32)   # (NI*56,256)
    y1 = jnp.maximum(y1 * s1_ref[...] + b1_ref[...], 0.0)               # BN (folded) + ReLU
    t1 = jnp.maximum(y1[:, 0:128], y1[:, 128:256])                      # MaxPool2 over the
    h1 = jnp.maximum(t1[:, 0:64], t1[:, 64:128])                        # 4 pool blocks
    h1 = h1.reshape(ni, 56, 64)                                         # parity-in-lanes

    # Stage h1 into a row-padded scratch so every conv2 shift is a static 56-row slice.
    # Only the pad rows are (re)zeroed; rows 8..63 are fully overwritten below.
    h1s_ref[:, 0:8, :] = jnp.zeros((ni, 8, 64), jnp.float32)
    h1s_ref[:, 64:72, :] = jnp.zeros((ni, 8, 64), jnp.float32)
    h1s_ref[:, 8:64, :] = h1

    # ---- layer-2 im2col: 9 shifted 64-lane slabs (masked), cast to bf16 at store -----
    for si, su in enumerate((-1, 0, 1)):
        for sj, sv in enumerate((-1, 0, 1)):
            idx = si * 3 + sj
            start = 8 + su * 7 + sv                                     # in [0, 16]
            piece = h1s_ref[:, start:start + 56, :] * masks_ref[idx]    # (NI,56,64) f32
            cols2_ref[:, :, idx * 64:(idx + 1) * 64] = piece.astype(jnp.bfloat16)

    # ---- layer 2: single matmul, 4 pool positions folded into N=128 -------------------
    c2 = cols2_ref[...].reshape(ni * 56, 576)
    y2 = jnp.dot(c2, w2_ref[...], preferred_element_type=jnp.float32)   # (NI*56,128)
    y2 = jnp.maximum(y2 * s2_ref[...] + b2_ref[...], 0.0)
    t2 = jnp.maximum(y2[:, 0:64], y2[:, 64:128])
    h2 = jnp.maximum(t2[:, 0:32], t2[:, 32:64]).reshape(ni, 56, 32)     # pooled (7x7,32)
    o_ref[...] = h2[:, 0:49, :].astype(o_ref.dtype)


def fc_logsoftmax_kernel(x_ref, w_ref, b_ref, o_ref):
    """x_ref: (MB,1568) bf16   w_ref: (1568,128) bf16   b_ref: (1,128) f32   o_ref: (MB,128).

    Lanes >= 10 carry bias -1e30, so they vanish from the max / logsumexp.
    """
    logits = jnp.dot(x_ref[...], w_ref[...],
                     preferred_element_type=jnp.float32) + b_ref[...]
    m = jnp.max(logits, axis=1, keepdims=True)
    s = logits - m
    lse = jnp.log(jnp.sum(jnp.exp(s), axis=1, keepdims=True))
    o_ref[...] = (s - lse).astype(o_ref.dtype)


# ---------------------------------------------------------------------------
# Glue (a handful of tiny XLA ops only)
# ---------------------------------------------------------------------------
def _build_cols1(x):
    """(B,28,28) f32 -> (B,56,64) bf16 conv1 patches.

    Row ih*7+iw = super-pixel (rows 49..55 zero-padded); column 32*di+8*p+4*dj+q =
    x_pad[4*ih + 4*di + p, 4*iw + 4*dj + q], i.e. the 8x8 window at (4*ih, 4*iw).
    """
    B = x.shape[0]
    xp = jnp.pad(x, ((0, 0), (2, 2), (2, 2)))                           # (B,32,32)
    pieces = [xp[:, 4 * di:4 * di + 28, 4 * dj:4 * dj + 28].reshape(B, 7, 4, 7, 4)
              for di in (0, 1) for dj in (0, 1)]                        # [b,ih,p,iw,q]
    d0 = jnp.stack(pieces[0:2], axis=4)                                 # [b,ih,p,iw,dj,q]
    d1 = jnp.stack(pieces[2:4], axis=4)
    g = jnp.stack([d0, d1], axis=2)                                     # [b,ih,di,p,iw,dj,q]
    g = jnp.transpose(g, (0, 1, 4, 2, 3, 5, 6))                         # [b,ih,iw,di,p,dj,q]
    cols1 = g.reshape(B, 49, 64)
    cols1 = jnp.pad(cols1, ((0, 0), (0, 7), (0, 0)))                    # rows 49 -> 56
    return cols1.astype(jnp.bfloat16)


@jax.jit
def cnn_fashion_mnist_forward(x_nchw, params):
    # TODO(synk): BatchNorm is implemented in inference mode (running stats folded into
    # scale/bias); PyTorch train-mode batch statistics are not computed.
    B = x_nchw.shape[0]
    Bp = ((B + NI - 1) // NI) * NI
    x = x_nchw[:, 0, :, :].astype(jnp.float32)                          # (B,28,28), Cin=1
    if Bp != B:
        x = jnp.pad(x, ((0, Bp - B), (0, 0), (0, 0)))
    cols1 = _build_cols1(x)                                             # (Bp,56,64) bf16

    h2 = pl.pallas_call(
        fused_conv_kernel,
        out_shape=jax.ShapeDtypeStruct((Bp, 49, 32), jnp.bfloat16),
        grid=(Bp // NI,),
        in_specs=[
            pl.BlockSpec((NI, 56, 64), lambda b: (b, 0, 0)),
            pl.BlockSpec((64, 256), lambda b: (0, 0)),
            pl.BlockSpec((1, 256), lambda b: (0, 0)),
            pl.BlockSpec((1, 256), lambda b: (0, 0)),
            pl.BlockSpec((576, 128), lambda b: (0, 0)),
            pl.BlockSpec((1, 128), lambda b: (0, 0)),
            pl.BlockSpec((1, 128), lambda b: (0, 0)),
            pl.BlockSpec((9, 56, 64), lambda b: (0, 0, 0)),
        ],
        out_specs=pl.BlockSpec((NI, 49, 32), lambda b: (b, 0, 0)),
        scratch_shapes=[pltpu.VMEM((NI, 72, 64), jnp.float32),
                        pltpu.VMEM((NI, 56, 576), jnp.bfloat16)],
        compiler_params=pltpu.CompilerParams(dimension_semantics=("parallel",)),
    )(cols1, params["w1m"], params["s1t"], params["b1t"],
      params["w2m"], params["s2t"], params["b2t"], params["masks"])

    # (h, w, c) flatten; FC weight rows were permuted to match in pack_params.
    flat = h2.reshape(Bp, 49 * 32)                                       # bf16, free reshape
    MB = Bp if Bp <= 128 else 128
    Bfc = ((Bp + MB - 1) // MB) * MB
    if Bfc != Bp:
        flat = jnp.pad(flat, ((0, Bfc - Bp), (0, 0)))
    out = pl.pallas_call(
        fc_logsoftmax_kernel,
        out_shape=jax.ShapeDtypeStruct((Bfc, 128), jnp.float32),
        grid=(Bfc // MB,),
        in_specs=[
            pl.BlockSpec((MB, 1568), lambda i: (i, 0)),
            pl.BlockSpec((1568, 128), lambda i: (0, 0)),
            pl.BlockSpec((1, 128), lambda i: (0, 0)),
        ],
        out_specs=pl.BlockSpec((MB, 128), lambda i: (i, 0)),
        compiler_params=pltpu.CompilerParams(dimension_semantics=("parallel",)),
    )(flat, params["wfc"], params["bfc"])
    return out[:B, :10]


# ---------------------------------------------------------------------------
# Parameters: synthetic raw weights + packing into kernel-friendly layouts
# ---------------------------------------------------------------------------
def init_params(key):
    """Deterministic synthetic parameters (shapes match the PyTorch module)."""
    eps = 1e-5
    keys = jax.random.split(key, 14)

    def layer(kw, kb, kg, kbe, km, kv, Cin, Cout):
        w = 0.1 * jax.random.normal(kw, (5, 5, Cin, Cout), jnp.float32)   # HWIO
        b = 0.05 * jax.random.normal(kb, (Cout,), jnp.float32)
        gamma = 1.0 + 0.1 * jax.random.normal(kg, (Cout,), jnp.float32)
        beta = 0.05 * jax.random.normal(kbe, (Cout,), jnp.float32)
        mean = 0.05 * jax.random.normal(km, (Cout,), jnp.float32)
        var = 1.0 + 0.1 * jax.nn.sigmoid(jax.random.normal(kv, (Cout,), jnp.float32))
        scale = gamma / jnp.sqrt(var + eps)                 # BN fold (eval mode)
        bias = (b - mean) * scale + beta
        return w, scale, bias

    w1, s1, c1 = layer(*keys[0:6], 1, 16)
    w2, s2, c2 = layer(*keys[6:12], 16, 32)
    # FC weight rows ordered (c, h, w) like torch's .view on the NCHW tensor.
    wf = 0.05 * jax.random.normal(keys[12], (32 * 7 * 7, 10), jnp.float32)
    bf = 0.05 * jax.random.normal(keys[13], (10,), jnp.float32)
    return dict(w1=w1, s1=s1, c1=c1, w2=w2, s2=s2, c2=c2, wf=wf, bf=bf)


def pack_params(raw):
    """One-time host-side packing into the block-structured / padded kernel layouts."""
    w1 = np.asarray(raw["w1"], np.float32)       # (5,5,1,16)
    w2 = np.asarray(raw["w2"], np.float32)       # (5,5,16,32)
    wf = np.asarray(raw["wf"], np.float32)       # (1568,10) rows = c*49 + h*7 + w
    bf = np.asarray(raw["bf"], np.float32)       # (10,)

    # conv1: rows = 8x8 window tap u*8+v; cols = pool j (4) x parity q (4) x cout (16).
    w1m = np.zeros((64, 256), np.float32)
    for u in range(8):
        for v in range(8):
            for j, (a, b) in enumerate(POOL_POS):
                for qh in (0, 1):
                    for qw in (0, 1):
                        dy, dx = u - (2 * qh + a), v - (2 * qw + b)
                        if 0 <= dy < 5 and 0 <= dx < 5:
                            col0 = j * 64 + (qh * 2 + qw) * 16
                            w1m[u * 8 + v, col0:col0 + 16] = w1[dy, dx, 0, :]

    # conv2: rows = 9 (su,sv) shifts x 4 parities x 16 cin; cols = 4 pool pos x 32 cout.
    w2m = np.zeros((576, 128), np.float32)
    for si, su in enumerate((-1, 0, 1)):
        for sj, sv in enumerate((-1, 0, 1)):
            for qu in (0, 1):
                for qv in (0, 1):
                    u, v = 2 * su + qu, 2 * sv + qv
                    for j, (a, b) in enumerate(POOL_POS):
                        dy, dx = u + 2 - a, v + 2 - b
                        if 0 <= dy < 5 and 0 <= dx < 5:
                            row0 = ((si * 3 + sj) * 4 + (qu * 2 + qv)) * 16
                            w2m[row0:row0 + 16, j * 32:(j + 1) * 32] = w2[dy, dx, :, :]

    s1t = np.tile(np.asarray(raw["s1"], np.float32), 16)[None, :]      # (1,256)
    b1t = np.tile(np.asarray(raw["c1"], np.float32), 16)[None, :]
    s2t = np.tile(np.asarray(raw["s2"], np.float32), 4)[None, :]       # (1,128)
    b2t = np.tile(np.asarray(raw["c2"], np.float32), 4)[None, :]

    # FC: permute rows from torch's (c,h,w) order to the kernel's (h,w,c) flatten and
    # pad N from 10 to a lane-dense 128 (padded lanes get bias -1e30).
    wfc = wf.reshape(32, 49, 10).transpose(1, 0, 2).reshape(1568, 10)
    wfc_pad = np.zeros((1568, 128), np.float32)
    wfc_pad[:, :10] = wfc
    bfc_pad = np.full((1, 128), -1e30, np.float32)
    bfc_pad[0, :10] = bf

    # Validity masks for the 9 (su,sv) shifts of the 7x7 grid; rows 49..55 are cols2
    # row padding and are always 0.
    masks = np.zeros((9, 56, 64), np.float32)
    for si, su in enumerate((-1, 0, 1)):
        for sj, sv in enumerate((-1, 0, 1)):
            oh = np.arange(7)[:, None]
            ow = np.arange(7)[None, :]
            valid = ((oh + su >= 0) & (oh + su <= 6) &
                     (ow + sv >= 0) & (ow + sv <= 6)).astype(np.float32)
            masks[si * 3 + sj, :49, :] = np.repeat(valid.reshape(49, 1), 64, axis=1)

    return dict(
        w1m=jnp.asarray(w1m, jnp.bfloat16), s1t=jnp.asarray(s1t), b1t=jnp.asarray(b1t),
        w2m=jnp.asarray(w2m, jnp.bfloat16), s2t=jnp.asarray(s2t), b2t=jnp.asarray(b2t),
        wfc=jnp.asarray(wfc_pad, jnp.bfloat16), bfc=jnp.asarray(bfc_pad),
        masks=jnp.asarray(masks),
    )


# ---------------------------------------------------------------------------
# Plain-JAX f32 reference of the same (BN-folded, eval-mode) forward pass
# ---------------------------------------------------------------------------
@jax.jit
def reference_forward(x_nchw, raw):
    x = jnp.transpose(x_nchw, (0, 2, 3, 1)).astype(jnp.float32)         # NHWC

    def block(h, w, scale, bias):
        y = lax.conv_general_dilated(h, w, (1, 1), ((2, 2), (2, 2)),
                                     dimension_numbers=("NHWC", "HWIO", "NHWC"))
        y = jnp.maximum(y * scale + bias, 0.0)
        return lax.reduce_window(y, -jnp.inf, lax.max,
                                 (1, 2, 2, 1), (1, 2, 2, 1), "VALID")

    h1 = block(x, raw["w1"], raw["s1"], raw["c1"])                       # (B,14,14,16)
    h2 = block(h1, raw["w2"], raw["s2"], raw["c2"])                      # (B,7,7,32)
    flat = jnp.transpose(h2, (0, 3, 1, 2)).reshape(x.shape[0], 32 * 7 * 7)
    logits = flat @ raw["wf"] + raw["bf"]
    return jax.nn.log_softmax(logits, axis=1)


if __name__ == "__main__":
    key = jax.random.PRNGKey(0)
    kx, kp = jax.random.split(key)
    # Fashion-MNIST geometry is fixed by the module (fc expects 7*7*32): 28x28x1.
    # B=16 -> two fused-conv grid steps of NI=8 images (exercises batching & both v7x TCs).
    B = 16
    x = jax.random.normal(kx, (B, 1, 28, 28), jnp.float32)
    raw = init_params(kp)
    params = pack_params(raw)

    out = cnn_fashion_mnist_forward(x, params)
    out = jax.block_until_ready(out)

    assert out.shape == (B, 10), out.shape
    assert bool(jnp.all(jnp.isfinite(out)))
    # log-softmax rows must exponentiate-sum to ~1
    row_sums = jnp.sum(jnp.exp(out), axis=1)
    assert bool(jnp.allclose(row_sums, 1.0, atol=1e-4)), row_sums

    # cross-check the bf16 Pallas pipeline against the f32 JAX reference
    ref = reference_forward(x, raw)
    max_diff = float(jnp.max(jnp.abs(out - ref)))
    assert max_diff < 0.3, f"kernel vs reference max |diff| = {max_diff}"
    print("KERNEL_OK")
</pallas_src>

<mosaic_0001>
module attributes {stable_mosaic.version = 11 : i64} {
  func.func @fused_conv_kernel(%arg0: i32, %arg1: memref<8x56x64xbf16, #tpu.memory_space<vmem>>, %arg2: memref<64x256xbf16, #tpu.memory_space<vmem>>, %arg3: memref<1x256xf32, #tpu.memory_space<vmem>>, %arg4: memref<1x256xf32, #tpu.memory_space<vmem>>, %arg5: memref<576x128xbf16, #tpu.memory_space<vmem>>, %arg6: memref<1x128xf32, #tpu.memory_space<vmem>>, %arg7: memref<1x128xf32, #tpu.memory_space<vmem>>, %arg8: memref<9x56x64xf32, #tpu.memory_space<vmem>>, %arg9: memref<8x49x32xbf16, #tpu.memory_space<vmem>>, %arg10: memref<8x72x64xf32, #tpu.memory_space<vmem>>, %arg11: memref<8x56x576xbf16, #tpu.memory_space<vmem>>) attributes {dimension_semantics = [#tpu.dimension_semantics<parallel>], iteration_bounds = array<i64: 2>, scalar_prefetch = 0 : i64, scratch_operands = 2 : i64, tpu.core_type = #tpu.core_type<tc>, window_params = [{transform_indices = @transform_0, window_bounds = array<i64: 8, 56, 64>}, {pipeline_mode = #tpu.pipeline_mode<synchronous>, transform_indices = @transform_1, window_bounds = array<i64: 64, 256>}, {pipeline_mode = #tpu.pipeline_mode<synchronous>, transform_indices = @transform_2, window_bounds = array<i64: 1, 256>}, {pipeline_mode = #tpu.pipeline_mode<synchronous>, transform_indices = @transform_3, window_bounds = array<i64: 1, 256>}, {pipeline_mode = #tpu.pipeline_mode<synchronous>, transform_indices = @transform_4, window_bounds = array<i64: 576, 128>}, {pipeline_mode = #tpu.pipeline_mode<synchronous>, transform_indices = @transform_5, window_bounds = array<i64: 1, 128>}, {pipeline_mode = #tpu.pipeline_mode<synchronous>, transform_indices = @transform_6, window_bounds = array<i64: 1, 128>}, {pipeline_mode = #tpu.pipeline_mode<synchronous>, transform_indices = @transform_7, window_bounds = array<i64: 9, 56, 64>}, {transform_indices = @transform_8, window_bounds = array<i64: 8, 49, 32>}]} {
    %c0 = arith.constant 0 : index
    %c0_0 = arith.constant 0 : index
    %c0_1 = arith.constant 0 : index
    %0 = vector.load %arg1[%c0, %c0_0, %c0_1] : memref<8x56x64xbf16, #tpu.memory_space<vmem>>, vector<8x56x64xbf16>
    %1 = vector.shape_cast %0 : vector<8x56x64xbf16> to vector<448x64xbf16>
    %c0_2 = arith.constant 0 : index
    %c0_3 = arith.constant 0 : index
    %2 = vector.load %arg2[%c0_2, %c0_3] : memref<64x256xbf16, #tpu.memory_space<vmem>>, vector<64x256xbf16>
    %cst = arith.constant dense<0.000000e+00> : vector<448x256xf32>
    %3 = tpu.matmul %1, %2, %cst {dimension_numbers = #tpu.dot_dimension_numbers<[1], [0], [0], [1], [0, 0, 1, 1], [], []>} : vector<448x64xbf16>, vector<64x256xbf16>, vector<448x256xf32> -> vector<448x256xf32>
    %c0_4 = arith.constant 0 : index
    %c0_5 = arith.constant 0 : index
    %4 = vector.load %arg3[%c0_4, %c0_5] : memref<1x256xf32, #tpu.memory_space<vmem>>, vector<1x256xf32>
    %5 = vector.broadcast %4 : vector<1x256xf32> to vector<448x256xf32>
    %6 = arith.mulf %3, %5 : vector<448x256xf32>
    %c0_6 = arith.constant 0 : index
    %c0_7 = arith.constant 0 : index
    %7 = vector.load %arg4[%c0_6, %c0_7] : memref<1x256xf32, #tpu.memory_space<vmem>>, vector<1x256xf32>
    %8 = vector.broadcast %7 : vector<1x256xf32> to vector<448x256xf32>
    %9 = arith.addf %6, %8 : vector<448x256xf32>
    %cst_8 = arith.constant 0.000000e+00 : f32
    %10 = vector.broadcast %cst_8 : f32 to vector<448x256xf32>
    %11 = arith.maximumf %9, %10 : vector<448x256xf32>
    %12 = vector.extract_strided_slice %11 {offsets = [0, 0], sizes = [448, 128], strides = [1, 1]} : vector<448x256xf32> to vector<448x128xf32>
    %13 = vector.extract_strided_slice %11 {offsets = [0, 128], sizes = [448, 128], strides = [1, 1]} : vector<448x256xf32> to vector<448x128xf32>
    %14 = arith.maximumf %12, %13 : vector<448x128xf32>
    %15 = vector.extract_strided_slice %14 {offsets = [0, 0], sizes = [448, 64], strides = [1, 1]} : vector<448x128xf32> to vector<448x64xf32>
    %16 = vector.extract_strided_slice %14 {offsets = [0, 64], sizes = [448, 64], strides = [1, 1]} : vector<448x128xf32> to vector<448x64xf32>
    %17 = arith.maximumf %15, %16 : vector<448x64xf32>
    %18 = vector.shape_cast %17 : vector<448x64xf32> to vector<8x56x64xf32>
    %cst_9 = arith.constant 0.000000e+00 : f32
    %19 = vector.broadcast %cst_9 : f32 to vector<8x8x64xf32>
    %c0_10 = arith.constant 0 : index
    %c0_11 = arith.constant 0 : index
    %c0_12 = arith.constant 0 : index
    %20 = vector.load %arg10[%c0_10, %c0_11, %c0_12] : memref<8x72x64xf32, #tpu.memory_space<vmem>>, vector<8x8x64xf32>
    tpu.vector_store %arg10[%c0_10, %c0_11, %c0_12], %19 {strides = array<i32>} : memref<8x72x64xf32, #tpu.memory_space<vmem>>, vector<8x8x64xf32>,
    %cst_13 = arith.constant 0.000000e+00 : f32
    %21 = vector.broadcast %cst_13 : f32 to vector<8x8x64xf32>
    %c0_14 = arith.constant 0 : index
    %c64 = arith.constant 64 : index
    %c0_15 = arith.constant 0 : index
    %22 = vector.load %arg10[%c0_14, %c64, %c0_15] : memref<8x72x64xf32, #tpu.memory_space<vmem>>, vector<8x8x64xf32>
    tpu.vector_store %arg10[%c0_14, %c64, %c0_15], %21 {strides = array<i32>} : memref<8x72x64xf32, #tpu.memory_space<vmem>>, vector<8x8x64xf32>,
    %c0_16 = arith.constant 0 : index
    %c8 = arith.constant 8 : index
    %c0_17 = arith.constant 0 : index
    %23 = vector.load %arg10[%c0_16, %c8, %c0_17] : memref<8x72x64xf32, #tpu.memory_space<vmem>>, vector<8x56x64xf32>
    tpu.vector_store %arg10[%c0_16, %c8, %c0_17], %18 {strides = array<i32>} : memref<8x72x64xf32, #tpu.memory_space<vmem>>, vector<8x56x64xf32>,
    %c0_18 = arith.constant 0 : index
    %c0_19 = arith.constant 0 : index
    %c0_20 = arith.constant 0 : index
    %24 = vector.load %arg10[%c0_18, %c0_19, %c0_20] : memref<8x72x64xf32, #tpu.memory_space<vmem>>, vector<8x56x64xf32>
    %c0_21 = arith.constant 0 : index
    %c0_22 = arith.constant 0 : index
    %c0_23 = arith.constant 0 : index
    %25 = vector.load %arg8[%c0_21, %c0_22, %c0_23] : memref<9x56x64xf32, #tpu.memory_space<vmem>>, vector<1x56x64xf32>
    %26 = vector.shape_cast %25 : vector<1x56x64xf32> to vector<56x64xf32>
    %27 = vector.shape_cast %26 : vector<56x64xf32> to vector<1x56x64xf32>
    %28 = vector.broadcast %27 : vector<1x56x64xf32> to vector<8x56x64xf32>
    %29 = arith.mulf %24, %28 : vector<8x56x64xf32>
    %30 = arith.truncf %29 : vector<8x56x64xf32> to vector<8x56x64xbf16>
    %c0_24 = arith.constant 0 : index
    %c0_25 = arith.constant 0 : index
    %c0_26 = arith.constant 0 : index
    %31 = vector.load %arg11[%c0_24, %c0_25, %c0_26] : memref<8x56x576xbf16, #tpu.memory_space<vmem>>, vector<8x56x64xbf16>
    tpu.vector_store %arg11[%c0_24, %c0_25, %c0_26], %30 {strides = array<i32>} : memref<8x56x576xbf16, #tpu.memory_space<vmem>>, vector<8x56x64xbf16>,
    %c0_27 = arith.constant 0 : index
    %c1 = arith.constant 1 : index
    %c0_28 = arith.constant 0 : index
    %32 = vector.load %arg10[%c0_27, %c1, %c0_28] : memref<8x72x64xf32, #tpu.memory_space<vmem>>, vector<8x56x64xf32>
    %c1_29 = arith.constant 1 : index
    %c0_30 = arith.constant 0 : index
    %c0_31 = arith.constant 0 : index
    %33 = vector.load %arg8[%c1_29, %c0_30, %c0_31] : memref<9x56x64xf32, #tpu.memory_space<vmem>>, vector<1x56x64xf32>
    %34 = vector.shape_cast %33 : vector<1x56x64xf32> to vector<56x64xf32>
    %35 = vector.shape_cast %34 : vector<56x64xf32> to vector<1x56x64xf32>
    %36 = vector.broadcast %35 : vector<1x56x64xf32> to vector<8x56x64xf32>
    %37 = arith.mulf %32, %36 : vector<8x56x64xf32>
    %38 = arith.truncf %37 : vector<8x56x64xf32> to vector<8x56x64xbf16>
    %c0_32 = arith.constant 0 : index
    %c0_33 = arith.constant 0 : index
    %c64_34 = arith.constant 64 : index
    %39 = vector.load %arg11[%c0_32, %c0_33, %c64_34] : memref<8x56x576xbf16, #tpu.memory_space<vmem>>, vector<8x56x64xbf16>
    tpu.vector_store %arg11[%c0_32, %c0_33, %c64_34], %38 {strides = array<i32>} : memref<8x56x576xbf16, #tpu.memory_space<vmem>>, vector<8x56x64xbf16>,
    %c0_35 = arith.constant 0 : index
    %c2 = arith.constant 2 : index
    %c0_36 = arith.constant 0 : index
    %40 = vector.load %arg10[%c0_35, %c2, %c0_36] : memref<8x72x64xf32, #tpu.memory_space<vmem>>, vector<8x56x64xf32>
    %c2_37 = arith.constant 2 : index
    %c0_38 = arith.constant 0 : index
    %c0_39 = arith.constant 0 : index
    %41 = vector.load %arg8[%c2_37, %c0_38, %c0_39] : memref<9x56x64xf32, #tpu.memory_space<vmem>>, vector<1x56x64xf32>
    %42 = vector.shape_cast %41 : vector<1x56x64xf32> to vector<56x64xf32>
    %43 = vector.shape_cast %42 : vector<56x64xf32> to vector<1x56x64xf32>
    %44 = vector.broadcast %43 : vector<1x56x64xf32> to vector<8x56x64xf32>
    %45 = arith.mulf %40, %44 : vector<8x56x64xf32>
    %46 = arith.truncf %45 : vector<8x56x64xf32> to vector<8x56x64xbf16>
    %c0_40 = arith.constant 0 : index
    %c0_41 = arith.constant 0 : index
    %c128 = arith.constant 128 : index
    %47 = vector.load %arg11[%c0_40, %c0_41, %c128] : memref<8x56x576xbf16, #tpu.memory_space<vmem>>, vector<8x56x64xbf16>
    tpu.vector_store %arg11[%c0_40, %c0_41, %c128], %46 {strides = array<i32>} : memref<8x56x576xbf16, #tpu.memory_space<vmem>>, vector<8x56x64xbf16>,
    %c0_42 = arith.constant 0 : index
    %c7 = arith.constant 7 : index
    %c0_43 = arith.constant 0 : index
    %48 = vector.load %arg10[%c0_42, %c7, %c0_43] : memref<8x72x64xf32, #tpu.memory_space<vmem>>, vector<8x56x64xf32>
    %c3 = arith.constant 3 : index
    %c0_44 = arith.constant 0 : index
    %c0_45 = arith.constant 0 : index
    %49 = vector.load %arg8[%c3, %c0_44, %c0_45] : memref<9x56x64xf32, #tpu.memory_space<vmem>>, vector<1x56x64xf32>
    %50 = vector.shape_cast %49 : vector<1x56x64xf32> to vector<56x64xf32>
    %51 = vector.shape_cast %50 : vector<56x64xf32> to vector<1x56x64xf32>
    %52 = vector.broadcast %51 : vector<1x56x64xf32> to vector<8x56x64xf32>
    %53 = arith.mulf %48, %52 : vector<8x56x64xf32>
    %54 = arith.truncf %53 : vector<8x56x64xf32> to vector<8x56x64xbf16>
    %c0_46 = arith.constant 0 : index
    %c0_47 = arith.constant 0 : index
    %c192 = arith.constant 192 : index
    %55 = vector.load %arg11[%c0_46, %c0_47, %c192] : memref<8x56x576xbf16, #tpu.memory_space<vmem>>, vector<8x56x64xbf16>
    tpu.vector_store %arg11[%c0_46, %c0_47, %c192], %54 {strides = array<i32>} : memref<8x56x576xbf16, #tpu.memory_space<vmem>>, vector<8x56x64xbf16>,
    %c0_48 = arith.constant 0 : index
    %c8_49 = arith.constant 8 : index
    %c0_50 = arith.constant 0 : index
    %56 = vector.load %arg10[%c0_48, %c8_49, %c0_50] : memref<8x72x64xf32, #tpu.memory_space<vmem>>, vector<8x56x64xf32>
    %c4 = arith.constant 4 : index
    %c0_51 = arith.constant 0 : index
    %c0_52 = arith.constant 0 : index
    %57 = vector.load %arg8[%c4, %c0_51, %c0_52] : memref<9x56x64xf32, #tpu.memory_space<vmem>>, vector<1x56x64xf32>
    %58 = vector.shape_cast %57 : vector<1x56x64xf32> to vector<56x64xf32>
    %59 = vector.shape_cast %58 : vector<56x64xf32> to vector<1x56x64xf32>
    %60 = vector.broadcast %59 : vector<1x56x64xf32> to vector<8x56x64xf32>
    %61 = arith.mulf %56, %60 : vector<8x56x64xf32>
    %62 = arith.truncf %61 : vector<8x56x64xf32> to vector<8x56x64xbf16>
    %c0_53 = arith.constant 0 : index
    %c0_54 = arith.constant 0 : index
    %c256 = arith.constant 256 : index
    %63 = vector.load %arg11[%c0_53, %c0_54, %c256] : memref<8x56x576xbf16, #tpu.memory_space<vmem>>, vector<8x56x64xbf16>
    tpu.vector_store %arg11[%c0_53, %c0_54, %c256], %62 {strides = array<i32>} : memref<8x56x576xbf16, #tpu.memory_space<vmem>>, vector<8x56x64xbf16>,
    %c0_55 = arith.constant 0 : index
    %c9 = arith.constant 9 : index
    %c0_56 = arith.constant 0 : index
    %64 = vector.load %arg10[%c0_55, %c9, %c0_56] : memref<8x72x64xf32, #tpu.memory_space<vmem>>, vector<8x56x64xf32>
    %c5 = arith.constant 5 : index
    %c0_57 = arith.constant 0 : index
    %c0_58 = arith.constant 0 : index
    %65 = vector.load %arg8[%c5, %c0_57, %c0_58] : memref<9x56x64xf32, #tpu.memory_space<vmem>>, vector<1x56x64xf32>
    %66 = vector.shape_cast %65 : vector<1x56x64xf32> to vector<56x64xf32>
    %67 = vector.shape_cast %66 : vector<56x64xf32> to vector<1x56x64xf32>
    %68 = vector.broadcast %67 : vector<1x56x64xf32> to vector<8x56x64xf32>
    %69 = arith.mulf %64, %68 : vector<8x56x64xf32>
    %70 = arith.truncf %69 : vector<8x56x64xf32> to vector<8x56x64xbf16>
    %c0_59 = arith.constant 0 : index
    %c0_60 = arith.constant 0 : index
    %c320 = arith.constant 320 : index
    %71 = vector.load %arg11[%c0_59, %c0_60, %c320] : memref<8x56x576xbf16, #tpu.memory_space<vmem>>, vector<8x56x64xbf16>
    tpu.vector_store %arg11[%c0_59, %c0_60, %c320], %70 {strides = array<i32>} : memref<8x56x576xbf16, #tpu.memory_space<vmem>>, vector<8x56x64xbf16>,
    %c0_61 = arith.constant 0 : index
    %c14 = arith.constant 14 : index
    %c0_62 = arith.constant 0 : index
    %72 = vector.load %arg10[%c0_61, %c14, %c0_62] : memref<8x72x64xf32, #tpu.memory_space<vmem>>, vector<8x56x64xf32>
    %c6 = arith.constant 6 : index
    %c0_63 = arith.constant 0 : index
    %c0_64 = arith.constant 0 : index
    %73 = vector.load %arg8[%c6, %c0_63, %c0_64] : memref<9x56x64xf32, #tpu.memory_space<vmem>>, vector<1x56x64xf32>
    %74 = vector.shape_cast %73 : vector<1x56x64xf32> to vector<56x64xf32>
    %75 = vector.shape_cast %74 : vector<56x64xf32> to vector<1x56x64xf32>
    %76 = vector.broadcast %75 : vector<1x56x64xf32> to vector<8x56x64xf32>
    %77 = arith.mulf %72, %76 : vector<8x56x64xf32>
    %78 = arith.truncf %77 : vector<8x56x64xf32> to vector<8x56x64xbf16>
    %c0_65 = arith.constant 0 : index
    %c0_66 = arith.constant 0 : index
    %c384 = arith.constant 384 : index
    %79 = vector.load %arg11[%c0_65, %c0_66, %c384] : memref<8x56x576xbf16, #tpu.memory_space<vmem>>, vector<8x56x64xbf16>
    tpu.vector_store %arg11[%c0_65, %c0_66, %c384], %78 {strides = array<i32>} : memref<8x56x576xbf16, #tpu.memory_space<vmem>>, vector<8x56x64xbf16>,
    %c0_67 = arith.constant 0 : index
    %c15 = arith.constant 15 : index
    %c0_68 = arith.constant 0 : index
    %80 = vector.load %arg10[%c0_67, %c15, %c0_68] : memref<8x72x64xf32, #tpu.memory_space<vmem>>, vector<8x56x64xf32>
    %c7_69 = arith.constant 7 : index
    %c0_70 = arith.constant 0 : index
    %c0_71 = arith.constant 0 : index
    %81 = vector.load %arg8[%c7_69, %c0_70, %c0_71] : memref<9x56x64xf32, #tpu.memory_space<vmem>>, vector<1x56x64xf32>
    %82 = vector.shape_cast %81 : vector<1x56x64xf32> to vector<56x64xf32>
    %83 = vector.shape_cast %82 : vector<56x64xf32> to vector<1x56x64xf32>
    %84 = vector.broadcast %83 : vector<1x56x64xf32> to vector<8x56x64xf32>
    %85 = arith.mulf %80, %84 : vector<8x56x64xf32>
    %86 = arith.truncf %85 : vector<8x56x64xf32> to vector<8x56x64xbf16>
    %c0_72 = arith.constant 0 : index
    %c0_73 = arith.constant 0 : index
    %c448 = arith.constant 448 : index
    %87 = vector.load %arg11[%c0_72, %c0_73, %c448] : memref<8x56x576xbf16, #tpu.memory_space<vmem>>, vector<8x56x64xbf16>
    tpu.vector_store %arg11[%c0_72, %c0_73, %c448], %86 {strides = array<i32>} : memref<8x56x576xbf16, #tpu.memory_space<vmem>>, vector<8x56x64xbf16>,
    %c0_74 = arith.constant 0 : index
    %c16 = arith.constant 16 : index
    %c0_75 = arith.constant 0 : index
    %88 = vector.load %arg10[%c0_74, %c16, %c0_75] : memref<8x72x64xf32, #tpu.memory_space<vmem>>, vector<8x56x64xf32>
    %c8_76 = arith.constant 8 : index
    %c0_77 = arith.constant 0 : index
    %c0_78 = arith.constant 0 : index
    %89 = vector.load %arg8[%c8_76, %c0_77, %c0_78] : memref<9x56x64xf32, #tpu.memory_space<vmem>>, vector<1x56x64xf32>
    %90 = vector.shape_cast %89 : vector<1x56x64xf32> to vector<56x64xf32>
    %91 = vector.shape_cast %90 : vector<56x64xf32> to vector<1x56x64xf32>
    %92 = vector.broadcast %91 : vector<1x56x64xf32> to vector<8x56x64xf32>
    %93 = arith.mulf %88, %92 : vector<8x56x64xf32>
    %94 = arith.truncf %93 : vector<8x56x64xf32> to vector<8x56x64xbf16>
    %c0_79 = arith.constant 0 : index
    %c0_80 = arith.constant 0 : index
    %c512 = arith.constant 512 : index
    %95 = vector.load %arg11[%c0_79, %c0_80, %c512] : memref<8x56x576xbf16, #tpu.memory_space<vmem>>, vector<8x56x64xbf16>
    tpu.vector_store %arg11[%c0_79, %c0_80, %c512], %94 {strides = array<i32>} : memref<8x56x576xbf16, #tpu.memory_space<vmem>>, vector<8x56x64xbf16>,
    %c0_81 = arith.constant 0 : index
    %c0_82 = arith.constant 0 : index
    %c0_83 = arith.constant 0 : index
    %96 = vector.load %arg11[%c0_81, %c0_82, %c0_83] : memref<8x56x576xbf16, #tpu.memory_space<vmem>>, vector<8x56x576xbf16>
    %97 = vector.shape_cast %96 : vector<8x56x576xbf16> to vector<448x576xbf16>
    %c0_84 = arith.constant 0 : index
    %c0_85 = arith.constant 0 : index
    %98 = vector.load %arg5[%c0_84, %c0_85] : memref<576x128xbf16, #tpu.memory_space<vmem>>, vector<576x128xbf16>
    %cst_86 = arith.constant dense<0.000000e+00> : vector<448x128xf32>
    %99 = tpu.matmul %97, %98, %cst_86 {dimension_numbers = #tpu.dot_dimension_numbers<[1], [0], [0], [1], [0, 0, 1, 1], [], []>} : vector<448x576xbf16>, vector<576x128xbf16>, vector<448x128xf32> -> vector<448x128xf32>
    %c0_87 = arith.constant 0 : index
    %c0_88 = arith.constant 0 : index
    %100 = vector.load %arg6[%c0_87, %c0_88] : memref<1x128xf32, #tpu.memory_space<vmem>>, vector<1x128xf32>
    %101 = vector.broadcast %100 : vector<1x128xf32> to vector<448x128xf32>
    %102 = arith.mulf %99, %101 : vector<448x128xf32>
    %c0_89 = arith.constant 0 : index
    %c0_90 = arith.constant 0 : index
    %103 = vector.load %arg7[%c0_89, %c0_90] : memref<1x128xf32, #tpu.memory_space<vmem>>, vector<1x128xf32>
    %104 = vector.broadcast %103 : vector<1x128xf32> to vector<448x128xf32>
    %105 = arith.addf %102, %104 : vector<448x128xf32>
    %cst_91 = arith.constant 0.000000e+00 : f32
    %106 = vector.broadcast %cst_91 : f32 to vector<448x128xf32>
    %107 = arith.maximumf %105, %106 : vector<448x128xf32>
    %108 = vector.extract_strided_slice %107 {offsets = [0, 0], sizes = [448, 64], strides = [1, 1]} : vector<448x128xf32> to vector<448x64xf32>
    %109 = vector.extract_strided_slice %107 {offsets = [0, 64], sizes = [448, 64], strides = [1, 1]} : vector<448x128xf32> to vector<448x64xf32>
    %110 = arith.maximumf %108, %109 : vector<448x64xf32>
    %111 = vector.extract_strided_slice %110 {offsets = [0, 0], sizes = [448, 32], strides = [1, 1]} : vector<448x64xf32> to vector<448x32xf32>
    %112 = vector.extract_strided_slice %110 {offsets = [0, 32], sizes = [448, 32], strides = [1, 1]} : vector<448x64xf32> to vector<448x32xf32>
    %113 = arith.maximumf %111, %112 : vector<448x32xf32>
    %114 = vector.shape_cast %113 : vector<448x32xf32> to vector<8x56x32xf32>
    %115 = vector.extract_strided_slice %114 {offsets = [0, 0, 0], sizes = [8, 49, 32], strides = [1, 1, 1]} : vector<8x56x32xf32> to vector<8x49x32xf32>
    %116 = arith.truncf %115 : vector<8x49x32xf32> to vector<8x49x32xbf16>
    %c0_92 = arith.constant 0 : index
    %c0_93 = arith.constant 0 : index
    %c0_94 = arith.constant 0 : index
    %117 = vector.load %arg9[%c0_92, %c0_93, %c0_94] : memref<8x49x32xbf16, #tpu.memory_space<vmem>>, vector<8x49x32xbf16>
    tpu.vector_store %arg9[%c0_92, %c0_93, %c0_94], %116 {strides = array<i32>} : memref<8x49x32xbf16, #tpu.memory_space<vmem>>, vector<8x49x32xbf16>,
    return
  }
  func.func @transform_0(%arg0: i32) -> (i32, i32, i32) {
    %c0_i32 = arith.constant 0 : i32
    %c0_i32_0 = arith.constant 0 : i32
    %c0_i32_1 = arith.constant 0 : i32
    return %arg0, %c0_i32, %c0_i32_0 : i32, i32, i32
  }
  func.func @transform_1(%arg0: i32) -> (i32, i32) {
    %c0_i32 = arith.constant 0 : i32
    %c0_i32_0 = arith.constant 0 : i32
    %c0_i32_1 = arith.constant 0 : i32
    return %c0_i32, %c0_i32_0 : i32, i32
  }
  func.func @transform_2(%arg0: i32) -> (i32, i32) {
    %c0_i32 = arith.constant 0 : i32
    %c0_i32_0 = arith.constant 0 : i32
    %c0_i32_1 = arith.constant 0 : i32
    return %c0_i32, %c0_i32_0 : i32, i32
  }
  func.func @transform_3(%arg0: i32) -> (i32, i32) {
    %c0_i32 = arith.constant 0 : i32
    %c0_i32_0 = arith.constant 0 : i32
    %c0_i32_1 = arith.constant 0 : i32
    return %c0_i32, %c0_i32_0 : i32, i32
  }
  func.func @transform_4(%arg0: i32) -> (i32, i32) {
    %c0_i32 = arith.constant 0 : i32
    %c0_i32_0 = arith.constant 0 : i32
    %c0_i32_1 = arith.constant 0 : i32
    return %c0_i32, %c0_i32_0 : i32, i32
  }
  func.func @transform_5(%arg0: i32) -> (i32, i32) {
    %c0_i32 = arith.constant 0 : i32
    %c0_i32_0 = arith.constant 0 : i32
    %c0_i32_1 = arith.constant 0 : i32
    return %c0_i32, %c0_i32_0 : i32, i32
  }
  func.func @transform_6(%arg0: i32) -> (i32, i32) {
    %c0_i32 = arith.constant 0 : i32
    %c0_i32_0 = arith.constant 0 : i32
    %c0_i32_1 = arith.constant 0 : i32
    return %c0_i32, %c0_i32_0 : i32, i32
  }
  func.func @transform_7(%arg0: i32) -> (i32, i32, i32) {
    %c0_i32 = arith.constant 0 : i32
    %c0_i32_0 = arith.constant 0 : i32
    %c0_i32_1 = arith.constant 0 : i32
    %c0_i32_2 = arith.constant 0 : i32
    return %c0_i32, %c0_i32_0, %c0_i32_1 : i32, i32, i32
  }
  func.func @transform_8(%arg0: i32) -> (i32, i32, i32) {
    %c0_i32 = arith.constant 0 : i32
    %c0_i32_0 = arith.constant 0 : i32
    %c0_i32_1 = arith.constant 0 : i32
    return %arg0, %c0_i32, %c0_i32_0 : i32, i32, i32
  }
}

module attributes {stable_mosaic.version = 11 : i64} {
  func.func @fc_logsoftmax_kernel(%arg0: i32, %arg1: memref<16x1568xbf16, #tpu.memory_space<vmem>>, %arg2: memref<1568x128xbf16, #tpu.memory_space<vmem>>, %arg3: memref<1x128xf32, #tpu.memory_space<vmem>>, %arg4: memref<16x128xf32, #tpu.memory_space<vmem>>) attributes {dimension_semantics = [#tpu.dimension_semantics<parallel>], iteration_bounds = array<i64: 1>, scalar_prefetch = 0 : i64, scratch_operands = 0 : i64, tpu.core_type = #tpu.core_type<tc>, window_params = [{transform_indices = @transform_0, window_bounds = array<i64: 16, 1568>}, {pipeline_mode = #tpu.pipeline_mode<synchronous>, transform_indices = @transform_1, window_bounds = array<i64: 1568, 128>}, {pipeline_mode = #tpu.pipeline_mode<synchronous>, transform_indices = @transform_2, window_bounds = array<i64: 1, 128>}, {transform_indices = @transform_3, window_bounds = array<i64: 16, 128>}]} {
    %c0 = arith.constant 0 : index
    %c0_0 = arith.constant 0 : index
    %0 = vector.load %arg1[%c0, %c0_0] : memref<16x1568xbf16, #tpu.memory_space<vmem>>, vector<16x1568xbf16>
    %c0_1 = arith.constant 0 : index
    %c0_2 = arith.constant 0 : index
    %1 = vector.load %arg2[%c0_1, %c0_2] : memref<1568x128xbf16, #tpu.memory_space<vmem>>, vector<1568x128xbf16>
    %cst = arith.constant dense<0.000000e+00> : vector<16x128xf32>
    %2 = tpu.matmul %0, %1, %cst {dimension_numbers = #tpu.dot_dimension_numbers<[1], [0], [0], [1], [0, 0, 1, 1], [], []>} : vector<16x1568xbf16>, vector<1568x128xbf16>, vector<16x128xf32> -> vector<16x128xf32>
    %c0_3 = arith.constant 0 : index
    %c0_4 = arith.constant 0 : index
    %3 = vector.load %arg3[%c0_3, %c0_4] : memref<1x128xf32, #tpu.memory_space<vmem>>, vector<1x128xf32>
    %4 = vector.broadcast %3 : vector<1x128xf32> to vector<16x128xf32>
    %5 = arith.addf %2, %4 : vector<16x128xf32>
    %cst_5 = arith.constant dense<0xFF800000> : vector<16xf32>
    %6 = vector.multi_reduction <maximumf>, %5, %cst_5 [1] : vector<16x128xf32> to vector<16xf32>
    %7 = vector.shape_cast %6 : vector<16xf32> to vector<16x1xf32>
    %8 = vector.broadcast %7 : vector<16x1xf32> to vector<16x128xf32>
    %9 = arith.subf %5, %8 : vector<16x128xf32>
    %10 = math.exp %9 : vector<16x128xf32>
    %cst_6 = arith.constant dense<0.000000e+00> : vector<16xf32>
    %11 = vector.multi_reduction <add>, %10, %cst_6 [1] : vector<16x128xf32> to vector<16xf32>
    %12 = vector.shape_cast %11 : vector<16xf32> to vector<16x1xf32>
    %13 = math.log %12 : vector<16x1xf32>
    %14 = vector.broadcast %13 : vector<16x1xf32> to vector<16x128xf32>
    %15 = arith.subf %9, %14 : vector<16x128xf32>
    %c0_7 = arith.constant 0 : index
    %c0_8 = arith.constant 0 : index
    %16 = vector.load %arg4[%c0_7, %c0_8] : memref<16x128xf32, #tpu.memory_space<vmem>>, vector<16x128xf32>
    tpu.vector_store %arg4[%c0_7, %c0_8], %15 {strides = array<i32>} : memref<16x128xf32, #tpu.memory_space<vmem>>, vector<16x128xf32>,
    return
  }
  func.func @transform_0(%arg0: i32) -> (i32, i32) {
    %c0_i32 = arith.constant 0 : i32
    %c0_i32_0 = arith.constant 0 : i32
    return %arg0, %c0_i32 : i32, i32
  }
  func.func @transform_1(%arg0: i32) -> (i32, i32) {
    %c0_i32 = arith.constant 0 : i32
    %c0_i32_0 = arith.constant 0 : i32
    %c0_i32_1 = arith.constant 0 : i32
    return %c0_i32, %c0_i32_0 : i32, i32
  }
  func.func @transform_2(%arg0: i32) -> (i32, i32) {
    %c0_i32 = arith.constant 0 : i32
    %c0_i32_0 = arith.constant 0 : i32
    %c0_i32_1 = arith.constant 0 : i32
    return %c0_i32, %c0_i32_0 : i32, i32
  }
  func.func @transform_3(%arg0: i32) -> (i32, i32) {
    %c0_i32 = arith.constant 0 : i32
    %c0_i32_0 = arith.constant 0 : i32
    return %arg0, %c0_i32 : i32, i32
  }
}

</mosaic_0001>

<bundles_post_ra>
// kernel: cnn_fashion_mnist_forward.3
= control target key start
LH: loop header
LB: loop body
LE: loop exit
PB: predicated region body
PF: predicated region fallthrough
CT: control target
= control target key end

     0   :  { %vm1626_vm0 = vmmov 0   ;;  %s1998_s0 = inlined_call_operand.vmem [shape: bf16[16,1568], index: 0, kind: input, shape index: {}]   ;;  %s1999_s1 = inlined_call_operand.vmem [shape: bf16[1568,128], index: 1, kind: input, shape index: {}]   ;;  %s2000_s2 = inlined_call_operand.vmem [shape: f32[1,128], index: 2, kind: input, shape index: {}]   ;;  %s2001_s3 = inlined_call_operand.hbm [shape: f32[16,128], index: 3, kind: output, shape index: {}]  }
   0x1   :  { %v1476_v0 = vld [vmem:[%s1999_s1 + $0x40] sm:$0xff]   ;;  %v1480_v4 = vld [vmem:[%s1999_s1 + $0x48] sm:$0xff]   ;;  %v1484_v8 = vld [vmem:[%s1999_s1 + $0x50] sm:$0xff]  }
   0x2   :  { %v1477_v1 = vld [vmem:[%s1999_s1] sm:$0xff]   ;;  %1328 = vmatprep.subr.bf16.mxu0 %v1476_v0  ;;  %v1481_v5 = vld [vmem:[%s1999_s1 + $0x8] sm:$0xff]   ;;  %v1485_v9 = vld [vmem:[%s1999_s1 + $0x10] sm:$0xff]  }
   0x3   :  { %v1478_v2 = vld [vmem:[%s1999_s1 + $0xc0] sm:$0xff]   ;;  %1329 = vmatpush3.bf16.msra.mxu0 %v1477_v1  ;;  %v1482_v6 = vld [vmem:[%s1999_s1 + $0xc8] sm:$0xff]   ;;  %v1486_v10 = vld [vmem:[%s1999_s1 + $0xd0] sm:$0xff]  }
   0x4   :  { %v1479_v3 = vld [vmem:[%s1999_s1 + $0x80] sm:$0xff]   ;;  %1350 = vmatprep.subr.bf16.mxu1 %v1478_v2  ;;  %1330 = vmatprep.subr.bf16.mxu0 %v1480_v4  ;;  %v1483_v7 = vld [vmem:[%s1999_s1 + $0x88] sm:$0xff]   ;;  %v1487_v11 = vld [vmem:[%s1999_s1 + $0x90] sm:$0xff]  }
   0x5   :  { %1351 = vmatpush3.bf16.msra.mxu1 %v1479_v3  ;;  %v1488_v12 = vld [vmem:[%s1999_s1 + $0x58] sm:$0xff]   ;;  %v1492_v16 = vld [vmem:[%s1999_s1 + $0x60] sm:$0xff]   ;;  %v1496_v20 = vld [vmem:[%s1999_s1 + $0x68] sm:$0xff]  }
   0x6   :  { %1352 = vmatprep.subr.bf16.mxu1 %v1482_v6  ;;  %v1489_v13 = vld [vmem:[%s1999_s1 + $0x18] sm:$0xff]   ;;  %v1493_v17 = vld [vmem:[%s1999_s1 + $0x20] sm:$0xff]   ;;  %v1497_v21 = vld [vmem:[%s1999_s1 + $0x28] sm:$0xff]  }
   0x7   :  { %1331 = vmatpush3.bf16.msra.mxu0 %v1481_v5  ;;  %v1490_v14 = vld [vmem:[%s1999_s1 + $0xd8] sm:$0xff]   ;;  %v1494_v18 = vld [vmem:[%s1999_s1 + $0xe0] sm:$0xff]   ;;  %v1498_v22 = vld [vmem:[%s1999_s1 + $0xe8] sm:$0xff]  }
   0x8   :  { %1332 = vmatprep.subr.bf16.mxu0 %v1484_v8  ;;  %v1491_v15 = vld [vmem:[%s1999_s1 + $0x98] sm:$0xff]   ;;  %v1495_v19 = vld [vmem:[%s1999_s1 + $0xa0] sm:$0xff]   ;;  %v1499_v23 = vld [vmem:[%s1999_s1 + $0xa8] sm:$0xff]  }
   0x9   :  { %1353 = vmatpush3.bf16.msra.mxu1 %v1483_v7  ;;  %v1500_v24 = vld [vmem:[%s1999_s1 + $0x70] sm:$0xff]   ;;  %v1504_v28 = vld [vmem:[%s1999_s1 + $0x78] sm:$0xff]   ;;  %v1511_v34 = vld [vmem:[%s1999_s1 + $0x140] sm:$0xff]  }
   0xa   :  { %1354 = vmatprep.subr.bf16.mxu1 %v1486_v10  ;;  %v1501_v25 = vld [vmem:[%s1999_s1 + $0x30] sm:$0xff]   ;;  %v1505_v29 = vld [vmem:[%s1999_s1 + $0x38] sm:$0xff]   ;;  %v1514_v36 = vld [vmem:[%s1998_s0 + $0xc] ss:$52 sps:$4 sm:$0xff]  }
   0xb   :  { %1333 = vmatpush3.bf16.msra.mxu0 %v1485_v9  ;;  %v1502_v26 = vld [vmem:[%s1999_s1 + $0xf0] sm:$0xff]   ;;  %v1506_v30 = vld [vmem:[%s1999_s1 + $0xf8] sm:$0xff]   ;;  %v1515_v37 = vld [vmem:[%s1999_s1 + $0x100] sm:$0xff]   ;;  %963 = vmatprep.mubr.bf16.mxu1 %v1514_v36 }
   0xc   :  { %1334 = vmatprep.subr.bf16.mxu0 %v1488_v12  ;;  %v1503_v27 = vld [vmem:[%s1999_s1 + $0xb0] sm:$0xff]   ;;  %v1507_v31 = vld [vmem:[%s1999_s1 + $0xb8] sm:$0xff]   ;;  %v1516_v38 = vld [vmem:[%s1999_s1 + $0x1c0] sm:$0xff]  }
   0xd   :  { %1355 = vmatpush3.bf16.msra.mxu1 %v1487_v11  ;;  %v1508_v32 = vld [vmem:[%s1998_s0] ss:$52 sps:$4 sm:$0xff]   ;;  %v1510_v33 = vld [vmem:[%s1998_s0 + $0x4] ss:$52 sps:$4 sm:$0xff]   ;;  %v1512_v35 = vld [vmem:[%s1998_s0 + $0x8] ss:$52 sps:$4 sm:$0xff]  }
   0xe   :  { %1356 = vmatprep.subr.bf16.mxu1 %v1490_v14  ;;  %922 = vmatprep.mubr.bf16.mxu0 %v1510_v33  ;;  %v1517_v39 = vld [vmem:[%s1999_s1 + $0x180] sm:$0xff]   ;;  %v1518_v40 = vld [vmem:[%s1999_s1 + $0x148] sm:$0xff]   ;;  %v1522_v44 = vld [vmem:[%s1999_s1 + $0x150] sm:$0xff]  }
   0xf   :  { %1335 = vmatpush3.bf16.msra.mxu0 %v1489_v13  ;;  %v1519_v41 = vld [vmem:[%s1999_s1 + $0x108] sm:$0xff]   ;;  %v1523_v45 = vld [vmem:[%s1999_s1 + $0x110] sm:$0xff]   ;;  %v1526_v48 = vld [vmem:[%s1999_s1 + $0x158] sm:$0xff]  }
  0x10   :  { %1336 = vmatprep.subr.bf16.mxu0 %v1492_v16  ;;  %v1520_v42 = vld [vmem:[%s1999_s1 + $0x1c8] sm:$0xff]   ;;  %v1524_v46 = vld [vmem:[%s1999_s1 + $0x1d0] sm:$0xff]   ;;  %v1527_v49 = vld [vmem:[%s1999_s1 + $0x118] sm:$0xff]  }
  0x11   :  { %1357 = vmatpush3.bf16.msra.mxu1 %v1491_v15  ;;  %v1521_v43 = vld [vmem:[%s1999_s1 + $0x188] sm:$0xff]   ;;  %v1525_v47 = vld [vmem:[%s1999_s1 + $0x190] sm:$0xff]   ;;  %v1528_v50 = vld [vmem:[%s1999_s1 + $0x1d8] sm:$0xff]  }
  0x12   :  { %1358 = vmatprep.subr.bf16.mxu1 %v1494_v18  ;;  %v1529_v51 = vld [vmem:[%s1999_s1 + $0x198] sm:$0xff]   ;;  %v1530_v52 = vld [vmem:[%s1999_s1 + $0x160] sm:$0xff]   ;;  %v1534_v56 = vld [vmem:[%s1999_s1 + $0x168] sm:$0xff]  }
  0x13   :  { %1337 = vmatpush3.bf16.msra.mxu0 %v1493_v17  ;;  %v1531_v53 = vld [vmem:[%s1999_s1 + $0x120] sm:$0xff]   ;;  %v1535_v57 = vld [vmem:[%s1999_s1 + $0x128] sm:$0xff]   ;;  %v1538_v60 = vld [vmem:[%s1999_s1 + $0x170] sm:$0xff]  }
  0x14   :  { %1338 = vmatprep.subr.bf16.mxu0 %v1496_v20  ;;  %v1532_v54 = vld [vmem:[%s1999_s1 + $0x1e0] sm:$0xff]   ;;  %v1536_v58 = vld [vmem:[%s1999_s1 + $0x1e8] sm:$0xff]   ;;  %v1539_v61 = vld [vmem:[%s1999_s1 + $0x130] sm:$0xff]  }
  0x15   :  { %1359 = vmatpush3.bf16.msra.mxu1 %v1495_v19  ;;  %v1533_v55 = vld [vmem:[%s1999_s1 + $0x1a0] sm:$0xff]   ;;  %v1537_v59 = vld [vmem:[%s1999_s1 + $0x1a8] sm:$0xff]   ;;  %v1540_v62 = vld [vmem:[%s1999_s1 + $0x1f0] sm:$0xff]  }
  0x16   :  { %1360 = vmatprep.subr.bf16.mxu1 %v1498_v22  ;;  %v1541_v63 = vld [vmem:[%s1999_s1 + $0x1b0] sm:$0xff]   ;;  %v1542_v0 = vld [vmem:[%s1999_s1 + $0x178] sm:$0xff]   ;;  %v1549_v6 = vld [vmem:[%s1999_s1 + $0x240] sm:$0xff]  }
  0x17   :  { %1339 = vmatpush3.bf16.msra.mxu0 %v1497_v21  ;;  %v1543_v1 = vld [vmem:[%s1999_s1 + $0x138] sm:$0xff]   ;;  %v1546_v4 = vld [vmem:[%s1998_s0 + $0x10] ss:$52 sps:$4 sm:$0xff]   ;;  %v1548_v5 = vld [vmem:[%s1998_s0 + $0x14] ss:$52 sps:$4 sm:$0xff]  }
  0x18   :  { %1340 = vmatprep.subr.bf16.mxu0 %v1500_v24  ;;  %v1544_v2 = vld [vmem:[%s1999_s1 + $0x1f8] sm:$0xff]   ;;  %v1553_v9 = vld [vmem:[%s1999_s1 + $0x200] sm:$0xff]   ;;  %v1556_v12 = vld [vmem:[%s1999_s1 + $0x248] sm:$0xff]  }
  0x19   :  { %1361 = vmatpush3.bf16.msra.mxu1 %v1499_v23  ;;  %v1545_v3 = vld [vmem:[%s1999_s1 + $0x1b8] sm:$0xff]   ;;  %v1554_v10 = vld [vmem:[%s1999_s1 + $0x2c0] sm:$0xff]   ;;  %v1557_v13 = vld [vmem:[%s1999_s1 + $0x208] sm:$0xff]  }
  0x1a   :  { %1362 = vmatprep.subr.bf16.mxu1 %v1502_v26  ;;  %v1550_v7 = vld [vmem:[%s1998_s0 + $0x18] ss:$52 sps:$4 sm:$0xff]   ;;  %v1552_v8 = vld [vmem:[%s1998_s0 + $0x1c] ss:$52 sps:$4 sm:$0xff]   ;;  %v1555_v11 = vld [vmem:[%s1999_s1 + $0x280] sm:$0xff]  }
  0x1b   :  { %1341 = vmatpush3.bf16.msra.mxu0 %v1501_v25  ;;  %v1558_v14 = vld [vmem:[%s1999_s1 + $0x2c8] sm:$0xff]   ;;  %v1560_v16 = vld [vmem:[%s1999_s1 + $0x250] sm:$0xff]   ;;  %v1564_v20 = vld [vmem:[%s1999_s1 + $0x258] sm:$0xff]  }
  0x1c   :  { %1342 = vmatprep.subr.bf16.mxu0 %v1504_v28  ;;  %v1559_v15 = vld [vmem:[%s1999_s1 + $0x288] sm:$0xff]   ;;  %v1561_v17 = vld [vmem:[%s1999_s1 + $0x210] sm:$0xff]   ;;  %v1565_v21 = vld [vmem:[%s1999_s1 + $0x218] sm:$0xff]  }
  0x1d   :  { %1363 = vmatpush3.bf16.msra.mxu1 %v1503_v27  ;;  %v1562_v18 = vld [vmem:[%s1999_s1 + $0x2d0] sm:$0xff]   ;;  %v1566_v22 = vld [vmem:[%s1999_s1 + $0x2d8] sm:$0xff]   ;;  %v1568_v24 = vld [vmem:[%s1999_s1 + $0x260] sm:$0xff]  }
  0x1e   :  { %1364 = vmatprep.subr.bf16.mxu1 %v1506_v30  ;;  %v1563_v19 = vld [vmem:[%s1999_s1 + $0x290] sm:$0xff]   ;;  %v1567_v23 = vld [vmem:[%s1999_s1 + $0x298] sm:$0xff]   ;;  %v1569_v25 = vld [vmem:[%s1999_s1 + $0x220] sm:$0xff]  }
  0x1f   :  { %1343 = vmatpush3.bf16.msra.mxu0 %v1505_v29  ;;  %v1570_v26 = vld [vmem:[%s1999_s1 + $0x2e0] sm:$0xff]   ;;  %v1572_v28 = vld [vmem:[%s1999_s1 + $0x268] sm:$0xff]   ;;  %v1577_v33 = vld [vmem:[%s1999_s1 + $0x230] sm:$0xff]  }
  0x20   :  { %1372 = vmatprep.subr.bf16.mxu0 %v1511_v34  ;;  %v1571_v27 = vld [vmem:[%s1999_s1 + $0x2a0] sm:$0xff]   ;;  %v1573_v29 = vld [vmem:[%s1999_s1 + $0x228] sm:$0xff]   ;;  %v1578_v34 = vld [vmem:[%s1999_s1 + $0x2f0] sm:$0xff]  }
  0x21   :  { %1365 = vmatpush3.bf16.msra.mxu1 %v1507_v31  ;;  %v1574_v30 = vld [vmem:[%s1999_s1 + $0x2e8] sm:$0xff]   ;;  %v1580_v36 = vld [vmem:[%s1999_s1 + $0x278] sm:$0xff]  }
  0x22   :  { %923 = vmatmul.mubr.bf16.vlgmr.msra.gmra.mrb[0].mxu0 %v1508_v32  ;;  %1394 = vmatprep.subr.bf16.mxu1 %v1516_v38  ;;  %v1575_v31 = vld [vmem:[%s1999_s1 + $0x2a8] sm:$0xff]   ;;  %v1576_v32 = vld [vmem:[%s1999_s1 + $0x270] sm:$0xff]   ;;  %v1582_v38 = vld [vmem:[%s1999_s1 + $0x2f8] sm:$0xff]  }
  0x23   :  { %1373 = vmatpush3.bf16.msra.mxu0 %v1515_v37  ;;  %1004 = vmatprep.mubr.bf16.mxu0 %v1548_v5  ;;  %v1581_v37 = vld [vmem:[%s1999_s1 + $0x238] sm:$0xff]  }
  0x24   :  { %964 = vmatmul.mubr.bf16.vlgmr.msra.gmra.mrb[0].mxu1 %v1512_v35  ;;  %1374 = vmatprep.subr.bf16.mxu0 %v1518_v40  ;;  %v1579_v35 = vld [vmem:[%s1999_s1 + $0x2b0] sm:$0xff]  }
  0x25   :  { %1395 = vmatpush3.bf16.msra.mxu1 %v1517_v39  ;;  %1045 = vmatprep.mubr.bf16.mxu1 %v1552_v8  ;;  %v1583_v39 = vld [vmem:[%s1999_s1 + $0x2b8] sm:$0xff]   ;;  %v1584_v40 = vld [vmem:[%s1998_s0 + $0x20] ss:$52 sps:$4 sm:$0xff]  }
  0x26   :  { %1396 = vmatprep.subr.bf16.mxu1 %v1520_v42  ;;  %v1625_v42 = vmov 0.0  }
  0x27   :  { %1375 = vmatpush3.bf16.msra.mxu0 %v1519_v41  ;;  %v1586_v41 = vld [vmem:[%s1998_s0 + $0x24] ss:$52 sps:$4 sm:$0xff]  }
  0x28   :  { %1376 = vmatprep.subr.bf16.mxu0 %v1522_v44  ;;  %v1589_v44 = vld [vmem:[%s1998_s0 + $0x2c] ss:$52 sps:$4 sm:$0xff]  }
  0x29   :  { %1397 = vmatpush3.bf16.msra.mxu1 %v1521_v43  ;;  %v1587_v43 = vld [vmem:[%s1998_s0 + $0x28] ss:$52 sps:$4 sm:$0xff]  }
  0x2a   :  { %1398 = vmatprep.subr.bf16.mxu1 %v1524_v46  ;;  %v1591_v46 = vld [vmem:[%s1999_s1 + $0x308] sm:$0xff]  }
  0x2b   :  { %1377 = vmatpush3.bf16.msra.mxu0 %v1523_v45  ;;  %v1590_v45 = vld [vmem:[%s1999_s1 + $0x300] sm:$0xff]  }
  0x2c   :  { %1378 = vmatprep.subr.bf16.mxu0 %v1526_v48 }
  0x2d   :  { %1399 = vmatpush3.bf16.msra.mxu1 %v1525_v47 }
  0x2e   :  { %1400 = vmatprep.subr.bf16.mxu1 %v1528_v50 }
  0x2f   :  { %1379 = vmatpush3.bf16.msra.mxu0 %v1527_v49 }
  0x30   :  { %1380 = vmatprep.subr.bf16.mxu0 %v1530_v52 }
  0x31   :  { %1401 = vmatpush3.bf16.msra.mxu1 %v1529_v51 }
  0x32   :  { %1402 = vmatprep.subr.bf16.mxu1 %v1532_v54 }
  0x33   :  { %1381 = vmatpush3.bf16.msra.mxu0 %v1531_v53 }
  0x34   :  { %1382 = vmatprep.subr.bf16.mxu0 %v1534_v56 }
  0x35   :  { %1403 = vmatpush3.bf16.msra.mxu1 %v1533_v55 }
  0x36   :  { %1404 = vmatprep.subr.bf16.mxu1 %v1536_v58 }
  0x37   :  { %1383 = vmatpush3.bf16.msra.mxu0 %v1535_v57 }
  0x38   :  { %1384 = vmatprep.subr.bf16.mxu0 %v1538_v60 }
  0x39   :  { %1405 = vmatpush3.bf16.msra.mxu1 %v1537_v59 }
  0x3a   :  { %1406 = vmatprep.subr.bf16.mxu1 %v1540_v62 }
  0x3b   :  { %1385 = vmatpush3.bf16.msra.mxu0 %v1539_v61 }
  0x3c   :  { %1386 = vmatprep.subr.bf16.mxu0 %v1542_v0 }
  0x3d   :  { %1407 = vmatpush3.bf16.msra.mxu1 %v1541_v63 }
  0x3e   :  { %1408 = vmatprep.subr.bf16.mxu1 %v1544_v2 }
  0x3f   :  { %1387 = vmatpush3.bf16.msra.mxu0 %v1543_v1 }
  0x40   :  { %1416 = vmatprep.subr.bf16.mxu0 %v1549_v6 }
  0x41   :  { %1409 = vmatpush3.bf16.msra.mxu1 %v1545_v3 }
  0x42   :  { %1005 = vmatmul.mubr.bf16.vlgmr.msra.gmra.mrb[4].mxu0 %v1546_v4  ;;  %1438 = vmatprep.subr.bf16.mxu1 %v1554_v10 }
  0x43   :  { %1417 = vmatpush3.bf16.msra.mxu0 %v1553_v9  ;;  %1086 = vmatprep.mubr.bf16.mxu0 %v1586_v41 }
  0x44   :  { %1046 = vmatmul.mubr.bf16.vlgmr.msra.gmra.mrb[4].mxu1 %v1550_v7  ;;  %1418 = vmatprep.subr.bf16.mxu0 %v1556_v12 }
  0x45   :  { %1439 = vmatpush3.bf16.msra.mxu1 %v1555_v11  ;;  %1127 = vmatprep.mubr.bf16.mxu1 %v1589_v44 }
  0x46   :  { %1440 = vmatprep.subr.bf16.mxu1 %v1558_v14 }
  0x47   :  { %1419 = vmatpush3.bf16.msra.mxu0 %v1557_v13 }
  0x48   :  { %1420 = vmatprep.subr.bf16.mxu0 %v1560_v16 }
  0x49   :  { %1441 = vmatpush3.bf16.msra.mxu1 %v1559_v15 }
  0x4a   :  { %1442 = vmatprep.subr.bf16.mxu1 %v1562_v18 }
  0x4b   :  { %1421 = vmatpush3.bf16.msra.mxu0 %v1561_v17 }
  0x4c   :  { %1422 = vmatprep.subr.bf16.mxu0 %v1564_v20 }
  0x4d   :  { %1443 = vmatpush3.bf16.msra.mxu1 %v1563_v19 }
  0x4e   :  { %1444 = vmatprep.subr.bf16.mxu1 %v1566_v22 }
  0x4f   :  { %1423 = vmatpush3.bf16.msra.mxu0 %v1565_v21 }
  0x50   :  { %1424 = vmatprep.subr.bf16.mxu0 %v1568_v24 }
  0x51   :  { %1445 = vmatpush3.bf16.msra.mxu1 %v1567_v23 }
  0x52   :  { %1446 = vmatprep.subr.bf16.mxu1 %v1570_v26 }
  0x53   :  { %1425 = vmatpush3.bf16.msra.mxu0 %v1569_v25 }
  0x54   :  { %1426 = vmatprep.subr.bf16.mxu0 %v1572_v28 }
  0x55   :  { %1447 = vmatpush3.bf16.msra.mxu1 %v1571_v27 }
  0x56   :  { %1448 = vmatprep.subr.bf16.mxu1 %v1574_v30 }
  0x57   :  { %1427 = vmatpush3.bf16.msra.mxu0 %v1573_v29 }
  0x58   :  { %1428 = vmatprep.subr.bf16.mxu0 %v1576_v32 }
  0x59   :  { %1449 = vmatpush3.bf16.msra.mxu1 %v1575_v31 }
  0x5a   :  { %1450 = vmatprep.subr.bf16.mxu1 %v1578_v34 }
  0x5b   :  { %1429 = vmatpush3.bf16.msra.mxu0 %v1577_v33 }
  0x5c   :  { %1430 = vmatprep.subr.bf16.mxu0 %v1580_v36 }
  0x5d   :  { %1451 = vmatpush3.bf16.msra.mxu1 %v1579_v35 }
  0x5e   :  { %1452 = vmatprep.subr.bf16.mxu1 %v1582_v38 }
  0x5f   :  { %1431 = vmatpush3.bf16.msra.mxu0 %v1581_v37 }
  0x60   :  { %1463 = vmatprep.subr.bf16.mxu0 %v1625_v42 }
  0x61   :  { %1453 = vmatpush3.bf16.msra.mxu1 %v1583_v39 }
  0x62   :  { %1087 = vmatmul.mubr.bf16.vlgmr.msra.gmra.mrb[8].mxu0 %v1584_v40 }
  0x63   :  { %1464 = vmatpush3.bf16.msra.mxu0 %v1590_v45  ;;  %1467 = vmatprep.mubr.msk.bf16.mxu0 %vm1626_vm0, %v1625_v42 }
  0x64   :  { %1128 = vmatmul.mubr.bf16.vlgmr.msra.gmra.mrb[8].mxu1 %v1587_v43  ;;  %1465 = vmatprep.subr.bf16.mxu0 %v1625_v42 }
  0x65   :  { %8 = vsyncpa [#allocation3], 0  ;;  %v1592_v47 = vld [vmem:[%s1998_s0 + $0x30] ss:$52 sps:$4 sm:$0xff]   ;;  %vm886_vm1 = vcmask 261120   ;;  %s1627_s0 = smov [#allocation2]  }
  0x66   :  { %v1215_v49 = vld [vmem:[%s2000_s2] ss:$0 sm:$0xff]  ;;  %s1204_s1 = sshll.u32 %s1627_s0, 4  ;;  %s1205_s1 = int_to_ptr.vmem [resolvable:$true] %s1204_s1 }
  0x67   :  { %1466 = vmatpush3.bf16.msra.mxu0 %v1591_v46  ;;  %s1601_s2 = scalar_lea.vmem %s1205_s1, 256  ;;  %p1606_p1 = scmp.lt.s32.totalorder %s1205_s1, %s1205_s1 }
  0x68   :  { %p1602_p0 = scmp.ne.s32.totalorder %s1205_s1, %s1601_s2  ;;  %p1607_p2 = scmp.lt.s32.totalorder %s1601_s2, %s1601_s2 }
  0x6a   :  { %1468 = vmatmul.mubr.msk.bf16.vlgmr.msra.gmra.mrb[12].mxu0 %vm886_vm1, %v1592_v47  ;;  %p1608_p3 = por %p1607_p2, %p1606_p1 }
  0x6c   :  { %p1609_p4 = pnand %p1608_p3, %p1602_p0 }
  0xf5   :  { %v1344_v48 = vpop.f32.mrb[0].mxu0 }
  0xf6   :  { %v1345_v50 = vpop.f32.mrb[1].mxu0 }
  0xf7   :  { %v1346_v51 = vadd.f32 %v1345_v50, %v1344_v48  ;;  %v1347_v52 = vpop.f32.mrb[2].mxu0  ;;  %v1366_v53 = vpop.f32.mrb[0].mxu1 }
  0xf8   :  { %v1348_v54 = vpop.f32.mrb[3].mxu0  ;;  %v1367_v55 = vpop.f32.mrb[1].mxu1 }
  0xf9   :  { %v925_v56 = vadd.f32 %v1346_v51, %v1215_v49  ;;  %v1349_v57 = vadd.f32 %v1348_v54, %v1347_v52  ;;  %v1368_v58 = vadd.f32 %v1367_v55, %v1366_v53  ;;  %v1369_v59 = vpop.f32.mrb[2].mxu1 }
  0xfa   :  { %v1370_v60 = vpop.f32.mrb[3].mxu1 }
  0xfb   :  { %v928_v61 = vadd.f32 %v1349_v57, %v1215_v49  ;;  %v966_v62 = vadd.f32 %v1368_v58, %v925_v56  ;;  %v1371_v63 = vadd.f32 %v1370_v60, %v1369_v59 }
  0xfd   :  { %v969_v0 = vadd.f32 %v1371_v63, %v928_v61 }
 0x115   :  { %v1388_v1 = vpop.f32.mrb[4].mxu0 }
 0x116   :  { %v1389_v2 = vpop.f32.mrb[5].mxu0 }
 0x117   :  { %v1390_v3 = vadd.f32 %v1389_v2, %v1388_v1  ;;  %v1391_v4 = vpop.f32.mrb[6].mxu0  ;;  %v1410_v5 = vpop.f32.mrb[4].mxu1 }
 0x118   :  { %v1392_v6 = vpop.f32.mrb[7].mxu0  ;;  %v1411_v9 = vpop.f32.mrb[5].mxu1 }
 0x119   :  { %v1007_v7 = vadd.f32 %v1390_v3, %v966_v62  ;;  %v1393_v8 = vadd.f32 %v1392_v6, %v1391_v4  ;;  %v1412_v10 = vadd.f32 %v1411_v9, %v1410_v5  ;;  %v1413_v11 = vpop.f32.mrb[6].mxu1 }
 0x11a   :  { %v1414_v13 = vpop.f32.mrb[7].mxu1 }
 0x11b   :  { %v1010_v12 = vadd.f32 %v1393_v8, %v969_v0  ;;  %v1048_v14 = vadd.f32 %v1412_v10, %v1007_v7  ;;  %v1415_v15 = vadd.f32 %v1414_v13, %v1413_v11 }
 0x11d   :  { %v1051_v16 = vadd.f32 %v1415_v15, %v1010_v12 }
 0x135   :  { %v1432_v17 = vpop.f32.mrb[8].mxu0 }
 0x136   :  { %v1433_v18 = vpop.f32.mrb[9].mxu0 }
 0x137   :  { %v1454_v19 = vpop.f32.mrb[8].mxu1  ;;  %v1434_v20 = vadd.f32 %v1433_v18, %v1432_v17  ;;  %v1435_v21 = vpop.f32.mrb[10].mxu0 }
 0x138   :  { %v1455_v22 = vpop.f32.mrb[9].mxu1  ;;  %v1436_v24 = vpop.f32.mrb[11].mxu0 }
 0x139   :  { %v1456_v23 = vadd.f32 %v1455_v22, %v1454_v19  ;;  %v1457_v25 = vpop.f32.mrb[10].mxu1  ;;  %v1089_v26 = vadd.f32 %v1434_v20, %v1048_v14  ;;  %v1437_v27 = vadd.f32 %v1436_v24, %v1435_v21 }
 0x13a   :  { %v1458_v28 = vpop.f32.mrb[11].mxu1 }
 0x13b   :  { %v1459_v29 = vadd.f32 %v1458_v28, %v1457_v25  ;;  %v1092_v30 = vadd.f32 %v1437_v27, %v1051_v16  ;;  %v1130_v31 = vadd.f32 %v1456_v23, %v1089_v26 }
 0x13d   :  { %v1170_v32 = vpop.f32.mrb[12].mxu0  ;;  %v1133_v33 = vadd.f32 %v1459_v29, %v1092_v30 }
 0x13e   :  { %v1171_v34 = vadd.f32 %v1170_v32, %v1130_v31  ;;  %v1469_v35 = vpop.f32.mrb[13].mxu0 }
 0x13f   :  { %v1173_v36 = vpop.f32.mrb[14].mxu0 }
 0x140   :  { %v1174_v37 = vadd.f32 %v1173_v36, %v1133_v33  ;;  %v1470_v38 = vpop.f32.mrb[15].mxu0  ;;  %1177 = vmax.xlane.f32.xlu0 %v1171_v34 }
 0x144   :  { %1179 = vmax.xlane.f32.xlu0 %v1174_v37 }
 0x1cd   :  { %v1178_v39 = vpop.xlane.xlu0 %1177 }
 0x1ce   :  { %v1181_v40 = vsub.f32 %v1171_v34, %v1178_v39 }
 0x1d0   :  { %v1183_v41 = vmul.f32 1.442695, %v1181_v40 }
 0x1d1   :  { %v1180_v42 = vpop.xlane.xlu0 %1179 }
 0x1d2   :  { %v1182_v43 = vsub.f32 %v1174_v37, %v1180_v42  ;;  %1593 = vpow2.f32 %v1183_v41 }
 0x1d4   :  { %v1185_v44 = vmul.f32 1.442695, %v1182_v43 }
 0x1d6   :  { %1595 = vpow2.f32 %v1185_v44 }
 0x1dc   :  { %v1594_v45 = vpop.eup %1593 }
 0x1dd   :  { %1187 = vadd.xlane.f32.xlu1 %v1594_v45 }
 0x1e0   :  { %v1596_v46 = vpop.eup %1595 }
 0x1e1   :  { %1189 = vadd.xlane.f32.xlu1 %v1596_v46 }
 0x26a   :  { %v1188_v47 = vpop.xlane.xlu1 %1187 }
 0x26b   :  { %1597 = vlog2.f32 %v1188_v47 }
 0x26e   :  { %v1190_v48 = vpop.xlane.xlu1 %1189 }
 0x26f   :  { %1599 = vlog2.f32 %v1190_v48 }
 0x275   :  { %v1598_v49 = vpop.eup %1597 }
 0x276   :  { %v1192_v50 = vmul.f32 0.6931472, %v1598_v49 }
 0x278   :  { %v1195_v51 = vsub.f32 %v1181_v40, %v1192_v50 }
 0x279   :  { %v1600_v52 = vpop.eup %1599 }
 0x27a   :  { %1197 = vst [vmem:[#allocation2] sm:$0xff] %v1195_v51  ;;  %v1194_v53 = vmul.f32 0.6931472, %v1600_v52 }
 0x27c   :  { %v1196_v54 = vsub.f32 %v1182_v43, %v1194_v53 }
 0x27e   :  { %1198 = vst [vmem:[#allocation2 + $0x8] sm:$0xff] %v1196_v54 }
 0x27f   :  { %1612 = shalt.err (!%p1609_p4)
}
 0x280   :  { %s1613_s22 = scalar_lea.hbm %s2001_s3, 256 }
 0x281   :  { %p1614_p5 = scmp.ne.s32.totalorder %s2001_s3, %s1613_s22  ;;  %p1617_p6 = scmp.lt.u32.totalorder %s1613_s22, %s2001_s3 }
 0x283   :  { %p1619_p7 = pnand %p1617_p6, %p1614_p5 }
 0x285   :  { %1622 = shalt.err (!%p1619_p7)
}
 0x286   :  { %s1628_s27 = smov 128   ;;  %s1629_s28 = smov 8  }
 0x287   :  { %1210 = dma.vmem_to_hbm [thread:$0]  %s1205_s1, 256, %s2001_s3, [#allocation3], %s1628_s27, %s1628_s27, %s1629_s28  }
 0x288   :  { %1623 = dma.done.wait [#allocation3], 256  }
 0x289   :  { %1624 = vsyncadd [#allocation3], 4294967040 }
 0x28a   :  { %1214 = vsyncpa [#allocation3], 1 }

// kernel: cnn_fashion_mnist_forward.2
= control target key start
LH: loop header
LB: loop body
LE: loop exit
PB: predicated region body
PF: predicated region fallthrough
CT: control target
= control target key end

     0   :  { %s11378_s27 = smov 0   ;;  %s15910_s0 = inlined_call_operand.vmem [shape: bf16[16,56,64], index: 0, kind: input, shape index: {}]   ;;  %s15911_s1 = inlined_call_operand.vmem [shape: bf16[64,256], index: 1, kind: input, shape index: {}]   ;;  %s15912_s2 = inlined_call_operand.vmem [shape: f32[1,256], index: 2, kind: input, shape index: {}]   ;;  %s15913_s3 = inlined_call_operand.vmem [shape: f32[1,256], index: 3, kind: input, shape index: {}]   ;;  %s15914_s4 = inlined_call_operand.vmem [shape: bf16[576,128], index: 4, kind: input, shape index: {}]   ;;  %s15915_s5 = inlined_call_operand.vmem [shape: f32[1,128], index: 5, kind: input, shape index: {}]   ;;  %s15916_s6 = inlined_call_operand.vmem [shape: f32[1,128], index: 6, kind: input, shape index: {}]   ;;  %s15917_s7 = inlined_call_operand.vmem [shape: f32[9,56,64], index: 7, kind: input, shape index: {}]   ;;  %s15918_s8 = inlined_call_operand.vmem [shape: bf16[16,49,32], index: 8, kind: output, shape index: {}]  }
   0x1 LB: > { %s8965_s28 = sadd.s32 4294967295, %s11327_s27   ;;  %p8969_p0 = scmp.ge.s32.totalorder %s11327_s27, 1  ;;  %s11327_s27 = sphi %s11378_s27, %s18_s27  }
   0x2   : > { %p264_p1 = scmp.lt.s32.totalorder %s11327_s27, 3 }
   0x4   : > { %p265_p2 = pnand %p8969_p0, %p264_p1 }
   0x6   : > { %268 = sbr.rel (%p265_p2) target bundleno = 1492 (0x5d4), region = 52 }
   0xd   : > { %v10935_v0 = vld [vmem:[%s15911_s1 + $0x4] ss:$8 sps:$4 sm:$0xff]   ;;  %s8970_s9 = sshll.u32 %s8965_s28, 3  ;;  %v10937_v1 = vld [vmem:[%s15911_s1] ss:$8 sps:$4 sm:$0xff]   ;;  %v15919_v2 = vmov 0   ;;  %v959_v34 = vlaneseq }
   0xe   : > { %676 = vmatprep.mubr.bf16.mxu0 %v15919_v2  ;;  %p301_p3 = scmp.lt.s32.totalorder %s8970_s9, 15  ;;  %10518 = vmatprep.subr.bf16.mxu1 %v15919_v2  ;;  %v10938_v3 = vld [vmem:[%s15911_s1 + $0x14] ss:$8 sps:$4 sm:$0xff]   ;;  %v10940_v4 = vld [vmem:[%s15911_s1 + $0x10] ss:$8 sps:$4 sm:$0xff]   ;;  %vm559_vm0 = vcmask 523264  }
   0xf   : > { %644 = vmatprep.subr.bf16.mxu0 %v10935_v0  ;;  %v10941_v5 = vld [vmem:[%s15911_s1 + $0x24] ss:$8 sps:$4 sm:$0xff]   ;;  %v10943_v6 = vld [vmem:[%s15911_s1 + $0x20] ss:$8 sps:$4 sm:$0xff]   ;;  %v10944_v7 = vld [vmem:[%s15911_s1 + $0x34] ss:$8 sps:$4 sm:$0xff]  }
  0x10   : > { %645 = vmatpush1.bf16.msra.mxu0 %v10937_v1  ;;  %s16228_s9 = smov (!%p301_p3, %s8970_s9), 15  ;;  %v10946_v8 = vld [vmem:[%s15911_s1 + $0x30] ss:$8 sps:$4 sm:$0xff]   ;;  %v960_v36 = vshrl.u32 %v959_v34, 7  ;;  %v957_v39 = vld [vmem:[%s15912_s2] sm:$0x3] }
  0x11   : > { %646 = vmatprep.subr.bf16.mxu0 %v10938_v3  ;;  %s10642_s20 = smul.u32 28, %s16228_s9  ;;  %v1081_v41 = vld [vmem:[%s15913_s3] sm:$0x3]  ;;  %v11330_v45 = vmov 0.0   ;;  %s11331_s12 = smov 64   ;;  %vm2076_vm1 = vcmask 519168  }
  0x12   : > { %v961_v37 = vsub.s32 0, %v960_v36  ;;  %v965_v40 = vsub.s32 1, %v960_v36  ;;  %1653 = vst.msk [vmem:[#allocation2] sm:$0xff] %vm559_vm0, %v11330_v45  ;;  %1654 = vst.msk [vmem:[#allocation2 + $0x48] sm:$0xff] %vm559_vm0, %v11330_v45  ;;  %vm2597_vm2 = vcmask 1043968   ;;  %vm8831_vm3 = vcmask 257024  }
  0x13   : > { %s11414_s23 = scalar_lea.vmem %s15910_s0, %s10642_s20  ;;  %1655 = vst.msk [vmem:[#allocation2 + $0x90] sm:$0xff] %vm559_vm0, %v11330_v45  ;;  %1656 = vst.msk [vmem:[#allocation2 + $0xd8] sm:$0xff] %vm559_vm0, %v11330_v45  ;;  %s15719_s17 = scalar_lea.vmem %s15918_s8, %s10642_s20  ;;  %vm8838_vm4 = vcmask 253952   ;;  %vm8839_vm5 = vsmask.f32 256 }
  0x14   : > { %647 = vmatpush1.bf16.msra.mxu0 %v10940_v4  ;;  %v10947_v9 = vld [vmem:[%s11414_s23] sm:$0xff]   ;;  %v10948_v10 = vld [vmem:[%s11414_s23 + $0x8] sm:$0xff]   ;;  %v10949_v11 = vld [vmem:[%s11414_s23 + $0x10] sm:$0xff]   ;;  %v11508_v42 = vrot.slane %v957_v39, %v961_v37  ;;  %v11511_v43 = vrot.slane %v957_v39, %v965_v40  ;;  %v11514_v44 = vrot.slane %v1081_v41, %v961_v37  ;;  %1657 = vst.msk [vmem:[#allocation2 + $0x120] sm:$0xff] %vm559_vm0, %v11330_v45 }
  0x15   : > { %648 = vmatprep.subr.bf16.mxu0 %v10941_v5  ;;  %v10950_v12 = vld [vmem:[%s11414_s23 + $0x18] sm:$0xff]   ;;  %v10951_v13 = vld [vmem:[%s11414_s23 + $0x20] sm:$0xff]   ;;  %v10952_v14 = vld [vmem:[%s11414_s23 + $0x28] sm:$0xff]   ;;  %1658 = vst.msk [vmem:[#allocation2 + $0x168] sm:$0xff] %vm559_vm0, %v11330_v45  ;;  %v11532_v47 = vrot.slane %v1081_v41, %v965_v40 }
  0x16   : > { %v10953_v15 = vld [vmem:[%s11414_s23 + $0x30] sm:$0xff]   ;;  %v10954_v16 = vld [vmem:[%s11414_s23 + $0x38] sm:$0xff]   ;;  %v10955_v17 = vld [vmem:[%s11414_s23 + $0x40] sm:$0xff]   ;;  %1659 = vst.msk [vmem:[#allocation2 + $0x1b0] sm:$0xff] %vm559_vm0, %v11330_v45 }
  0x17   : > { %v10956_v18 = vld [vmem:[%s11414_s23 + $0x48] sm:$0xff]   ;;  %v10957_v19 = vld [vmem:[%s11414_s23 + $0x50] sm:$0xff]   ;;  %v10958_v20 = vld [vmem:[%s11414_s23 + $0x58] sm:$0xff]   ;;  %1660 = vst.msk [vmem:[#allocation2 + $0x1f8] sm:$0xff] %vm559_vm0, %v11330_v45 }
  0x18   : > { %649 = vmatpush1.bf16.msra.mxu0 %v10943_v6  ;;  %v10959_v21 = vld [vmem:[%s11414_s23 + $0x60] sm:$0xff]   ;;  %v10960_v22 = vld [vmem:[%s11414_s23 + $0x68] sm:$0xff]   ;;  %v10961_v23 = vld [vmem:[%s11414_s23 + $0x70] sm:$0xff]   ;;  %1661 = vst.msk [vmem:[#allocation2 + $0x40] sm:$0xff] %vm559_vm0, %v11330_v45 }
  0x19   : > { %650 = vmatprep.subr.bf16.mxu0 %v10944_v7  ;;  %v10962_v24 = vld [vmem:[%s11414_s23 + $0x78] sm:$0xff]   ;;  %v10963_v25 = vld [vmem:[%s11414_s23 + $0x80] sm:$0xff]   ;;  %v10964_v26 = vld [vmem:[%s11414_s23 + $0x88] sm:$0xff]   ;;  %1662 = vst.msk [vmem:[#allocation2 + $0x88] sm:$0xff] %vm559_vm0, %v11330_v45 }
  0x1a   : > { %v10965_v27 = vld [vmem:[%s11414_s23 + $0x90] sm:$0xff]   ;;  %v10966_v28 = vld [vmem:[%s11414_s23 + $0x98] sm:$0xff]   ;;  %v10967_v29 = vld [vmem:[%s11414_s23 + $0xa0] sm:$0xff]   ;;  %1663 = vst.msk [vmem:[#allocation2 + $0xd0] sm:$0xff] %vm559_vm0, %v11330_v45 }
  0x1b   : > { %v10968_v30 = vld [vmem:[%s11414_s23 + $0xa8] sm:$0xff]   ;;  %v10969_v31 = vld [vmem:[%s11414_s23 + $0xb0] sm:$0xff]   ;;  %v10970_v32 = vld [vmem:[%s11414_s23 + $0xb8] sm:$0xff]   ;;  %1664 = vst.msk [vmem:[#allocation2 + $0x118] sm:$0xff] %vm559_vm0, %v11330_v45 }
  0x1c   : > { %651 = vmatpush1.bf16.msra.mxu0 %v10946_v8  ;;  %v10971_v33 = vld [vmem:[%s11414_s23 + $0xc0] sm:$0xff]   ;;  %v10972_v35 = vld [vmem:[%s11414_s23 + $0xc8] sm:$0xff]   ;;  %v10973_v38 = vld [vmem:[%s11414_s23 + $0xd0] sm:$0xff]   ;;  %1665 = vst.msk [vmem:[#allocation2 + $0x160] sm:$0xff] %vm559_vm0, %v11330_v45 }
  0x1d   : > { %7086 = vmatprep.subr.bf16.mxu0 %v15919_v2  ;;  %1666 = vst.msk [vmem:[#allocation2 + $0x1a8] sm:$0xff] %vm559_vm0, %v11330_v45  ;;  %1667 = vst.msk [vmem:[#allocation2 + $0x1f0] sm:$0xff] %vm559_vm0, %v11330_v45  ;;  %v10974_v50 = vld [vmem:[%s11414_s23 + $0xd8] sm:$0xff]  }
  0x1e   : > { %1668 = vst.msk [vmem:[#allocation2 + $0x238] sm:$0xff] %vm559_vm0, %v11330_v45  ;;  %vm15733_vm6 = vmand %vm8838_vm4, %vm8839_vm5 }
  0x1f   : > { %9010 = vmatmul.mubr.msk.bf16.vlgmr.msra.gmra.mrb[0].mxu0 %vm559_vm0, %v10947_v9 }
  0x20   : > { %686 = vmatprep.mubr.bf16.mxu0 %v15919_v2 }
  0x27   : > { %9011 = vmatmul.mubr.msk.bf16.gmra.mrb[4].mxu0 %vm559_vm0, %v10948_v10 }
  0x28   : > { %696 = vmatprep.mubr.bf16.mxu0 %v15919_v2 }
  0x2f   : > { %9012 = vmatmul.mubr.msk.bf16.gmra.mrb[8].mxu0 %vm559_vm0, %v10949_v11 }
  0x30   : > { %706 = vmatprep.mubr.bf16.mxu0 %v15919_v2 }
  0x37   : > { %9013 = vmatmul.mubr.msk.bf16.gmra.mrb[12].mxu0 %vm559_vm0, %v10950_v12 }
  0x38   : > { %716 = vmatprep.mubr.bf16.mxu0 %v15919_v2 }
  0x3f   : > { %9014 = vmatmul.mubr.msk.bf16.gmra.mrb[16].mxu0 %vm559_vm0, %v10951_v13 }
  0x40   : > { %726 = vmatprep.mubr.bf16.mxu0 %v15919_v2 }
  0x47   : > { %9015 = vmatmul.mubr.msk.bf16.gmra.mrb[20].mxu0 %vm559_vm0, %v10952_v14 }
  0x48   : > { %736 = vmatprep.mubr.bf16.mxu0 %v15919_v2 }
  0x4f   : > { %9016 = vmatmul.mubr.msk.bf16.gmra.mrb[24].mxu0 %vm559_vm0, %v10953_v15 }
  0x50   : > { %746 = vmatprep.mubr.bf16.mxu0 %v15919_v2 }
  0x57   : > { %9017 = vmatmul.mubr.msk.bf16.gmra.mrb[28].mxu0 %vm559_vm0, %v10954_v16 }
  0x58   : > { %756 = vmatprep.mubr.bf16.mxu0 %v15919_v2 }
  0x5f   : > { %9018 = vmatmul.mubr.msk.bf16.gmra.mrb[32].mxu0 %vm559_vm0, %v10955_v17 }
  0x60   : > { %766 = vmatprep.mubr.bf16.mxu0 %v15919_v2 }
  0x67   : > { %9019 = vmatmul.mubr.msk.bf16.gmra.mrb[36].mxu0 %vm559_vm0, %v10956_v18 }
  0x68   : > { %776 = vmatprep.mubr.bf16.mxu0 %v15919_v2 }
  0x6f   : > { %9020 = vmatmul.mubr.msk.bf16.gmra.mrb[40].mxu0 %vm559_vm0, %v10957_v19 }
  0x70   : > { %786 = vmatprep.mubr.bf16.mxu0 %v15919_v2 }
  0x77   : > { %9021 = vmatmul.mubr.msk.bf16.gmra.mrb[44].mxu0 %vm559_vm0, %v10958_v20 }
  0x78   : > { %796 = vmatprep.mubr.bf16.mxu0 %v15919_v2 }
  0x7f   : > { %9022 = vmatmul.mubr.msk.bf16.gmra.mrb[48].mxu0 %vm559_vm0, %v10959_v21 }
  0x80   : > { %806 = vmatprep.mubr.bf16.mxu0 %v15919_v2 }
  0x87   : > { %9023 = vmatmul.mubr.msk.bf16.gmra.mrb[52].mxu0 %vm559_vm0, %v10960_v22 }
  0x88   : > { %816 = vmatprep.mubr.bf16.mxu0 %v15919_v2 }
  0x8f   : > { %9024 = vmatmul.mubr.msk.bf16.gmra.mrb[56].mxu0 %vm559_vm0, %v10961_v23 }
  0x90   : > { %826 = vmatprep.mubr.bf16.mxu0 %v15919_v2 }
  0x97   : > { %9025 = vmatmul.mubr.msk.bf16.gmra.mrb[60].mxu0 %vm559_vm0, %v10962_v24 }
  0x98   : > { %836 = vmatprep.mubr.bf16.mxu0 %v15919_v2 }
  0x9f   : > { %9026 = vmatmul.mubr.msk.bf16.gmra.mrb[64].mxu0 %vm559_vm0, %v10963_v25 }
  0xa0   : > { %846 = vmatprep.mubr.bf16.mxu0 %v15919_v2 }
  0xa7   : > { %9027 = vmatmul.mubr.msk.bf16.gmra.mrb[68].mxu0 %vm559_vm0, %v10964_v26 }
  0xa8   : > { %856 = vmatprep.mubr.bf16.mxu0 %v15919_v2 }
  0xaf   : > { %9028 = vmatmul.mubr.msk.bf16.gmra.mrb[72].mxu0 %vm559_vm0, %v10965_v27 }
  0xb0   : > { %866 = vmatprep.mubr.bf16.mxu0 %v15919_v2 }
  0xb7   : > { %9029 = vmatmul.mubr.msk.bf16.gmra.mrb[76].mxu0 %vm559_vm0, %v10966_v28 }
  0xb8   : > { %876 = vmatprep.mubr.bf16.mxu0 %v15919_v2 }
  0xbf   : > { %9030 = vmatmul.mubr.msk.bf16.gmra.mrb[80].mxu0 %vm559_vm0, %v10967_v29 }
  0xc0   : > { %886 = vmatprep.mubr.bf16.mxu0 %v15919_v2 }
  0xc7   : > { %9031 = vmatmul.mubr.msk.bf16.gmra.mrb[84].mxu0 %vm559_vm0, %v10968_v30 }
  0xc8   : > { %896 = vmatprep.mubr.bf16.mxu0 %v15919_v2 }
  0xcf   : > { %9032 = vmatmul.mubr.msk.bf16.gmra.mrb[88].mxu0 %vm559_vm0, %v10969_v31 }
  0xd0   : > { %906 = vmatprep.mubr.bf16.mxu0 %v15919_v2 }
  0xd7   : > { %9033 = vmatmul.mubr.msk.bf16.gmra.mrb[92].mxu0 %vm559_vm0, %v10970_v32 }
  0xd8   : > { %916 = vmatprep.mubr.bf16.mxu0 %v15919_v2 }
  0xdf   : > { %9034 = vmatmul.mubr.msk.bf16.gmra.mrb[96].mxu0 %vm559_vm0, %v10971_v33 }
  0xe0   : > { %926 = vmatprep.mubr.bf16.mxu0 %v15919_v2 }
  0xe7   : > { %9035 = vmatmul.mubr.msk.bf16.gmra.mrb[100].mxu0 %vm559_vm0, %v10972_v35 }
  0xe8   : > { %936 = vmatprep.mubr.bf16.mxu0 %v15919_v2 }
  0xef   : > { %9036 = vmatmul.mubr.msk.bf16.gmra.mrb[104].mxu0 %vm559_vm0, %v10973_v38 }
  0xf0   : > { %946 = vmatprep.mubr.bf16.mxu0 %v15919_v2 }
  0xf2   : > { %v678_v46 = vpop.f32.mrb[0].mxu0 }
  0xf3   : > { %v969_v48 = vmul.f32 %v11508_v42, %v678_v46  ;;  %v680_v49 = vpop.f32.mrb[1].mxu0 }
  0xf4   : > { %v970_v51 = vmul.f32 %v11511_v43, %v680_v49  ;;  %v682_v52 = vpop.f32.mrb[2].mxu0 }
  0xf5   : > { %v1093_v53 = vadd.f32 %v11514_v44, %v969_v48  ;;  %v971_v54 = vmul.f32 %v11508_v42, %v682_v52  ;;  %v684_v55 = vpop.f32.mrb[3].mxu0 }
  0xf6   : > { %v1094_v56 = vadd.f32 %v11532_v47, %v970_v51  ;;  %v972_v57 = vmul.f32 %v11511_v43, %v684_v55 }
  0xf7   : > { %v1205_v58 = vmax.f32 %v1093_v53, 0.0  ;;  %v1095_v59 = vadd.f32 %v11514_v44, %v971_v54  ;;  %9037 = vmatmul.mubr.msk.bf16.gmra.mrb[108].mxu0 %vm559_vm0, %v10974_v50 }
  0xf8   : > { %v1206_v60 = vmax.f32 %v1094_v56, 0.0  ;;  %v1096_v61 = vadd.f32 %v11532_v47, %v972_v57 }
  0xf9   : > { %v1207_v62 = vmax.f32 %v1095_v59, 0.0 }
  0xfa   : > { %v1208_v63 = vmax.f32 %v1096_v61, 0.0  ;;  %v688_v0 = vpop.f32.mrb[4].mxu0  ;;  %v11544_v1 = vmax.f32 %v1205_v58, %v1206_v60 }
  0xfb   : > { %v973_v3 = vmul.f32 %v11508_v42, %v688_v0  ;;  %v690_v4 = vpop.f32.mrb[5].mxu0 }
  0xfc   : > { %v974_v5 = vmul.f32 %v11511_v43, %v690_v4  ;;  %1429 = vrot.lane.b32.xlu1 %v11544_v1, %s11331_s12  ;;  %v692_v6 = vpop.f32.mrb[6].mxu0  ;;  %v11550_v7 = vmax.f32 %v1207_v62, %v1208_v63 }
  0xfd   : > { %v1097_v8 = vadd.f32 %v11514_v44, %v973_v3  ;;  %v975_v9 = vmul.f32 %v11508_v42, %v692_v6  ;;  %v694_v10 = vpop.f32.mrb[7].mxu0 }
  0xfe   : > { %v1098_v11 = vadd.f32 %v11532_v47, %v974_v5  ;;  %v976_v12 = vmul.f32 %v11511_v43, %v694_v10  ;;  %1431 = vrot.lane.b32.xlu0 %v11550_v7, %s11331_s12 }
  0xff   : > { %v1209_v13 = vmax.f32 %v1097_v8, 0.0  ;;  %v1099_v14 = vadd.f32 %v11514_v44, %v975_v9 }
 0x100   : > { %v1210_v15 = vmax.f32 %v1098_v11, 0.0  ;;  %v1100_v16 = vadd.f32 %v11532_v47, %v976_v12 }
 0x101   : > { %v1211_v17 = vmax.f32 %v1099_v14, 0.0 }
 0x102   : > { %v1212_v18 = vmax.f32 %v1100_v16, 0.0  ;;  %v698_v19 = vpop.f32.mrb[8].mxu0  ;;  %v11560_v20 = vmax.f32 %v1209_v13, %v1210_v15 }
 0x103   : > { %v977_v21 = vmul.f32 %v11508_v42, %v698_v19  ;;  %v700_v22 = vpop.f32.mrb[9].mxu0 }
 0x104   : > { %v978_v23 = vmul.f32 %v11511_v43, %v700_v22  ;;  %1433 = vrot.lane.b32.xlu1 %v11560_v20, %s11331_s12  ;;  %v702_v24 = vpop.f32.mrb[10].mxu0  ;;  %v11566_v25 = vmax.f32 %v1211_v17, %v1212_v18 }
 0x105   : > { %v1101_v26 = vadd.f32 %v11514_v44, %v977_v21  ;;  %v979_v27 = vmul.f32 %v11508_v42, %v702_v24  ;;  %v704_v28 = vpop.f32.mrb[11].mxu0 }
 0x106   : > { %v1102_v29 = vadd.f32 %v11532_v47, %v978_v23  ;;  %v980_v30 = vmul.f32 %v11511_v43, %v704_v28  ;;  %1435 = vrot.lane.b32.xlu0 %v11566_v25, %s11331_s12 }
 0x107   : > { %v1213_v31 = vmax.f32 %v1101_v26, 0.0  ;;  %v1103_v32 = vadd.f32 %v11514_v44, %v979_v27 }
 0x108   : > { %v1214_v33 = vmax.f32 %v1102_v29, 0.0  ;;  %v1104_v34 = vadd.f32 %v11532_v47, %v980_v30 }
 0x109   : > { %v1215_v35 = vmax.f32 %v1103_v32, 0.0 }
 0x10a   : > { %v1216_v36 = vmax.f32 %v1104_v34, 0.0  ;;  %v708_v37 = vpop.f32.mrb[12].mxu0  ;;  %v11576_v38 = vmax.f32 %v1213_v31, %v1214_v33 }
 0x10b   : > { %v981_v39 = vmul.f32 %v11508_v42, %v708_v37  ;;  %v710_v40 = vpop.f32.mrb[13].mxu0 }
 0x10c   : > { %v982_v41 = vmul.f32 %v11511_v43, %v710_v40  ;;  %1437 = vrot.lane.b32.xlu1 %v11576_v38, %s11331_s12  ;;  %v712_v45 = vpop.f32.mrb[14].mxu0  ;;  %v11582_v46 = vmax.f32 %v1215_v35, %v1216_v36 }
 0x10d   : > { %v1105_v48 = vadd.f32 %v11514_v44, %v981_v39  ;;  %v983_v49 = vmul.f32 %v11508_v42, %v712_v45  ;;  %v714_v50 = vpop.f32.mrb[15].mxu0 }
 0x10e   : > { %v1106_v51 = vadd.f32 %v11532_v47, %v982_v41  ;;  %v984_v52 = vmul.f32 %v11511_v43, %v714_v50  ;;  %1439 = vrot.lane.b32.xlu0 %v11582_v46, %s11331_s12 }
 0x10f   : > { %v1217_v53 = vmax.f32 %v1105_v48, 0.0  ;;  %v1107_v54 = vadd.f32 %v11514_v44, %v983_v49 }
 0x110   : > { %v1218_v55 = vmax.f32 %v1106_v51, 0.0  ;;  %v1108_v56 = vadd.f32 %v11532_v47, %v984_v52 }
 0x111   : > { %v1219_v57 = vmax.f32 %v1107_v54, 0.0 }
 0x112   : > { %v1220_v58 = vmax.f32 %v1108_v56, 0.0  ;;  %v718_v59 = vpop.f32.mrb[16].mxu0  ;;  %v11592_v60 = vmax.f32 %v1217_v53, %v1218_v55 }
 0x113   : > { %v985_v61 = vmul.f32 %v11508_v42, %v718_v59  ;;  %v720_v62 = vpop.f32.mrb[17].mxu0 }
 0x114   : > { %v986_v63 = vmul.f32 %v11511_v43, %v720_v62  ;;  %1441 = vrot.lane.b32.xlu1 %v11592_v60, %s11331_s12  ;;  %v722_v0 = vpop.f32.mrb[18].mxu0  ;;  %v11598_v3 = vmax.f32 %v1219_v57, %v1220_v58 }
 0x115   : > { %v1109_v4 = vadd.f32 %v11514_v44, %v985_v61  ;;  %v987_v5 = vmul.f32 %v11508_v42, %v722_v0  ;;  %v724_v6 = vpop.f32.mrb[19].mxu0 }
 0x116   : > { %v1110_v8 = vadd.f32 %v11532_v47, %v986_v63  ;;  %v988_v9 = vmul.f32 %v11511_v43, %v724_v6  ;;  %1443 = vrot.lane.b32.xlu0 %v11598_v3, %s11331_s12 }
 0x117   : > { %v1221_v10 = vmax.f32 %v1109_v4, 0.0  ;;  %v1111_v11 = vadd.f32 %v11514_v44, %v987_v5 }
 0x118   : > { %v1222_v12 = vmax.f32 %v1110_v8, 0.0  ;;  %v1112_v13 = vadd.f32 %v11532_v47, %v988_v9 }
 0x119   : > { %v1223_v14 = vmax.f32 %v1111_v11, 0.0 }
 0x11a   : > { %v1224_v15 = vmax.f32 %v1112_v13, 0.0  ;;  %v728_v16 = vpop.f32.mrb[20].mxu0  ;;  %v11608_v17 = vmax.f32 %v1221_v10, %v1222_v12 }
 0x11b   : > { %v989_v18 = vmul.f32 %v11508_v42, %v728_v16  ;;  %v730_v19 = vpop.f32.mrb[21].mxu0 }
 0x11c   : > { %v990_v21 = vmul.f32 %v11511_v43, %v730_v19  ;;  %1445 = vrot.lane.b32.xlu1 %v11608_v17, %s11331_s12  ;;  %v732_v22 = vpop.f32.mrb[22].mxu0  ;;  %v11614_v23 = vmax.f32 %v1223_v14, %v1224_v15 }
 0x11d   : > { %v1113_v24 = vadd.f32 %v11514_v44, %v989_v18  ;;  %v991_v26 = vmul.f32 %v11508_v42, %v732_v22  ;;  %v734_v27 = vpop.f32.mrb[23].mxu0 }
 0x11e   : > { %v1114_v28 = vadd.f32 %v11532_v47, %v990_v21  ;;  %v992_v29 = vmul.f32 %v11511_v43, %v734_v27  ;;  %1447 = vrot.lane.b32.xlu0 %v11614_v23, %s11331_s12 }
 0x11f   : > { %v1225_v30 = vmax.f32 %v1113_v24, 0.0  ;;  %v1115_v31 = vadd.f32 %v11514_v44, %v991_v26 }
 0x120   : > { %v1226_v32 = vmax.f32 %v1114_v28, 0.0  ;;  %v1116_v33 = vadd.f32 %v11532_v47, %v992_v29 }
 0x121   : > { %v1227_v34 = vmax.f32 %v1115_v31, 0.0 }
 0x122   : > { %v1228_v35 = vmax.f32 %v1116_v33, 0.0  ;;  %v738_v36 = vpop.f32.mrb[24].mxu0  ;;  %v11624_v37 = vmax.f32 %v1225_v30, %v1226_v32 }
 0x123   : > { %v993_v39 = vmul.f32 %v11508_v42, %v738_v36  ;;  %v740_v40 = vpop.f32.mrb[25].mxu0 }
 0x124   : > { %v994_v41 = vmul.f32 %v11511_v43, %v740_v40  ;;  %1449 = vrot.lane.b32.xlu1 %v11624_v37, %s11331_s12  ;;  %v742_v45 = vpop.f32.mrb[26].mxu0  ;;  %v11630_v48 = vmax.f32 %v1227_v34, %v1228_v35 }
 0x125   : > { %v1117_v49 = vadd.f32 %v11514_v44, %v993_v39  ;;  %v995_v50 = vmul.f32 %v11508_v42, %v742_v45  ;;  %v744_v51 = vpop.f32.mrb[27].mxu0 }
 0x126   : > { %v1118_v52 = vadd.f32 %v11532_v47, %v994_v41  ;;  %v996_v53 = vmul.f32 %v11511_v43, %v744_v51  ;;  %1451 = vrot.lane.b32.xlu0 %v11630_v48, %s11331_s12 }
 0x127   : > { %v1229_v54 = vmax.f32 %v1117_v49, 0.0  ;;  %v1119_v55 = vadd.f32 %v11514_v44, %v995_v50 }
 0x128   : > { %v1230_v56 = vmax.f32 %v1118_v52, 0.0  ;;  %v1120_v57 = vadd.f32 %v11532_v47, %v996_v53 }
 0x129   : > { %v1231_v58 = vmax.f32 %v1119_v55, 0.0 }
 0x12a   : > { %v1232_v59 = vmax.f32 %v1120_v57, 0.0  ;;  %v748_v61 = vpop.f32.mrb[28].mxu0  ;;  %v11640_v62 = vmax.f32 %v1229_v54, %v1230_v56 }
 0x12b   : > { %v997_v63 = vmul.f32 %v11508_v42, %v748_v61  ;;  %v750_v0 = vpop.f32.mrb[29].mxu0 }
 0x12c   : > { %v998_v4 = vmul.f32 %v11511_v43, %v750_v0  ;;  %1453 = vrot.lane.b32.xlu1 %v11640_v62, %s11331_s12  ;;  %v752_v5 = vpop.f32.mrb[30].mxu0  ;;  %v11646_v6 = vmax.f32 %v1231_v58, %v1232_v59 }
 0x12d   : > { %v1121_v8 = vadd.f32 %v11514_v44, %v997_v63  ;;  %v999_v9 = vmul.f32 %v11508_v42, %v752_v5  ;;  %v754_v10 = vpop.f32.mrb[31].mxu0 }
 0x12e   : > { %v1122_v11 = vadd.f32 %v11532_v47, %v998_v4  ;;  %v1000_v12 = vmul.f32 %v11511_v43, %v754_v10  ;;  %1455 = vrot.lane.b32.xlu0 %v11646_v6, %s11331_s12 }
 0x12f   : > { %v1233_v13 = vmax.f32 %v1121_v8, 0.0  ;;  %v1123_v14 = vadd.f32 %v11514_v44, %v999_v9 }
 0x130   : > { %v1234_v15 = vmax.f32 %v1122_v11, 0.0  ;;  %v1124_v16 = vadd.f32 %v11532_v47, %v1000_v12 }
 0x131   : > { %v1235_v18 = vmax.f32 %v1123_v14, 0.0 }
 0x132   : > { %v1236_v19 = vmax.f32 %v1124_v16, 0.0  ;;  %v758_v21 = vpop.f32.mrb[32].mxu0  ;;  %v11656_v22 = vmax.f32 %v1233_v13, %v1234_v15 }
 0x133   : > { %v1001_v24 = vmul.f32 %v11508_v42, %v758_v21  ;;  %v760_v26 = vpop.f32.mrb[33].mxu0 }
 0x134   : > { %v1002_v27 = vmul.f32 %v11511_v43, %v760_v26  ;;  %1457 = vrot.lane.b32.xlu1 %v11656_v22, %s11331_s12  ;;  %v762_v28 = vpop.f32.mrb[34].mxu0  ;;  %v11662_v29 = vmax.f32 %v1235_v18, %v1236_v19 }
 0x135   : > { %v1125_v30 = vadd.f32 %v11514_v44, %v1001_v24  ;;  %v1003_v31 = vmul.f32 %v11508_v42, %v762_v28  ;;  %v764_v32 = vpop.f32.mrb[35].mxu0 }
 0x136   : > { %v1126_v33 = vadd.f32 %v11532_v47, %v1002_v27  ;;  %v1004_v34 = vmul.f32 %v11511_v43, %v764_v32  ;;  %1459 = vrot.lane.b32.xlu0 %v11662_v29, %s11331_s12 }
 0x137   : > { %v1237_v35 = vmax.f32 %v1125_v30, 0.0  ;;  %v1127_v36 = vadd.f32 %v11514_v44, %v1003_v31 }
 0x138   : > { %v1238_v39 = vmax.f32 %v1126_v33, 0.0  ;;  %v1128_v40 = vadd.f32 %v11532_v47, %v1004_v34 }
 0x139   : > { %v1239_v41 = vmax.f32 %v1127_v36, 0.0  ;;  %v10975_v36 = vld [vmem:[%s15914_s4] sm:$0xff]  }
 0x13a   : > { %v1240_v45 = vmax.f32 %v1128_v40, 0.0  ;;  %v768_v49 = vpop.f32.mrb[36].mxu0  ;;  %v11672_v50 = vmax.f32 %v1237_v35, %v1238_v39  ;;  %7087 = vmatpush1.bf16.msra.mxu0 %v10975_v36  ;;  %10534 = vmatpush1.bf16.msra.mxu1 %v10975_v36 }
 0x13b   : > { %v1005_v51 = vmul.f32 %v11508_v42, %v768_v49  ;;  %v770_v52 = vpop.f32.mrb[37].mxu0  ;;  %7088 = vmatprep.subr.bf16.mxu0 %v15919_v2  ;;  %10519 = vmatprep.subr.bf16.mxu1 %v15919_v2 }
 0x13c   : > { %v1006_v53 = vmul.f32 %v11511_v43, %v770_v52  ;;  %1461 = vrot.lane.b32.xlu1 %v11672_v50, %s11331_s12  ;;  %v772_v54 = vpop.f32.mrb[38].mxu0  ;;  %v11678_v55 = vmax.f32 %v1239_v41, %v1240_v45 }
 0x13d   : > { %v1129_v56 = vadd.f32 %v11514_v44, %v1005_v51  ;;  %v1007_v57 = vmul.f32 %v11508_v42, %v772_v54  ;;  %v774_v58 = vpop.f32.mrb[39].mxu0 }
 0x13e   : > { %v1130_v59 = vadd.f32 %v11532_v47, %v1006_v53  ;;  %v1008_v61 = vmul.f32 %v11511_v43, %v774_v58  ;;  %1463 = vrot.lane.b32.xlu0 %v11678_v55, %s11331_s12 }
 0x13f   : > { %v1241_v63 = vmax.f32 %v1129_v56, 0.0  ;;  %v1131_v0 = vadd.f32 %v11514_v44, %v1007_v57  ;;  %v10976_v57 = vld [vmem:[%s15914_s4 + $0x8] sm:$0xff]  }
 0x140   : > { %v1242_v4 = vmax.f32 %v1130_v59, 0.0  ;;  %v1132_v5 = vadd.f32 %v11532_v47, %v1008_v61  ;;  %7089 = vmatpush1.bf16.msra.mxu0 %v10976_v57  ;;  %10535 = vmatpush1.bf16.msra.mxu1 %v10976_v57 }
 0x141   : > { %v1243_v8 = vmax.f32 %v1131_v0, 0.0  ;;  %7090 = vmatprep.subr.bf16.mxu0 %v15919_v2  ;;  %10520 = vmatprep.subr.bf16.mxu1 %v15919_v2 }
 0x142   : > { %v1244_v9 = vmax.f32 %v1132_v5, 0.0  ;;  %v778_v10 = vpop.f32.mrb[40].mxu0  ;;  %v11688_v11 = vmax.f32 %v1241_v63, %v1242_v4 }
 0x143   : > { %v1009_v12 = vmul.f32 %v11508_v42, %v778_v10  ;;  %v780_v13 = vpop.f32.mrb[41].mxu0 }
 0x144   : > { %v1010_v14 = vmul.f32 %v11511_v43, %v780_v13  ;;  %1465 = vrot.lane.b32.xlu1 %v11688_v11, %s11331_s12  ;;  %v782_v15 = vpop.f32.mrb[42].mxu0  ;;  %v11694_v16 = vmax.f32 %v1243_v8, %v1244_v9  ;;  %v10977_v9 = vld [vmem:[%s15914_s4 + $0x10] sm:$0xff]  }
 0x145   : > { %v1133_v18 = vadd.f32 %v11514_v44, %v1009_v12  ;;  %v1011_v19 = vmul.f32 %v11508_v42, %v782_v15  ;;  %v784_v21 = vpop.f32.mrb[43].mxu0  ;;  %7091 = vmatpush1.bf16.msra.mxu0 %v10977_v9  ;;  %10536 = vmatpush1.bf16.msra.mxu1 %v10977_v9 }
 0x146   : > { %v1134_v24 = vadd.f32 %v11532_v47, %v1010_v14  ;;  %v1012_v26 = vmul.f32 %v11511_v43, %v784_v21  ;;  %1467 = vrot.lane.b32.xlu0 %v11694_v16, %s11331_s12  ;;  %7092 = vmatprep.subr.bf16.mxu0 %v15919_v2 }
 0x147   : > { %v1245_v27 = vmax.f32 %v1133_v18, 0.0  ;;  %v1135_v28 = vadd.f32 %v11514_v44, %v1011_v19  ;;  %10521 = vmatprep.subr.bf16.mxu1 %v15919_v2 }
 0x148   : > { %v1246_v30 = vmax.f32 %v1134_v24, 0.0  ;;  %v1136_v31 = vadd.f32 %v11532_v47, %v1012_v26 }
 0x149   : > { %v1247_v32 = vmax.f32 %v1135_v28, 0.0 }
 0x14a   : > { %v1248_v33 = vmax.f32 %v1136_v31, 0.0  ;;  %v788_v34 = vpop.f32.mrb[44].mxu0  ;;  %v11704_v35 = vmax.f32 %v1245_v27, %v1246_v30  ;;  %v10978_v27 = vld [vmem:[%s15914_s4 + $0x18] sm:$0xff]  }
 0x14b   : > { %v1013_v39 = vmul.f32 %v11508_v42, %v788_v34  ;;  %v790_v40 = vpop.f32.mrb[45].mxu0  ;;  %7093 = vmatpush1.bf16.msra.mxu0 %v10978_v27  ;;  %10537 = vmatpush1.bf16.msra.mxu1 %v10978_v27 }
 0x14c   : > { %v1014_v41 = vmul.f32 %v11511_v43, %v790_v40  ;;  %1469 = vrot.lane.b32.xlu0 %v11704_v35, %s11331_s12  ;;  %v792_v45 = vpop.f32.mrb[46].mxu0  ;;  %v11713_v49 = vmax.f32 %v1247_v32, %v1248_v33  ;;  %7094 = vmatprep.subr.bf16.mxu0 %v15919_v2  ;;  %v10979_v40 = vld [vmem:[%s15914_s4 + $0x20] sm:$0xff]  }
 0x14d   : > { %v1137_v51 = vadd.f32 %v11514_v44, %v1013_v39  ;;  %v1015_v52 = vmul.f32 %v11508_v42, %v792_v45  ;;  %v794_v53 = vpop.f32.mrb[47].mxu0  ;;  %10522 = vmatprep.subr.bf16.mxu1 %v15919_v2 }
 0x14e   : > { %v1138_v54 = vadd.f32 %v11532_v47, %v1014_v41  ;;  %v1016_v56 = vmul.f32 %v11511_v43, %v794_v53  ;;  %1471 = vrot.lane.b32.xlu1 %v11713_v49, %s11331_s12 }
 0x14f   : > { %v1249_v58 = vmax.f32 %v1137_v51, 0.0  ;;  %v1139_v59 = vadd.f32 %v11514_v44, %v1015_v52  ;;  %7095 = vmatpush1.bf16.msra.mxu0 %v10979_v40  ;;  %10538 = vmatpush1.bf16.msra.mxu1 %v10979_v40 }
 0x150   : > { %v1250_v61 = vmax.f32 %v1138_v54, 0.0  ;;  %v1140_v63 = vadd.f32 %v11532_v47, %v1016_v56  ;;  %7096 = vmatprep.subr.bf16.mxu0 %v15919_v2  ;;  %10523 = vmatprep.subr.bf16.mxu1 %v15919_v2 }
 0x151   : > { %v1251_v0 = vmax.f32 %v1139_v59, 0.0 }
 0x152   : > { %v1252_v4 = vmax.f32 %v1140_v63, 0.0  ;;  %v798_v5 = vpop.f32.mrb[48].mxu0  ;;  %v11729_v8 = vmax.f32 %v1249_v58, %v1250_v61  ;;  %v10980_v61 = vld [vmem:[%s15914_s4 + $0x28] sm:$0xff]  }
 0x153   : > { %v1017_v10 = vmul.f32 %v11508_v42, %v798_v5  ;;  %v800_v12 = vpop.f32.mrb[49].mxu0  ;;  %7097 = vmatpush1.bf16.msra.mxu0 %v10980_v61  ;;  %10539 = vmatpush1.bf16.msra.mxu1 %v10980_v61 }
 0x154   : > { %v1018_v13 = vmul.f32 %v11511_v43, %v800_v12  ;;  %1473 = vrot.lane.b32.xlu1 %v11729_v8, %s11331_s12  ;;  %v802_v14 = vpop.f32.mrb[50].mxu0  ;;  %v11739_v15 = vmax.f32 %v1251_v0, %v1252_v4  ;;  %7098 = vmatprep.subr.bf16.mxu0 %v15919_v2 }
 0x155   : > { %v1141_v18 = vadd.f32 %v11514_v44, %v1017_v10  ;;  %v1019_v19 = vmul.f32 %v11508_v42, %v802_v14  ;;  %v804_v21 = vpop.f32.mrb[51].mxu0  ;;  %v10981_v14 = vld [vmem:[%s15914_s4 + $0x30] sm:$0xff]   ;;  %10524 = vmatprep.subr.bf16.mxu1 %v15919_v2 }
 0x156   : > { %v1142_v24 = vadd.f32 %v11532_v47, %v1018_v13  ;;  %v1020_v26 = vmul.f32 %v11511_v43, %v804_v21  ;;  %1475 = vrot.lane.b32.xlu0 %v11739_v15, %s11331_s12 }
 0x157   : > { %v1253_v28 = vmax.f32 %v1141_v18, 0.0  ;;  %v1143_v30 = vadd.f32 %v11514_v44, %v1019_v19  ;;  %7099 = vmatpush1.bf16.msra.mxu0 %v10981_v14  ;;  %10540 = vmatpush1.bf16.msra.mxu1 %v10981_v14  ;;  %v10984_v14 = vld [vmem:[%s15914_s4 + $0x48] sm:$0xff]  }
 0x158   : > { %v1254_v31 = vmax.f32 %v1142_v24, 0.0  ;;  %v1144_v32 = vadd.f32 %v11532_v47, %v1020_v26  ;;  %7100 = vmatprep.subr.bf16.mxu0 %v15919_v2  ;;  %10525 = vmatprep.subr.bf16.mxu1 %v15919_v2 }
 0x159   : > { %v1255_v33 = vmax.f32 %v1143_v30, 0.0 }
 0x15a   : > { %v1256_v34 = vmax.f32 %v1144_v32, 0.0  ;;  %v808_v36 = vpop.f32.mrb[52].mxu0  ;;  %v11755_v39 = vmax.f32 %v1253_v28, %v1254_v31 }
 0x15b   : > { %v1021_v41 = vmul.f32 %v11508_v42, %v808_v36  ;;  %v810_v45 = vpop.f32.mrb[53].mxu0 }
 0x15c   : > { %16038 = vst [vmem:[#allocation4_spill] sm:$0xff] %v11755_v39  ;;  %v1022_v51 = vmul.f32 %v11511_v43, %v810_v45  ;;  %1477 = vrot.lane.b32.xlu1 %v11755_v39, %s11331_s12  ;;  %v812_v52 = vpop.f32.mrb[54].mxu0  ;;  %v11765_v53 = vmax.f32 %v1255_v33, %v1256_v34  ;;  %v10982_v33 = vld [vmem:[%s15914_s4 + $0x38] sm:$0xff]  }
 0x15d   : > { %v1145_v54 = vadd.f32 %v11514_v44, %v1021_v41  ;;  %v1023_v56 = vmul.f32 %v11508_v42, %v812_v52  ;;  %v814_v57 = vpop.f32.mrb[55].mxu0  ;;  %7101 = vmatpush1.bf16.msra.mxu0 %v10982_v33  ;;  %10541 = vmatpush1.bf16.msra.mxu1 %v10982_v33 }
 0x15e   : > { %16039 = vst [vmem:[#allocation5_spill] sm:$0xff] %v11765_v53  ;;  %v1146_v58 = vadd.f32 %v11532_v47, %v1022_v51  ;;  %v1024_v59 = vmul.f32 %v11511_v43, %v814_v57  ;;  %1479 = vrot.lane.b32.xlu0 %v11765_v53, %s11331_s12  ;;  %7102 = vmatprep.subr.bf16.mxu0 %v15919_v2 }
 0x15f   : > { %v1257_v63 = vmax.f32 %v1145_v54, 0.0  ;;  %v1147_v0 = vadd.f32 %v11514_v44, %v1023_v56  ;;  %v10983_v56 = vld [vmem:[%s15914_s4 + $0x40] sm:$0xff]   ;;  %10526 = vmatprep.subr.bf16.mxu1 %v15919_v2 }
 0x160   : > { %v1258_v4 = vmax.f32 %v1146_v58, 0.0  ;;  %v1148_v5 = vadd.f32 %v11532_v47, %v1024_v59 }
 0x161   : > { %v1259_v9 = vmax.f32 %v1147_v0, 0.0  ;;  %7103 = vmatpush1.bf16.msra.mxu0 %v10983_v56  ;;  %10542 = vmatpush1.bf16.msra.mxu1 %v10983_v56 }
 0x162   : > { %v1260_v10 = vmax.f32 %v1148_v5, 0.0  ;;  %v818_v12 = vpop.f32.mrb[56].mxu0  ;;  %v11781_v13 = vmax.f32 %v1257_v63, %v1258_v4  ;;  %7104 = vmatprep.subr.bf16.mxu0 %v15919_v2  ;;  %10527 = vmatprep.subr.bf16.mxu1 %v15919_v2 }
 0x163   : > { %v1025_v18 = vmul.f32 %v11508_v42, %v818_v12  ;;  %v820_v19 = vpop.f32.mrb[57].mxu0 }
 0x164   : > { %16040 = vst [vmem:[#allocation6_spill] sm:$0xff] %v11781_v13  ;;  %v1026_v21 = vmul.f32 %v11511_v43, %v820_v19  ;;  %1481 = vrot.lane.b32.xlu1 %v11781_v13, %s11331_s12  ;;  %v822_v24 = vpop.f32.mrb[58].mxu0  ;;  %v11791_v26 = vmax.f32 %v1259_v9, %v1260_v10 }
 0x165   : > { %v1149_v27 = vadd.f32 %v11514_v44, %v1025_v18  ;;  %v1027_v28 = vmul.f32 %v11508_v42, %v822_v24  ;;  %v824_v30 = vpop.f32.mrb[59].mxu0  ;;  %7105 = vmatpush1.bf16.msra.mxu0 %v10984_v14  ;;  %10543 = vmatpush1.bf16.msra.mxu1 %v10984_v14 }
 0x166   : > { %16041 = vst [vmem:[#allocation7_spill] sm:$0xff] %v11791_v26  ;;  %v1150_v31 = vadd.f32 %v11532_v47, %v1026_v21  ;;  %v1028_v32 = vmul.f32 %v11511_v43, %v824_v30  ;;  %1483 = vrot.lane.b32.xlu0 %v11791_v26, %s11331_s12  ;;  %7106 = vmatprep.subr.bf16.mxu0 %v15919_v2 }
 0x167   : > { %v1261_v34 = vmax.f32 %v1149_v27, 0.0  ;;  %v1151_v36 = vadd.f32 %v11514_v44, %v1027_v28  ;;  %10528 = vmatprep.subr.bf16.mxu1 %v15919_v2 }
 0x168   : > { %v1262_v40 = vmax.f32 %v1150_v31, 0.0  ;;  %v1152_v41 = vadd.f32 %v11532_v47, %v1028_v32 }
 0x169   : > { %v1263_v45 = vmax.f32 %v1151_v36, 0.0 }
 0x16a   : > { %v1264_v51 = vmax.f32 %v1152_v41, 0.0  ;;  %v828_v52 = vpop.f32.mrb[60].mxu0  ;;  %v11807_v54 = vmax.f32 %v1261_v34, %v1262_v40 }
 0x16b   : > { %v1029_v57 = vmul.f32 %v11508_v42, %v828_v52  ;;  %v830_v58 = vpop.f32.mrb[61].mxu0  ;;  %v1781_v52 = vld [vmem:[%s15917_s7] sm:$0xff] }
 0x16c   : > { %16042 = vst [vmem:[#allocation8_spill] sm:$0xff] %v11807_v54  ;;  %v1030_v59 = vmul.f32 %v11511_v43, %v830_v58  ;;  %1485 = vrot.lane.b32.xlu1 %v11807_v54, %s11331_s12  ;;  %v832_v61 = vpop.f32.mrb[62].mxu0  ;;  %v11817_v63 = vmax.f32 %v1263_v45, %v1264_v51  ;;  %v1725_v51 = vld [vmem:[#allocation2] sm:$0xff]  ;;  %v12051_v54 = vld [vmem:[%s15917_s7 + $0x130] sm:$0xff] }
 0x16d   : > { %v1153_v0 = vadd.f32 %v11514_v44, %v1029_v57  ;;  %v1031_v4 = vmul.f32 %v11508_v42, %v832_v61  ;;  %v834_v5 = vpop.f32.mrb[63].mxu0  ;;  %16052 = vst [vmem:[#allocation17_spill] sm:$0xff] %v12051_v54 }
 0x16e   : > { %16043 = vst [vmem:[#allocation9_spill] sm:$0xff] %v11817_v63  ;;  %v1154_v9 = vadd.f32 %v11532_v47, %v1030_v59  ;;  %v1032_v10 = vmul.f32 %v11511_v43, %v834_v5  ;;  %v1430_v12 = vpop.permute.xlu1 %1429  ;;  %1487 = vrot.lane.b32.xlu0 %v11817_v63, %s11331_s12  ;;  %v1788_v59 = vmul.f32 %v1781_v52, %v1725_v51  ;;  %v9094_v5 = vld [vmem:[%s15917_s7 + $0x38] sm:$0xff] }
 0x16f   : > { %v1265_v18 = vmax.f32 %v1153_v0, 0.0  ;;  %v1155_v19 = vadd.f32 %v11514_v44, %v1031_v4  ;;  %v1597_v21 = vmax.f32 %v11544_v1, %v1430_v12  ;;  %v10985_v1 = vld [vmem:[%s15914_s4 + $0x50] sm:$0xff]  }
 0x170   : > { %v1266_v24 = vmax.f32 %v1154_v9, 0.0  ;;  %v1156_v27 = vadd.f32 %v11532_v47, %v1032_v10  ;;  %v1432_v28 = vpop.permute.xlu0 %1431  ;;  %7107 = vmatpush1.bf16.msra.mxu0 %v10985_v1  ;;  %10544 = vmatpush1.bf16.msra.mxu1 %v10985_v1  ;;  %v10986_v9 = vld [vmem:[%s15914_s4 + $0x58] sm:$0xff]   ;;  %v11869_v10 = vld [vmem:[%s15917_s7 + $0x1c0] sm:$0xff] }
 0x171   : > { %v1267_v30 = vmax.f32 %v1155_v19, 0.0  ;;  %1669 = vst.msk [vmem:[#allocation2 + $0x8] sm:$0xff] %vm559_vm0, %v1597_v21  ;;  %v1598_v31 = vmax.f32 %v11550_v7, %v1432_v28  ;;  %7108 = vmatprep.subr.bf16.mxu0 %v15919_v2  ;;  %10529 = vmatprep.subr.bf16.mxu1 %v15919_v2  ;;  %v9220_v19 = vld [vmem:[%s15917_s7 + $0xa8] sm:$0xff]  ;;  %v9862_v21 = vpack.c.bf16 %v1788_v59, %v1788_v59 }
 0x172   : > { %v1268_v32 = vmax.f32 %v1156_v27, 0.0  ;;  %v838_v33 = vpop.f32.mrb[64].mxu0  ;;  %v11836_v34 = vmax.f32 %v1265_v18, %v1266_v24 }
 0x173   : > { %1670 = vst.msk [vmem:[#allocation2 + $0x10] sm:$0xff] %vm559_vm0, %v1598_v31  ;;  %v1033_v36 = vmul.f32 %v11508_v42, %v838_v33  ;;  %v840_v40 = vpop.f32.mrb[65].mxu0  ;;  %v9095_v31 = vld [vmem:[%s15917_s7 + $0x40] sm:$0xff] }
 0x174   : > { %16044 = vst [vmem:[#allocation10_spill] sm:$0xff] %v11836_v34  ;;  %v1034_v7 = vmul.f32 %v11511_v43, %v840_v40  ;;  %1489 = vrot.lane.b32.xlu1 %v11836_v34, %s11331_s12  ;;  %v842_v41 = vpop.f32.mrb[66].mxu0  ;;  %v11847_v45 = vmax.f32 %v1267_v30, %v1268_v32  ;;  %7109 = vmatpush1.bf16.msra.mxu0 %v10986_v9  ;;  %2077 = vst.msk [vmem:[#allocation3] sm:$0xf] %vm2076_vm1, %v9862_v21  ;;  %v1782_v40 = vld [vmem:[%s15917_s7 + $0x8] sm:$0xff] }
 0x175   : > { %v1157_v56 = vadd.f32 %v11514_v44, %v1033_v36  ;;  %v1035_v57 = vmul.f32 %v11508_v42, %v842_v41  ;;  %v844_v58 = vpop.f32.mrb[67].mxu0  ;;  %7110 = vmatprep.subr.bf16.mxu0 %v15919_v2  ;;  %10545 = vmatpush1.bf16.msra.mxu1 %v10986_v9  ;;  %v10987_v9 = vld [vmem:[%s15914_s4 + $0x60] sm:$0xff]  }
 0x176   : > { %16045 = vst [vmem:[#allocation11_spill] sm:$0xff] %v11847_v45  ;;  %v1158_v61 = vadd.f32 %v11532_v47, %v1034_v7  ;;  %v1036_v0 = vmul.f32 %v11511_v43, %v844_v58  ;;  %v1434_v4 = vpop.permute.xlu1 %1433  ;;  %1491 = vrot.lane.b32.xlu0 %v11847_v45, %s11331_s12  ;;  %10530 = vmatprep.subr.bf16.mxu1 %v15919_v2 }
 0x177   : > { %v1269_v12 = vmax.f32 %v1157_v56, 0.0  ;;  %v1159_v14 = vadd.f32 %v11514_v44, %v1035_v57  ;;  %v1599_v18 = vmax.f32 %v11560_v20, %v1434_v4 }
 0x178   : > { %v1270_v24 = vmax.f32 %v1158_v61, 0.0  ;;  %v1160_v27 = vadd.f32 %v11532_v47, %v1036_v0  ;;  %v1436_v28 = vpop.permute.xlu0 %1435  ;;  %v2133_v30 = vld [vmem:[#allocation2 + $0x1] sm:$0xff]  ;;  %7111 = vmatpush1.bf16.msra.mxu0 %v10987_v9 }
 0x179   : > { %v3062_v32 = vld [vmem:[#allocation2 + $0x7] sm:$0xff]  ;;  %v1271_v33 = vmax.f32 %v1159_v14, 0.0  ;;  %1671 = vst.msk [vmem:[#allocation2 + $0x18] sm:$0xff] %vm559_vm0, %v1599_v18  ;;  %v1600_v20 = vmax.f32 %v11566_v25, %v1436_v28  ;;  %v2197_v1 = vmul.f32 %v9094_v5, %v2133_v30  ;;  %v9221_v5 = vld [vmem:[%s15917_s7 + $0xb0] sm:$0xff]  ;;  %7112 = vmatprep.subr.bf16.mxu0 %v15919_v2  ;;  %10546 = vmatpush1.bf16.msra.mxu1 %v10987_v9 }
 0x17a   : > { %v11884_v36 = vld [vmem:[#allocation2 + $0x8] sm:$0xff]  ;;  %v5438_v7 = vld [vmem:[#allocation2 + $0x10] sm:$0xff]  ;;  %v1272_v41 = vmax.f32 %v1160_v27, 0.0  ;;  %v11889_v51 = vmax.f32 %v1269_v12, %v1270_v24  ;;  %v848_v52 = vpop.f32.mrb[68].mxu0  ;;  %v3126_v57 = vmul.f32 %v9220_v19, %v3062_v32  ;;  %10531 = vmatprep.subr.bf16.mxu1 %v15919_v2 }
 0x17b   : > { %v2134_v56 = vld [vmem:[#allocation2 + $0x9] sm:$0xff]  ;;  %v5502_v25 = vmul.f32 %v11869_v10, %v5438_v7  ;;  %1672 = vst.msk [vmem:[#allocation2 + $0x20] sm:$0xff] %vm559_vm0, %v1600_v20  ;;  %v1037_v58 = vmul.f32 %v11508_v42, %v848_v52  ;;  %v9918_v59 = vpack.c.bf16 %v2197_v1, %v2197_v1  ;;  %v850_v61 = vpop.f32.mrb[69].mxu0  ;;  %v1789_v19 = vmul.f32 %v1782_v40, %v11884_v36 }
 0x17c   : > { %16046 = vst [vmem:[#allocation12_spill] sm:$0xff] %v11889_v51  ;;  %v2198_v0 = vmul.f32 %v9095_v31, %v2134_v56  ;;  %v11895_v4 = vld [vmem:[#allocation2 + $0xf] sm:$0xff]  ;;  %1493 = vrot.lane.b32.xlu1 %v11889_v51, %s11331_s12  ;;  %v1038_v12 = vmul.f32 %v11511_v43, %v850_v61  ;;  %v852_v14 = vpop.f32.mrb[70].mxu0  ;;  %v11906_v18 = vmax.f32 %v1271_v33, %v1272_v41 }
 0x17d   : > { %v10310_v21 = vpack.c.bf16 %v5502_v25, %v5502_v25  ;;  %v1161_v24 = vadd.f32 %v11514_v44, %v1037_v58  ;;  %2429 = vrot.lane.b32.xlu0 %v9918_v59, %s11331_s12  ;;  %v1039_v27 = vmul.f32 %v11508_v42, %v852_v14  ;;  %v854_v28 = vpop.f32.mrb[71].mxu0  ;;  %v11915_v31 = vld [vmem:[%s15917_s7 + $0x1c8] sm:$0xff]  ;;  %v3127_v1 = vmul.f32 %v9221_v5, %v11895_v4  ;;  %v11928_v25 = vld [vmem:[%s15917_s7 + $0x118] sm:$0xff]  ;;  %v11934_v59 = vld [vmem:[%s15917_s7 + $0x1d0] sm:$0xff] }
 0x17e   : > { %16047 = vst [vmem:[#allocation13_spill] sm:$0xff] %v11906_v18  ;;  %v9919_v30 = vpack.c.bf16 %v2198_v0, %v2198_v0  ;;  %v1162_v32 = vadd.f32 %v11532_v47, %v1038_v12  ;;  %v1438_v33 = vpop.permute.xlu1 %1437  ;;  %v1040_v20 = vmul.f32 %v11511_v43, %v854_v28  ;;  %v10988_v40 = vld [vmem:[%s15914_s4 + $0x68] sm:$0xff]   ;;  %v10030_v52 = vpack.c.bf16 %v3126_v57, %v3126_v57 }
 0x17f   : > { %5790 = vst.msk [vmem:[#allocation3 + $0x10] sm:$0xf] %vm2076_vm1, %v10310_v21  ;;  %v1273_v7 = vmax.f32 %v1161_v24, 0.0  ;;  %v1601_v41 = vmax.f32 %v11576_v38, %v1438_v33  ;;  %v1163_v0 = vadd.f32 %v11514_v44, %v1039_v27  ;;  %v9863_v5 = vpack.c.bf16 %v1789_v19, %v1789_v19  ;;  %7113 = vmatpush1.bf16.msra.mxu0 %v10988_v40  ;;  %v11958_v33 = vld [vmem:[%s15917_s7 + $0x188] sm:$0xff] }
 0x180   : > { %v5439_v58 = vld [vmem:[#allocation2 + $0x18] sm:$0xff]  ;;  %v1274_v61 = vmax.f32 %v1162_v32, 0.0  ;;  %v1164_v38 = vadd.f32 %v11532_v47, %v1040_v20  ;;  %v1440_v57 = vpop.permute.xlu0 %1439  ;;  %2431 = vrot.lane.b32.xlu1 %v9919_v30, %s11331_s12  ;;  %v10031_v21 = vpack.c.bf16 %v3127_v1, %v3127_v1  ;;  %v4054_v27 = vmul.f32 %v11928_v25, %v2134_v56  ;;  %7114 = vmatprep.subr.bf16.mxu0 %v15919_v2 }
 0x181   : > { %v5503_v12 = vmul.f32 %v11915_v31, %v5439_v58  ;;  %1673 = vst.msk [vmem:[#allocation2 + $0x28] sm:$0xff] %vm559_vm0, %v1601_v41  ;;  %v1602_v9 = vmax.f32 %v11582_v46, %v1440_v57  ;;  %3358 = vrot.lane.b32.xlu0 %v10030_v52, %s11331_s12  ;;  %v3991_v32 = vld [vmem:[#allocation2 + $0x11] sm:$0xff]  ;;  %v11953_v46 = vld [vmem:[%s15917_s7 + $0x120] sm:$0xff]  ;;  %v1275_v1 = vmax.f32 %v1163_v0, 0.0  ;;  %10547 = vmatpush1.bf16.msra.mxu1 %v10988_v40 }
 0x182   : > { %v5440_v14 = vld [vmem:[#allocation2 + $0x20] sm:$0xff]  ;;  %v11944_v24 = vmax.f32 %v1273_v7, %v1274_v61  ;;  %v858_v28 = vpop.f32.mrb[72].mxu0  ;;  %2078 = vst.msk [vmem:[#allocation3 + $0x14] sm:$0xf] %vm2076_vm1, %v9863_v5  ;;  %v1276_v7 = vmax.f32 %v1164_v38, 0.0  ;;  %v11970_v61 = vld [vmem:[%s15917_s7 + $0x190] sm:$0xff]  ;;  %10532 = vmatprep.subr.bf16.mxu1 %v15919_v2 }
 0x183   : > { %v10311_v19 = vpack.c.bf16 %v5503_v12, %v5503_v12  ;;  %v5504_v30 = vmul.f32 %v11934_v59, %v5440_v14  ;;  %1674 = vst.msk [vmem:[#allocation2 + $0x30] sm:$0xff] %vm559_vm0, %v1602_v9  ;;  %v1041_v56 = vmul.f32 %v11508_v42, %v858_v28  ;;  %v860_v20 = vpop.f32.mrb[73].mxu0  ;;  %v11976_v38 = vld [vmem:[%s15917_s7 + $0x1d8] sm:$0xff]  ;;  %v10142_v12 = vpack.c.bf16 %v4054_v27, %v4054_v27  ;;  %v11993_v40 = vld [vmem:[%s15917_s7 + $0x1e0] sm:$0xff]  ;;  %v9097_v2 = vld [vmem:[%s15917_s7 + $0x50] sm:$0xff] }
 0x184   : > { %16048 = vst [vmem:[#allocation14_spill] sm:$0xff] %v11944_v24  ;;  %3360 = vrot.lane.b32.xlu1 %v10031_v21, %s11331_s12  ;;  %v1042_v41 = vmul.f32 %v11511_v43, %v860_v20  ;;  %v862_v52 = vpop.f32.mrb[74].mxu0  ;;  %v4055_v9 = vmul.f32 %v11953_v46, %v3991_v32  ;;  %v4982_v14 = vmul.f32 %v11958_v33, %v11895_v4  ;;  %v4919_v21 = vld [vmem:[#allocation2 + $0x17] sm:$0xff] }
 0x185   : > { %5791 = vst.msk [vmem:[#allocation3 + $0x24] sm:$0xf] %vm2076_vm1, %v10311_v19  ;;  %v10312_v58 = vpack.c.bf16 %v5504_v30, %v5504_v30  ;;  %1495 = vrot.lane.b32.xlu0 %v11906_v18, %s11331_s12  ;;  %v1165_v57 = vadd.f32 %v11514_v44, %v1041_v56  ;;  %v864_v0 = vpop.f32.mrb[75].mxu0  ;;  %v9096_v56 = vld [vmem:[%s15917_s7 + $0x48] sm:$0xff]  ;;  %v1043_v27 = vmul.f32 %v11508_v42, %v862_v52 }
 0x186   : > { %v1442_v5 = vpop.permute.xlu1 %1441  ;;  %v1166_v28 = vadd.f32 %v11532_v47, %v1042_v41  ;;  %v1044_v20 = vmul.f32 %v11511_v43, %v864_v0  ;;  %v4983_v0 = vmul.f32 %v11970_v61, %v4919_v21 }
 0x187   : > { %5792 = vst.msk [vmem:[#allocation3 + $0x38] sm:$0xf] %vm2076_vm1, %v10312_v58  ;;  %v1603_v19 = vmax.f32 %v11592_v60, %v1442_v5  ;;  %v1277_v30 = vmax.f32 %v1165_v57, 0.0  ;;  %v11997_v58 = vmax.f32 %v1275_v1, %v1276_v7  ;;  %v2136_v5 = vld [vmem:[#allocation2 + $0x19] sm:$0xff]  ;;  %v10989_v1 = vld [vmem:[%s15914_s4 + $0x70] sm:$0xff]   ;;  %v1167_v51 = vadd.f32 %v11514_v44, %v1043_v27 }
 0x188   : > { %v5441_v4 = vld [vmem:[#allocation2 + $0x28] sm:$0xff]  ;;  %v1444_v41 = vpop.permute.xlu0 %1443  ;;  %1497 = vrot.lane.b32.xlu1 %v11944_v24, %s11331_s12  ;;  %v1278_v60 = vmax.f32 %v1166_v28, 0.0  ;;  %v10143_v28 = vpack.c.bf16 %v4055_v9, %v4055_v9  ;;  %v2199_v24 = vmul.f32 %v9096_v56, %v3991_v32  ;;  %v1168_v45 = vadd.f32 %v11532_v47, %v1044_v20  ;;  %7115 = vmatpush1.bf16.msra.mxu0 %v10989_v1  ;;  %v12022_v32 = vld [vmem:[%s15914_s4 + $0x78] sm:$0xff]  }
 0x189   : > { %16049 = vst [vmem:[#allocation15_spill] sm:$0xff] %v11997_v58  ;;  %v5505_v57 = vmul.f32 %v11976_v38, %v5441_v4  ;;  %1675 = vst.msk [vmem:[#allocation2 + $0x38] sm:$0xff] %vm559_vm0, %v1603_v19  ;;  %v1604_v52 = vmax.f32 %v11598_v3, %v1444_v41  ;;  %4286 = vrot.lane.b32.xlu0 %v10142_v12, %s11331_s12  ;;  %v10254_v4 = vpack.c.bf16 %v4982_v14, %v4982_v14  ;;  %v9222_v3 = vld [vmem:[%s15917_s7 + $0xb8] sm:$0xff] }
 0x18a   : > { %v5442_v7 = vld [vmem:[#allocation2 + $0x30] sm:$0xff]  ;;  %v12013_v12 = vmax.f32 %v1277_v30, %v1278_v60  ;;  %v868_v19 = vpop.f32.mrb[76].mxu0  ;;  %v2200_v9 = vmul.f32 %v9097_v2, %v2136_v5  ;;  %v10255_v27 = vpack.c.bf16 %v4983_v0, %v4983_v0  ;;  %v3128_v20 = vmul.f32 %v9222_v3, %v4919_v21  ;;  %v3065_v60 = vld [vmem:[#allocation2 + $0x1f] sm:$0xff]  ;;  %v12035_v2 = vld [vmem:[%s15917_s7 + $0x1e8] sm:$0xff]  ;;  %10548 = vmatpush1.bf16.msra.mxu1 %v10989_v1 }
 0x18b   : > { %v10313_v41 = vpack.c.bf16 %v5505_v57, %v5505_v57  ;;  %v5506_v18 = vmul.f32 %v11993_v40, %v5442_v7  ;;  %1676 = vst.msk [vmem:[#allocation2 + $0x50] sm:$0xff] %vm559_vm0, %v1604_v52  ;;  %v870_v34 = vpop.f32.mrb[77].mxu0  ;;  %v1045_v14 = vmul.f32 %v11508_v42, %v868_v19  ;;  %v9223_v57 = vld [vmem:[%s15917_s7 + $0xc0] sm:$0xff]  ;;  %v9920_v19 = vpack.c.bf16 %v2199_v24, %v2199_v24  ;;  %v12070_v1 = vld [vmem:[%s15917_s7 + $0x198] sm:$0xff] }
 0x18c   : > { %16050 = vst [vmem:[#allocation16_spill] sm:$0xff] %v12013_v12  ;;  %4288 = vrot.lane.b32.xlu1 %v10143_v28, %s11331_s12  ;;  %v872_v30 = vpop.f32.mrb[78].mxu0  ;;  %v1046_v52 = vmul.f32 %v11511_v43, %v870_v34  ;;  %v16051_v34 = vmov 0   ;;  %v1280_v63 = vmax.f32 %v1168_v45, 0.0  ;;  %v3993_v24 = vld [vmem:[#allocation2 + $0x21] sm:$0xff]  ;;  %v9921_v26 = vpack.c.bf16 %v2200_v9, %v2200_v9 }
 0x18d   : > { %5793 = vst.msk [vmem:[#allocation3 + $0x4c] sm:$0xf] %vm2076_vm1, %v10313_v41  ;;  %v10314_v56 = vpack.c.bf16 %v5506_v18, %v5506_v18  ;;  %5214 = vrot.lane.b32.xlu0 %v10254_v4, %s11331_s12  ;;  %v874_v7 = vpop.f32.mrb[79].mxu0  ;;  %v12040_v18 = vld [vmem:[%s15917_s7 + $0x128] sm:$0xff]  ;;  %v1169_v21 = vadd.f32 %v11514_v44, %v1045_v14  ;;  %v1047_v0 = vmul.f32 %v11508_v42, %v872_v30  ;;  %v1279_v41 = vmax.f32 %v1167_v51, 0.0 }
 0x18e   : > { %v1446_v28 = vpop.permute.xlu1 %1445  ;;  %v1048_v4 = vmul.f32 %v11511_v43, %v874_v7  ;;  %7116 = vmatprep.subr.bf16.mxu0 %v16051_v34  ;;  %v1170_v14 = vadd.f32 %v11532_v47, %v1046_v52  ;;  %v12061_v51 = vmul.f32 %v12040_v18, %v2136_v5  ;;  %10533 = vmatprep.subr.bf16.mxu1 %v16051_v34 }
 0x18f   : > { %5794 = vst.msk [vmem:[#allocation3 + $0x60] sm:$0xf] %vm2076_vm1, %v10314_v56  ;;  %v1605_v3 = vmax.f32 %v11608_v17, %v1446_v28  ;;  %7117 = vmatpush1.bf16.msra.mxu0 %v12022_v32  ;;  %v3129_v56 = vmul.f32 %v9223_v57, %v3065_v60  ;;  %v1281_v13 = vmax.f32 %v1169_v21, 0.0  ;;  %v10032_v28 = vpack.c.bf16 %v3128_v20, %v3128_v20 }
 0x190   : > { %v5443_v30 = vld [vmem:[#allocation2 + $0x38] sm:$0xff]  ;;  %v1448_v7 = vpop.permute.xlu0 %1447  ;;  %5216 = vrot.lane.b32.xlu1 %v10255_v27, %s11331_s12  ;;  %v1282_v52 = vmax.f32 %v1170_v14, 0.0  ;;  %v12065_v9 = vmul.f32 %v12051_v54, %v3993_v24  ;;  %v1171_v27 = vadd.f32 %v11514_v44, %v1047_v0  ;;  %v12075_v5 = vmax.f32 %v1279_v41, %v1280_v63  ;;  %10549 = vmatpush1.bf16.msra.mxu1 %v12022_v32 }
 0x191   : > { %v5507_v17 = vmul.f32 %v12035_v2, %v5443_v30  ;;  %1677 = vst.msk [vmem:[#allocation2 + $0x58] sm:$0xff] %vm559_vm0, %v1605_v3  ;;  %v1606_v45 = vmax.f32 %v11614_v23, %v1448_v7  ;;  %2433 = vrot.lane.b32.xlu0 %v9920_v19, %s11331_s12  ;;  %v1172_v23 = vadd.f32 %v11532_v47, %v1048_v4  ;;  %v12092_v4 = vld [vmem:[%s15917_s7 + $0x1a0] sm:$0xff] }
 0x192   : > { %v878_v57 = vpop.f32.mrb[80].mxu0  ;;  %16053 = vst [vmem:[#allocation18_spill] sm:$0xff] %v12075_v5  ;;  %v12077_v21 = vmax.f32 %v1281_v13, %v1282_v52  ;;  %v10033_v14 = vpack.c.bf16 %v3129_v56, %v3129_v56  ;;  %v10144_v0 = vpack.c.bf16 %v12061_v51, %v12061_v51  ;;  %v12087_v63 = vmul.f32 %v12070_v1, %v3065_v60  ;;  %v4921_v13 = vld [vmem:[#allocation2 + $0x27] sm:$0xff] }
 0x193   : > { %v10315_v19 = vpack.c.bf16 %v5507_v17, %v5507_v17  ;;  %1678 = vst.msk [vmem:[#allocation2 + $0x60] sm:$0xff] %vm559_vm0, %v1606_v45  ;;  %v1049_v20 = vmul.f32 %v11508_v42, %v878_v57  ;;  %v880_v3 = vpop.f32.mrb[81].mxu0  ;;  %16055 = vst [vmem:[#allocation20_spill] sm:$0xff] %v12092_v4  ;;  %v1283_v51 = vmax.f32 %v1171_v27, 0.0  ;;  %v1284_v52 = vmax.f32 %v1172_v23, 0.0  ;;  %v12099_v60 = vld [vmem:[#allocation2 + $0x29] sm:$0xff]  ;;  %7343 = vmatprep.subr.bf16.mxu1 %v16051_v34 }
 0x194   : > { %16054 = vst [vmem:[#allocation19_spill] sm:$0xff] %v12077_v21  ;;  %2435 = vrot.lane.b32.xlu1 %v9921_v26, %s11331_s12  ;;  %v1050_v30 = vmul.f32 %v11511_v43, %v880_v3  ;;  %v882_v7 = vpop.f32.mrb[82].mxu0  ;;  %v9098_v26 = vld [vmem:[%s15917_s7 + $0x58] sm:$0xff]  ;;  %v10145_v3 = vpack.c.bf16 %v12065_v9, %v12065_v9  ;;  %v9224_v27 = vld [vmem:[%s15917_s7 + $0xc8] sm:$0xff]  ;;  %v12117_v32 = vmul.f32 %v12092_v4, %v4921_v13  ;;  %v9225_v9 = vld [vmem:[%s15917_s7 + $0xd0] sm:$0xff] }
 0x195   : > { %5795 = vst.msk [vmem:[#allocation3 + $0x74] sm:$0xf] %vm2076_vm1, %v10315_v19  ;;  %3362 = vrot.lane.b32.xlu0 %v10032_v28, %s11331_s12  ;;  %v1173_v41 = vadd.f32 %v11514_v44, %v1049_v20  ;;  %v1051_v56 = vmul.f32 %v11508_v42, %v882_v7  ;;  %v884_v17 = vpop.f32.mrb[83].mxu0  ;;  %v9099_v28 = vld [vmem:[%s15917_s7 + $0x60] sm:$0xff]  ;;  %v12135_v39 = vmul.f32 %v9224_v27, %v4921_v13 }
 0x196   : > { %v1450_v45 = vpop.permute.xlu1 %1449  ;;  %v1174_v57 = vadd.f32 %v11532_v47, %v1050_v30  ;;  %v1052_v19 = vmul.f32 %v11511_v43, %v884_v17  ;;  %v12121_v17 = vld [vmem:[#allocation2 + $0x2f] sm:$0xff]  ;;  %v12139_v54 = vmax.f32 %v1283_v51, %v1284_v52  ;;  %v10256_v13 = vpack.c.bf16 %v12087_v63, %v12087_v63  ;;  %v12163_v63 = vld [vmem:[%s15917_s7 + $0x138] sm:$0xff] }
 0x197   : > { %v1607_v20 = vmax.f32 %v11624_v37, %v1450_v45  ;;  %v1285_v23 = vmax.f32 %v1173_v41, 0.0  ;;  %v1175_v7 = vadd.f32 %v11514_v44, %v1051_v56  ;;  %v12119_v37 = vmul.f32 %v9098_v26, %v3993_v24  ;;  %16058 = vst [vmem:[#allocation23_spill] sm:$0xff] %v12163_v63 }
 0x198   : > { %v5445_v53 = vld [vmem:[#allocation2 + $0x58] sm:$0xff]  ;;  %v1452_v30 = vpop.permute.xlu0 %1451  ;;  %3364 = vrot.lane.b32.xlu1 %v10033_v14, %s11331_s12  ;;  %v1286_v41 = vmax.f32 %v1174_v57, 0.0  ;;  %v1176_v56 = vadd.f32 %v11532_v47, %v1052_v19  ;;  %v12133_v24 = vmul.f32 %v9099_v28, %v12099_v60  ;;  %v10257_v51 = vpack.c.bf16 %v12117_v32, %v12117_v32 }
 0x199   : > { %v5509_v45 = vmul.f32 %v11869_v10, %v5445_v53  ;;  %1679 = vst.msk [vmem:[#allocation2 + $0x68] sm:$0xff] %vm559_vm0, %v1607_v20  ;;  %v1608_v14 = vmax.f32 %v11630_v48, %v1452_v30  ;;  %1499 = vrot.lane.b32.xlu0 %v11997_v58, %s11331_s12  ;;  %v1287_v26 = vmax.f32 %v1175_v7, 0.0  ;;  %v12144_v48 = vmul.f32 %v9225_v9, %v12121_v17  ;;  %v12212_v58 = vld [vmem:[%s15917_s7 + $0x148] sm:$0xff] }
 0x19a   : > { %v5446_v34 = vld [vmem:[#allocation2 + $0x60] sm:$0xff]  ;;  %v1288_v4 = vmax.f32 %v1176_v56, 0.0  ;;  %v12137_v57 = vmax.f32 %v1285_v23, %v1286_v41  ;;  %v888_v19 = vpop.f32.mrb[84].mxu0  ;;  %v9922_v30 = vpack.c.bf16 %v12119_v37, %v12119_v37  ;;  %v9157_v56 = vld [vmem:[%s15917_s7 + $0x70] sm:$0xff]  ;;  %16062 = vst [vmem:[#allocation27_spill] sm:$0xff] %v12212_v58 }
 0x19b   : > { %v10317_v53 = vpack.c.bf16 %v5509_v45, %v5509_v45  ;;  %v5510_v20 = vmul.f32 %v11915_v31, %v5446_v34  ;;  %1680 = vst.msk [vmem:[#allocation2 + $0x70] sm:$0xff] %vm559_vm0, %v1608_v14  ;;  %v1053_v28 = vmul.f32 %v11508_v42, %v888_v19  ;;  %v890_v7 = vpop.f32.mrb[85].mxu0  ;;  %v3995_v14 = vld [vmem:[#allocation2 + $0x31] sm:$0xff] }
 0x19c   : > { %16056 = vst [vmem:[#allocation21_spill] sm:$0xff] %v12137_v57  ;;  %1501 = vrot.lane.b32.xlu1 %v12013_v12, %s11331_s12  ;;  %v1054_v52 = vmul.f32 %v11511_v43, %v890_v7  ;;  %v892_v34 = vpop.f32.mrb[86].mxu0  ;;  %v12154_v27 = vmax.f32 %v1287_v26, %v1288_v4  ;;  %v2654_v4 = vld [vmem:[#allocation2 + $0x2] sm:$0xff] }
 0x19d   : > { %5797 = vst.msk [vmem:[#allocation3 + $0x9c] sm:$0xf] %vm2076_vm1, %v10317_v53  ;;  %v10318_v23 = vpack.c.bf16 %v5510_v20, %v5510_v20  ;;  %4290 = vrot.lane.b32.xlu0 %v10144_v0, %s11331_s12  ;;  %v1177_v32 = vadd.f32 %v11514_v44, %v1053_v28  ;;  %v1055_v9 = vmul.f32 %v11508_v42, %v892_v34  ;;  %v894_v41 = vpop.f32.mrb[87].mxu0  ;;  %v12177_v26 = vld [vmem:[%s15917_s7 + $0x140] sm:$0xff]  ;;  %v12188_v7 = vld [vmem:[%s15917_s7 + $0x1a8] sm:$0xff] }
 0x19e   : > { %16057 = vst [vmem:[#allocation22_spill] sm:$0xff] %v12154_v27  ;;  %v1454_v45 = vpop.permute.xlu1 %1453  ;;  %16059 = vst [vmem:[#allocation24_spill] sm:$0xff] %v12177_v26  ;;  %v1178_v19 = vadd.f32 %v11532_v47, %v1054_v52  ;;  %v1056_v53 = vmul.f32 %v11511_v43, %v894_v41  ;;  %v12194_v52 = vmul.f32 %v12163_v63, %v12099_v60  ;;  %v3996_v28 = vld [vmem:[#allocation2 + $0x39] sm:$0xff]  ;;  %v2655_v63 = vld [vmem:[#allocation2 + $0xa] sm:$0xff] }
 0x19f   : > { %5798 = vst.msk [vmem:[#allocation3 + $0xb0] sm:$0xf] %vm2076_vm1, %v10318_v23  ;;  %v1609_v20 = vmax.f32 %v11640_v62, %v1454_v45  ;;  %16060 = vst [vmem:[#allocation25_spill] sm:$0xff] %v12188_v7  ;;  %v1289_v34 = vmax.f32 %v1177_v32, 0.0  ;;  %v1179_v37 = vadd.f32 %v11514_v44, %v1055_v9  ;;  %v4923_v62 = vld [vmem:[#allocation2 + $0x37] sm:$0xff]  ;;  %v2718_v32 = vmul.f32 %v9157_v56, %v2654_v4 }
 0x1a0   : > { %v5447_v0 = vld [vmem:[#allocation2 + $0x68] sm:$0xff]  ;;  %v1456_v12 = vpop.permute.xlu0 %1455  ;;  %4292 = vrot.lane.b32.xlu1 %v10145_v3, %s11331_s12  ;;  %v12199_v23 = vld [vmem:[%s15917_s7 + $0x1b0] sm:$0xff]  ;;  %v1290_v41 = vmax.f32 %v1178_v19, 0.0  ;;  %v1180_v45 = vadd.f32 %v11532_v47, %v1056_v53  ;;  %v12207_v60 = vmul.f32 %v12177_v26, %v3995_v14  ;;  %v12216_v4 = vmul.f32 %v12188_v7, %v12121_v17  ;;  %v12229_v17 = vld [vmem:[%s15917_s7 + $0x78] sm:$0xff] }
 0x1a1   : > { %16061 = vst [vmem:[#allocation26_spill] sm:$0xff] %v12199_v23  ;;  %v5511_v9 = vmul.f32 %v11934_v59, %v5447_v0  ;;  %1681 = vst.msk [vmem:[#allocation2 + $0x78] sm:$0xff] %vm559_vm0, %v1609_v20  ;;  %v1610_v3 = vmax.f32 %v11646_v6, %v1456_v12  ;;  %5218 = vrot.lane.b32.xlu0 %v10256_v13, %s11331_s12  ;;  %v1291_v19 = vmax.f32 %v1179_v37, 0.0 }
 0x1a2   : > { %v5448_v53 = vld [vmem:[#allocation2 + $0x70] sm:$0xff]  ;;  %v1292_v56 = vmax.f32 %v1180_v45, 0.0  ;;  %v12218_v0 = vmax.f32 %v1289_v34, %v1290_v41  ;;  %v898_v6 = vpop.f32.mrb[88].mxu0  ;;  %v9974_v12 = vpack.c.bf16 %v2718_v32, %v2718_v32  ;;  %v12223_v20 = vmul.f32 %v12199_v23, %v4923_v62  ;;  %v4924_v45 = vld [vmem:[#allocation2 + $0x3f] sm:$0xff] }
 0x1a3   : > { %v10319_v13 = vpack.c.bf16 %v5511_v9, %v5511_v9  ;;  %v5512_v14 = vmul.f32 %v11976_v38, %v5448_v53  ;;  %1682 = vst.msk [vmem:[#allocation2 + $0x80] sm:$0xff] %vm559_vm0, %v1610_v3  ;;  %v1057_v37 = vmul.f32 %v11508_v42, %v898_v6  ;;  %v900_v26 = vpop.f32.mrb[89].mxu0  ;;  %v12235_v41 = vmul.f32 %v12212_v58, %v3996_v28  ;;  %v12240_v62 = vld [vmem:[%s15917_s7 + $0x1b8] sm:$0xff] }
 0x1a4   : > { %5220 = vrot.lane.b32.xlu1 %v10257_v51, %s11331_s12  ;;  %v1058_v32 = vmul.f32 %v11511_v43, %v900_v26  ;;  %v902_v9 = vpop.f32.mrb[90].mxu0  ;;  %v12243_v3 = vmax.f32 %v1291_v19, %v1292_v56  ;;  %3006 = vst.msk [vmem:[#allocation3 + $0x4] sm:$0xf] %vm2076_vm1, %v9974_v12  ;;  %v12255_v26 = vld [vmem:[%s15917_s7 + $0xe0] sm:$0xff]  ;;  %v3997_v12 = vld [vmem:[#allocation2 + $0x51] sm:$0xff] }
 0x1a5   : > { %5799 = vst.msk [vmem:[#allocation3 + $0xc4] sm:$0xf] %vm2076_vm1, %v10319_v13  ;;  %v10320_v51 = vpack.c.bf16 %v5512_v14, %v5512_v14  ;;  %2437 = vrot.lane.b32.xlu0 %v9922_v30, %s11331_s12  ;;  %v1181_v53 = vadd.f32 %v11514_v44, %v1057_v37  ;;  %v1059_v6 = vmul.f32 %v11508_v42, %v902_v9  ;;  %v904_v34 = vpop.f32.mrb[91].mxu0  ;;  %v4925_v28 = vld [vmem:[#allocation2 + $0x57] sm:$0xff] }
 0x1a6   : > { %v1458_v19 = vpop.permute.xlu1 %1457  ;;  %v1182_v30 = vadd.f32 %v11532_v47, %v1058_v32  ;;  %v1060_v13 = vmul.f32 %v11511_v43, %v904_v34  ;;  %v2719_v14 = vmul.f32 %v12229_v17, %v2655_v63  ;;  %v12265_v9 = vmul.f32 %v12240_v62, %v4924_v45 }
 0x1a7   : > { %5800 = vst.msk [vmem:[#allocation3 + $0xd8] sm:$0xf] %vm2076_vm1, %v10320_v51  ;;  %v1611_v37 = vmax.f32 %v11656_v22, %v1458_v19  ;;  %v1293_v23 = vmax.f32 %v1181_v53, 0.0  ;;  %v1183_v58 = vadd.f32 %v11514_v44, %v1059_v6  ;;  %v16063_v32 = vpack.c.bf16 %v12133_v24, %v12133_v24  ;;  %v3998_v19 = vld [vmem:[#allocation2 + $0x59] sm:$0xff] }
 0x1a8   : > { %v5449_v7 = vld [vmem:[#allocation2 + $0x78] sm:$0xff]  ;;  %v1460_v56 = vpop.permute.xlu0 %1459  ;;  %v1294_v34 = vmax.f32 %v1182_v30, 0.0  ;;  %v1184_v63 = vadd.f32 %v11532_v47, %v1060_v13  ;;  %v9975_v51 = vpack.c.bf16 %v2719_v14, %v2719_v14  ;;  %v3646_v22 = vmul.f32 %v12255_v26, %v11884_v36 }
 0x1a9   : > { %2439 = vrot.lane.b32.xlu1 %v16063_v32, %s11331_s12  ;;  %v5513_v45 = vmul.f32 %v11993_v40, %v5449_v7  ;;  %1683 = vst.msk [vmem:[#allocation2 + $0x98] sm:$0xff] %vm559_vm0, %v1611_v37  ;;  %v1612_v53 = vmax.f32 %v11662_v29, %v1460_v56  ;;  %v16064_v6 = vpack.c.bf16 %v12135_v39, %v12135_v39  ;;  %v1295_v30 = vmax.f32 %v1183_v58, 0.0  ;;  %v4926_v37 = vld [vmem:[#allocation2 + $0x5f] sm:$0xff] }
 0x1aa   : > { %v12283_v24 = vmul.f32 %v11928_v25, %v3997_v12  ;;  %v5450_v13 = vld [vmem:[#allocation2 + $0x80] sm:$0xff]  ;;  %v12286_v14 = vmul.f32 %v11958_v33, %v4925_v28  ;;  %v1296_v36 = vmax.f32 %v1184_v63, 0.0  ;;  %v908_v7 = vpop.f32.mrb[92].mxu0  ;;  %v12288_v32 = vmax.f32 %v1293_v23, %v1294_v34  ;;  %3007 = vst.msk [vmem:[#allocation3 + $0x18] sm:$0xf] %vm2076_vm1, %v9975_v51  ;;  %v4511_v25 = vld [vmem:[#allocation2 + $0x16] sm:$0xff] }
 0x1ab   : > { %3366 = vrot.lane.b32.xlu0 %v16064_v6, %s11331_s12  ;;  %v10086_v29 = vpack.c.bf16 %v3646_v22, %v3646_v22  ;;  %v10321_v56 = vpack.c.bf16 %v5513_v45, %v5513_v45  ;;  %v5514_v39 = vmul.f32 %v12035_v2, %v5450_v13  ;;  %1684 = vst.msk [vmem:[#allocation2 + $0xa0] sm:$0xff] %vm559_vm0, %v1612_v53  ;;  %v910_v12 = vpop.f32.mrb[93].mxu0  ;;  %v12312_v22 = vld [vmem:[%s15917_s7 + $0xe8] sm:$0xff]  ;;  %v12329_v13 = vld [vmem:[%s15917_s7 + $0x158] sm:$0xff] }
 0x1ac   : > { %v1061_v58 = vmul.f32 %v11508_v42, %v908_v7  ;;  %v16065_v33 = vpack.c.bf16 %v12144_v48, %v12144_v48  ;;  %v12303_v28 = vmul.f32 %v11953_v46, %v3998_v19  ;;  %v1062_v34 = vmul.f32 %v11511_v43, %v910_v12  ;;  %v912_v63 = vpop.f32.mrb[94].mxu0  ;;  %v3999_v45 = vld [vmem:[#allocation2 + $0x61] sm:$0xff]  ;;  %v4510_v12 = vld [vmem:[#allocation2 + $0xe] sm:$0xff] }
 0x1ad   : > { %v12306_v51 = vmax.f32 %v1295_v30, %v1296_v36  ;;  %3934 = vst.msk [vmem:[#allocation3 + $0x8] sm:$0xf] %vm2076_vm1, %v10086_v29  ;;  %5801 = vst.msk [vmem:[#allocation3 + $0xec] sm:$0xf] %vm2076_vm1, %v10321_v56  ;;  %v10322_v48 = vpack.c.bf16 %v5514_v39, %v5514_v39  ;;  %v1063_v6 = vmul.f32 %v11508_v42, %v912_v63  ;;  %v914_v19 = vpop.f32.mrb[95].mxu0  ;;  %v12324_v30 = vld [vmem:[%s15917_s7 + $0x150] sm:$0xff] }
 0x1ae   : > { %3368 = vrot.lane.b32.xlu1 %v16065_v33, %s11331_s12  ;;  %v1185_v53 = vadd.f32 %v11514_v44, %v1061_v58  ;;  %v1462_v36 = vpop.permute.xlu1 %1461  ;;  %v1186_v56 = vadd.f32 %v11532_v47, %v1062_v34  ;;  %v1064_v39 = vmul.f32 %v11511_v43, %v914_v19  ;;  %v3583_v58 = vld [vmem:[#allocation2 + $0x10] sm:$0xff]  ;;  %v12340_v63 = vmul.f32 %v11970_v61, %v4926_v37  ;;  %v4927_v46 = vld [vmem:[#allocation2 + $0x67] sm:$0xff] }
 0x1af   : > { %1503 = vrot.lane.b32.xlu0 %v12075_v5, %s11331_s12  ;;  %5802 = vst.msk [vmem:[#allocation3 + $0x100] sm:$0xf] %vm2076_vm1, %v10322_v48  ;;  %v1613_v33 = vmax.f32 %v11672_v50, %v1462_v36  ;;  %v1187_v7 = vadd.f32 %v11514_v44, %v1063_v6  ;;  %v12348_v19 = vmul.f32 %v12040_v18, %v3999_v45  ;;  %v12362_v18 = vld [vmem:[%s15917_s7 + $0x10] sm:$0xff] }
 0x1b0   : > { %v1297_v23 = vmax.f32 %v1185_v53, 0.0  ;;  %v1464_v5 = vpop.permute.xlu0 %1463  ;;  %v1298_v48 = vmax.f32 %v1186_v56, 0.0  ;;  %v1188_v50 = vadd.f32 %v11532_v47, %v1064_v39  ;;  %v16066_v37 = vpack.c.bf16 %v12194_v52, %v12194_v52  ;;  %v2656_v34 = vld [vmem:[#allocation2 + $0x12] sm:$0xff] }
 0x1b1   : > { %1685 = vst.msk [vmem:[#allocation2 + $0xa8] sm:$0xff] %vm559_vm0, %v1613_v33  ;;  %v1614_v61 = vmax.f32 %v11678_v55, %v1464_v5  ;;  %v1299_v53 = vmax.f32 %v1187_v7, 0.0  ;;  %v3647_v6 = vmul.f32 %v12312_v22, %v3583_v58  ;;  %v4574_v36 = vmul.f32 %v12324_v30, %v4510_v12  ;;  %v1728_v7 = vld [vmem:[#allocation2 + $0x18] sm:$0xff] }
 0x1b2   : > { %1505 = vrot.lane.b32.xlu1 %v12077_v21, %s11331_s12  ;;  %v5452_v45 = vld [vmem:[#allocation2 + $0xa0] sm:$0xff]  ;;  %v12365_v56 = vmul.f32 %v12070_v1, %v4927_v46  ;;  %v1300_v55 = vmax.f32 %v1188_v50, 0.0  ;;  %v918_v5 = vpop.f32.mrb[96].mxu0  ;;  %v12367_v39 = vmax.f32 %v1297_v23, %v1298_v48  ;;  %v4575_v52 = vmul.f32 %v12329_v13, %v4511_v25  ;;  %v12373_v12 = vld [vmem:[%s15917_s7 + $0x18] sm:$0xff] }
 0x1b3   : > { %4294 = vrot.lane.b32.xlu0 %v16066_v37, %s11331_s12  ;;  %v5516_v33 = vmul.f32 %v11869_v10, %v5452_v45  ;;  %1686 = vst.msk [vmem:[#allocation2 + $0xb0] sm:$0xff] %vm559_vm0, %v1614_v61  ;;  %v1065_v37 = vmul.f32 %v11508_v42, %v918_v5  ;;  %v920_v1 = vpop.f32.mrb[97].mxu0  ;;  %v10087_v46 = vpack.c.bf16 %v3647_v6, %v3647_v6  ;;  %v12381_v25 = vld [vmem:[%s15917_s7 + $0x80] sm:$0xff] }
 0x1b4   : > { %v10198_v50 = vpack.c.bf16 %v4574_v36, %v4574_v36  ;;  %v16067_v23 = vpack.c.bf16 %v12207_v60, %v12207_v60  ;;  %v1066_v10 = vmul.f32 %v11511_v43, %v920_v1  ;;  %v922_v48 = vpop.f32.mrb[98].mxu0  ;;  %v12388_v61 = vmax.f32 %v1299_v53, %v1300_v55  ;;  %v2657_v55 = vld [vmem:[#allocation2 + $0x1a] sm:$0xff] }
 0x1b5   : > { %v10199_v45 = vpack.c.bf16 %v4575_v52, %v4575_v52  ;;  %v1790_v6 = vmul.f32 %v3583_v58, %v12362_v18  ;;  %v10324_v36 = vpack.c.bf16 %v5516_v33, %v5516_v33  ;;  %v16069_v5 = vpack.c.bf16 %v12216_v4, %v12216_v4  ;;  %v924_v60 = vpop.f32.mrb[99].mxu0  ;;  %3935 = vst.msk [vmem:[#allocation3 + $0x1c] sm:$0xf] %vm2076_vm1, %v10087_v46  ;;  %v12403_v58 = vld [vmem:[%s15917_s7 + $0x88] sm:$0xff]  ;;  %v12412_v46 = vld [vmem:[%s15917_s7 + $0xf0] sm:$0xff] }
 0x1b6   : > { %4296 = vrot.lane.b32.xlu1 %v16067_v23, %s11331_s12  ;;  %16068 = vst [vmem:[#allocation28_spill] sm:$0xff] %v12388_v61  ;;  %v1189_v29 = vadd.f32 %v11514_v44, %v1065_v37  ;;  %v1067_v21 = vmul.f32 %v11508_v42, %v922_v48  ;;  %4862 = vst.msk [vmem:[#allocation3 + $0xc] sm:$0xf] %vm2076_vm1, %v10198_v50  ;;  %v1791_v53 = vmul.f32 %v12373_v12, %v1728_v7  ;;  %v1466_v52 = vpop.permute.xlu1 %1465 }
 0x1b7   : > { %5222 = vrot.lane.b32.xlu0 %v16069_v5, %s11331_s12  ;;  %v1190_v4 = vadd.f32 %v11532_v47, %v1066_v10  ;;  %v1068_v33 = vmul.f32 %v11511_v43, %v924_v60  ;;  %4863 = vst.msk [vmem:[#allocation3 + $0x20] sm:$0xf] %vm2076_vm1, %v10199_v45  ;;  %v9864_v37 = vpack.c.bf16 %v1790_v6, %v1790_v6  ;;  %5804 = vst.msk [vmem:[#allocation3 + $0x128] sm:$0xf] %vm2076_vm1, %v10324_v36  ;;  %v3585_v5 = vld [vmem:[#allocation2 + $0x20] sm:$0xff]  ;;  %v12420_v45 = vld [vmem:[%s15917_s7 + $0xf8] sm:$0xff] }
 0x1b8   : > { %v2720_v1 = vmul.f32 %v12381_v25, %v2656_v34  ;;  %v1615_v50 = vmax.f32 %v11688_v11, %v1466_v52  ;;  %v1301_v23 = vmax.f32 %v1189_v29, 0.0  ;;  %v1191_v48 = vadd.f32 %v11514_v44, %v1067_v21  ;;  %v5453_v34 = vld [vmem:[#allocation2 + $0xa8] sm:$0xff]  ;;  %v1468_v6 = vpop.permute.xlu0 %1467 }
 0x1b9   : > { %v9865_v10 = vpack.c.bf16 %v1791_v53, %v1791_v53  ;;  %v16070_v60 = vpack.c.bf16 %v12223_v20, %v12223_v20  ;;  %v1302_v36 = vmax.f32 %v1190_v4, 0.0  ;;  %v1192_v11 = vadd.f32 %v11532_v47, %v1068_v33  ;;  %2079 = vst.msk [vmem:[#allocation3 + $0x28] sm:$0xf] %vm2076_vm1, %v9864_v37  ;;  %v4512_v33 = vld [vmem:[#allocation2 + $0x1e] sm:$0xff] }
 0x1ba   : > { %v9976_v21 = vpack.c.bf16 %v2720_v1, %v2720_v1  ;;  %v2721_v29 = vmul.f32 %v12403_v58, %v2657_v55  ;;  %v5517_v53 = vmul.f32 %v11915_v31, %v5453_v34  ;;  %1687 = vst.msk [vmem:[#allocation2 + $0xb8] sm:$0xff] %vm559_vm0, %v1615_v50  ;;  %v1616_v52 = vmax.f32 %v11694_v16, %v1468_v6  ;;  %v12441_v55 = vld [vmem:[%s15917_s7 + $0x160] sm:$0xff]  ;;  %v5454_v31 = vld [vmem:[#allocation2 + $0xb0] sm:$0xff]  ;;  %v928_v1 = vpop.f32.mrb[100].mxu0 }
 0x1bb   : > { %5224 = vrot.lane.b32.xlu1 %v16070_v60, %s11331_s12  ;;  %v16071_v61 = vpack.c.bf16 %v12235_v41, %v12235_v41  ;;  %v1303_v20 = vmax.f32 %v1191_v48, 0.0  ;;  %2080 = vst.msk [vmem:[#allocation3 + $0x3c] sm:$0xf] %vm2076_vm1, %v9865_v10  ;;  %v3648_v4 = vmul.f32 %v12412_v46, %v1728_v7  ;;  %v1304_v37 = vmax.f32 %v1192_v11, 0.0  ;;  %v4513_v50 = vld [vmem:[#allocation2 + $0x26] sm:$0xff] }
 0x1bc   : > { %v12443_v16 = vmax.f32 %v1301_v23, %v1302_v36  ;;  %3008 = vst.msk [vmem:[#allocation3 + $0x2c] sm:$0xf] %vm2076_vm1, %v9976_v21  ;;  %v9977_v41 = vpack.c.bf16 %v2721_v29, %v2721_v29  ;;  %v12450_v7 = vld [vmem:[%s15917_s7 + $0x168] sm:$0xff]  ;;  %v10325_v48 = vpack.c.bf16 %v5517_v53, %v5517_v53  ;;  %v5518_v10 = vmul.f32 %v11934_v59, %v5454_v31  ;;  %v930_v23 = vpop.f32.mrb[101].mxu0  ;;  %v12458_v60 = vld [vmem:[%s15917_s7 + $0x20] sm:$0xff] }
 0x1bd   : > { %4298 = vrot.lane.b32.xlu0 %v16071_v61, %s11331_s12  ;;  %v3649_v61 = vmul.f32 %v12420_v45, %v3585_v5  ;;  %1688 = vst.msk [vmem:[#allocation2 + $0xc0] sm:$0xff] %vm559_vm0, %v1616_v52  ;;  %v1069_v34 = vmul.f32 %v11508_v42, %v928_v1  ;;  %v10088_v6 = vpack.c.bf16 %v3648_v4, %v3648_v4  ;;  %v932_v11 = vpop.f32.mrb[102].mxu0 }
 0x1be   : > { %16072 = vst [vmem:[#allocation29_spill] sm:$0xff] %v12443_v16  ;;  %v1070_v36 = vmul.f32 %v11511_v43, %v930_v23  ;;  %v12463_v21 = vmax.f32 %v1303_v20, %v1304_v37  ;;  %3009 = vst.msk [vmem:[#allocation3 + $0x40] sm:$0xf] %vm2076_vm1, %v9977_v41  ;;  %v4576_v29 = vmul.f32 %v12441_v55, %v4512_v33  ;;  %v934_v1 = vpop.f32.mrb[103].mxu0  ;;  %v1730_v37 = vld [vmem:[#allocation2 + $0x28] sm:$0xff]  ;;  %v1470_v41 = vpop.permute.xlu0 %1469 }
 0x1bf   : > { %1509 = vrot.lane.b32.xlu1 %v12137_v57, %s11331_s12  ;;  %v10089_v59 = vpack.c.bf16 %v3649_v61, %v3649_v61  ;;  %5805 = vst.msk [vmem:[#allocation3 + $0x13c] sm:$0xf] %vm2076_vm1, %v10325_v48  ;;  %v10326_v53 = vpack.c.bf16 %v5518_v10, %v5518_v10  ;;  %v16074_v52 = vpack.c.bf16 %v12265_v9, %v12265_v9  ;;  %3936 = vst.msk [vmem:[#allocation3 + $0x30] sm:$0xf] %vm2076_vm1, %v10088_v6  ;;  %v12479_v33 = vld [vmem:[%s15917_s7 + $0x28] sm:$0xff] }
 0x1c0   : > { %16073 = vst [vmem:[#allocation30_spill] sm:$0xff] %v12463_v21  ;;  %v1193_v4 = vadd.f32 %v11514_v44, %v1069_v34  ;;  %v1071_v31 = vmul.f32 %v11508_v42, %v932_v11  ;;  %v4577_v20 = vmul.f32 %v12450_v7, %v4513_v50  ;;  %v1194_v61 = vadd.f32 %v11532_v47, %v1070_v36  ;;  %v2658_v34 = vld [vmem:[#allocation2 + $0x22] sm:$0xff]  ;;  %v12488_v50 = vld [vmem:[%s15917_s7 + $0x90] sm:$0xff] }
 0x1c1   : > { %5226 = vrot.lane.b32.xlu0 %v16074_v52, %s11331_s12  ;;  %v1072_v9 = vmul.f32 %v11511_v43, %v934_v1  ;;  %3937 = vst.msk [vmem:[#allocation3 + $0x44] sm:$0xf] %vm2076_vm1, %v10089_v59  ;;  %v10200_v48 = vpack.c.bf16 %v4576_v29, %v4576_v29  ;;  %v1792_v10 = vmul.f32 %v3585_v5, %v12458_v60  ;;  %5806 = vst.msk [vmem:[#allocation3 + $0x150] sm:$0xf] %vm2076_vm1, %v10326_v53  ;;  %v2659_v52 = vld [vmem:[#allocation2 + $0x2a] sm:$0xff]  ;;  %v12496_v59 = vld [vmem:[%s15917_s7 + $0x98] sm:$0xff]  ;;  %v1472_v29 = vpop.permute.xlu1 %1471 }
 0x1c2   : > { %v1617_v23 = vmax.f32 %v11704_v35, %v1470_v41  ;;  %v1305_v6 = vmax.f32 %v1193_v4, 0.0  ;;  %v1195_v36 = vadd.f32 %v11514_v44, %v1071_v31  ;;  %v10201_v11 = vpack.c.bf16 %v4577_v20, %v4577_v20  ;;  %v5455_v5 = vld [vmem:[#allocation2 + $0xb8] sm:$0xff] }
 0x1c3   : > { %v16075_v1 = vpack.c.bf16 %v12283_v24, %v12283_v24  ;;  %v1306_v53 = vmax.f32 %v1194_v61, 0.0  ;;  %v1196_v35 = vadd.f32 %v11532_v47, %v1072_v9  ;;  %4864 = vst.msk [vmem:[#allocation3 + $0x34] sm:$0xf] %vm2076_vm1, %v10200_v48  ;;  %v9866_v4 = vpack.c.bf16 %v1792_v10, %v1792_v10  ;;  %v12515_v61 = vld [vmem:[%s15917_s7 + $0x100] sm:$0xff] }
 0x1c4   : > { %v1793_v31 = vmul.f32 %v12479_v33, %v1730_v37  ;;  %v5519_v20 = vmul.f32 %v11976_v38, %v5455_v5  ;;  %1689 = vst.msk [vmem:[#allocation2 + $0xc8] sm:$0xff] %vm559_vm0, %v1617_v23  ;;  %v1618_v41 = vmax.f32 %v11713_v49, %v1472_v29  ;;  %v1307_v57 = vmax.f32 %v1195_v36, 0.0  ;;  %v5456_v9 = vld [vmem:[#allocation2 + $0xc0] sm:$0xff]  ;;  %v938_v38 = vpop.f32.mrb[104].mxu0  ;;  %v3587_v36 = vld [vmem:[#allocation2 + $0x30] sm:$0xff] }
 0x1c5   : > { %4300 = vrot.lane.b32.xlu1 %v16075_v1, %s11331_s12  ;;  %1507 = vrot.lane.b32.xlu0 %v12139_v54, %s11331_s12  ;;  %4865 = vst.msk [vmem:[#allocation3 + $0x48] sm:$0xf] %vm2076_vm1, %v10201_v11  ;;  %v2722_v24 = vmul.f32 %v12488_v50, %v2658_v34  ;;  %v1308_v48 = vmax.f32 %v1196_v35, 0.0  ;;  %v12517_v10 = vmax.f32 %v1305_v6, %v1306_v53  ;;  %2081 = vst.msk [vmem:[#allocation3 + $0x50] sm:$0xf] %vm2076_vm1, %v9866_v4  ;;  %v12524_v34 = vld [vmem:[%s15917_s7 + $0x108] sm:$0xff] }
 0x1c6   : > { %v9867_v49 = vpack.c.bf16 %v1793_v31, %v1793_v31  ;;  %v2723_v23 = vmul.f32 %v12496_v59, %v2659_v52  ;;  %v10327_v11 = vpack.c.bf16 %v5519_v20, %v5519_v20  ;;  %v5520_v5 = vmul.f32 %v11993_v40, %v5456_v9  ;;  %1690 = vst.msk [vmem:[#allocation2 + $0xe0] sm:$0xff] %vm559_vm0, %v1618_v41  ;;  %v940_v6 = vpop.f32.mrb[105].mxu0  ;;  %v4514_v53 = vld [vmem:[#allocation2 + $0x2e] sm:$0xff] }
 0x1c7   : > { %16076 = vst [vmem:[#allocation31_spill] sm:$0xff] %v12517_v10  ;;  %v1073_v29 = vmul.f32 %v11508_v42, %v938_v38  ;;  %v9978_v1 = vpack.c.bf16 %v2722_v24, %v2722_v24  ;;  %v12532_v52 = vld [vmem:[%s15917_s7 + $0x170] sm:$0xff]  ;;  %v16077_v35 = vpack.c.bf16 %v12286_v14, %v12286_v14  ;;  %v1074_v4 = vmul.f32 %v11511_v43, %v940_v6  ;;  %v942_v40 = vpop.f32.mrb[106].mxu0 }
 0x1c8   : > { %v12539_v31 = vmax.f32 %v1307_v57, %v1308_v48  ;;  %2082 = vst.msk [vmem:[#allocation3 + $0x64] sm:$0xf] %vm2076_vm1, %v9867_v49  ;;  %v9979_v20 = vpack.c.bf16 %v2723_v23, %v2723_v23  ;;  %v3650_v41 = vmul.f32 %v12515_v61, %v1730_v37  ;;  %5807 = vst.msk [vmem:[#allocation3 + $0x164] sm:$0xf] %vm2076_vm1, %v10327_v11  ;;  %v944_v38 = vpop.f32.mrb[107].mxu0  ;;  %v4515_v48 = vld [vmem:[#allocation2 + $0x36] sm:$0xff]  ;;  %v1474_v49 = vpop.permute.xlu1 %1473 }
 0x1c9   : > { %5228 = vrot.lane.b32.xlu1 %v16077_v35, %s11331_s12  ;;  %v10328_v24 = vpack.c.bf16 %v5520_v5, %v5520_v5  ;;  %1511 = vrot.lane.b32.xlu0 %v12154_v27, %s11331_s12  ;;  %v1197_v9 = vadd.f32 %v11514_v44, %v1073_v29  ;;  %v1075_v14 = vmul.f32 %v11508_v42, %v942_v40  ;;  %v12553_v37 = vld [vmem:[%s15917_s7 + $0x178] sm:$0xff]  ;;  %v1476_v27 = vpop.permute.xlu0 %1475 }
 0x1ca   : > { %16078 = vst [vmem:[#allocation32_spill] sm:$0xff] %v12539_v31  ;;  %3010 = vst.msk [vmem:[#allocation3 + $0x54] sm:$0xf] %vm2076_vm1, %v9978_v1  ;;  %v3651_v57 = vmul.f32 %v12524_v34, %v3587_v36  ;;  %v1198_v23 = vadd.f32 %v11532_v47, %v1074_v4  ;;  %v1076_v11 = vmul.f32 %v11511_v43, %v944_v38 }
 0x1cb   : > { %3011 = vst.msk [vmem:[#allocation3 + $0x68] sm:$0xf] %vm2076_vm1, %v9979_v20  ;;  %v10090_v5 = vpack.c.bf16 %v3650_v41, %v3650_v41  ;;  %v4578_v29 = vmul.f32 %v12532_v52, %v4514_v53  ;;  %5808 = vst.msk [vmem:[#allocation3 + $0x178] sm:$0xf] %vm2076_vm1, %v10328_v24  ;;  %v1619_v36 = vmax.f32 %v11729_v8, %v1474_v49  ;;  %v1309_v6 = vmax.f32 %v1197_v9, 0.0  ;;  %v5457_v40 = vld [vmem:[#allocation2 + $0xc8] sm:$0xff] }
 0x1cc   : > { %v1199_v1 = vadd.f32 %v11514_v44, %v1075_v14  ;;  %v10091_v35 = vpack.c.bf16 %v3651_v57, %v3651_v57  ;;  %v1310_v4 = vmax.f32 %v1198_v23, 0.0  ;;  %v1200_v38 = vadd.f32 %v11532_v47, %v1076_v11  ;;  %v4000_v57 = vld [vmem:[#allocation2 + $0x69] sm:$0xff] }
 0x1cd   : > { %1513 = vrot.lane.b32.xlu1 %v12218_v0, %s11331_s12  ;;  %3938 = vst.msk [vmem:[#allocation3 + $0x58] sm:$0xf] %vm2076_vm1, %v10090_v5  ;;  %v10202_v20 = vpack.c.bf16 %v4578_v29, %v4578_v29  ;;  %v4579_v53 = vmul.f32 %v12553_v37, %v4515_v48  ;;  %v5521_v41 = vmul.f32 %v12035_v2, %v5457_v40  ;;  %v948_v2 = vpop.f32.mrb[108].mxu0  ;;  %v4928_v11 = vld [vmem:[#allocation2 + $0x6f] sm:$0xff] }
 0x1ce   : > { %1691 = vst.msk [vmem:[#allocation2 + $0xe8] sm:$0xff] %vm559_vm0, %v1619_v36  ;;  %v1620_v8 = vmax.f32 %v11739_v15, %v1476_v27  ;;  %v16079_v24 = vpack.c.bf16 %v12303_v28, %v12303_v28  ;;  %v1311_v9 = vmax.f32 %v1199_v1, 0.0  ;;  %v10151_v14 = vpack.c.bf16 %v12348_v19, %v12348_v19  ;;  %v3588_v15 = vld [vmem:[#allocation2 + $0x38] sm:$0xff]  ;;  %v12583_v27 = vld [vmem:[%s15917_s7 + $0x110] sm:$0xff]  ;;  %v950_v29 = vpop.f32.mrb[109].mxu0 }
 0x1cf   : > { %3939 = vst.msk [vmem:[#allocation3 + $0x6c] sm:$0xf] %vm2076_vm1, %v10091_v35  ;;  %v1312_v49 = vmax.f32 %v1200_v38, 0.0  ;;  %v12577_v48 = vmax.f32 %v1309_v6, %v1310_v4  ;;  %4866 = vst.msk [vmem:[#allocation3 + $0x5c] sm:$0xf] %vm2076_vm1, %v10202_v20  ;;  %v10203_v23 = vpack.c.bf16 %v4579_v53, %v4579_v53  ;;  %v10329_v28 = vpack.c.bf16 %v5521_v41, %v5521_v41  ;;  %v4516_v36 = vld [vmem:[#allocation2 + $0x3e] sm:$0xff] }
 0x1d0   : > { %4302 = vrot.lane.b32.xlu0 %v16079_v24, %s11331_s12  ;;  %1692 = vst.msk [vmem:[#allocation2 + $0xf0] sm:$0xff] %vm559_vm0, %v1620_v8  ;;  %v10262_v19 = vpack.c.bf16 %v12340_v63, %v12340_v63  ;;  %v1077_v5 = vmul.f32 %v11508_v42, %v948_v2  ;;  %v12592_v6 = vld [vmem:[%s15917_s7 + $0x180] sm:$0xff]  ;;  %v10263_v1 = vpack.c.bf16 %v12365_v56, %v12365_v56  ;;  %v952_v63 = vpop.f32.mrb[110].mxu0  ;;  %v16082_v4 = vld [vmem:[#allocation17_spill] sm:$0xff]  ;;  %v3589_v8 = vld [vmem:[#allocation2 + $0x50] sm:$0xff]  ;;  %v1478_v24 = vpop.permute.xlu1 %1477 }
 0x1d1   : > { %16080 = vst [vmem:[#allocation33_spill] sm:$0xff] %v12577_v48  ;;  %4304 = vrot.lane.b32.xlu1 %v10151_v14, %s11331_s12  ;;  %v12597_v35 = vmax.f32 %v1311_v9, %v1312_v49  ;;  %v1078_v40 = vmul.f32 %v11511_v43, %v950_v29  ;;  %4867 = vst.msk [vmem:[#allocation3 + $0x70] sm:$0xf] %vm2076_vm1, %v10203_v23  ;;  %v4064_v38 = vmul.f32 %v16082_v4, %v4000_v57  ;;  %v954_v41 = vpop.f32.mrb[111].mxu0  ;;  %v4001_v9 = vld [vmem:[#allocation2 + $0x71] sm:$0xff]  ;;  %v16083_v14 = vld [vmem:[#allocation20_spill] sm:$0xff] }
 0x1d2   : > { %5809 = vst.msk [vmem:[#allocation3 + $0x18c] sm:$0xf] %vm2076_vm1, %v10329_v28  ;;  %v1201_v20 = vadd.f32 %v11514_v44, %v1077_v5  ;;  %v1079_v53 = vmul.f32 %v11508_v42, %v952_v63  ;;  %v3652_v56 = vmul.f32 %v12583_v27, %v3588_v15  ;;  %v12608_v49 = vmul.f32 %v16083_v14, %v4928_v11  ;;  %v16084_v57 = vld [vmem:[#allocation4_spill] sm:$0xff]  ;;  %v1480_v15 = vpop.permute.xlu0 %1479 }
 0x1d3   : > { %16081 = vst [vmem:[#allocation34_spill] sm:$0xff] %v12597_v35  ;;  %v1202_v2 = vadd.f32 %v11532_v47, %v1078_v40  ;;  %v1080_v23 = vmul.f32 %v11511_v43, %v954_v41  ;;  %v4580_v28 = vmul.f32 %v12592_v6, %v4516_v36  ;;  %v3653_v40 = vmul.f32 %v12255_v26, %v3589_v8  ;;  %v12621_v43 = vld [vmem:[%s15917_s7 + $0x1c0] sm:$0xff]  ;;  %v4517_v26 = vld [vmem:[#allocation2 + $0x56] sm:$0xff] }
 0x1d4   : > { %5230 = vrot.lane.b32.xlu0 %v10262_v19, %s11331_s12  ;;  %v1621_v19 = vmax.f32 %v16084_v57, %v1478_v24  ;;  %v1313_v5 = vmax.f32 %v1201_v20, 0.0  ;;  %v1203_v42 = vadd.f32 %v11514_v44, %v1079_v53  ;;  %v10092_v29 = vpack.c.bf16 %v3652_v56, %v3652_v56  ;;  %v16085_v44 = vld [vmem:[#allocation5_spill] sm:$0xff] }
 0x1d5   : > { %v5459_v63 = vld [vmem:[#allocation2 + $0xe8] sm:$0xff]  ;;  %5232 = vrot.lane.b32.xlu1 %v10263_v1, %s11331_s12  ;;  %v1314_v4 = vmax.f32 %v1202_v2, 0.0  ;;  %v1204_v11 = vadd.f32 %v11532_v47, %v1080_v23  ;;  %v10204_v14 = vpack.c.bf16 %v4580_v28, %v4580_v28  ;;  %v1622_v20 = vmax.f32 %v16085_v44, %v1480_v15  ;;  %v16086_v1 = vld [vmem:[#allocation23_spill] sm:$0xff]  ;;  %v3591_v28 = vld [vmem:[#allocation2 + $0x60] sm:$0xff] }
 0x1d6   : > { %v5523_v36 = vmul.f32 %v12621_v43, %v5459_v63  ;;  %1693 = vst.msk [vmem:[#allocation2 + $0xf8] sm:$0xff] %vm559_vm0, %v1621_v19  ;;  %v4065_v53 = vmul.f32 %v16086_v1, %v4001_v9  ;;  %v4929_v47 = vld [vmem:[#allocation2 + $0x77] sm:$0xff]  ;;  %v1315_v41 = vmax.f32 %v1203_v42, 0.0  ;;  %v10093_v2 = vpack.c.bf16 %v3653_v40, %v3653_v40  ;;  %v12636_v19 = vld [vmem:[%s15917_s7 + $0x1c8] sm:$0xff] }
 0x1d7   : > { %3940 = vst.msk [vmem:[#allocation3 + $0x80] sm:$0xf] %vm2076_vm1, %v10092_v29  ;;  %v5460_v56 = vld [vmem:[#allocation2 + $0xf0] sm:$0xff]  ;;  %v12630_v8 = vmax.f32 %v1313_v5, %v1314_v4  ;;  %v1316_v24 = vmax.f32 %v1204_v11, 0.0  ;;  %4868 = vst.msk [vmem:[#allocation3 + $0x84] sm:$0xf] %vm2076_vm1, %v10204_v14  ;;  %v10152_v42 = vpack.c.bf16 %v4064_v38, %v4064_v38  ;;  %v10264_v15 = vpack.c.bf16 %v12608_v49, %v12608_v49 }
 0x1d8   : > { %1515 = vrot.lane.b32.xlu0 %v12243_v3, %s11331_s12  ;;  %v3590_v23 = vld [vmem:[#allocation2 + $0x58] sm:$0xff]  ;;  %v10331_v57 = vpack.c.bf16 %v5523_v36, %v5523_v36  ;;  %v5524_v9 = vmul.f32 %v12636_v19, %v5460_v56  ;;  %1694 = vst.msk [vmem:[#allocation2 + $0x100] sm:$0xff] %vm559_vm0, %v1622_v20  ;;  %v4003_v29 = vld [vmem:[#allocation2 + $0x81] sm:$0xff]  ;;  %v4581_v40 = vmul.f32 %v12324_v30, %v4517_v26  ;;  %v3593_v49 = vld [vmem:[#allocation2 + $0x70] sm:$0xff] }
 0x1d9   : > { %16087 = vst [vmem:[#allocation17_spill] sm:$0xff] %v12630_v8  ;;  %v4518_v5 = vld [vmem:[#allocation2 + $0x5e] sm:$0xff]  ;;  %v4519_v63 = vld [vmem:[#allocation2 + $0x66] sm:$0xff]  ;;  %1517 = vrot.lane.b32.xlu1 %v12288_v32, %s11331_s12  ;;  %v12645_v14 = vmax.f32 %v1315_v41, %v1316_v24  ;;  %3941 = vst.msk [vmem:[#allocation3 + $0x94] sm:$0xf] %vm2076_vm1, %v10093_v2  ;;  %v10153_v44 = vpack.c.bf16 %v4065_v53, %v4065_v53  ;;  %v3654_v20 = vmul.f32 %v12312_v22, %v3590_v23 }
 0x1da   : > { %v16088_v4 = vld [vmem:[#allocation25_spill] sm:$0xff]  ;;  %5811 = vst.msk [vmem:[#allocation3 + $0x1b4] sm:$0xf] %vm2076_vm1, %v10331_v57  ;;  %v10332_v38 = vpack.c.bf16 %v5524_v9, %v5524_v9  ;;  %v3655_v1 = vmul.f32 %v12412_v46, %v3591_v28  ;;  %v16090_v41 = vld [vmem:[#allocation27_spill] sm:$0xff]  ;;  %v4582_v30 = vmul.f32 %v12329_v13, %v4518_v5  ;;  %v4583_v26 = vmul.f32 %v12441_v55, %v4519_v63  ;;  %v16091_v57 = vld [vmem:[#allocation6_spill] sm:$0xff] }
 0x1db   : > { %v4993_v11 = vmul.f32 %v16088_v4, %v4929_v47  ;;  %16089 = vst [vmem:[#allocation20_spill] sm:$0xff] %v12645_v14  ;;  %v3592_v36 = vld [vmem:[#allocation2 + $0x68] sm:$0xff]  ;;  %v1482_v47 = vpop.permute.xlu1 %1481  ;;  %v12654_v24 = vmul.f32 %v16090_v41, %v4003_v29  ;;  %v4002_v2 = vld [vmem:[#allocation2 + $0x79] sm:$0xff]  ;;  %v10205_v4 = vpack.c.bf16 %v4581_v40, %v4581_v40  ;;  %v10094_v9 = vpack.c.bf16 %v3654_v20, %v3654_v20  ;;  %v12668_v5 = vld [vmem:[%s15917_s7 + $0x1d0] sm:$0xff] }
 0x1dc   : > { %4306 = vrot.lane.b32.xlu0 %v10152_v42, %s11331_s12  ;;  %v4520_v56 = vld [vmem:[#allocation2 + $0x6e] sm:$0xff]  ;;  %5812 = vst.msk [vmem:[#allocation3 + $0x1c8] sm:$0xf] %vm2076_vm1, %v10332_v38  ;;  %v1623_v53 = vmax.f32 %v16091_v57, %v1482_v47  ;;  %v10095_v22 = vpack.c.bf16 %v3655_v1, %v3655_v1  ;;  %v3656_v46 = vmul.f32 %v12420_v45, %v3592_v36  ;;  %v4521_v23 = vld [vmem:[#allocation2 + $0x76] sm:$0xff]  ;;  %v1484_v42 = vpop.permute.xlu0 %1483  ;;  %v4523_v41 = vld [vmem:[#allocation2 + $0x86] sm:$0xff] }
 0x1dd   : > { %v5461_v28 = vld [vmem:[#allocation2 + $0xf8] sm:$0xff]  ;;  %4308 = vrot.lane.b32.xlu1 %v10153_v44, %s11331_s12  ;;  %4869 = vst.msk [vmem:[#allocation3 + $0x98] sm:$0xf] %vm2076_vm1, %v10205_v4  ;;  %v10206_v29 = vpack.c.bf16 %v4582_v30, %v4582_v30  ;;  %v10207_v40 = vpack.c.bf16 %v4583_v26, %v4583_v26  ;;  %v3657_v13 = vmul.f32 %v12515_v61, %v3593_v49  ;;  %v16093_v44 = vld [vmem:[#allocation24_spill] sm:$0xff]  ;;  %3942 = vst.msk [vmem:[#allocation3 + $0xa8] sm:$0xf] %vm2076_vm1, %v10094_v9 }
 0x1de   : > { %v4584_v55 = vmul.f32 %v12450_v7, %v4520_v56  ;;  %v5525_v45 = vmul.f32 %v12668_v5, %v5461_v28  ;;  %1695 = vst.msk [vmem:[#allocation2 + $0x108] sm:$0xff] %vm559_vm0, %v1623_v53  ;;  %v16092_v63 = vld [vmem:[#allocation7_spill] sm:$0xff]  ;;  %v10265_v38 = vpack.c.bf16 %v4993_v11, %v4993_v11  ;;  %v12675_v20 = vmul.f32 %v16093_v44, %v4002_v2  ;;  %v4931_v61 = vld [vmem:[#allocation2 + $0x87] sm:$0xff] }
 0x1df   : > { %v1624_v36 = vmax.f32 %v16092_v63, %v1484_v42  ;;  %3943 = vst.msk [vmem:[#allocation3 + $0xbc] sm:$0xf] %vm2076_vm1, %v10095_v22  ;;  %v3595_v7 = vld [vmem:[#allocation2 + $0x80] sm:$0xff]  ;;  %4870 = vst.msk [vmem:[#allocation3 + $0xac] sm:$0xf] %vm2076_vm1, %v10206_v29  ;;  %v10096_v49 = vpack.c.bf16 %v3656_v46, %v3656_v46  ;;  %v10097_v56 = vpack.c.bf16 %v3657_v13, %v3657_v13  ;;  %v3594_v11 = vld [vmem:[#allocation2 + $0x78] sm:$0xff]  ;;  %v1486_v13 = vpop.permute.xlu1 %1485 }
 0x1e0   : > { %5234 = vrot.lane.b32.xlu0 %v10264_v15, %s11331_s12  ;;  %v5462_v1 = vld [vmem:[#allocation2 + $0x100] sm:$0xff]  ;;  %4871 = vst.msk [vmem:[#allocation3 + $0xc0] sm:$0xf] %vm2076_vm1, %v10207_v40  ;;  %v10208_v47 = vpack.c.bf16 %v4584_v55, %v4584_v55  ;;  %v4585_v15 = vmul.f32 %v12532_v52, %v4521_v23  ;;  %v10333_v2 = vpack.c.bf16 %v5525_v45, %v5525_v45  ;;  %v12685_v4 = vld [vmem:[%s15917_s7 + $0x1d8] sm:$0xff]  ;;  %v12709_v29 = vld [vmem:[%s15917_s7 + $0x30] sm:$0xff] }
 0x1e1   : > { %v5526_v30 = vmul.f32 %v12685_v4, %v5462_v1  ;;  %1696 = vst.msk [vmem:[#allocation2 + $0x110] sm:$0xff] %vm559_vm0, %v1624_v36  ;;  %v4930_v26 = vld [vmem:[#allocation2 + $0x7f] sm:$0xff]  ;;  %5236 = vrot.lane.b32.xlu1 %v10265_v38, %s11331_s12  ;;  %v10155_v52 = vpack.c.bf16 %v12654_v24, %v12654_v24  ;;  %v12693_v9 = vmul.f32 %v12240_v62, %v4931_v61  ;;  %v16094_v55 = vld [vmem:[#allocation26_spill] sm:$0xff]  ;;  %v1748_v1 = vld [vmem:[#allocation2 + $0xe8] sm:$0xff] }
 0x1e2   : > { %v4522_v57 = vld [vmem:[#allocation2 + $0x7e] sm:$0xff]  ;;  %3944 = vst.msk [vmem:[#allocation3 + $0xd0] sm:$0xf] %vm2076_vm1, %v10096_v49  ;;  %3945 = vst.msk [vmem:[#allocation3 + $0xe4] sm:$0xf] %vm2076_vm1, %v10097_v56  ;;  %v10209_v22 = vpack.c.bf16 %v4585_v15, %v4585_v15  ;;  %v3659_v46 = vmul.f32 %v12583_v27, %v3595_v7  ;;  %v10154_v62 = vpack.c.bf16 %v12675_v20, %v12675_v20  ;;  %v1488_v56 = vpop.permute.xlu0 %1487  ;;  %v12728_v15 = vld [vmem:[%s15917_s7 + $0x70] sm:$0xff] }
 0x1e3   : > { %v1745_v53 = vld [vmem:[#allocation2 + $0xc0] sm:$0xff]  ;;  %4872 = vst.msk [vmem:[#allocation3 + $0xd4] sm:$0xf] %vm2076_vm1, %v10208_v47  ;;  %5813 = vst.msk [vmem:[#allocation3 + $0x1dc] sm:$0xf] %vm2076_vm1, %v10333_v2  ;;  %v10334_v28 = vpack.c.bf16 %v5526_v30, %v5526_v30  ;;  %v3658_v24 = vmul.f32 %v12524_v34, %v3594_v11  ;;  %v4587_v42 = vmul.f32 %v12592_v6, %v4523_v41  ;;  %v12734_v41 = vld [vmem:[%s15917_s7 + $0x8] sm:$0xff] }
 0x1e4   : > { %v2674_v23 = vld [vmem:[#allocation2 + $0xc2] sm:$0xff]  ;;  %1519 = vrot.lane.b32.xlu0 %v12306_v51, %s11331_s12  ;;  %v2675_v27 = vld [vmem:[#allocation2 + $0xda] sm:$0xff]  ;;  %v4994_v45 = vmul.f32 %v16094_v55, %v4930_v26  ;;  %4873 = vst.msk [vmem:[#allocation3 + $0xe8] sm:$0xf] %vm2076_vm1, %v10209_v22  ;;  %v10099_v63 = vpack.c.bf16 %v3659_v46, %v3659_v46  ;;  %v4586_v36 = vmul.f32 %v12553_v37, %v4522_v57 }
 0x1e5   : > { %v1747_v40 = vld [vmem:[#allocation2 + $0xe0] sm:$0xff]  ;;  %v1808_v38 = vmul.f32 %v12709_v29, %v1745_v53  ;;  %5814 = vst.msk [vmem:[#allocation3 + $0x1f0] sm:$0xf] %vm2076_vm1, %v10334_v28  ;;  %v10098_v20 = vpack.c.bf16 %v3658_v24, %v3658_v24  ;;  %v10211_v61 = vpack.c.bf16 %v4587_v42, %v4587_v42  ;;  %v5463_v49 = vld [vmem:[#allocation2 + $0x108] sm:$0xff]  ;;  %4312 = vrot.lane.b32.xlu1 %v10155_v52, %s11331_s12 }
 0x1e6   : > { %v12718_v34 = vld [vmem:[%s15917_s7 + $0xa0] sm:$0xff]  ;;  %3947 = vst.msk [vmem:[#allocation3 + $0x10c] sm:$0xf] %vm2076_vm1, %v10099_v63  ;;  %v10210_v37 = vpack.c.bf16 %v4586_v36, %v4586_v36  ;;  %v2739_v11 = vmul.f32 %v12728_v15, %v2675_v27  ;;  %v1810_v2 = vmul.f32 %v12734_v41, %v1747_v40  ;;  %v16096_v57 = vld [vmem:[#allocation9_spill] sm:$0xff]  ;;  %v10267_v52 = vpack.c.bf16 %v12693_v9, %v12693_v9  ;;  %v1750_v63 = vld [vmem:[#allocation2 + $0xf8] sm:$0xff] }
 0x1e7   : > { %v16095_v6 = vld [vmem:[#allocation8_spill] sm:$0xff]  ;;  %v2738_v7 = vmul.f32 %v12718_v34, %v2674_v23  ;;  %v9882_v47 = vpack.c.bf16 %v1808_v38, %v1808_v38  ;;  %v1626_v53 = vmax.f32 %v16096_v57, %v1488_v56  ;;  %3946 = vst.msk [vmem:[#allocation3 + $0xf8] sm:$0xf] %vm2076_vm1, %v10098_v20  ;;  %4875 = vst.msk [vmem:[#allocation3 + $0x110] sm:$0xf] %vm2076_vm1, %v10211_v61  ;;  %v2677_v27 = vld [vmem:[#allocation2 + $0xea] sm:$0xff] }
 0x1e8   : > { %v1625_v44 = vmax.f32 %v16095_v6, %v1486_v13  ;;  %v12740_v30 = vld [vmem:[%s15917_s7 + $0x1e0] sm:$0xff]  ;;  %4310 = vrot.lane.b32.xlu0 %v10154_v62, %s11331_s12  ;;  %v5464_v46 = vld [vmem:[#allocation2 + $0x110] sm:$0xff]  ;;  %4874 = vst.msk [vmem:[#allocation3 + $0xfc] sm:$0xf] %vm2076_vm1, %v10210_v37  ;;  %v9995_v28 = vpack.c.bf16 %v2739_v11, %v2739_v11  ;;  %v9884_v24 = vpack.c.bf16 %v1810_v2, %v1810_v2  ;;  %v12756_v9 = vld [vmem:[%s15917_s7 + $0x1e8] sm:$0xff] }
 0x1e9   : > { %v5527_v26 = vmul.f32 %v12740_v30, %v5463_v49  ;;  %v2676_v22 = vld [vmem:[#allocation2 + $0xe2] sm:$0xff]  ;;  %2097 = vst.msk [vmem:[#allocation3 + $0x190] sm:$0xf] %vm2076_vm1, %v9882_v47  ;;  %v9994_v23 = vpack.c.bf16 %v2738_v7, %v2738_v7  ;;  %v1811_v42 = vmul.f32 %v12362_v18, %v1748_v1  ;;  %v1749_v62 = vld [vmem:[#allocation2 + $0xf0] sm:$0xff]  ;;  %v5528_v13 = vmul.f32 %v12756_v9, %v5464_v46  ;;  %v1490_v49 = vpop.permute.xlu1 %1489 }
 0x1ea   : > { %1697 = vst.msk [vmem:[#allocation2 + $0x128] sm:$0xff] %vm559_vm0, %v1625_v44  ;;  %1698 = vst.msk [vmem:[#allocation2 + $0x130] sm:$0xff] %vm559_vm0, %v1626_v53  ;;  %v10266_v55 = vpack.c.bf16 %v4994_v45, %v4994_v45  ;;  %v2678_v36 = vld [vmem:[#allocation2 + $0xf2] sm:$0xff]  ;;  %5240 = vrot.lane.b32.xlu1 %v10267_v52, %s11331_s12  ;;  %v2740_v6 = vmul.f32 %v12229_v17, %v2676_v22  ;;  %v2679_v44 = vld [vmem:[#allocation2 + $0xfa] sm:$0xff]  ;;  %v2741_v45 = vmul.f32 %v12381_v25, %v2677_v27  ;;  %v1492_v22 = vpop.permute.xlu0 %1491 }
 0x1eb   : > { %v10335_v40 = vpack.c.bf16 %v5527_v26, %v5527_v26  ;;  %3026 = vst.msk [vmem:[#allocation3 + $0x194] sm:$0xf] %vm2076_vm1, %v9994_v23  ;;  %3027 = vst.msk [vmem:[#allocation3 + $0x1a8] sm:$0xf] %vm2076_vm1, %v9995_v28  ;;  %v9885_v38 = vpack.c.bf16 %v1811_v42, %v1811_v42  ;;  %v10336_v20 = vpack.c.bf16 %v5528_v13, %v5528_v13  ;;  %v1751_v7 = vld [vmem:[#allocation2 + $0x100] sm:$0xff]  ;;  %v1752_v1 = vld [vmem:[#allocation2 + $0x108] sm:$0xff] }
 0x1ec   : > { %2099 = vst.msk [vmem:[#allocation3 + $0x1b8] sm:$0xf] %vm2076_vm1, %v9884_v24  ;;  %5238 = vrot.lane.b32.xlu0 %v10266_v55, %s11331_s12  ;;  %v1812_v61 = vmul.f32 %v12373_v12, %v1749_v62  ;;  %v9996_v56 = vpack.c.bf16 %v2740_v6, %v2740_v6  ;;  %v1813_v37 = vmul.f32 %v12458_v60, %v1750_v63  ;;  %v16097_v47 = vld [vmem:[#allocation10_spill] sm:$0xff]  ;;  %v2680_v53 = vld [vmem:[#allocation2 + $0x102] sm:$0xff]  ;;  %v16098_v42 = vld [vmem:[#allocation11_spill] sm:$0xff] }
 0x1ed   : > { %5815 = vst.msk [vmem:[#allocation3 + $0x204] sm:$0xf] %vm2076_vm1, %v10335_v40  ;;  %2100 = vst.msk [vmem:[#allocation3 + $0x1cc] sm:$0xf] %vm2076_vm1, %v9885_v38  ;;  %v2742_v17 = vmul.f32 %v12403_v58, %v2678_v36  ;;  %v1627_v11 = vmax.f32 %v16097_v47, %v1490_v49  ;;  %v9997_v2 = vpack.c.bf16 %v2741_v45, %v2741_v45  ;;  %v2681_v52 = vld [vmem:[#allocation2 + $0x10a] sm:$0xff]  ;;  %v16099_v62 = vld [vmem:[#allocation28_spill] sm:$0xff] }
 0x1ee   : > { %5816 = vst.msk [vmem:[#allocation3 + $0x218] sm:$0xf] %vm2076_vm1, %v10336_v20  ;;  %v9886_v26 = vpack.c.bf16 %v1812_v61, %v1812_v61  ;;  %v2743_v57 = vmul.f32 %v12488_v50, %v2679_v44  ;;  %1521 = vrot.lane.b32.xlu1 %v12367_v39, %s11331_s12  ;;  %3028 = vst.msk [vmem:[#allocation3 + $0x1bc] sm:$0xf] %vm2076_vm1, %v9996_v56  ;;  %v9887_v46 = vpack.c.bf16 %v1813_v37, %v1813_v37 }
 0x1ef   : > { %v9998_v23 = vpack.c.bf16 %v2742_v17, %v2742_v17  ;;  %v1814_v28 = vmul.f32 %v12479_v33, %v1751_v7  ;;  %v1815_v24 = vmul.f32 %v12709_v29, %v1752_v1  ;;  %1699 = vst.msk [vmem:[#allocation2 + $0x138] sm:$0xff] %vm559_vm0, %v1627_v11  ;;  %v1628_v27 = vmax.f32 %v16098_v42, %v1492_v22  ;;  %v1494_v17 = vpop.permute.xlu1 %1493  ;;  %v12806_v11 = vld [vmem:[%s15917_s7 + $0x78] sm:$0xff] }
 0x1f0   : > { %1523 = vrot.lane.b32.xlu0 %v16099_v62, %s11331_s12  ;;  %3029 = vst.msk [vmem:[#allocation3 + $0x1d0] sm:$0xf] %vm2076_vm1, %v9997_v2  ;;  %2101 = vst.msk [vmem:[#allocation3 + $0x1e0] sm:$0xf] %vm2076_vm1, %v9886_v26  ;;  %v9999_v40 = vpack.c.bf16 %v2743_v57, %v2743_v57  ;;  %v2744_v38 = vmul.f32 %v12496_v59, %v2680_v53  ;;  %v2745_v6 = vmul.f32 %v12718_v34, %v2681_v52  ;;  %v16100_v26 = vld [vmem:[#allocation12_spill] sm:$0xff]  ;;  %v2430_v53 = vpop.permute.xlu0 %2429 }
 0x1f1   : > { %v1754_v13 = vld [vmem:[#allocation2 + $0x128] sm:$0xff]  ;;  %v5466_v55 = vld [vmem:[#allocation2 + $0x130] sm:$0xff]  ;;  %2102 = vst.msk [vmem:[#allocation3 + $0x1f4] sm:$0xf] %vm2076_vm1, %v9887_v46  ;;  %3030 = vst.msk [vmem:[#allocation3 + $0x1e4] sm:$0xf] %vm2076_vm1, %v9998_v23  ;;  %v9888_v63 = vpack.c.bf16 %v1814_v28, %v1814_v28  ;;  %v9889_v36 = vpack.c.bf16 %v1815_v24, %v1815_v24  ;;  %v1629_v57 = vmax.f32 %v16100_v26, %v1494_v17 }
 0x1f2   : > { %v2682_v44 = vld [vmem:[#allocation2 + $0x122] sm:$0xff]  ;;  %v5530_v20 = vmul.f32 %v12621_v43, %v5466_v55  ;;  %1700 = vst.msk [vmem:[#allocation2 + $0x140] sm:$0xff] %vm559_vm0, %v1628_v27  ;;  %v2683_v45 = vld [vmem:[#allocation2 + $0x12a] sm:$0xff]  ;;  %1525 = vrot.lane.b32.xlu1 %v12443_v16, %s11331_s12  ;;  %v10000_v61 = vpack.c.bf16 %v2744_v38, %v2744_v38  ;;  %v10001_v7 = vpack.c.bf16 %v2745_v6, %v2745_v6  ;;  %v2154_v23 = vld [vmem:[#allocation2 + $0xd9] sm:$0xff] }
 0x1f3   : > { %3031 = vst.msk [vmem:[#allocation3 + $0x1f8] sm:$0xf] %vm2076_vm1, %v9999_v40  ;;  %2103 = vst.msk [vmem:[#allocation3 + $0x208] sm:$0xf] %vm2076_vm1, %v9888_v63  ;;  %v1817_v1 = vmul.f32 %v12734_v41, %v1754_v13  ;;  %v2746_v56 = vmul.f32 %v12728_v15, %v2682_v44  ;;  %v1755_v37 = vld [vmem:[#allocation2 + $0x130] sm:$0xff]  ;;  %v2747_v2 = vmul.f32 %v12806_v11, %v2683_v45  ;;  %v2153_v52 = vld [vmem:[#allocation2 + $0xc1] sm:$0xff]  ;;  %v2432_v55 = vpop.permute.xlu1 %2431 }
 0x1f4   : > { %2104 = vst.msk [vmem:[#allocation3 + $0x21c] sm:$0xf] %vm2076_vm1, %v9889_v36  ;;  %v10338_v49 = vpack.c.bf16 %v5530_v20, %v5530_v20  ;;  %1527 = vrot.lane.b32.xlu0 %v12463_v21, %s11331_s12  ;;  %3032 = vst.msk [vmem:[#allocation3 + $0x20c] sm:$0xf] %vm2076_vm1, %v10000_v61  ;;  %v1818_v24 = vmul.f32 %v12362_v18, %v1755_v37  ;;  %v12823_v27 = vld [vmem:[%s15917_s7 + $0x68] sm:$0xff]  ;;  %v3359_v44 = vpop.permute.xlu0 %3358  ;;  %v12834_v20 = vld [vmem:[%s15917_s7 + $0x38] sm:$0xff] }
 0x1f5   : > { %3033 = vst.msk [vmem:[#allocation3 + $0x220] sm:$0xf] %vm2076_vm1, %v10001_v7  ;;  %v9891_v47 = vpack.c.bf16 %v1817_v1, %v1817_v1  ;;  %v10002_v22 = vpack.c.bf16 %v2746_v56, %v2746_v56  ;;  %v10003_v28 = vpack.c.bf16 %v2747_v2, %v2747_v2  ;;  %v2217_v63 = vmul.f32 %v12823_v27, %v2153_v52  ;;  %v3082_v61 = vld [vmem:[#allocation2 + $0xc7] sm:$0xff]  ;;  %v12847_v56 = vld [vmem:[%s15917_s7 + $0xd8] sm:$0xff] }
 0x1f6   : > { %5818 = vst.msk [vmem:[#allocation3 + $0x240] sm:$0xf] %vm2076_vm1, %v10338_v49  ;;  %v5467_v46 = vld [vmem:[#allocation2 + $0x138] sm:$0xff]  ;;  %1529 = vrot.lane.b32.xlu1 %v12517_v10, %s11331_s12  ;;  %v9892_v18 = vpack.c.bf16 %v1818_v24, %v1818_v24  ;;  %v2218_v45 = vmul.f32 %v12834_v20, %v2154_v23  ;;  %v3146_v2 = vmul.f32 %v12847_v56, %v3082_v61  ;;  %v12865_v23 = vld [vmem:[%s15917_s7] sm:$0xff]  ;;  %v16101_v24 = vld [vmem:[#allocation13_spill] sm:$0xff] }
 0x1f7   : > { %2598 = vst.msk [vmem:[#allocation3] sm:$0xf] %vm2597_vm2, %v2430_v53  ;;  %v5531_v42 = vmul.f32 %v12636_v19, %v5467_v46  ;;  %v1756_v40 = vld [vmem:[#allocation2 + $0x138] sm:$0xff]  ;;  %2599 = vst.msk [vmem:[#allocation3 + $0x14] sm:$0xf] %vm2597_vm2, %v2432_v55  ;;  %v3361_v17 = vpop.permute.xlu1 %3360 }
 0x1f8   : > { %2106 = vst.msk [vmem:[#allocation3 + $0x244] sm:$0xf] %vm2076_vm1, %v9891_v47  ;;  %1531 = vrot.lane.b32.xlu0 %v12539_v31, %s11331_s12  ;;  %3034 = vst.msk [vmem:[#allocation3 + $0x234] sm:$0xf] %vm2076_vm1, %v10002_v22  ;;  %v1819_v19 = vmul.f32 %v12373_v12, %v1756_v40  ;;  %v2684_v36 = vld [vmem:[#allocation2 + $0x132] sm:$0xff]  ;;  %v3083_v12 = vld [vmem:[#allocation2 + $0xdf] sm:$0xff]  ;;  %v9938_v47 = vpack.c.bf16 %v2217_v63, %v2217_v63  ;;  %v1496_v52 = vpop.permute.xlu0 %1495  ;;  %v9939_v22 = vpack.c.bf16 %v2218_v45, %v2218_v45 }
 0x1f9   : > { %1701 = vst.msk [vmem:[#allocation2 + $0x148] sm:$0xff] %vm559_vm0, %v1629_v57  ;;  %v5468_v13 = vld [vmem:[#allocation2 + $0x140] sm:$0xff]  ;;  %v10339_v38 = vpack.c.bf16 %v5531_v42, %v5531_v42  ;;  %v2748_v37 = vmul.f32 %v12381_v25, %v2684_v36  ;;  %v1746_v26 = vld [vmem:[#allocation2 + $0xd8] sm:$0xff]  ;;  %v12859_v25 = vld [vmem:[%s15917_s7 + $0xa8] sm:$0xff]  ;;  %v1630_v42 = vmax.f32 %v16101_v24, %v1496_v52 }
 0x1fa   : > { %3035 = vst.msk [vmem:[#allocation3 + $0x248] sm:$0xf] %vm2076_vm1, %v10003_v28  ;;  %v5532_v6 = vmul.f32 %v12668_v5, %v5468_v13  ;;  %v2685_v7 = vld [vmem:[#allocation2 + $0x13a] sm:$0xff]  ;;  %1533 = vrot.lane.b32.xlu1 %v12577_v48, %s11331_s12  ;;  %2107 = vst.msk [vmem:[#allocation3 + $0x258] sm:$0xf] %vm2076_vm1, %v9892_v18  ;;  %v9893_v5 = vpack.c.bf16 %v1819_v19, %v1819_v19  ;;  %v3147_v46 = vmul.f32 %v12859_v25, %v3083_v12  ;;  %v16102_v45 = vld [vmem:[#allocation14_spill] sm:$0xff] }
 0x1fb   : > { %v1757_v1 = vld [vmem:[#allocation2 + $0x140] sm:$0xff]  ;;  %3526 = vst.msk [vmem:[#allocation3 + $0x4] sm:$0xf] %vm2597_vm2, %v3359_v44  ;;  %v2749_v57 = vmul.f32 %v12403_v58, %v2685_v7  ;;  %3527 = vst.msk [vmem:[#allocation3 + $0x18] sm:$0xf] %vm2597_vm2, %v3361_v17  ;;  %v1809_v58 = vmul.f32 %v12865_v23, %v1746_v26  ;;  %v1498_v36 = vpop.permute.xlu1 %1497  ;;  %v12909_v24 = vld [vmem:[%s15917_s7 + $0xb0] sm:$0xff] }
 0x1fc   : > { %5819 = vst.msk [vmem:[#allocation3 + $0x254] sm:$0xf] %vm2076_vm1, %v10339_v38  ;;  %v10340_v49 = vpack.c.bf16 %v5532_v6, %v5532_v6  ;;  %1535 = vrot.lane.b32.xlu0 %v12597_v35, %s11331_s12  ;;  %2108 = vst.msk [vmem:[#allocation3 + $0x26c] sm:$0xf] %vm2076_vm1, %v9893_v5  ;;  %v1820_v53 = vmul.f32 %v12458_v60, %v1757_v1  ;;  %v10004_v60 = vpack.c.bf16 %v2748_v37, %v2748_v37  ;;  %v4287_v7 = vpop.permute.xlu0 %4286  ;;  %v2155_v12 = vld [vmem:[#allocation2 + $0xe1] sm:$0xff]  ;;  %v2156_v5 = vld [vmem:[#allocation2 + $0xe9] sm:$0xff] }
 0x1fd   : > { %v10005_v40 = vpack.c.bf16 %v2749_v57, %v2749_v57  ;;  %v9883_v63 = vpack.c.bf16 %v1809_v58, %v1809_v58  ;;  %1702 = vst.msk [vmem:[#allocation2 + $0x150] sm:$0xff] %vm559_vm0, %v1630_v42  ;;  %v10050_v38 = vpack.c.bf16 %v3146_v2, %v3146_v2  ;;  %v1631_v61 = vmax.f32 %v16102_v45, %v1498_v36  ;;  %v12897_v57 = vld [vmem:[%s15917_s7 + $0x48] sm:$0xff]  ;;  %v13195_v31 = vld [vmem:[#allocation2 + $0xb8] sm:$0xff] }
 0x1fe   : > { %5820 = vst.msk [vmem:[#allocation3 + $0x268] sm:$0xf] %vm2076_vm1, %v10340_v49  ;;  %2469 = vrot.lane.b32.xlu1 %v9938_v47, %s11331_s12  ;;  %v9894_v13 = vpack.c.bf16 %v1820_v53, %v1820_v53  ;;  %3036 = vst.msk [vmem:[#allocation3 + $0x25c] sm:$0xf] %vm2076_vm1, %v10004_v60  ;;  %v10051_v1 = vpack.c.bf16 %v3147_v46, %v3147_v46  ;;  %v12888_v47 = vld [vmem:[%s15917_s7 + $0x40] sm:$0xff]  ;;  %v2220_v53 = vmul.f32 %v12897_v57, %v2156_v5 }
 0x1ff   : > { %3037 = vst.msk [vmem:[#allocation3 + $0x270] sm:$0xf] %vm2076_vm1, %v10005_v40  ;;  %2098 = vst.msk [vmem:[#allocation3 + $0x1a4] sm:$0xf] %vm2076_vm1, %v9883_v63  ;;  %v2219_v2 = vmul.f32 %v12888_v47, %v2155_v12  ;;  %v3084_v52 = vld [vmem:[#allocation2 + $0xe7] sm:$0xff] }
 0x200   : > { %v5469_v28 = vld [vmem:[#allocation2 + $0x148] sm:$0xff]  ;;  %2471 = vrot.lane.b32.xlu0 %v9939_v22, %s11331_s12  ;;  %2109 = vst.msk [vmem:[#allocation3 + $0x280] sm:$0xf] %vm2076_vm1, %v9894_v13  ;;  %v5215_v26 = vpop.permute.xlu0 %5214  ;;  %v3148_v42 = vmul.f32 %v12909_v24, %v3084_v52  ;;  %v9941_v63 = vpack.c.bf16 %v2220_v53, %v2220_v53  ;;  %v3087_v53 = vld [vmem:[#allocation2 + $0xff] sm:$0xff] }
 0x201   : > { %v5533_v55 = vmul.f32 %v12685_v4, %v5469_v28  ;;  %v1758_v18 = vld [vmem:[#allocation2 + $0x148] sm:$0xff]  ;;  %4454 = vst.msk [vmem:[#allocation3 + $0x8] sm:$0xf] %vm2597_vm2, %v4287_v7  ;;  %5382 = vst.msk [vmem:[#allocation3 + $0xc] sm:$0xf] %vm2597_vm2, %v5215_v26  ;;  %v9940_v28 = vpack.c.bf16 %v2219_v2, %v2219_v2  ;;  %v3086_v26 = vld [vmem:[#allocation2 + $0xf7] sm:$0xff] }
 0x202   : > { %v2686_v19 = vld [vmem:[#allocation2 + $0x142] sm:$0xff]  ;;  %v1821_v6 = vmul.f32 %v12479_v33, %v1758_v18  ;;  %3398 = vrot.lane.b32.xlu1 %v10050_v38, %s11331_s12  ;;  %1703 = vst.msk [vmem:[#allocation2 + $0x158] sm:$0xff] %vm559_vm0, %v1631_v61  ;;  %v4289_v33 = vpop.permute.xlu1 %4288  ;;  %v3085_v22 = vld [vmem:[#allocation2 + $0xef] sm:$0xff]  ;;  %v12916_v18 = vld [vmem:[%s15917_s7 + $0xb8] sm:$0xff]  ;;  %v10052_v12 = vpack.c.bf16 %v3148_v42, %v3148_v42 }
 0x203   : > { %v2750_v44 = vmul.f32 %v12488_v50, %v2686_v19  ;;  %v10341_v4 = vpack.c.bf16 %v5533_v55, %v5533_v55  ;;  %v10991_v50 = vld [vmem:[#allocation3] ss:$20 sps:$4 sm:$0xff]   ;;  %v10993_v17 = vld [vmem:[#allocation3 + $0x4] ss:$20 sps:$4 sm:$0xff]   ;;  %4455 = vst.msk [vmem:[#allocation3 + $0x1c] sm:$0xf] %vm2597_vm2, %v4289_v33 }
 0x204   : > { %v9895_v49 = vpack.c.bf16 %v1821_v6, %v1821_v6  ;;  %3400 = vrot.lane.b32.xlu0 %v10051_v1, %s11331_s12  ;;  %7118 = vmatprep.mubr.bf16.mxu0 %v10993_v17  ;;  %v5470_v46 = vld [vmem:[#allocation2 + $0x150] sm:$0xff]  ;;  %v2434_v55 = vpop.permute.xlu0 %2433  ;;  %v12937_v17 = vld [vmem:[%s15917_s7 + $0x58] sm:$0xff] }
 0x205   : > { %v10006_v37 = vpack.c.bf16 %v2750_v44, %v2750_v44  ;;  %5821 = vst.msk [vmem:[#allocation3 + $0x27c] sm:$0xf] %vm2076_vm1, %v10341_v4  ;;  %7119 = vmatmul.mubr.bf16.vlgmr.msra.gmra.mrb[112].mxu0 %v10991_v50  ;;  %v5534_v58 = vmul.f32 %v12740_v30, %v5470_v46  ;;  %v2687_v40 = vld [vmem:[#allocation2 + $0x14a] sm:$0xff]  ;;  %v3149_v30 = vmul.f32 %v12916_v18, %v3085_v22  ;;  %v2158_v4 = vld [vmem:[#allocation2 + $0xf9] sm:$0xff] }
 0x206   : > { %2110 = vst.msk [vmem:[#allocation3 + $0x294] sm:$0xf] %vm2076_vm1, %v9895_v49  ;;  %1537 = vrot.lane.b32.xlu1 %v12630_v8, %s11331_s12  ;;  %v5217_v60 = vpop.permute.xlu1 %5216  ;;  %v1759_v13 = vld [vmem:[#allocation2 + $0x150] sm:$0xff]  ;;  %v2751_v36 = vmul.f32 %v12496_v59, %v2687_v40  ;;  %v2222_v2 = vmul.f32 %v12937_v17, %v2158_v4  ;;  %v12957_v40 = vld [vmem:[%s15917_s7 + $0xc8] sm:$0xff] }
 0x207   : > { %3038 = vst.msk [vmem:[#allocation3 + $0x284] sm:$0xf] %vm2076_vm1, %v10006_v37  ;;  %v2157_v19 = vld [vmem:[#allocation2 + $0xf1] sm:$0xff]  ;;  %v1822_v38 = vmul.f32 %v12709_v29, %v1759_v13  ;;  %v10342_v6 = vpack.c.bf16 %v5534_v58, %v5534_v58  ;;  %v10053_v50 = vpack.c.bf16 %v3149_v30, %v3149_v30  ;;  %v12949_v58 = vld [vmem:[%s15917_s7 + $0xc0] sm:$0xff]  ;;  %v3151_v13 = vmul.f32 %v12957_v40, %v3087_v53 }
 0x208   : > { %1539 = vrot.lane.b32.xlu0 %v12645_v14, %s11331_s12  ;;  %5383 = vst.msk [vmem:[#allocation3 + $0x20] sm:$0xf] %vm2597_vm2, %v5217_v60  ;;  %2600 = vst.msk [vmem:[#allocation3 + $0x28] sm:$0xf] %vm2597_vm2, %v2434_v55  ;;  %v10007_v61 = vpack.c.bf16 %v2751_v36, %v2751_v36  ;;  %v12929_v59 = vld [vmem:[%s15917_s7 + $0x50] sm:$0xff]  ;;  %v3150_v60 = vmul.f32 %v12949_v58, %v3086_v26  ;;  %v9943_v42 = vpack.c.bf16 %v2222_v2, %v2222_v2  ;;  %v2159_v55 = vld [vmem:[#allocation2 + $0x101] sm:$0xff] }
 0x209   : > { %v5471_v44 = vld [vmem:[#allocation2 + $0x158] sm:$0xff]  ;;  %5822 = vst.msk [vmem:[#allocation3 + $0x290] sm:$0xf] %vm2076_vm1, %v10342_v6  ;;  %v2221_v5 = vmul.f32 %v12929_v59, %v2157_v19  ;;  %v9896_v49 = vpack.c.bf16 %v1822_v38, %v1822_v38  ;;  %v2160_v19 = vld [vmem:[#allocation2 + $0x109] sm:$0xff]  ;;  %v1753_v36 = vld [vmem:[#allocation2 + $0x120] sm:$0xff] }
 0x20a   : > { %2473 = vrot.lane.b32.xlu1 %v9940_v28, %s11331_s12  ;;  %v5535_v45 = vmul.f32 %v12756_v9, %v5471_v44  ;;  %v2688_v7 = vld [vmem:[#allocation2 + $0x152] sm:$0xff]  ;;  %v2436_v1 = vpop.permute.xlu1 %2435  ;;  %v3363_v9 = vpop.permute.xlu0 %3362  ;;  %3039 = vst.msk [vmem:[#allocation3 + $0x298] sm:$0xf] %vm2076_vm1, %v10007_v61  ;;  %v10054_v6 = vpack.c.bf16 %v3150_v60, %v3150_v60  ;;  %v12967_v44 = vld [vmem:[%s15917_s7 + $0x60] sm:$0xff] }
 0x20b   : > { %v2752_v37 = vmul.f32 %v12718_v34, %v2688_v7  ;;  %2601 = vst.msk [vmem:[#allocation3 + $0x3c] sm:$0xf] %vm2597_vm2, %v2436_v1  ;;  %3528 = vst.msk [vmem:[#allocation3 + $0x2c] sm:$0xf] %vm2597_vm2, %v3363_v9  ;;  %v9942_v46 = vpack.c.bf16 %v2221_v5, %v2221_v5  ;;  %v2223_v4 = vmul.f32 %v12967_v44, %v2159_v55  ;;  %v16104_v61 = vld [vmem:[#allocation16_spill] sm:$0xff]  ;;  %v12980_v53 = vld [vmem:[%s15917_s7 + $0xd0] sm:$0xff] }
 0x20c   : > { %2475 = vrot.lane.b32.xlu0 %v9941_v63, %s11331_s12  ;;  %v10343_v33 = vpack.c.bf16 %v5535_v45, %v5535_v45  ;;  %2111 = vst.msk [vmem:[#allocation3 + $0x2a8] sm:$0xf] %vm2076_vm1, %v9896_v49  ;;  %v16103_v63 = vld [vmem:[#allocation15_spill] sm:$0xff]  ;;  %v1816_v45 = vmul.f32 %v12865_v23, %v1753_v36  ;;  %v2224_v5 = vmul.f32 %v12823_v27, %v2160_v19  ;;  %v3088_v49 = vld [vmem:[#allocation2 + $0x107] sm:$0xff]  ;;  %v16108_v8 = vld [vmem:[#allocation22_spill] sm:$0xff] }
 0x20d   : > { %v10008_v52 = vpack.c.bf16 %v2752_v37, %v2752_v37  ;;  %v3089_v37 = vld [vmem:[#allocation2 + $0x10f] sm:$0xff] }
 0x20e   : > { %3402 = vrot.lane.b32.xlu1 %v10052_v12, %s11331_s12  ;;  %5823 = vst.msk [vmem:[#allocation3 + $0x2a4] sm:$0xf] %vm2076_vm1, %v10343_v33  ;;  %v3365_v22 = vpop.permute.xlu1 %3364  ;;  %v1500_v28 = vpop.permute.xlu0 %1499  ;;  %v10055_v12 = vpack.c.bf16 %v3151_v13, %v3151_v13  ;;  %v9890_v33 = vpack.c.bf16 %v1816_v45, %v1816_v45  ;;  %v3153_v60 = vmul.f32 %v12847_v56, %v3089_v37 }
 0x20f   : > { %3040 = vst.msk [vmem:[#allocation3 + $0x2ac] sm:$0xf] %vm2076_vm1, %v10008_v52  ;;  %v1632_v30 = vmax.f32 %v16103_v63, %v1500_v28  ;;  %v3152_v52 = vmul.f32 %v12980_v53, %v3088_v49  ;;  %v2161_v28 = vld [vmem:[#allocation2 + $0x121] sm:$0xff] }
 0x210   : > { %3404 = vrot.lane.b32.xlu0 %v10053_v50, %s11331_s12  ;;  %3529 = vst.msk [vmem:[#allocation3 + $0x40] sm:$0xf] %vm2597_vm2, %v3365_v22  ;;  %v9944_v50 = vpack.c.bf16 %v2223_v4, %v2223_v4  ;;  %v2225_v63 = vmul.f32 %v12834_v20, %v2161_v28 }
 0x211   : > { %1704 = vst.msk [vmem:[#allocation2 + $0x170] sm:$0xff] %vm559_vm0, %v1632_v30  ;;  %v10056_v55 = vpack.c.bf16 %v3152_v52, %v3152_v52  ;;  %v3090_v30 = vld [vmem:[#allocation2 + $0x127] sm:$0xff] }
 0x212   : > { %2477 = vrot.lane.b32.xlu1 %v9942_v46, %s11331_s12  ;;  %v1502_v38 = vpop.permute.xlu1 %1501  ;;  %v4291_v1 = vpop.permute.xlu0 %4290  ;;  %v10996_v26 = vld [vmem:[#allocation3 + $0x28] ss:$20 sps:$4 sm:$0xff]   ;;  %2105 = vst.msk [vmem:[#allocation3 + $0x230] sm:$0xf] %vm2076_vm1, %v9890_v33  ;;  %v9945_v46 = vpack.c.bf16 %v2224_v5, %v2224_v5  ;;  %v3154_v5 = vmul.f32 %v12859_v25, %v3090_v30  ;;  %v1731_v30 = vld [vmem:[#allocation2 + $0x30] sm:$0xff] }
 0x213   : > { %v1633_v7 = vmax.f32 %v16104_v61, %v1502_v38  ;;  %4456 = vst.msk [vmem:[#allocation3 + $0x30] sm:$0xf] %vm2597_vm2, %v4291_v1  ;;  %v3091_v1 = vld [vmem:[#allocation2 + $0x12f] sm:$0xff] }
 0x214   : > { %2479 = vrot.lane.b32.xlu0 %v9943_v42, %s11331_s12  ;;  %v2162_v42 = vld [vmem:[#allocation2 + $0x129] sm:$0xff]  ;;  %v3155_v28 = vmul.f32 %v12909_v24, %v3091_v1  ;;  %v3092_v1 = vld [vmem:[#allocation2 + $0x137] sm:$0xff] }
 0x215   : > { %1705 = vst.msk [vmem:[#allocation2 + $0x178] sm:$0xff] %vm559_vm0, %v1633_v7  ;;  %v2226_v4 = vmul.f32 %v12888_v47, %v2162_v42  ;;  %v2163_v42 = vld [vmem:[#allocation2 + $0x131] sm:$0xff] }
 0x216   : > { %3406 = vrot.lane.b32.xlu1 %v10054_v6, %s11331_s12  ;;  %v4293_v9 = vpop.permute.xlu1 %4292  ;;  %v5219_v22 = vpop.permute.xlu0 %5218  ;;  %v10057_v6 = vpack.c.bf16 %v3153_v60, %v3153_v60 }
 0x217   : > { %v10994_v2 = vld [vmem:[#allocation3 + $0x2c] ss:$20 sps:$4 sm:$0xff]   ;;  %4457 = vst.msk [vmem:[#allocation3 + $0x44] sm:$0xf] %vm2597_vm2, %v4293_v9  ;;  %5384 = vst.msk [vmem:[#allocation3 + $0x34] sm:$0xf] %vm2597_vm2, %v5219_v22  ;;  %v9947_v60 = vpack.c.bf16 %v2226_v4, %v2226_v4 }
 0x218   : > { %3408 = vrot.lane.b32.xlu0 %v10055_v12, %s11331_s12  ;;  %7126 = vmatprep.mubr.bf16.mxu0 %v10994_v2  ;;  %v2689_v19 = vld [vmem:[#allocation2 + $0x16a] sm:$0xff] }
 0x219   : > { %7127 = vmatmul.mubr.bf16.gmra.mrb[116].mxu0 %v10996_v26  ;;  %v1761_v36 = vld [vmem:[#allocation2 + $0x170] sm:$0xff]  ;;  %v2753_v45 = vmul.f32 %v12728_v15, %v2689_v19 }
 0x21a   : > { %2481 = vrot.lane.b32.xlu1 %v9944_v50, %s11331_s12  ;;  %v5221_v13 = vpop.permute.xlu1 %5220  ;;  %v2438_v38 = vpop.permute.xlu0 %2437  ;;  %v1824_v61 = vmul.f32 %v12734_v41, %v1761_v36  ;;  %v9946_v50 = vpack.c.bf16 %v2225_v63, %v2225_v63  ;;  %v13002_v26 = vld [vmem:[%s15917_s7 + $0x10] sm:$0xff]  ;;  %v10058_v36 = vpack.c.bf16 %v3154_v5, %v3154_v5 }
 0x21b   : > { %5385 = vst.msk [vmem:[#allocation3 + $0x48] sm:$0xf] %vm2597_vm2, %v5221_v13  ;;  %2602 = vst.msk [vmem:[#allocation3 + $0x50] sm:$0xf] %vm2597_vm2, %v2438_v38  ;;  %v10009_v49 = vpack.c.bf16 %v2753_v45, %v2753_v45  ;;  %v2164_v13 = vld [vmem:[#allocation2 + $0x139] sm:$0xff]  ;;  %v2227_v38 = vmul.f32 %v12897_v57, %v2163_v42  ;;  %v2661_v4 = vld [vmem:[#allocation2 + $0x4a] sm:$0xff] }
 0x21c   : > { %2483 = vrot.lane.b32.xlu0 %v9945_v46, %s11331_s12  ;;  %v5473_v7 = vld [vmem:[#allocation2 + $0x178] sm:$0xff]  ;;  %v9898_v2 = vpack.c.bf16 %v1824_v61, %v1824_v61  ;;  %v10059_v61 = vpack.c.bf16 %v3155_v28, %v3155_v28  ;;  %v16105_v5 = vld [vmem:[#allocation18_spill] sm:$0xff] }
 0x21d   : > { %v5537_v12 = vmul.f32 %v12621_v43, %v5473_v7  ;;  %v1762_v37 = vld [vmem:[#allocation2 + $0x178] sm:$0xff]  ;;  %3041 = vst.msk [vmem:[#allocation3 + $0x2c0] sm:$0xf] %vm2076_vm1, %v10009_v49  ;;  %v2228_v7 = vmul.f32 %v12929_v59, %v2164_v13  ;;  %v1794_v49 = vmul.f32 %v12709_v29, %v1731_v30  ;;  %v3156_v29 = vmul.f32 %v12916_v18, %v3092_v1  ;;  %v2165_v30 = vld [vmem:[#allocation2 + $0x141] sm:$0xff]  ;;  %v3095_v1 = vld [vmem:[#allocation2 + $0x14f] sm:$0xff] }
 0x21e   : > { %3410 = vrot.lane.b32.xlu1 %v10056_v55, %s11331_s12  ;;  %v2690_v33 = vld [vmem:[#allocation2 + $0x172] sm:$0xff]  ;;  %v2440_v9 = vpop.permute.xlu1 %2439  ;;  %v1825_v52 = vmul.f32 %v13002_v26, %v1762_v37  ;;  %v3367_v46 = vpop.permute.xlu0 %3366  ;;  %2113 = vst.msk [vmem:[#allocation3 + $0x2d0] sm:$0xf] %vm2076_vm1, %v9898_v2  ;;  %v2725_v2 = vmul.f32 %v12728_v15, %v2661_v4  ;;  %v4524_v28 = vld [vmem:[#allocation2 + $0x9e] sm:$0xff]  ;;  %v4525_v15 = vld [vmem:[#allocation2 + $0xa6] sm:$0xff] }
 0x21f   : > { %v2754_v22 = vmul.f32 %v12806_v11, %v2690_v33  ;;  %v10345_v43 = vpack.c.bf16 %v5537_v12, %v5537_v12  ;;  %2603 = vst.msk [vmem:[#allocation3 + $0x64] sm:$0xf] %vm2597_vm2, %v2440_v9  ;;  %3530 = vst.msk [vmem:[#allocation3 + $0x54] sm:$0xf] %vm2597_vm2, %v3367_v46  ;;  %v3093_v12 = vld [vmem:[#allocation2 + $0x13f] sm:$0xff]  ;;  %v9868_v9 = vpack.c.bf16 %v1794_v49, %v1794_v49 }
 0x220   : > { %3412 = vrot.lane.b32.xlu0 %v10057_v6, %s11331_s12  ;;  %v9899_v55 = vpack.c.bf16 %v1825_v52, %v1825_v52  ;;  %v2660_v6 = vld [vmem:[#allocation2 + $0x32] sm:$0xff]  ;;  %v13027_v52 = vld [vmem:[#allocation2 + $0xa0] sm:$0xff]  ;;  %v3157_v46 = vmul.f32 %v12949_v58, %v3093_v12 }
 0x221   : > { %v10010_v63 = vpack.c.bf16 %v2754_v22, %v2754_v22  ;;  %5825 = vst.msk [vmem:[#allocation3 + $0x2cc] sm:$0xf] %vm2076_vm1, %v10345_v43  ;;  %v13020_v37 = vld [vmem:[#allocation2 + $0x98] sm:$0xff]  ;;  %v9948_v43 = vpack.c.bf16 %v2227_v38, %v2227_v38  ;;  %2083 = vst.msk [vmem:[#allocation3 + $0x78] sm:$0xf] %vm2076_vm1, %v9868_v9  ;;  %v1733_v38 = vld [vmem:[#allocation2 + $0x50] sm:$0xff] }
 0x222   : > { %2485 = vrot.lane.b32.xlu1 %v9946_v50, %s11331_s12  ;;  %v3369_v19 = vpop.permute.xlu1 %3368  ;;  %2114 = vst.msk [vmem:[#allocation3 + $0x2e4] sm:$0xf] %vm2076_vm1, %v9899_v55  ;;  %v1504_v45 = vpop.permute.xlu0 %1503  ;;  %v2724_v50 = vmul.f32 %v12718_v34, %v2660_v6  ;;  %v16106_v42 = vld [vmem:[#allocation19_spill] sm:$0xff]  ;;  %v2166_v6 = vld [vmem:[#allocation2 + $0x149] sm:$0xff] }
 0x223   : > { %3042 = vst.msk [vmem:[#allocation3 + $0x2d4] sm:$0xf] %vm2076_vm1, %v10010_v63  ;;  %v1634_v33 = vmax.f32 %v16105_v5, %v1504_v45  ;;  %v9949_v63 = vpack.c.bf16 %v2228_v7, %v2228_v7  ;;  %v13046_v45 = vld [vmem:[%s15917_s7 + $0xe8] sm:$0xff]  ;;  %v13057_v12 = vld [vmem:[%s15917_s7 + $0x150] sm:$0xff]  ;;  %v13063_v5 = vld [vmem:[%s15917_s7 + $0x158] sm:$0xff] }
 0x224   : > { %2487 = vrot.lane.b32.xlu0 %v9947_v60, %s11331_s12  ;;  %3531 = vst.msk [vmem:[#allocation3 + $0x68] sm:$0xf] %vm2597_vm2, %v3369_v19  ;;  %v13035_v60 = vld [vmem:[%s15917_s7 + $0xe0] sm:$0xff]  ;;  %v9980_v19 = vpack.c.bf16 %v2724_v50, %v2724_v50  ;;  %v4588_v49 = vmul.f32 %v13057_v12, %v4524_v28  ;;  %v1734_v9 = vld [vmem:[#allocation2 + $0x58] sm:$0xff] }
 0x225   : > { %1706 = vst.msk [vmem:[#allocation2 + $0x180] sm:$0xff] %vm559_vm0, %v1634_v33  ;;  %v3660_v34 = vmul.f32 %v13035_v60, %v13020_v37  ;;  %v3094_v7 = vld [vmem:[#allocation2 + $0x147] sm:$0xff]  ;;  %v4589_v33 = vmul.f32 %v13063_v5, %v4525_v15 }
 0x226   : > { %3414 = vrot.lane.b32.xlu1 %v10058_v36, %s11331_s12  ;;  %v1506_v22 = vpop.permute.xlu1 %1505  ;;  %v4295_v55 = vpop.permute.xlu0 %4294  ;;  %v9981_v36 = vpack.c.bf16 %v2725_v2, %v2725_v2  ;;  %3012 = vst.msk [vmem:[#allocation3 + $0x7c] sm:$0xf] %vm2076_vm1, %v9980_v19  ;;  %v10060_v2 = vpack.c.bf16 %v3156_v29, %v3156_v29  ;;  %v1760_v19 = vld [vmem:[#allocation2 + $0x168] sm:$0xff]  ;;  %v10212_v15 = vpack.c.bf16 %v4588_v49, %v4588_v49 }
 0x227   : > { %v1635_v13 = vmax.f32 %v16106_v42, %v1506_v22  ;;  %4458 = vst.msk [vmem:[#allocation3 + $0x58] sm:$0xf] %vm2597_vm2, %v4295_v55  ;;  %v10100_v4 = vpack.c.bf16 %v3660_v34, %v3660_v34  ;;  %v2229_v34 = vmul.f32 %v12937_v17, %v2165_v30  ;;  %v10061_v55 = vpack.c.bf16 %v3157_v46, %v3157_v46 }
 0x228   : > { %3416 = vrot.lane.b32.xlu0 %v10059_v61, %s11331_s12  ;;  %v3661_v61 = vmul.f32 %v13046_v45, %v13027_v52  ;;  %3013 = vst.msk [vmem:[#allocation3 + $0x90] sm:$0xf] %vm2076_vm1, %v9981_v36  ;;  %v10213_v36 = vpack.c.bf16 %v4589_v33, %v4589_v33  ;;  %v13074_v29 = vmul.f32 %v12957_v40, %v3094_v7  ;;  %4876 = vst.msk [vmem:[#allocation3 + $0x124] sm:$0xf] %vm2076_vm1, %v10212_v15  ;;  %v13088_v7 = vld [vmem:[%s15917_s7 + $0x1c8] sm:$0xff]  ;;  %v2662_v15 = vld [vmem:[#allocation2 + $0x52] sm:$0xff] }
 0x229   : > { %1707 = vst.msk [vmem:[#allocation2 + $0x188] sm:$0xff] %vm559_vm0, %v1635_v13  ;;  %v1796_v13 = vmul.f32 %v12734_v41, %v1733_v38  ;;  %v13077_v30 = vmul.f32 %v12980_v53, %v3095_v1  ;;  %v1823_v41 = vmul.f32 %v12865_v23, %v1760_v19  ;;  %v2167_v38 = vld [vmem:[#allocation2 + $0x151] sm:$0xff]  ;;  %v9950_v49 = vpack.c.bf16 %v2229_v34, %v2229_v34  ;;  %v2168_v33 = vld [vmem:[#allocation2 + $0x169] sm:$0xff] }
 0x22a   : > { %2489 = vrot.lane.b32.xlu1 %v9948_v43, %s11331_s12  ;;  %v4297_v50 = vpop.permute.xlu1 %4296  ;;  %v10999_v43 = vld [vmem:[#allocation3 + $0x50] ss:$20 sps:$4 sm:$0xff]   ;;  %3948 = vst.msk [vmem:[#allocation3 + $0x120] sm:$0xf] %vm2076_vm1, %v10100_v4  ;;  %v10101_v42 = vpack.c.bf16 %v3661_v61, %v3661_v61  ;;  %v5223_v28 = vpop.permute.xlu0 %5222  ;;  %4877 = vst.msk [vmem:[#allocation3 + $0x138] sm:$0xf] %vm2076_vm1, %v10213_v36  ;;  %v1797_v61 = vmul.f32 %v13002_v26, %v1734_v9 }
 0x22b   : > { %v10997_v22 = vld [vmem:[#allocation3 + $0x54] ss:$20 sps:$4 sm:$0xff]   ;;  %4459 = vst.msk [vmem:[#allocation3 + $0x6c] sm:$0xf] %vm2597_vm2, %v4297_v50  ;;  %5386 = vst.msk [vmem:[#allocation3 + $0x5c] sm:$0xf] %vm2597_vm2, %v5223_v28  ;;  %v9870_v4 = vpack.c.bf16 %v1796_v13, %v1796_v13  ;;  %v9897_v50 = vpack.c.bf16 %v1823_v41, %v1823_v41  ;;  %v10062_v41 = vpack.c.bf16 %v13074_v29, %v13074_v29 }
 0x22c   : > { %2491 = vrot.lane.b32.xlu0 %v9949_v63, %s11331_s12  ;;  %v2230_v63 = vmul.f32 %v12967_v44, %v2166_v6  ;;  %7134 = vmatprep.mubr.bf16.mxu0 %v10997_v22  ;;  %3949 = vst.msk [vmem:[#allocation3 + $0x134] sm:$0xf] %vm2076_vm1, %v10101_v42  ;;  %v5474_v46 = vld [vmem:[#allocation2 + $0x180] sm:$0xff]  ;;  %v3096_v6 = vld [vmem:[#allocation2 + $0x157] sm:$0xff]  ;;  %v3097_v13 = vld [vmem:[#allocation2 + $0x16f] sm:$0xff]  ;;  %v9871_v19 = vpack.c.bf16 %v1797_v61, %v1797_v61 }
 0x22d   : > { %7135 = vmatmul.mubr.bf16.gmra.mrb[120].mxu0 %v10999_v43  ;;  %v5538_v23 = vmul.f32 %v13088_v7, %v5474_v46  ;;  %v1763_v22 = vld [vmem:[#allocation2 + $0x180] sm:$0xff]  ;;  %v13101_v34 = vld [vmem:[%s15917_s7 + $0x18] sm:$0xff]  ;;  %2085 = vst.msk [vmem:[#allocation3 + $0xa0] sm:$0xf] %vm2076_vm1, %v9870_v4  ;;  %v10063_v46 = vpack.c.bf16 %v13077_v30, %v13077_v30  ;;  %2112 = vst.msk [vmem:[#allocation3 + $0x2bc] sm:$0xf] %vm2076_vm1, %v9897_v50  ;;  %v13123_v29 = vmul.f32 %v12834_v20, %v2168_v33 }
 0x22e   : > { %3418 = vrot.lane.b32.xlu1 %v10060_v2, %s11331_s12  ;;  %v5225_v1 = vpop.permute.xlu1 %5224  ;;  %v2691_v2 = vld [vmem:[#allocation2 + $0x17a] sm:$0xff]  ;;  %v9951_v42 = vpack.c.bf16 %v2230_v63, %v2230_v63  ;;  %v13118_v4 = vld [vmem:[%s15917_s7 + $0x1d0] sm:$0xff]  ;;  %v13126_v30 = vmul.f32 %v12847_v56, %v3096_v6  ;;  %2086 = vst.msk [vmem:[#allocation3 + $0xb4] sm:$0xf] %vm2076_vm1, %v9871_v19  ;;  %v13142_v33 = vld [vmem:[%s15917_s7 + $0x88] sm:$0xff] }
 0x22f   : > { %5387 = vst.msk [vmem:[#allocation3 + $0x70] sm:$0xf] %vm2597_vm2, %v5225_v1  ;;  %v4299_v43 = vpop.permute.xlu0 %4298  ;;  %v13095_v9 = vld [vmem:[%s15917_s7 + $0x80] sm:$0xff]  ;;  %v10346_v63 = vpack.c.bf16 %v5538_v23, %v5538_v23  ;;  %v13112_v1 = vmul.f32 %v12823_v27, %v2167_v38  ;;  %v13147_v19 = vld [vmem:[#allocation2 + $0xb0] sm:$0xff] }
 0x230   : > { %3420 = vrot.lane.b32.xlu0 %v10061_v55, %s11331_s12  ;;  %v2755_v28 = vmul.f32 %v13095_v9, %v2691_v2  ;;  %v1826_v55 = vmul.f32 %v13101_v34, %v1763_v22  ;;  %v5475_v36 = vld [vmem:[#allocation2 + $0x188] sm:$0xff]  ;;  %4460 = vst.msk [vmem:[#allocation3 + $0x80] sm:$0xf] %vm2597_vm2, %v4299_v43  ;;  %v2169_v2 = vld [vmem:[#allocation2 + $0x171] sm:$0xff]  ;;  %v2170_v22 = vld [vmem:[#allocation2 + $0x179] sm:$0xff]  ;;  %v13131_v43 = vmul.f32 %v12859_v25, %v3097_v13 }
 0x231   : > { %v5539_v61 = vmul.f32 %v13118_v4, %v5475_v36  ;;  %v1764_v38 = vld [vmem:[#allocation2 + $0x188] sm:$0xff]  ;;  %5826 = vst.msk [vmem:[#allocation3 + $0x2e0] sm:$0xf] %vm2076_vm1, %v10346_v63  ;;  %v13136_v20 = vld [vmem:[%s15917_s7 + $0x20] sm:$0xff]  ;;  %v13151_v14 = vmul.f32 %v12888_v47, %v2169_v2  ;;  %v9952_v47 = vpack.c.bf16 %v13112_v1, %v13112_v1  ;;  %v13172_v2 = vld [vmem:[%s15917_s7 + $0xf0] sm:$0xff]  ;;  %v16109_v21 = vpack.c.bf16 %v13126_v30, %v13126_v30 }
 0x232   : > { %2493 = vrot.lane.b32.xlu1 %v9950_v49, %s11331_s12  ;;  %v10011_v27 = vpack.c.bf16 %v2755_v28, %v2755_v28  ;;  %v2692_v23 = vld [vmem:[#allocation2 + $0x182] sm:$0xff]  ;;  %v2663_v49 = vld [vmem:[#allocation2 + $0x5a] sm:$0xff]  ;;  %v1510_v50 = vpop.permute.xlu1 %1509  ;;  %v1827_v56 = vmul.f32 %v13136_v20, %v1764_v38  ;;  %v9900_v6 = vpack.c.bf16 %v1826_v55, %v1826_v55  ;;  %v13154_v55 = vmul.f32 %v12897_v57, %v2170_v22  ;;  %v4526_v1 = vld [vmem:[#allocation2 + $0xae] sm:$0xff] }
 0x233   : > { %v13145_v28 = vld [vmem:[#allocation2 + $0xa8] sm:$0xff]  ;;  %v10347_v25 = vpack.c.bf16 %v5539_v61, %v5539_v61  ;;  %v5227_v36 = vpop.permute.xlu0 %5226  ;;  %v3098_v38 = vld [vmem:[#allocation2 + $0x177] sm:$0xff]  ;;  %v1735_v22 = vld [vmem:[#allocation2 + $0x60] sm:$0xff] }
 0x234   : > { %2495 = vrot.lane.b32.xlu0 %v9951_v42, %s11331_s12  ;;  %v2756_v42 = vmul.f32 %v13142_v33, %v2692_v23  ;;  %v16107_v13 = vld [vmem:[#allocation21_spill] sm:$0xff]  ;;  %3043 = vst.msk [vmem:[#allocation3 + $0x2e8] sm:$0xf] %vm2076_vm1, %v10011_v27  ;;  %v9901_v23 = vpack.c.bf16 %v1827_v56, %v1827_v56  ;;  %2115 = vst.msk [vmem:[#allocation3 + $0x2f8] sm:$0xf] %vm2076_vm1, %v9900_v6 }
 0x235   : > { %v1637_v63 = vmax.f32 %v16107_v13, %v1510_v50  ;;  %5388 = vst.msk [vmem:[#allocation3 + $0x84] sm:$0xf] %vm2597_vm2, %v5227_v36  ;;  %v2726_v50 = vmul.f32 %v12806_v11, %v2662_v15  ;;  %v2727_v13 = vmul.f32 %v13095_v9, %v2663_v49  ;;  %v3662_v11 = vmul.f32 %v13172_v2, %v13145_v28  ;;  %v13179_v15 = vld [vmem:[%s15917_s7 + $0xf8] sm:$0xff]  ;;  %v2664_v36 = vld [vmem:[#allocation2 + $0x62] sm:$0xff] }
 0x236   : > { %3422 = vrot.lane.b32.xlu1 %v10062_v41, %s11331_s12  ;;  %v10012_v61 = vpack.c.bf16 %v2756_v42, %v2756_v42  ;;  %5827 = vst.msk [vmem:[#allocation3 + $0x2f4] sm:$0xf] %vm2076_vm1, %v10347_v25  ;;  %v3099_v41 = vld [vmem:[#allocation2 + $0x17f] sm:$0xff]  ;;  %v9953_v49 = vpack.c.bf16 %v13123_v29, %v13123_v29  ;;  %2116 = vst.msk [vmem:[#allocation3 + $0x30c] sm:$0xf] %vm2076_vm1, %v9901_v23  ;;  %v4527_v25 = vld [vmem:[#allocation2 + $0xb6] sm:$0xff]  ;;  %v13193_v29 = vmul.f32 %v12909_v24, %v3098_v38 }
 0x237   : > { %1709 = vst.msk [vmem:[#allocation2 + $0x198] sm:$0xff] %vm559_vm0, %v1637_v63  ;;  %v4301_v27 = vpop.permute.xlu1 %4300  ;;  %v9982_v6 = vpack.c.bf16 %v2726_v50, %v2726_v50  ;;  %v9983_v42 = vpack.c.bf16 %v2727_v13, %v2727_v13  ;;  %v1736_v63 = vld [vmem:[#allocation2 + $0x68] sm:$0xff]  ;;  %v1508_v57 = vpop.permute.xlu0 %1507  ;;  %v10102_v56 = vpack.c.bf16 %v3662_v11, %v3662_v11  ;;  %v13202_v13 = vmul.f32 %v12916_v18, %v3099_v41  ;;  %v13209_v24 = vld [vmem:[%s15917_s7 + $0x160] sm:$0xff] }
 0x238   : > { %3424 = vrot.lane.b32.xlu0 %v10063_v46, %s11331_s12  ;;  %v3663_v46 = vmul.f32 %v13179_v15, %v13147_v19  ;;  %3044 = vst.msk [vmem:[#allocation3 + $0x2fc] sm:$0xf] %vm2076_vm1, %v10012_v61  ;;  %v2171_v35 = vld [vmem:[#allocation2 + $0x181] sm:$0xff]  ;;  %v2665_v23 = vld [vmem:[#allocation2 + $0x6a] sm:$0xff]  ;;  %v1636_v61 = vmax.f32 %v12139_v54, %v1508_v57  ;;  %v4590_v38 = vmul.f32 %v13209_v24, %v4526_v1 }
 0x239   : > { %4461 = vst.msk [vmem:[#allocation3 + $0x94] sm:$0xf] %vm2597_vm2, %v4301_v27  ;;  %v13218_v54 = vld [vmem:[%s15917_s7 + $0x168] sm:$0xff]  ;;  %v1799_v57 = vmul.f32 %v13136_v20, %v1736_v63  ;;  %v2728_v41 = vmul.f32 %v13142_v33, %v2664_v36  ;;  %v3601_v11 = vld [vmem:[#allocation2 + $0xc0] sm:$0xff]  ;;  %v13226_v1 = vmul.f32 %v12929_v59, %v2171_v35  ;;  %v13231_v27 = vld [vmem:[%s15917_s7 + $0x90] sm:$0xff] }
 0x23a   : > { %v10103_v48 = vpack.c.bf16 %v3663_v46, %v3663_v46  ;;  %2497 = vrot.lane.b32.xlu1 %v9952_v47, %s11331_s12  ;;  %3014 = vst.msk [vmem:[#allocation3 + $0xa4] sm:$0xf] %vm2076_vm1, %v9982_v6  ;;  %3015 = vst.msk [vmem:[#allocation3 + $0xb8] sm:$0xf] %vm2076_vm1, %v9983_v42  ;;  %v4591_v18 = vmul.f32 %v13218_v54, %v4527_v25  ;;  %v1798_v47 = vmul.f32 %v13101_v34, %v1735_v22  ;;  %v13237_v22 = vld [vmem:[%s15917_s7 + $0x100] sm:$0xff] }
 0x23b   : > { %3950 = vst.msk [vmem:[#allocation3 + $0x148] sm:$0xf] %vm2076_vm1, %v10102_v56  ;;  %v5229_v46 = vpop.permute.xlu1 %5228  ;;  %v3664_v56 = vmul.f32 %v13237_v22, %v13195_v31  ;;  %v4528_v6 = vld [vmem:[#allocation2 + $0xbe] sm:$0xff]  ;;  %v4529_v42 = vld [vmem:[#allocation2 + $0xc6] sm:$0xff]  ;;  %v1512_v35 = vpop.permute.xlu0 %1511  ;;  %v9873_v63 = vpack.c.bf16 %v1799_v57, %v1799_v57  ;;  %v9984_v36 = vpack.c.bf16 %v2728_v41, %v2728_v41  ;;  %v13267_v57 = vld [vmem:[%s15917_s7 + $0x30] sm:$0xff] }
 0x23c   : > { %2499 = vrot.lane.b32.xlu0 %v9953_v49, %s11331_s12  ;;  %3951 = vst.msk [vmem:[#allocation3 + $0x15c] sm:$0xf] %vm2076_vm1, %v10103_v48  ;;  %v10214_v48 = vpack.c.bf16 %v4590_v38, %v4590_v38  ;;  %v2729_v49 = vmul.f32 %v13231_v27, %v2665_v23  ;;  %v10215_v59 = vpack.c.bf16 %v4591_v18, %v4591_v18  ;;  %v1738_v38 = vld [vmem:[#allocation2 + $0x78] sm:$0xff]  ;;  %v13251_v18 = vld [vmem:[%s15917_s7 + $0x108] sm:$0xff]  ;;  %16112 = vst [vmem:[#allocation5_spill] sm:$0xff] %v13267_v57 }
 0x23d   : > { %1708 = vst.msk [vmem:[#allocation2 + $0x190] sm:$0xff] %vm559_vm0, %v1636_v61  ;;  %v9872_v25 = vpack.c.bf16 %v1798_v47, %v1798_v47  ;;  %v1737_v61 = vld [vmem:[#allocation2 + $0x70] sm:$0xff]  ;;  %v1638_v10 = vmax.f32 %v16108_v8, %v1512_v35  ;;  %v10104_v62 = vpack.c.bf16 %v3664_v56, %v3664_v56  ;;  %v3665_v47 = vmul.f32 %v13251_v18, %v3601_v11  ;;  %v13257_v8 = vld [vmem:[%s15917_s7 + $0x1e0] sm:$0xff]  ;;  %v13283_v11 = vld [vmem:[%s15917_s7 + $0x178] sm:$0xff] }
 0x23e   : > { %5389 = vst.msk [vmem:[#allocation3 + $0x98] sm:$0xf] %vm2597_vm2, %v5229_v46  ;;  %v2666_v23 = vld [vmem:[#allocation2 + $0x72] sm:$0xff]  ;;  %3426 = vrot.lane.b32.xlu1 %v16109_v21, %s11331_s12  ;;  %v9985_v46 = vpack.c.bf16 %v2729_v49, %v2729_v49  ;;  %16110 = vst [vmem:[#allocation4_spill] sm:$0xff] %v13257_v8  ;;  %v16111_v21 = vpack.c.bf16 %v13131_v43, %v13131_v43  ;;  %v13292_v56 = vld [vmem:[%s15917_s7 + $0x28] sm:$0xff]  ;;  %v1801_v35 = vmul.f32 %v13267_v57, %v1738_v38 }
 0x23f   : > { %v5477_v50 = vld [vmem:[#allocation2 + $0x198] sm:$0xff]  ;;  %4878 = vst.msk [vmem:[#allocation3 + $0x14c] sm:$0xf] %vm2076_vm1, %v10214_v48  ;;  %4879 = vst.msk [vmem:[#allocation3 + $0x160] sm:$0xf] %vm2076_vm1, %v10215_v59  ;;  %v13277_v43 = vld [vmem:[%s15917_s7 + $0x170] sm:$0xff]  ;;  %v1514_v48 = vpop.permute.xlu1 %1513  ;;  %v10105_v49 = vpack.c.bf16 %v3665_v47, %v3665_v47 }
 0x240   : > { %v1766_v16 = vld [vmem:[#allocation2 + $0x198] sm:$0xff]  ;;  %v5541_v30 = vmul.f32 %v13257_v8, %v5477_v50  ;;  %3428 = vrot.lane.b32.xlu0 %v16111_v21, %s11331_s12  ;;  %2087 = vst.msk [vmem:[#allocation3 + $0xc8] sm:$0xf] %vm2076_vm1, %v9872_v25  ;;  %2088 = vst.msk [vmem:[#allocation3 + $0xdc] sm:$0xf] %vm2076_vm1, %v9873_v63  ;;  %v4592_v50 = vmul.f32 %v13277_v43, %v4528_v6  ;;  %v1800_v6 = vmul.f32 %v13292_v56, %v1737_v61 }
 0x241   : > { %v1829_v41 = vmul.f32 %v13267_v57, %v1766_v16  ;;  %3016 = vst.msk [vmem:[#allocation3 + $0xcc] sm:$0xf] %vm2076_vm1, %v9984_v36  ;;  %v4593_v16 = vmul.f32 %v13283_v11, %v4529_v42  ;;  %3017 = vst.msk [vmem:[#allocation3 + $0xe0] sm:$0xf] %vm2076_vm1, %v9985_v46  ;;  %v13299_v42 = vld [vmem:[%s15917_s7 + $0x98] sm:$0xff]  ;;  %v16113_v61 = vpack.c.bf16 %v13151_v14, %v13151_v14  ;;  %v3602_v57 = vld [vmem:[#allocation2 + $0xc8] sm:$0xff] }
 0x242   : > { %1710 = vst.msk [vmem:[#allocation2 + $0x1a0] sm:$0xff] %vm559_vm0, %v1638_v10  ;;  %v2730_v10 = vmul.f32 %v13299_v42, %v2666_v23  ;;  %v2667_v59 = vld [vmem:[#allocation2 + $0x7a] sm:$0xff]  ;;  %v10349_v25 = vpack.c.bf16 %v5541_v30, %v5541_v30  ;;  %v4303_v63 = vpop.permute.xlu0 %4302  ;;  %v10216_v46 = vpack.c.bf16 %v4592_v50, %v4592_v50  ;;  %v9874_v47 = vpack.c.bf16 %v1800_v6, %v1800_v6  ;;  %v3100_v14 = vld [vmem:[#allocation2 + $0x187] sm:$0xff] }
 0x243   : > { %3952 = vst.msk [vmem:[#allocation3 + $0x170] sm:$0xf] %vm2076_vm1, %v10104_v62  ;;  %v1639_v62 = vmax.f32 %v12218_v0, %v1514_v48  ;;  %v9903_v36 = vpack.c.bf16 %v1829_v41, %v1829_v41  ;;  %2501 = vrot.lane.b32.xlu1 %v16113_v61, %s11331_s12  ;;  %3953 = vst.msk [vmem:[#allocation3 + $0x184] sm:$0xf] %vm2076_vm1, %v10105_v49  ;;  %v10217_v38 = vpack.c.bf16 %v4593_v16, %v4593_v16  ;;  %v13320_v50 = vld [vmem:[%s15917_s7 + $0xa0] sm:$0xff]  ;;  %v13326_v48 = vld [vmem:[%s15917_s7 + $0x1d8] sm:$0xff]  ;;  %v4305_v49 = vpop.permute.xlu1 %4304 }
 0x244   : > { %4462 = vst.msk [vmem:[#allocation3 + $0xa8] sm:$0xf] %vm2597_vm2, %v4303_v63  ;;  %v9875_v21 = vpack.c.bf16 %v1801_v35, %v1801_v35  ;;  %v9986_v23 = vpack.c.bf16 %v2730_v10, %v2730_v10  ;;  %v5476_v0 = vld [vmem:[#allocation2 + $0x190] sm:$0xff]  ;;  %v16114_v30 = vpack.c.bf16 %v13154_v55, %v13154_v55  ;;  %v2731_v16 = vmul.f32 %v13320_v50, %v2667_v59  ;;  %v3603_v59 = vld [vmem:[#allocation2 + $0xe0] sm:$0xff] }
 0x245   : > { %5829 = vst.msk [vmem:[#allocation3 + $0x31c] sm:$0xf] %vm2076_vm1, %v10349_v25  ;;  %v2172_v41 = vld [vmem:[#allocation2 + $0x189] sm:$0xff]  ;;  %2118 = vst.msk [vmem:[#allocation3 + $0x334] sm:$0xf] %vm2076_vm1, %v9903_v36  ;;  %v5540_v55 = vmul.f32 %v13326_v48, %v5476_v0  ;;  %v10066_v6 = vpack.c.bf16 %v13193_v29, %v13193_v29  ;;  %v10067_v63 = vpack.c.bf16 %v13202_v13, %v13202_v13  ;;  %v2173_v0 = vld [vmem:[#allocation2 + $0x191] sm:$0xff] }
 0x246   : > { %1711 = vst.msk [vmem:[#allocation2 + $0x1b8] sm:$0xff] %vm559_vm0, %v1639_v62  ;;  %2503 = vrot.lane.b32.xlu0 %v16114_v30, %s11331_s12  ;;  %v2236_v35 = vmul.f32 %v12937_v17, %v2172_v41  ;;  %v2693_v10 = vld [vmem:[#allocation2 + $0x18a] sm:$0xff]  ;;  %v5231_v62 = vpop.permute.xlu0 %5230  ;;  %v9987_v61 = vpack.c.bf16 %v2731_v16, %v2731_v16  ;;  %v9956_v13 = vpack.c.bf16 %v13226_v1, %v13226_v1 }
 0x247   : > { %4880 = vst.msk [vmem:[#allocation3 + $0x174] sm:$0xf] %vm2076_vm1, %v10216_v46  ;;  %4881 = vst.msk [vmem:[#allocation3 + $0x188] sm:$0xf] %vm2076_vm1, %v10217_v38  ;;  %v4530_v25 = vld [vmem:[#allocation2 + $0xce] sm:$0xff]  ;;  %v2757_v17 = vmul.f32 %v13231_v27, %v2693_v10  ;;  %3430 = vrot.lane.b32.xlu1 %v10066_v6, %s11331_s12  ;;  %v13358_v6 = vmul.f32 %v13035_v60, %v3603_v59 }
 0x248   : > { %2089 = vst.msk [vmem:[#allocation3 + $0xf0] sm:$0xf] %vm2076_vm1, %v9874_v47  ;;  %2090 = vst.msk [vmem:[#allocation3 + $0x104] sm:$0xf] %vm2076_vm1, %v9875_v21  ;;  %v3101_v29 = vld [vmem:[#allocation2 + $0x18f] sm:$0xff]  ;;  %v10348_v21 = vpack.c.bf16 %v5540_v55, %v5540_v55  ;;  %v9957_v60 = vpack.c.bf16 %v2236_v35, %v2236_v35 }
 0x249   : > { %3018 = vst.msk [vmem:[#allocation3 + $0xf4] sm:$0xf] %vm2076_vm1, %v9986_v23  ;;  %v1765_v36 = vld [vmem:[#allocation2 + $0x190] sm:$0xff]  ;;  %v13351_v23 = vmul.f32 %v12949_v58, %v3100_v14  ;;  %v5478_v41 = vld [vmem:[#allocation2 + $0x1a0] sm:$0xff]  ;;  %3019 = vst.msk [vmem:[#allocation3 + $0x108] sm:$0xf] %vm2076_vm1, %v9987_v61  ;;  %v3165_v59 = vmul.f32 %v12957_v40, %v3101_v29  ;;  %v13378_v61 = vmul.f32 %v12967_v44, %v2173_v0 }
 0x24a   : > { %4463 = vst.msk [vmem:[#allocation3 + $0xbc] sm:$0xf] %vm2597_vm2, %v4305_v49  ;;  %v2694_v46 = vld [vmem:[#allocation2 + $0x192] sm:$0xff]  ;;  %5390 = vst.msk [vmem:[#allocation3 + $0xac] sm:$0xf] %vm2597_vm2, %v5231_v62  ;;  %v1828_v30 = vmul.f32 %v13292_v56, %v1765_v36  ;;  %3432 = vrot.lane.b32.xlu0 %v10067_v63, %s11331_s12  ;;  %v13363_v58 = vld [vmem:[%s15917_s7 + $0x180] sm:$0xff]  ;;  %v5233_v62 = vpop.permute.xlu1 %5232 }
 0x24b   : > { %v13343_v38 = vld [vmem:[%s15917_s7 + $0x110] sm:$0xff]  ;;  %v2174_v16 = vld [vmem:[#allocation2 + $0x199] sm:$0xff]  ;;  %v2758_v55 = vmul.f32 %v13299_v42, %v2694_v46  ;;  %v13366_v1 = vmul.f32 %v13363_v58, %v4530_v25  ;;  %5828 = vst.msk [vmem:[#allocation3 + $0x308] sm:$0xf] %vm2076_vm1, %v10348_v21  ;;  %v13372_v14 = vld [vmem:[%s15917_s7 + $0x1e8] sm:$0xff]  ;;  %v1516_v25 = vpop.permute.xlu0 %1515  ;;  %2507 = vrot.lane.b32.xlu1 %v9957_v60, %s11331_s12 }
 0x24c   : > { %v3666_v47 = vmul.f32 %v13343_v38, %v3602_v57  ;;  %v3102_v49 = vld [vmem:[#allocation2 + $0x197] sm:$0xff]  ;;  %v10013_v57 = vpack.c.bf16 %v2757_v17, %v2757_v17  ;;  %16115 = vst [vmem:[#allocation23_spill] sm:$0xff] %v13372_v14  ;;  %v5542_v10 = vmul.f32 %v13372_v14, %v5478_v41  ;;  %v3103_v63 = vld [vmem:[#allocation2 + $0x19f] sm:$0xff]  ;;  %v9902_v17 = vpack.c.bf16 %v1828_v30, %v1828_v30  ;;  %v13387_v40 = vld [vmem:[%s15917_s7 + $0x68] sm:$0xff] }
 0x24d   : > { %v2695_v36 = vld [vmem:[#allocation2 + $0x19a] sm:$0xff]  ;;  %v4531_v46 = vld [vmem:[#allocation2 + $0xe6] sm:$0xff]  ;;  %5391 = vst.msk [vmem:[#allocation3 + $0xc0] sm:$0xf] %vm2597_vm2, %v5233_v62  ;;  %v10014_v8 = vpack.c.bf16 %v2758_v55, %v2758_v55  ;;  %v1640_v35 = vmax.f32 %v12243_v3, %v1516_v25  ;;  %v13390_v29 = vmul.f32 %v13387_v40, %v2174_v16  ;;  %v13393_v44 = vmul.f32 %v12980_v53, %v3102_v49  ;;  %v2696_v49 = vld [vmem:[#allocation2 + $0x1b2] sm:$0xff] }
 0x24e   : > { %3045 = vst.msk [vmem:[#allocation3 + $0x310] sm:$0xf] %vm2076_vm1, %v10013_v57  ;;  %v2759_v21 = vmul.f32 %v13320_v50, %v2695_v36  ;;  %v10106_v41 = vpack.c.bf16 %v3666_v47, %v3666_v47  ;;  %v10350_v14 = vpack.c.bf16 %v5542_v10, %v5542_v10  ;;  %2117 = vst.msk [vmem:[#allocation3 + $0x320] sm:$0xf] %vm2076_vm1, %v9902_v17  ;;  %v1768_v0 = vld [vmem:[#allocation2 + $0x1b8] sm:$0xff]  ;;  %2505 = vrot.lane.b32.xlu0 %v9956_v13, %s11331_s12  ;;  %v13409_v53 = vld [vmem:[%s15917_s7 + $0x8] sm:$0xff]  ;;  %v1518_v57 = vpop.permute.xlu1 %1517 }
 0x24f   : > { %v13400_v3 = vld [vmem:[%s15917_s7 + $0xd8] sm:$0xff]  ;;  %3046 = vst.msk [vmem:[#allocation3 + $0x324] sm:$0xf] %vm2076_vm1, %v10014_v8  ;;  %v1831_v16 = vmul.f32 %v13409_v53, %v1768_v0  ;;  %v4595_v13 = vmul.f32 %v13057_v12, %v4531_v46  ;;  %v10069_v55 = vpack.c.bf16 %v3165_v59, %v3165_v59  ;;  %v13419_v8 = vld [vmem:[%s15917_s7 + $0x70] sm:$0xff]  ;;  %v1641_v60 = vmax.f32 %v12288_v32, %v1518_v57  ;;  %v3604_v25 = vld [vmem:[#allocation2 + $0xe8] sm:$0xff] }
 0x250   : > { %v13403_v47 = vmul.f32 %v13400_v3, %v3103_v63  ;;  %v10015_v30 = vpack.c.bf16 %v2759_v21, %v2759_v21  ;;  %3954 = vst.msk [vmem:[#allocation3 + $0x198] sm:$0xf] %vm2076_vm1, %v10106_v41  ;;  %5830 = vst.msk [vmem:[#allocation3 + $0x330] sm:$0xf] %vm2076_vm1, %v10350_v14  ;;  %v2760_v10 = vmul.f32 %v13419_v8, %v2696_v49  ;;  %v2668_v62 = vld [vmem:[#allocation2 + $0x92] sm:$0xff]  ;;  %v4307_v63 = vpop.permute.xlu0 %4306  ;;  %v2669_v46 = vld [vmem:[#allocation2 + $0x9a] sm:$0xff] }
 0x251   : > { %1712 = vst.msk [vmem:[#allocation2 + $0x1c0] sm:$0xff] %vm559_vm0, %v1640_v35  ;;  %v10068_v17 = vpack.c.bf16 %v13351_v23, %v13351_v23  ;;  %v9958_v14 = vpack.c.bf16 %v13378_v61, %v13378_v61  ;;  %v9905_v59 = vpack.c.bf16 %v1831_v16, %v1831_v16  ;;  %v1767_v36 = vld [vmem:[#allocation2 + $0x1b0] sm:$0xff]  ;;  %3436 = vrot.lane.b32.xlu1 %v10069_v55, %s11331_s12  ;;  %v13437_v61 = vld [vmem:[%s15917_s7] sm:$0xff]  ;;  %1713 = vst.msk [vmem:[#allocation2 + $0x1c8] sm:$0xff] %vm559_vm0, %v1641_v60 }
 0x252   : > { %3047 = vst.msk [vmem:[#allocation3 + $0x338] sm:$0xf] %vm2076_vm1, %v10015_v30  ;;  %v9959_v32 = vpack.c.bf16 %v13390_v29, %v13390_v29  ;;  %v10070_v21 = vpack.c.bf16 %v13393_v44, %v13393_v44  ;;  %v2175_v23 = vld [vmem:[#allocation2 + $0x1b1] sm:$0xff]  ;;  %v1830_v41 = vmul.f32 %v13437_v61, %v1767_v36  ;;  %v10016_v35 = vpack.c.bf16 %v2760_v10, %v2760_v10  ;;  %v4309_v10 = vpop.permute.xlu1 %4308 }
 0x253   : > { %4464 = vst.msk [vmem:[#allocation3 + $0xd0] sm:$0xf] %vm2597_vm2, %v4307_v63  ;;  %v3605_v0 = vld [vmem:[#allocation2 + $0xf0] sm:$0xff]  ;;  %3434 = vrot.lane.b32.xlu0 %v10068_v17, %s11331_s12  ;;  %v10071_v29 = vpack.c.bf16 %v13403_v47, %v13403_v47  ;;  %v10107_v16 = vpack.c.bf16 %v13358_v6, %v13358_v6  ;;  %v10218_v49 = vpack.c.bf16 %v13366_v1, %v13366_v1  ;;  %4465 = vst.msk [vmem:[#allocation3 + $0xe4] sm:$0xf] %vm2597_vm2, %v4309_v10 }
 0x254   : > { %v4532_v30 = vld [vmem:[#allocation2 + $0xee] sm:$0xff]  ;;  %2120 = vst.msk [vmem:[#allocation3 + $0x35c] sm:$0xf] %vm2076_vm1, %v9905_v59  ;;  %v10219_v57 = vpack.c.bf16 %v4595_v13, %v4595_v13  ;;  %v4533_v55 = vld [vmem:[#allocation2 + $0xf6] sm:$0xff]  ;;  %v9904_v36 = vpack.c.bf16 %v1830_v41, %v1830_v41  ;;  %3048 = vst.msk [vmem:[#allocation3 + $0x34c] sm:$0xf] %vm2076_vm1, %v10016_v35  ;;  %v1803_v60 = vmul.f32 %v13409_v53, %v13020_v37  ;;  %v5235_v1 = vpop.permute.xlu0 %5234 }
 0x255   : > { %v3104_v63 = vld [vmem:[#allocation2 + $0x1b7] sm:$0xff]  ;;  %v2732_v17 = vmul.f32 %v13419_v8, %v2668_v62  ;;  %3955 = vst.msk [vmem:[#allocation3 + $0x1ac] sm:$0xf] %vm2076_vm1, %v10107_v16  ;;  %4882 = vst.msk [vmem:[#allocation3 + $0x19c] sm:$0xf] %vm2076_vm1, %v10218_v49  ;;  %v3668_v37 = vmul.f32 %v13046_v45, %v3604_v25  ;;  %v3669_v62 = vmul.f32 %v13172_v2, %v3605_v0  ;;  %2511 = vrot.lane.b32.xlu1 %v9959_v32, %s11331_s12 }
 0x256   : > { %v13456_v59 = vld [vmem:[%s15917_s7 + $0x78] sm:$0xff]  ;;  %4883 = vst.msk [vmem:[#allocation3 + $0x1b0] sm:$0xf] %vm2076_vm1, %v10219_v57  ;;  %2119 = vst.msk [vmem:[#allocation3 + $0x348] sm:$0xf] %vm2076_vm1, %v9904_v36  ;;  %v4597_v16 = vmul.f32 %v13209_v24, %v4533_v55  ;;  %v13490_v24 = vld [vmem:[%s15917_s7 + $0x1c0] sm:$0xff]  ;;  %v5237_v55 = vpop.permute.xlu1 %5236 }
 0x257   : > { %v2733_v6 = vmul.f32 %v13456_v59, %v2669_v46  ;;  %v13463_v13 = vld [vmem:[%s15917_s7 + $0x38] sm:$0xff]  ;;  %v4596_v46 = vmul.f32 %v13063_v5, %v4532_v30  ;;  %5392 = vst.msk [vmem:[#allocation3 + $0xd4] sm:$0xf] %vm2597_vm2, %v5235_v1  ;;  %v9988_v35 = vpack.c.bf16 %v2732_v17, %v2732_v17  ;;  %2509 = vrot.lane.b32.xlu0 %v9958_v14, %s11331_s12  ;;  %v13482_v5 = vld [vmem:[%s15917_s7 + $0xa8] sm:$0xff]  ;;  %v13496_v36 = vld [vmem:[%s15917_s7 + $0x40] sm:$0xff] }
 0x258   : > { %v13466_v41 = vmul.f32 %v13463_v13, %v2175_v23  ;;  %v9877_v23 = vpack.c.bf16 %v1803_v60, %v1803_v60  ;;  %v5480_v49 = vld [vmem:[#allocation2 + $0x1c0] sm:$0xff]  ;;  %v13485_v2 = vmul.f32 %v13482_v5, %v3104_v63  ;;  %v10108_v32 = vpack.c.bf16 %v3668_v37, %v3668_v37  ;;  %v13502_v63 = vld [vmem:[%s15917_s7 + $0xb0] sm:$0xff]  ;;  %5393 = vst.msk [vmem:[#allocation3 + $0xe8] sm:$0xf] %vm2597_vm2, %v5237_v55 }
 0x259   : > { %v9989_v10 = vpack.c.bf16 %v2733_v6, %v2733_v6  ;;  %v2176_v57 = vld [vmem:[#allocation2 + $0x1b9] sm:$0xff]  ;;  %v10109_v0 = vpack.c.bf16 %v3669_v62, %v3669_v62  ;;  %v10220_v30 = vpack.c.bf16 %v4596_v46, %v4596_v46  ;;  %v5544_v14 = vmul.f32 %v13490_v24, %v5480_v49  ;;  %3020 = vst.msk [vmem:[#allocation3 + $0x11c] sm:$0xf] %vm2076_vm1, %v9988_v35  ;;  %v1520_v62 = vpop.permute.xlu0 %1519 }
 0x25a   : > { %v3105_v25 = vld [vmem:[#allocation2 + $0x1bf] sm:$0xff]  ;;  %v2240_v60 = vmul.f32 %v13496_v36, %v2176_v57  ;;  %2092 = vst.msk [vmem:[#allocation3 + $0x12c] sm:$0xf] %vm2076_vm1, %v9877_v23  ;;  %v10221_v37 = vpack.c.bf16 %v4597_v16, %v4597_v16  ;;  %3956 = vst.msk [vmem:[#allocation3 + $0x1c0] sm:$0xf] %vm2076_vm1, %v10108_v32  ;;  %v1804_v23 = vmul.f32 %v13002_v26, %v13027_v52  ;;  %v5481_v57 = vld [vmem:[#allocation2 + $0x1c8] sm:$0xff]  ;;  %3440 = vrot.lane.b32.xlu1 %v10071_v29, %s11331_s12 }
 0x25b   : > { %v13505_v17 = vmul.f32 %v13502_v63, %v3105_v25  ;;  %v2697_v6 = vld [vmem:[#allocation2 + $0x1ba] sm:$0xff]  ;;  %3021 = vst.msk [vmem:[#allocation3 + $0x130] sm:$0xf] %vm2076_vm1, %v9989_v10  ;;  %3957 = vst.msk [vmem:[#allocation3 + $0x1d4] sm:$0xf] %vm2076_vm1, %v10109_v0  ;;  %v1805_v35 = vmul.f32 %v13101_v34, %v13145_v28  ;;  %v2670_v10 = vld [vmem:[#allocation2 + $0xa2] sm:$0xff]  ;;  %v10352_v16 = vpack.c.bf16 %v5544_v14, %v5544_v14  ;;  %3438 = vrot.lane.b32.xlu0 %v10070_v21, %s11331_s12 }
 0x25c   : > { %v1769_v1 = vld [vmem:[#allocation2 + $0x1c0] sm:$0xff]  ;;  %v2761_v46 = vmul.f32 %v13456_v59, %v2697_v6  ;;  %4884 = vst.msk [vmem:[#allocation3 + $0x1c4] sm:$0xf] %vm2076_vm1, %v10220_v30  ;;  %v1642_v25 = vmax.f32 %v12306_v51, %v1520_v62  ;;  %v9960_v32 = vpack.c.bf16 %v13466_v41, %v13466_v41  ;;  %4885 = vst.msk [vmem:[#allocation3 + $0x1d8] sm:$0xf] %vm2076_vm1, %v10221_v37  ;;  %v1770_v29 = vld [vmem:[#allocation2 + $0x1c8] sm:$0xff]  ;;  %v4313_v41 = vpop.permute.xlu1 %4312 }
 0x25d   : > { %v1832_v49 = vmul.f32 %v13002_v26, %v1769_v1  ;;  %v2177_v0 = vld [vmem:[#allocation2 + $0x1c1] sm:$0xff]  ;;  %v2671_v26 = vld [vmem:[#allocation2 + $0xaa] sm:$0xff]  ;;  %v5545_v52 = vmul.f32 %v13088_v7, %v5481_v57  ;;  %v9961_v51 = vpack.c.bf16 %v2240_v60, %v2240_v60  ;;  %v10072_v28 = vpack.c.bf16 %v13485_v2, %v13485_v2  ;;  %v3606_v14 = vld [vmem:[#allocation2 + $0xf8] sm:$0xff]  ;;  %5832 = vst.msk [vmem:[#allocation3 + $0x358] sm:$0xf] %vm2076_vm1, %v10352_v16  ;;  %v4311_v2 = vpop.permute.xlu0 %4310 }
 0x25e   : > { %v10017_v47 = vpack.c.bf16 %v2761_v46, %v2761_v46  ;;  %v2698_v30 = vld [vmem:[#allocation2 + $0x1c2] sm:$0xff]  ;;  %1714 = vst.msk [vmem:[#allocation2 + $0x1d0] sm:$0xff] %vm559_vm0, %v1642_v25  ;;  %v1833_v7 = vmul.f32 %v13101_v34, %v1770_v29  ;;  %v9878_v44 = vpack.c.bf16 %v1804_v23, %v1804_v23  ;;  %v10073_v62 = vpack.c.bf16 %v13505_v17, %v13505_v17 }
 0x25f   : > { %v9906_v55 = vpack.c.bf16 %v1832_v49, %v1832_v49  ;;  %v2762_v6 = vmul.f32 %v13095_v9, %v2698_v30  ;;  %v3607_v21 = vld [vmem:[#allocation2 + $0x100] sm:$0xff]  ;;  %v10353_v37 = vpack.c.bf16 %v5545_v52, %v5545_v52  ;;  %4467 = vst.msk [vmem:[#allocation3 + $0x10c] sm:$0xf] %vm2597_vm2, %v4313_v41  ;;  %v13545_v46 = vld [vmem:[%s15917_s7 + $0x48] sm:$0xff]  ;;  %v9879_v49 = vpack.c.bf16 %v1805_v35, %v1805_v35  ;;  %v2672_v30 = vld [vmem:[#allocation2 + $0xb2] sm:$0xff] }
 0x260   : > { %v4534_v60 = vld [vmem:[#allocation2 + $0xfe] sm:$0xff]  ;;  %v4535_v1 = vld [vmem:[#allocation2 + $0x106] sm:$0xff]  ;;  %v13548_v34 = vmul.f32 %v13545_v46, %v2177_v0  ;;  %3049 = vst.msk [vmem:[#allocation3 + $0x360] sm:$0xf] %vm2076_vm1, %v10017_v47  ;;  %2515 = vrot.lane.b32.xlu1 %v9961_v51, %s11331_s12  ;;  %v9907_v23 = vpack.c.bf16 %v1833_v7, %v1833_v7  ;;  %2093 = vst.msk [vmem:[#allocation3 + $0x140] sm:$0xf] %vm2076_vm1, %v9878_v44  ;;  %v2734_v17 = vmul.f32 %v13095_v9, %v2670_v10  ;;  %v5241_v51 = vpop.permute.xlu1 %5240 }
 0x261   : > { %4466 = vst.msk [vmem:[#allocation3 + $0xf8] sm:$0xf] %vm2597_vm2, %v4311_v2  ;;  %v10018_v16 = vpack.c.bf16 %v2762_v6, %v2762_v6  ;;  %v2735_v57 = vmul.f32 %v13142_v33, %v2671_v26  ;;  %2513 = vrot.lane.b32.xlu0 %v9960_v32, %s11331_s12  ;;  %v3670_v35 = vmul.f32 %v13179_v15, %v3606_v14  ;;  %5395 = vst.msk [vmem:[#allocation3 + $0x110] sm:$0xf] %vm2597_vm2, %v5241_v51  ;;  %v5239_v15 = vpop.permute.xlu0 %5238 }
 0x262   : > { %2121 = vst.msk [vmem:[#allocation3 + $0x370] sm:$0xf] %vm2076_vm1, %v9906_v55  ;;  %5833 = vst.msk [vmem:[#allocation3 + $0x36c] sm:$0xf] %vm2076_vm1, %v10353_v37  ;;  %v3671_v25 = vmul.f32 %v13237_v22, %v3607_v21  ;;  %v4598_v0 = vmul.f32 %v13218_v54, %v4534_v60  ;;  %v4599_v52 = vmul.f32 %v13277_v43, %v4535_v1  ;;  %v3106_v22 = vld [vmem:[#allocation2 + $0x1c7] sm:$0xff]  ;;  %v13592_v60 = vld [vmem:[%s15917_s7 + $0xb8] sm:$0xff] }
 0x263   : > { %2094 = vst.msk [vmem:[#allocation3 + $0x154] sm:$0xf] %vm2076_vm1, %v9879_v49  ;;  %2122 = vst.msk [vmem:[#allocation3 + $0x384] sm:$0xf] %vm2076_vm1, %v9907_v23  ;;  %v9990_v9 = vpack.c.bf16 %v2734_v17, %v2734_v17  ;;  %v9991_v10 = vpack.c.bf16 %v2735_v57, %v2735_v57  ;;  %v1806_v32 = vmul.f32 %v13136_v20, %v13147_v19  ;;  %v16116_v17 = vld [vmem:[#allocation28_spill] sm:$0xff] }
 0x264   : > { %3050 = vst.msk [vmem:[#allocation3 + $0x374] sm:$0xf] %vm2076_vm1, %v10018_v16  ;;  %v1807_v26 = vmul.f32 %v13292_v56, %v13195_v31  ;;  %v10110_v54 = vpack.c.bf16 %v3670_v35, %v3670_v35  ;;  %v10111_v47 = vpack.c.bf16 %v3671_v25, %v3671_v25  ;;  %v10222_v43 = vpack.c.bf16 %v4598_v0, %v4598_v0  ;;  %v1522_v6 = vpop.permute.xlu1 %1521  ;;  %v13605_v25 = vld [vmem:[%s15917_s7 + $0xc0] sm:$0xff] }
 0x265   : > { %v10223_v29 = vpack.c.bf16 %v4599_v52, %v4599_v52  ;;  %5394 = vst.msk [vmem:[#allocation3 + $0xfc] sm:$0xf] %vm2597_vm2, %v5239_v15  ;;  %3444 = vrot.lane.b32.xlu1 %v10073_v62, %s11331_s12  ;;  %v9880_v19 = vpack.c.bf16 %v1806_v32, %v1806_v32  ;;  %v5482_v14 = vld [vmem:[#allocation2 + $0x1d0] sm:$0xff]  ;;  %3442 = vrot.lane.b32.xlu0 %v10072_v28, %s11331_s12  ;;  %v1524_v62 = vpop.permute.xlu0 %1523  ;;  %v2673_v0 = vld [vmem:[#allocation2 + $0xba] sm:$0xff]  ;;  %v3608_v52 = vld [vmem:[#allocation2 + $0x108] sm:$0xff] }
 0x266   : > { %3022 = vst.msk [vmem:[#allocation3 + $0x144] sm:$0xf] %vm2076_vm1, %v9990_v9  ;;  %3023 = vst.msk [vmem:[#allocation3 + $0x158] sm:$0xf] %vm2076_vm1, %v9991_v10  ;;  %v2178_v31 = vld [vmem:[#allocation2 + $0x1c9] sm:$0xff]  ;;  %v9881_v55 = vpack.c.bf16 %v1807_v26, %v1807_v26  ;;  %v5546_v7 = vmul.f32 %v13118_v4, %v5482_v14  ;;  %v9962_v44 = vpack.c.bf16 %v13548_v34, %v13548_v34 }
 0x267   : > { %v3107_v41 = vld [vmem:[#allocation2 + $0x1cf] sm:$0xff]  ;;  %3958 = vst.msk [vmem:[#allocation3 + $0x1e8] sm:$0xf] %vm2076_vm1, %v10110_v54  ;;  %3959 = vst.msk [vmem:[#allocation3 + $0x1fc] sm:$0xf] %vm2076_vm1, %v10111_v47  ;;  %v3170_v1 = vmul.f32 %v13592_v60, %v3106_v22  ;;  %v1643_v2 = vmax.f32 %v12367_v39, %v1522_v6  ;;  %v2736_v23 = vmul.f32 %v13231_v27, %v2672_v30 }
 0x268   : > { %4886 = vst.msk [vmem:[#allocation3 + $0x1ec] sm:$0xf] %vm2076_vm1, %v10222_v43  ;;  %4887 = vst.msk [vmem:[#allocation3 + $0x200] sm:$0xf] %vm2076_vm1, %v10223_v29  ;;  %v13586_v28 = vld [vmem:[%s15917_s7 + $0x50] sm:$0xff]  ;;  %v10354_v16 = vpack.c.bf16 %v5546_v7, %v5546_v7  ;;  %v1644_v57 = vmax.f32 %v16116_v17, %v1524_v62  ;;  %v3171_v39 = vmul.f32 %v13605_v25, %v3107_v41  ;;  %v1526_v51 = vpop.permute.xlu1 %1525  ;;  %v16117_v26 = vld [vmem:[#allocation29_spill] sm:$0xff] }
 0x269   : > { %v2242_v21 = vmul.f32 %v13586_v28, %v2178_v31  ;;  %v2699_v37 = vld [vmem:[#allocation2 + $0x1ca] sm:$0xff]  ;;  %2095 = vst.msk [vmem:[#allocation3 + $0x168] sm:$0xf] %vm2076_vm1, %v9880_v19  ;;  %2096 = vst.msk [vmem:[#allocation3 + $0x17c] sm:$0xf] %vm2076_vm1, %v9881_v55  ;;  %2517 = vrot.lane.b32.xlu0 %v9962_v44, %s11331_s12  ;;  %v10074_v9 = vpack.c.bf16 %v3170_v1, %v3170_v1  ;;  %v1645_v15 = vmax.f32 %v16117_v26, %v1526_v51  ;;  %v1528_v22 = vpop.permute.xlu0 %1527  ;;  %v4537_v29 = vld [vmem:[#allocation2 + $0x116] sm:$0xff] }
 0x26a   : > { %v1771_v4 = vld [vmem:[#allocation2 + $0x1d0] sm:$0xff]  ;;  %v2763_v34 = vmul.f32 %v13142_v33, %v2699_v37  ;;  %1715 = vst.msk [vmem:[#allocation2 + $0x1d8] sm:$0xff] %vm559_vm0, %v1643_v2  ;;  %1716 = vst.msk [vmem:[#allocation2 + $0x1e0] sm:$0xff] %vm559_vm0, %v1644_v57  ;;  %v9992_v54 = vpack.c.bf16 %v2736_v23, %v2736_v23  ;;  %v2737_v47 = vmul.f32 %v13299_v42, %v2673_v0  ;;  %v3610_v19 = vld [vmem:[#allocation2 + $0x128] sm:$0xff] }
 0x26b   : > { %v1834_v49 = vmul.f32 %v13136_v20, %v1771_v4  ;;  %v9963_v35 = vpack.c.bf16 %v2242_v21, %v2242_v21  ;;  %5834 = vst.msk [vmem:[#allocation3 + $0x380] sm:$0xf] %vm2076_vm1, %v10354_v16  ;;  %v3609_v10 = vld [vmem:[#allocation2 + $0x110] sm:$0xff]  ;;  %v3672_v43 = vmul.f32 %v13251_v18, %v3608_v52  ;;  %v10075_v41 = vpack.c.bf16 %v3171_v39, %v3171_v39  ;;  %v13630_v37 = vld [vmem:[%s15917_s7 + $0xe0] sm:$0xff]  ;;  %v16119_v62 = vld [vmem:[#allocation31_spill] sm:$0xff] }
 0x26c   : > { %v10019_v20 = vpack.c.bf16 %v2763_v34, %v2763_v34  ;;  %v4536_v32 = vld [vmem:[#allocation2 + $0x10e] sm:$0xff]  ;;  %1717 = vst.msk [vmem:[#allocation2 + $0x1e8] sm:$0xff] %vm559_vm0, %v1645_v15  ;;  %v9993_v7 = vpack.c.bf16 %v2737_v47, %v2737_v47  ;;  %v3673_v44 = vmul.f32 %v13343_v38, %v3609_v10  ;;  %v1530_v18 = vpop.permute.xlu1 %1529  ;;  %v4601_v1 = vmul.f32 %v13363_v58, %v4537_v29  ;;  %v16120_v23 = vld [vmem:[#allocation32_spill] sm:$0xff] }
 0x26d   : > { %v9908_v33 = vpack.c.bf16 %v1834_v49, %v1834_v49  ;;  %2519 = vrot.lane.b32.xlu1 %v9963_v35, %s11331_s12  ;;  %v3611_v30 = vld [vmem:[#allocation2 + $0x130] sm:$0xff]  ;;  %3446 = vrot.lane.b32.xlu0 %v10074_v9, %s11331_s12  ;;  %3024 = vst.msk [vmem:[#allocation3 + $0x16c] sm:$0xf] %vm2076_vm1, %v9992_v54  ;;  %v10112_v6 = vpack.c.bf16 %v3672_v43, %v3672_v43  ;;  %v1532_v34 = vpop.permute.xlu0 %1531  ;;  %v16121_v10 = vld [vmem:[#allocation4_spill] sm:$0xff]  ;;  %v13659_v54 = vld [vmem:[%s15917_s7 + $0xc8] sm:$0xff] }
 0x26e   : > { %3051 = vst.msk [vmem:[#allocation3 + $0x388] sm:$0xf] %vm2076_vm1, %v10019_v20  ;;  %v16118_v14 = vld [vmem:[#allocation30_spill] sm:$0xff]  ;;  %v4600_v21 = vmul.f32 %v13283_v11, %v4536_v32  ;;  %v3674_v4 = vmul.f32 %v13630_v37, %v3610_v19  ;;  %v3675_v2 = vmul.f32 %v13046_v45, %v3611_v30  ;;  %v1647_v38 = vmax.f32 %v16119_v62, %v1530_v18  ;;  %v13644_v20 = vld [vmem:[%s15917_s7 + $0x58] sm:$0xff]  ;;  %v13653_v15 = vld [vmem:[%s15917_s7 + $0x60] sm:$0xff] }
 0x26f   : > { %2123 = vst.msk [vmem:[#allocation3 + $0x398] sm:$0xf] %vm2076_vm1, %v9908_v33  ;;  %v1646_v31 = vmax.f32 %v16118_v14, %v1528_v22  ;;  %v4538_v55 = vld [vmem:[#allocation2 + $0x12e] sm:$0xff]  ;;  %3025 = vst.msk [vmem:[#allocation3 + $0x180] sm:$0xf] %vm2076_vm1, %v9993_v7  ;;  %v10113_v49 = vpack.c.bf16 %v3673_v44, %v3673_v44  ;;  %v1648_v16 = vmax.f32 %v16120_v23, %v1532_v34 }
 0x270   : > { %3960 = vst.msk [vmem:[#allocation3 + $0x210] sm:$0xf] %vm2076_vm1, %v10112_v6  ;;  %v4602_v11 = vmul.f32 %v13057_v12, %v4538_v55  ;;  %v10224_v35 = vpack.c.bf16 %v4600_v21, %v4600_v21  ;;  %v10225_v39 = vpack.c.bf16 %v4601_v1, %v4601_v1  ;;  %v10114_v0 = vpack.c.bf16 %v3674_v4, %v3674_v4  ;;  %v1534_v26 = vpop.permute.xlu1 %1533  ;;  %v16122_v30 = vld [vmem:[#allocation33_spill] sm:$0xff]  ;;  %v16123_v18 = vld [vmem:[#allocation34_spill] sm:$0xff] }
 0x271   : > { %1718 = vst.msk [vmem:[#allocation2 + $0x200] sm:$0xff] %vm559_vm0, %v1646_v31  ;;  %3448 = vrot.lane.b32.xlu1 %v10075_v41, %s11331_s12  ;;  %v5483_v58 = vld [vmem:[#allocation2 + $0x1d8] sm:$0xff]  ;;  %v5484_v52 = vld [vmem:[#allocation2 + $0x1e0] sm:$0xff]  ;;  %1719 = vst.msk [vmem:[#allocation2 + $0x208] sm:$0xff] %vm559_vm0, %v1647_v38  ;;  %v10115_v9 = vpack.c.bf16 %v3675_v2, %v3675_v2  ;;  %v1649_v14 = vmax.f32 %v16122_v30, %v1534_v26  ;;  %v1536_v31 = vpop.permute.xlu0 %1535 }
 0x272   : > { %v2179_v17 = vld [vmem:[#allocation2 + $0x1d1] sm:$0xff]  ;;  %v5547_v45 = vmul.f32 %v13326_v48, %v5483_v58  ;;  %v2180_v33 = vld [vmem:[#allocation2 + $0x1d9] sm:$0xff]  ;;  %3961 = vst.msk [vmem:[#allocation3 + $0x224] sm:$0xf] %vm2076_vm1, %v10113_v49  ;;  %v5548_v32 = vmul.f32 %v16121_v10, %v5484_v52  ;;  %4888 = vst.msk [vmem:[#allocation3 + $0x214] sm:$0xf] %vm2076_vm1, %v10224_v35  ;;  %v10226_v29 = vpack.c.bf16 %v4602_v11, %v4602_v11 }
 0x273   : > { %v3108_v57 = vld [vmem:[#allocation2 + $0x1d7] sm:$0xff]  ;;  %v2243_v12 = vmul.f32 %v13644_v20, %v2179_v17  ;;  %v3109_v51 = vld [vmem:[#allocation2 + $0x1df] sm:$0xff]  ;;  %1720 = vst.msk [vmem:[#allocation2 + $0x210] sm:$0xff] %vm559_vm0, %v1648_v16  ;;  %v2244_v22 = vmul.f32 %v13653_v15, %v2180_v33  ;;  %v5485_v44 = vld [vmem:[#allocation2 + $0x1e8] sm:$0xff]  ;;  %v1650_v21 = vmax.f32 %v16123_v18, %v1536_v31 }
 0x274   : > { %v3172_v47 = vmul.f32 %v13659_v54, %v3108_v57  ;;  %v1772_v43 = vld [vmem:[#allocation2 + $0x1d8] sm:$0xff]  ;;  %4889 = vst.msk [vmem:[#allocation3 + $0x228] sm:$0xf] %vm2076_vm1, %v10225_v39  ;;  %3962 = vst.msk [vmem:[#allocation3 + $0x238] sm:$0xf] %vm2076_vm1, %v10114_v0  ;;  %v10355_v19 = vpack.c.bf16 %v5547_v45, %v5547_v45  ;;  %v10356_v6 = vpack.c.bf16 %v5548_v32, %v5548_v32  ;;  %v13671_v4 = vld [vmem:[%s15917_s7 + $0xd0] sm:$0xff]  ;;  %v2470_v58 = vpop.permute.xlu1 %2469 }
 0x275   : > { %v9964_v41 = vpack.c.bf16 %v2243_v12, %v2243_v12  ;;  %v2700_v55 = vld [vmem:[#allocation2 + $0x1d2] sm:$0xff]  ;;  %v2701_v7 = vld [vmem:[#allocation2 + $0x1da] sm:$0xff]  ;;  %3963 = vst.msk [vmem:[#allocation3 + $0x24c] sm:$0xf] %vm2076_vm1, %v10115_v9  ;;  %v9965_v1 = vpack.c.bf16 %v2244_v22, %v2244_v22  ;;  %v3173_v2 = vmul.f32 %v13671_v4, %v3109_v51  ;;  %4890 = vst.msk [vmem:[#allocation3 + $0x23c] sm:$0xf] %vm2076_vm1, %v10226_v29  ;;  %v2472_v39 = vpop.permute.xlu0 %2471 }
 0x276   : > { %v2181_v62 = vld [vmem:[#allocation2 + $0x1e1] sm:$0xff]  ;;  %5835 = vst.msk [vmem:[#allocation3 + $0x394] sm:$0xf] %vm2076_vm1, %v10355_v19  ;;  %v16124_v38 = vld [vmem:[#allocation23_spill] sm:$0xff]  ;;  %v1835_v11 = vmul.f32 %v13292_v56, %v1772_v43  ;;  %5836 = vst.msk [vmem:[#allocation3 + $0x3a8] sm:$0xf] %vm2076_vm1, %v10356_v6  ;;  %v10076_v23 = vpack.c.bf16 %v3172_v47, %v3172_v47  ;;  %v2764_v16 = vmul.f32 %v13231_v27, %v2700_v55 }
 0x277   : > { %v5549_v34 = vmul.f32 %v16124_v38, %v5485_v44  ;;  %1721 = vst.msk [vmem:[#allocation2 + $0x218] sm:$0xff] %vm559_vm0, %v1649_v14  ;;  %2521 = vrot.lane.b32.xlu0 %v9964_v41, %s11331_s12  ;;  %1722 = vst.msk [vmem:[#allocation2 + $0x220] sm:$0xff] %vm559_vm0, %v1650_v21  ;;  %2523 = vrot.lane.b32.xlu1 %v9965_v1, %s11331_s12  ;;  %v2765_v17 = vmul.f32 %v13299_v42, %v2701_v7  ;;  %v1773_v57 = vld [vmem:[#allocation2 + $0x1e0] sm:$0xff]  ;;  %v1774_v51 = vld [vmem:[#allocation2 + $0x1f8] sm:$0xff] }
 0x278   : > { %v2182_v49 = vld [vmem:[#allocation2 + $0x1f9] sm:$0xff]  ;;  %2618 = vst.msk [vmem:[#allocation3 + $0x190] sm:$0xf] %vm2597_vm2, %v2470_v58  ;;  %v2245_v0 = vmul.f32 %v13387_v40, %v2181_v62  ;;  %v3110_v52 = vld [vmem:[#allocation2 + $0x1e7] sm:$0xff]  ;;  %v9909_v33 = vpack.c.bf16 %v1835_v11, %v1835_v11  ;;  %2619 = vst.msk [vmem:[#allocation3 + $0x1a4] sm:$0xf] %vm2597_vm2, %v2472_v39  ;;  %v10077_v10 = vpack.c.bf16 %v3173_v2, %v3173_v2  ;;  %v3399_v14 = vpop.permute.xlu1 %3398 }
 0x279   : > { %v10357_v35 = vpack.c.bf16 %v5549_v34, %v5549_v34  ;;  %v2246_v45 = vmul.f32 %v13463_v13, %v2182_v49  ;;  %v3111_v12 = vld [vmem:[#allocation2 + $0x1ff] sm:$0xff]  ;;  %v5487_v9 = vld [vmem:[#allocation2 + $0x208] sm:$0xff]  ;;  %v10020_v27 = vpack.c.bf16 %v2764_v16, %v2764_v16  ;;  %v10021_v32 = vpack.c.bf16 %v2765_v17, %v2765_v17  ;;  %3546 = vst.msk [vmem:[#allocation3 + $0x194] sm:$0xf] %vm2597_vm2, %v3399_v14  ;;  %v3401_v6 = vpop.permute.xlu0 %3400 }
 0x27a   : > { %v5551_v42 = vmul.f32 %v13490_v24, %v5487_v9  ;;  %v5488_v26 = vld [vmem:[#allocation2 + $0x210] sm:$0xff]  ;;  %v2183_v47 = vld [vmem:[#allocation2 + $0x201] sm:$0xff]  ;;  %2124 = vst.msk [vmem:[#allocation3 + $0x3ac] sm:$0xf] %vm2076_vm1, %v9909_v33  ;;  %v3174_v31 = vmul.f32 %v13400_v3, %v3110_v52  ;;  %v3175_v24 = vmul.f32 %v13482_v5, %v3111_v12  ;;  %v1837_v41 = vmul.f32 %v13437_v61, %v1774_v51 }
 0x27b   : > { %5837 = vst.msk [vmem:[#allocation3 + $0x3bc] sm:$0xf] %vm2076_vm1, %v10357_v35  ;;  %3450 = vrot.lane.b32.xlu0 %v10076_v23, %s11331_s12  ;;  %v2184_v22 = vld [vmem:[#allocation2 + $0x209] sm:$0xff]  ;;  %3452 = vrot.lane.b32.xlu1 %v10077_v10, %s11331_s12  ;;  %3052 = vst.msk [vmem:[#allocation3 + $0x39c] sm:$0xf] %vm2076_vm1, %v10020_v27  ;;  %v9966_v44 = vpack.c.bf16 %v2245_v0, %v2245_v0  ;;  %v9967_v18 = vpack.c.bf16 %v2246_v45, %v2246_v45  ;;  %v2703_v1 = vld [vmem:[#allocation2 + $0x1fa] sm:$0xff] }
 0x27c   : > { %v16125_v43 = vld [vmem:[#allocation5_spill] sm:$0xff]  ;;  %3053 = vst.msk [vmem:[#allocation3 + $0x3b0] sm:$0xf] %vm2076_vm1, %v10021_v32  ;;  %v10359_v7 = vpack.c.bf16 %v5551_v42, %v5551_v42  ;;  %v13706_v3 = vmul.f32 %v13545_v46, %v2184_v22  ;;  %v13709_v34 = vmul.f32 %v13496_v36, %v2183_v47  ;;  %v9911_v58 = vpack.c.bf16 %v1837_v41, %v1837_v41  ;;  %v11241_v23 = vld [vmem:[%s15917_s7 + $0x1d0] sm:$0xff]  ;;  %v1775_v52 = vld [vmem:[#allocation2 + $0x200] sm:$0xff] }
 0x27d   : > { %v1836_v29 = vmul.f32 %v16125_v43, %v1773_v57  ;;  %v11240_v19 = vld [vmem:[%s15917_s7 + $0x1c8] sm:$0xff]  ;;  %3547 = vst.msk [vmem:[#allocation3 + $0x1a8] sm:$0xf] %vm2597_vm2, %v3401_v6  ;;  %v1538_v57 = vpop.permute.xlu1 %1537  ;;  %v10078_v35 = vpack.c.bf16 %v3174_v31, %v3174_v31  ;;  %v10079_v39 = vpack.c.bf16 %v3175_v24, %v3175_v24  ;;  %v2767_v0 = vmul.f32 %v13419_v8, %v2703_v1  ;;  %v1777_v32 = vld [vmem:[#allocation2 + $0x210] sm:$0xff]  ;;  %v16127_v22 = vld [vmem:[#allocation20_spill] sm:$0xff] }
 0x27e   : > { %v5552_v30 = vmul.f32 %v11240_v19, %v5488_v26  ;;  %v2702_v55 = vld [vmem:[#allocation2 + $0x1e2] sm:$0xff]  ;;  %v5489_v62 = vld [vmem:[#allocation2 + $0x218] sm:$0xff]  ;;  %v3113_v49 = vld [vmem:[#allocation2 + $0x20f] sm:$0xff]  ;;  %5839 = vst.msk [vmem:[#allocation3 + $0x3e4] sm:$0xf] %vm2076_vm1, %v10359_v7  ;;  %v9969_v8 = vpack.c.bf16 %v13706_v3, %v13706_v3  ;;  %v9968_v43 = vpack.c.bf16 %v13709_v34, %v13709_v34  ;;  %v1838_v31 = vmul.f32 %v13409_v53, %v1775_v52 }
 0x27f   : > { %v9910_v21 = vpack.c.bf16 %v1836_v29, %v1836_v29  ;;  %v3112_v11 = vld [vmem:[#allocation2 + $0x207] sm:$0xff]  ;;  %v5553_v16 = vmul.f32 %v11241_v23, %v5489_v62  ;;  %2525 = vrot.lane.b32.xlu0 %v9966_v44, %s11331_s12  ;;  %v2766_v46 = vmul.f32 %v13320_v50, %v2702_v55  ;;  %2527 = vrot.lane.b32.xlu1 %v9967_v18, %s11331_s12  ;;  %v1540_v50 = vpop.permute.xlu0 %1539  ;;  %v1778_v42 = vld [vmem:[#allocation2 + $0x218] sm:$0xff] }
 0x280   : > { %v10360_v2 = vpack.c.bf16 %v5552_v30, %v5552_v30  ;;  %v5490_v17 = vld [vmem:[#allocation2 + $0x220] sm:$0xff]  ;;  %2126 = vst.msk [vmem:[#allocation3 + $0x3d4] sm:$0xf] %vm2076_vm1, %v9911_v58  ;;  %v1776_v45 = vld [vmem:[#allocation2 + $0x208] sm:$0xff]  ;;  %v13725_v10 = vmul.f32 %v13592_v60, %v3113_v49  ;;  %v1652_v47 = vmax.f32 %v16127_v22, %v1540_v50  ;;  %v2706_v29 = vld [vmem:[#allocation2 + $0x212] sm:$0xff]  ;;  %v10023_v60 = vpack.c.bf16 %v2767_v0, %v2767_v0 }
 0x281   : > { %2125 = vst.msk [vmem:[#allocation3 + $0x3c0] sm:$0xf] %vm2076_vm1, %v9910_v21  ;;  %v5554_v36 = vmul.f32 %v13326_v48, %v5490_v17  ;;  %v2705_v12 = vld [vmem:[#allocation2 + $0x20a] sm:$0xff]  ;;  %v10361_v33 = vpack.c.bf16 %v5553_v16, %v5553_v16  ;;  %v13728_v48 = vmul.f32 %v13502_v63, %v3112_v11  ;;  %v2704_v27 = vld [vmem:[#allocation2 + $0x202] sm:$0xff]  ;;  %v2707_v19 = vld [vmem:[#allocation2 + $0x21a] sm:$0xff]  ;;  %v10022_v63 = vpack.c.bf16 %v2766_v46, %v2766_v46  ;;  %v2474_v24 = vpop.permute.xlu1 %2473 }
 0x282   : > { %5840 = vst.msk [vmem:[#allocation3 + $0x3f8] sm:$0xf] %vm2076_vm1, %v10360_v2  ;;  %v16126_v51 = vld [vmem:[#allocation17_spill] sm:$0xff]  ;;  %v11242_v30 = vld [vmem:[%s15917_s7 + $0x10] sm:$0xff]  ;;  %v11003_v41 = vld [vmem:[%s15914_s4 + $0x80] sm:$0xff]   ;;  %v2768_v6 = vmul.f32 %v13456_v59, %v2704_v27  ;;  %v9912_v34 = vpack.c.bf16 %v1838_v31, %v1838_v31 }
 0x283   : > { %v1651_v9 = vmax.f32 %v16126_v51, %v1538_v57  ;;  %v10362_v26 = vpack.c.bf16 %v5554_v36, %v5554_v36  ;;  %5841 = vst.msk [vmem:[#allocation3 + $0x40c] sm:$0xf] %vm2076_vm1, %v10361_v33  ;;  %3454 = vrot.lane.b32.xlu0 %v10078_v35, %s11331_s12  ;;  %v1839_v14 = vmul.f32 %v11242_v30, %v1776_v45  ;;  %v11243_v55 = vld [vmem:[%s15917_s7 + $0x80] sm:$0xff]  ;;  %v11244_v53 = vld [vmem:[%s15917_s7 + $0x18] sm:$0xff]  ;;  %v2476_v2 = vpop.permute.xlu0 %2475  ;;  %3054 = vst.msk [vmem:[#allocation3 + $0x3c4] sm:$0xf] %vm2076_vm1, %v10022_v63 }
 0x284   : > { %1724 = vst.msk [vmem:[#allocation2 + $0x230] sm:$0xff] %vm559_vm0, %v1652_v47  ;;  %3456 = vrot.lane.b32.xlu1 %v10079_v39, %s11331_s12  ;;  %v2769_v7 = vmul.f32 %v11243_v55, %v2705_v12  ;;  %v1840_v44 = vmul.f32 %v11244_v53, %v1777_v32  ;;  %v11245_v18 = vld [vmem:[%s15917_s7 + $0x20] sm:$0xff]  ;;  %v11002_v3 = vld [vmem:[#allocation3 + $0x194] ss:$20 sps:$4 sm:$0xff]   ;;  %v10024_v46 = vpack.c.bf16 %v2768_v6, %v2768_v6 }
 0x285   : > { %1723 = vst.msk [vmem:[#allocation2 + $0x228] sm:$0xff] %vm559_vm0, %v1651_v9  ;;  %v1841_v21 = vmul.f32 %v11245_v18, %v1778_v42  ;;  %v1779_v1 = vld [vmem:[#allocation2 + $0x220] sm:$0xff]  ;;  %v9913_v59 = vpack.c.bf16 %v1839_v14, %v1839_v14  ;;  %v11246_v49 = vld [vmem:[%s15917_s7 + $0x88] sm:$0xff]  ;;  %v11247_v58 = vld [vmem:[%s15917_s7 + $0x90] sm:$0xff]  ;;  %7198 = vmatprep.mubr.bf16.mxu1 %v11002_v3  ;;  %v3403_v12 = vpop.permute.xlu1 %3402  ;;  %v10081_v51 = vpack.c.bf16 %v13725_v10, %v13725_v10 }
 0x286   : > { %5842 = vst.msk [vmem:[#allocation3 + $0x420] sm:$0xf] %vm2076_vm1, %v10362_v26  ;;  %v11000_v62 = vld [vmem:[#allocation3 + $0x190] ss:$20 sps:$4 sm:$0xff]   ;;  %3055 = vst.msk [vmem:[#allocation3 + $0x3d8] sm:$0xf] %vm2076_vm1, %v10023_v60  ;;  %v2770_v11 = vmul.f32 %v11246_v49, %v2706_v29  ;;  %v2771_v23 = vmul.f32 %v11247_v58, %v2707_v19  ;;  %v10025_v17 = vpack.c.bf16 %v2769_v7, %v2769_v7 }
 0x287   : > { %2620 = vst.msk [vmem:[#allocation3 + $0x1b8] sm:$0xf] %vm2597_vm2, %v2474_v24  ;;  %2621 = vst.msk [vmem:[#allocation3 + $0x1cc] sm:$0xf] %vm2597_vm2, %v2476_v2  ;;  %v2185_v16 = vld [vmem:[#allocation2 + $0x211] sm:$0xff]  ;;  %v9914_v36 = vpack.c.bf16 %v1840_v44, %v1840_v44  ;;  %v9915_v57 = vpack.c.bf16 %v1841_v21, %v1841_v21  ;;  %2531 = vrot.lane.b32.xlu0 %v9969_v8, %s11331_s12  ;;  %v2186_v35 = vld [vmem:[#allocation2 + $0x219] sm:$0xff]  ;;  %v1842_v52 = vmul.f32 %v13292_v56, %v1779_v1  ;;  %v3405_v33 = vpop.permute.xlu0 %3404 }
 0x288   : > { %v11007_v39 = vld [vmem:[%s15914_s4 + $0x88] sm:$0xff]   ;;  %2128 = vst.msk [vmem:[#allocation3 + $0x3fc] sm:$0xf] %vm2076_vm1, %v9913_v59  ;;  %2127 = vst.msk [vmem:[#allocation3 + $0x3e8] sm:$0xf] %vm2076_vm1, %v9912_v34  ;;  %v10026_v0 = vpack.c.bf16 %v2770_v11, %v2770_v11  ;;  %v10027_v45 = vpack.c.bf16 %v2771_v23, %v2771_v23  ;;  %2529 = vrot.lane.b32.xlu1 %v9968_v43, %s11331_s12  ;;  %7199 = vmatmul.mubr.bf16.vlgmr.msra.gmra.mrb[0].mxu1 %v11000_v62  ;;  %v3114_v42 = vld [vmem:[#allocation2 + $0x217] sm:$0xff] }
 0x289   : > { %3057 = vst.msk [vmem:[#allocation3 + $0x400] sm:$0xf] %vm2076_vm1, %v10025_v17  ;;  %3056 = vst.msk [vmem:[#allocation3 + $0x3ec] sm:$0xf] %vm2076_vm1, %v10024_v46  ;;  %v2249_v56 = vmul.f32 %v13586_v28, %v2185_v16  ;;  %7344 = vmatpush1.bf16.msra.mxu1 %v11003_v41  ;;  %v9916_v9 = vpack.c.bf16 %v1842_v52, %v1842_v52  ;;  %v10080_v27 = vpack.c.bf16 %v13728_v48, %v13728_v48  ;;  %v16128_v26 = vmov 0   ;;  %v11248_v28 = vld [vmem:[%s15917_s7 + $0x1e0] sm:$0xff]  ;;  %v2478_v48 = vpop.permute.xlu1 %2477 }
 0x28a   : > { %2129 = vst.msk [vmem:[#allocation3 + $0x410] sm:$0xf] %vm2076_vm1, %v9914_v36  ;;  %2130 = vst.msk [vmem:[#allocation3 + $0x424] sm:$0xf] %vm2076_vm1, %v9915_v57  ;;  %v2250_v32 = vmul.f32 %v13644_v20, %v2186_v35  ;;  %7345 = vmatprep.subr.bf16.mxu1 %v16128_v26  ;;  %v3115_v47 = vld [vmem:[#allocation2 + $0x21f] sm:$0xff]  ;;  %v3178_v30 = vmul.f32 %v13605_v25, %v3114_v42  ;;  %v11011_v14 = vld [vmem:[%s15914_s4 + $0x90] sm:$0xff]  }
 0x28b   : > { %3548 = vst.msk [vmem:[#allocation3 + $0x1bc] sm:$0xf] %vm2597_vm2, %v3403_v12  ;;  %3549 = vst.msk [vmem:[#allocation3 + $0x1d0] sm:$0xf] %vm2597_vm2, %v3405_v33  ;;  %v5492_v22 = vld [vmem:[#allocation2 + $0x230] sm:$0xff]  ;;  %3460 = vrot.lane.b32.xlu0 %v10081_v51, %s11331_s12  ;;  %v2480_v63 = vpop.permute.xlu0 %2479  ;;  %v9970_v60 = vpack.c.bf16 %v2249_v56, %v2249_v56  ;;  %v3179_v7 = vmul.f32 %v13659_v54, %v3115_v47  ;;  %v11250_v25 = vld [vmem:[%s15917_s7 + $0x98] sm:$0xff] }
 0x28c   : > { %3058 = vst.msk [vmem:[#allocation3 + $0x414] sm:$0xf] %vm2076_vm1, %v10026_v0  ;;  %3059 = vst.msk [vmem:[#allocation3 + $0x428] sm:$0xf] %vm2076_vm1, %v10027_v45  ;;  %v5491_v50 = vld [vmem:[#allocation2 + $0x228] sm:$0xff]  ;;  %v5556_v8 = vmul.f32 %v16124_v38, %v5492_v22  ;;  %3458 = vrot.lane.b32.xlu1 %v10080_v27, %s11331_s12  ;;  %v11249_v38 = vld [vmem:[%s15917_s7 + $0x30] sm:$0xff]  ;;  %v9971_v55 = vpack.c.bf16 %v2250_v32, %v2250_v32  ;;  %v10082_v49 = vpack.c.bf16 %v3178_v30, %v3178_v30 }
 0x28d   : > { %v5555_v10 = vmul.f32 %v11248_v28, %v5491_v50  ;;  %2131 = vst.msk [vmem:[#allocation3 + $0x438] sm:$0xf] %vm2076_vm1, %v9916_v9  ;;  %v1780_v20 = vld [vmem:[#allocation2 + $0x228] sm:$0xff]  ;;  %7346 = vmatpush1.bf16.msra.mxu1 %v11007_v39  ;;  %v4539_v24 = vld [vmem:[#allocation2 + $0x136] sm:$0xff]  ;;  %v11251_v1 = vld [vmem:[%s15917_s7 + $0xa0] sm:$0xff]  ;;  %v3407_v2 = vpop.permute.xlu1 %3406  ;;  %v10083_v36 = vpack.c.bf16 %v3179_v7, %v3179_v7 }
 0x28e   : > { %v2708_v43 = vld [vmem:[#allocation2 + $0x222] sm:$0xff]  ;;  %v2709_v29 = vld [vmem:[#allocation2 + $0x22a] sm:$0xff]  ;;  %2622 = vst.msk [vmem:[#allocation3 + $0x1e0] sm:$0xf] %vm2597_vm2, %v2478_v48  ;;  %v1843_v31 = vmul.f32 %v11249_v38, %v1780_v20  ;;  %v10364_v41 = vpack.c.bf16 %v5556_v8, %v5556_v8  ;;  %2623 = vst.msk [vmem:[#allocation3 + $0x1f4] sm:$0xf] %vm2597_vm2, %v2480_v63  ;;  %7347 = vmatprep.subr.bf16.mxu1 %v16128_v26 }
 0x28f   : > { %v10363_v19 = vpack.c.bf16 %v5555_v10, %v5555_v10  ;;  %v2187_v6 = vld [vmem:[#allocation2 + $0x221] sm:$0xff]  ;;  %v2772_v53 = vmul.f32 %v11250_v25, %v2708_v43  ;;  %2533 = vrot.lane.b32.xlu0 %v9970_v60, %s11331_s12  ;;  %v2188_v44 = vld [vmem:[#allocation2 + $0x229] sm:$0xff]  ;;  %v2139_v18 = vld [vmem:[#allocation2 + $0x31] sm:$0xff]  ;;  %v2773_v54 = vmul.f32 %v11251_v1, %v2709_v29  ;;  %3550 = vst.msk [vmem:[#allocation3 + $0x1e4] sm:$0xf] %vm2597_vm2, %v3407_v2  ;;  %v3409_v34 = vpop.permute.xlu0 %3408 }
 0x290   : > { %v9917_v21 = vpack.c.bf16 %v1843_v31, %v1843_v31  ;;  %5844 = vst.msk [vmem:[#allocation3 + $0x448] sm:$0xf] %vm2076_vm1, %v10364_v41  ;;  %2535 = vrot.lane.b32.xlu1 %v9971_v55, %s11331_s12  ;;  %v3116_v62 = vld [vmem:[#allocation2 + $0x227] sm:$0xff]  ;;  %v11018_v3 = vld [vmem:[%s15914_s4 + $0x98] sm:$0xff]   ;;  %v2251_v23 = vmul.f32 %v13653_v15, %v2187_v6  ;;  %v2252_v57 = vmul.f32 %v13387_v40, %v2188_v44  ;;  %v3117_v39 = vld [vmem:[#allocation2 + $0x22f] sm:$0xff] }
 0x291   : > { %5843 = vst.msk [vmem:[#allocation3 + $0x434] sm:$0xf] %vm2076_vm1, %v10363_v19  ;;  %v10028_v59 = vpack.c.bf16 %v2772_v53, %v2772_v53  ;;  %v11006_v58 = vld [vmem:[#allocation3 + $0x1b8] ss:$20 sps:$4 sm:$0xff]   ;;  %7348 = vmatpush1.bf16.msra.mxu1 %v11011_v14  ;;  %v10029_v16 = vpack.c.bf16 %v2773_v54, %v2773_v54  ;;  %v3613_v45 = vld [vmem:[#allocation2 + $0x140] sm:$0xff]  ;;  %v2482_v12 = vpop.permute.xlu1 %2481  ;;  %v13840_v40 = vmul.f32 %v13671_v4, %v3116_v62  ;;  %v13857_v10 = vld [vmem:[%s15917_s7 + $0xf0] sm:$0xff] }
 0x292   : > { %v11004_v11 = vld [vmem:[#allocation3 + $0x1bc] ss:$20 sps:$4 sm:$0xff]   ;;  %2132 = vst.msk [vmem:[#allocation3 + $0x44c] sm:$0xf] %vm2076_vm1, %v9917_v21  ;;  %7349 = vmatprep.subr.bf16.mxu1 %v16128_v26  ;;  %v1732_v15 = vld [vmem:[#allocation2 + $0x48] sm:$0xff]  ;;  %v9972_v27 = vpack.c.bf16 %v2251_v23, %v2251_v23  ;;  %v11022_v4 = vld [vmem:[%s15914_s4 + $0xa0] sm:$0xff]   ;;  %v9973_v8 = vpack.c.bf16 %v2252_v57, %v2252_v57 }
 0x293   : > { %v13828_v17 = vld [vmem:[%s15917_s7 + $0x158] sm:$0xff]  ;;  %3551 = vst.msk [vmem:[#allocation3 + $0x1f8] sm:$0xf] %vm2597_vm2, %v3409_v34  ;;  %3462 = vrot.lane.b32.xlu0 %v10082_v49, %s11331_s12  ;;  %7206 = vmatprep.mubr.bf16.mxu1 %v11004_v11  ;;  %v1795_v0 = vmul.f32 %v13437_v61, %v1732_v15  ;;  %v13845_v33 = vld [vmem:[%s15917_s7 + $0x68] sm:$0xff]  ;;  %2624 = vst.msk [vmem:[#allocation3 + $0x208] sm:$0xf] %vm2597_vm2, %v2482_v12  ;;  %v2484_v50 = vpop.permute.xlu0 %2483  ;;  %v10084_v62 = vpack.c.bf16 %v13840_v40, %v13840_v40 }
 0x294   : > { %v4603_v46 = vmul.f32 %v13828_v17, %v4539_v24  ;;  %3060 = vst.msk [vmem:[#allocation3 + $0x43c] sm:$0xf] %vm2076_vm1, %v10028_v59  ;;  %v3612_v35 = vld [vmem:[#allocation2 + $0x138] sm:$0xff]  ;;  %3061 = vst.msk [vmem:[#allocation3 + $0x450] sm:$0xf] %vm2076_vm1, %v10029_v16  ;;  %3464 = vrot.lane.b32.xlu1 %v10083_v36, %s11331_s12  ;;  %7207 = vmatmul.mubr.bf16.gmra.mrb[4].mxu1 %v11006_v58  ;;  %v13848_v51 = vmul.f32 %v13845_v33, %v2139_v18  ;;  %v2140_v56 = vld [vmem:[#allocation2 + $0x49] sm:$0xff] }
 0x295   : > { %v4540_v52 = vld [vmem:[#allocation2 + $0x13e] sm:$0xff]  ;;  %v4541_v9 = vld [vmem:[#allocation2 + $0x146] sm:$0xff]  ;;  %7350 = vmatpush1.bf16.msra.mxu1 %v11018_v3  ;;  %v9869_v42 = vpack.c.bf16 %v1795_v0, %v1795_v0  ;;  %v3676_v22 = vmul.f32 %v13857_v10, %v3612_v35  ;;  %v3615_v47 = vld [vmem:[#allocation2 + $0x150] sm:$0xff]  ;;  %2625 = vst.msk [vmem:[#allocation3 + $0x21c] sm:$0xf] %vm2597_vm2, %v2484_v50  ;;  %v13887_v14 = vmul.f32 %v13463_v13, %v2140_v56  ;;  %v3411_v6 = vpop.permute.xlu1 %3410 }
 0x296   : > { %v3614_v61 = vld [vmem:[#allocation2 + $0x148] sm:$0xff]  ;;  %v3068_v32 = vld [vmem:[#allocation2 + $0x37] sm:$0xff]  ;;  %v10227_v28 = vpack.c.bf16 %v4603_v46, %v4603_v46  ;;  %7351 = vmatprep.subr.bf16.mxu1 %v16128_v26  ;;  %v13877_v19 = vld [vmem:[%s15917_s7 + $0x160] sm:$0xff]  ;;  %3552 = vst.msk [vmem:[#allocation3 + $0x20c] sm:$0xf] %vm2597_vm2, %v3411_v6 }
 0x297   : > { %v13864_v48 = vld [vmem:[%s15917_s7 + $0xd8] sm:$0xff]  ;;  %v4604_v63 = vmul.f32 %v13877_v19, %v4540_v52  ;;  %v5444_v60 = vld [vmem:[#allocation2 + $0x40] sm:$0xff]  ;;  %v13883_v30 = vld [vmem:[%s15917_s7 + $0x1f0] sm:$0xff]  ;;  %2537 = vrot.lane.b32.xlu0 %v9972_v27, %s11331_s12  ;;  %2084 = vst.msk [vmem:[#allocation3 + $0x8c] sm:$0xf] %vm2076_vm1, %v9869_v42  ;;  %v10116_v38 = vpack.c.bf16 %v3676_v22, %v3676_v22  ;;  %v3413_v2 = vpop.permute.xlu0 %3412 }
 0x298   : > { %v3181_v20 = vmul.f32 %v13864_v48, %v3117_v39  ;;  %v13871_v43 = vld [vmem:[%s15917_s7 + $0xf8] sm:$0xff]  ;;  %4891 = vst.msk [vmem:[#allocation3 + $0x250] sm:$0xf] %vm2076_vm1, %v10227_v28  ;;  %v13894_v31 = vld [vmem:[%s15917_s7 + $0x168] sm:$0xff]  ;;  %v13900_v41 = vld [vmem:[%s15917_s7 + $0x100] sm:$0xff]  ;;  %2539 = vrot.lane.b32.xlu1 %v9973_v8, %s11331_s12  ;;  %v13905_v25 = vmul.f32 %v13864_v48, %v3068_v32  ;;  %v5508_v11 = vmul.f32 %v13883_v30, %v5444_v60 }
 0x299   : > { %v3677_v29 = vmul.f32 %v13871_v43, %v3613_v45  ;;  %v4605_v24 = vmul.f32 %v13894_v31, %v4541_v9  ;;  %v3678_v13 = vmul.f32 %v13900_v41, %v3614_v61  ;;  %v4542_v55 = vld [vmem:[#allocation2 + $0x14e] sm:$0xff]  ;;  %v4543_v7 = vld [vmem:[#allocation2 + $0x156] sm:$0xff]  ;;  %v10228_v21 = vpack.c.bf16 %v4604_v63, %v4604_v63  ;;  %7352 = vmatpush1.bf16.msra.mxu1 %v11022_v4  ;;  %v2486_v45 = vpop.permute.xlu1 %2485  ;;  %v4544_v56 = vld [vmem:[#allocation2 + $0x15e] sm:$0xff] }
 0x29a   : > { %v3069_v53 = vld [vmem:[#allocation2 + $0x4f] sm:$0xff]  ;;  %v11008_v3 = vld [vmem:[#allocation3 + $0x1e4] ss:$20 sps:$4 sm:$0xff]   ;;  %3964 = vst.msk [vmem:[#allocation3 + $0x260] sm:$0xf] %vm2076_vm1, %v10116_v38  ;;  %v10085_v58 = vpack.c.bf16 %v3181_v20, %v3181_v20  ;;  %7353 = vmatprep.subr.bf16.mxu1 %v16128_v26  ;;  %v10316_v35 = vpack.c.bf16 %v5508_v11, %v5508_v11  ;;  %v9924_v9 = vpack.c.bf16 %v13848_v51, %v13848_v51 }
 0x29b   : > { %v11026_v44 = vld [vmem:[%s15914_s4 + $0xa8] sm:$0xff]   ;;  %v10117_v18 = vpack.c.bf16 %v3677_v29, %v3677_v29  ;;  %v11010_v59 = vld [vmem:[#allocation3 + $0x1e0] ss:$20 sps:$4 sm:$0xff]   ;;  %v10229_v34 = vpack.c.bf16 %v4605_v24, %v4605_v24  ;;  %v10118_v49 = vpack.c.bf16 %v3678_v13, %v3678_v13  ;;  %3553 = vst.msk [vmem:[#allocation3 + $0x220] sm:$0xf] %vm2597_vm2, %v3413_v2  ;;  %v13934_v36 = vld [vmem:[%s15917_s7 + $0x178] sm:$0xff]  ;;  %3466 = vrot.lane.b32.xlu0 %v10084_v62, %s11331_s12 }
 0x29c   : > { %v13913_v1 = vld [vmem:[%s15917_s7 + $0x108] sm:$0xff]  ;;  %4892 = vst.msk [vmem:[#allocation3 + $0x264] sm:$0xf] %vm2076_vm1, %v10228_v21  ;;  %v13928_v16 = vld [vmem:[%s15917_s7 + $0x170] sm:$0xff]  ;;  %v4607_v57 = vmul.f32 %v13934_v36, %v4543_v7  ;;  %7214 = vmatprep.mubr.bf16.mxu1 %v11008_v3  ;;  %v13939_v15 = vmul.f32 %v13482_v5, %v3069_v53  ;;  %v3616_v39 = vld [vmem:[#allocation2 + $0x158] sm:$0xff]  ;;  %3468 = vrot.lane.b32.xlu1 %v10085_v58, %s11331_s12  ;;  %v2488_v5 = vpop.permute.xlu0 %2487 }
 0x29d   : > { %v3679_v54 = vmul.f32 %v13913_v1, %v3615_v47  ;;  %3965 = vst.msk [vmem:[#allocation3 + $0x274] sm:$0xf] %vm2076_vm1, %v10117_v18  ;;  %v4606_v46 = vmul.f32 %v13928_v16, %v4542_v55  ;;  %4893 = vst.msk [vmem:[#allocation3 + $0x278] sm:$0xf] %vm2076_vm1, %v10229_v34  ;;  %v3617_v0 = vld [vmem:[#allocation2 + $0x170] sm:$0xff]  ;;  %7215 = vmatmul.mubr.bf16.gmra.mrb[8].mxu1 %v11010_v59  ;;  %v13944_v52 = vld [vmem:[#allocation2 + $0x99] sm:$0xff]  ;;  %v9925_v4 = vpack.c.bf16 %v13887_v14, %v13887_v14  ;;  %v3415_v13 = vpop.permute.xlu1 %3414 }
 0x29e   : > { %3966 = vst.msk [vmem:[#allocation3 + $0x288] sm:$0xf] %vm2076_vm1, %v10118_v49  ;;  %v5451_v40 = vld [vmem:[#allocation2 + $0x88] sm:$0xff]  ;;  %7354 = vmatpush1.bf16.msra.mxu1 %v11026_v44  ;;  %v11030_v61 = vld [vmem:[%s15914_s4 + $0xb0] sm:$0xff]   ;;  %5796 = vst.msk [vmem:[#allocation3 + $0x88] sm:$0xf] %vm2076_vm1, %v10316_v35  ;;  %v10231_v50 = vpack.c.bf16 %v4607_v57, %v4607_v57  ;;  %v10036_v42 = vpack.c.bf16 %v13905_v25, %v13905_v25  ;;  %v3681_v22 = vmul.f32 %v13630_v37, %v3617_v0 }
 0x29f   : > { %v10119_v23 = vpack.c.bf16 %v3679_v54, %v3679_v54  ;;  %v10230_v12 = vpack.c.bf16 %v4606_v46, %v4606_v46  ;;  %2626 = vst.msk [vmem:[#allocation3 + $0x230] sm:$0xf] %vm2597_vm2, %v2486_v45  ;;  %v4545_v27 = vld [vmem:[#allocation2 + $0x176] sm:$0xff]  ;;  %2627 = vst.msk [vmem:[#allocation3 + $0x244] sm:$0xf] %vm2597_vm2, %v2488_v5  ;;  %7355 = vmatprep.subr.bf16.mxu1 %v16128_v26  ;;  %2441 = vrot.lane.b32.xlu0 %v9924_v9, %s11331_s12  ;;  %v13980_v60 = vld [vmem:[#allocation2 + $0xa1] sm:$0xff] }
 0x2a0   : > { %v3618_v32 = vld [vmem:[#allocation2 + $0x178] sm:$0xff]  ;;  %v13964_v51 = vld [vmem:[%s15917_s7 + $0x110] sm:$0xff]  ;;  %v10037_v20 = vpack.c.bf16 %v13939_v15, %v13939_v15  ;;  %4895 = vst.msk [vmem:[#allocation3 + $0x2a0] sm:$0xf] %vm2076_vm1, %v10231_v50  ;;  %v5515_v37 = vmul.f32 %v13883_v30, %v5451_v40  ;;  %v13987_v14 = vld [vmem:[%s15917_s7 + $0x180] sm:$0xff]  ;;  %2443 = vrot.lane.b32.xlu1 %v9925_v4, %s11331_s12  ;;  %v10121_v6 = vpack.c.bf16 %v3681_v22, %v3681_v22  ;;  %v3417_v21 = vpop.permute.xlu0 %3416 }
 0x2a1   : > { %3967 = vst.msk [vmem:[#allocation3 + $0x29c] sm:$0xf] %vm2076_vm1, %v10119_v23  ;;  %4894 = vst.msk [vmem:[#allocation3 + $0x28c] sm:$0xf] %vm2076_vm1, %v10230_v12  ;;  %v3680_v28 = vmul.f32 %v13964_v51, %v3616_v39  ;;  %v5458_v47 = vld [vmem:[#allocation2 + $0xd0] sm:$0xff]  ;;  %v5465_v8 = vld [vmem:[#allocation2 + $0x118] sm:$0xff]  ;;  %v4608_v38 = vmul.f32 %v13987_v14, %v4544_v56  ;;  %v2490_v0 = vpop.permute.xlu1 %2489 }
 0x2a2   : > { %v13974_v29 = vld [vmem:[%s15917_s7 + $0x118] sm:$0xff]  ;;  %v5472_v24 = vld [vmem:[#allocation2 + $0x160] sm:$0xff]  ;;  %v13997_v25 = vld [vmem:[%s15917_s7 + $0x150] sm:$0xff]  ;;  %3554 = vst.msk [vmem:[#allocation3 + $0x234] sm:$0xf] %vm2597_vm2, %v3415_v13  ;;  %7356 = vmatpush1.bf16.msra.mxu1 %v11030_v61  ;;  %v10323_v62 = vpack.c.bf16 %v5515_v37, %v5515_v37  ;;  %v5522_v59 = vmul.f32 %v13883_v30, %v5458_v47  ;;  %v5529_v34 = vmul.f32 %v13883_v30, %v5465_v8 }
 0x2a3   : > { %v13978_v63 = vmul.f32 %v13974_v29, %v13944_v52  ;;  %v11034_v55 = vld [vmem:[%s15914_s4 + $0xb8] sm:$0xff]   ;;  %v10120_v7 = vpack.c.bf16 %v3680_v28, %v3680_v28  ;;  %v4609_v53 = vmul.f32 %v13997_v25, %v4545_v27  ;;  %v14003_v44 = vld [vmem:[%s15917_s7 + $0xe8] sm:$0xff]  ;;  %v10232_v3 = vpack.c.bf16 %v4608_v38, %v4608_v38  ;;  %3555 = vst.msk [vmem:[#allocation3 + $0x248] sm:$0xf] %vm2597_vm2, %v3417_v21  ;;  %v14013_v49 = vld [vmem:[%s15917_s7 + $0x120] sm:$0xff] }
 0x2a4   : > { %v3682_v18 = vmul.f32 %v14003_v44, %v3618_v32  ;;  %v11012_v54 = vld [vmem:[#allocation3 + $0x20c] ss:$20 sps:$4 sm:$0xff]   ;;  %v11014_v2 = vld [vmem:[#allocation3 + $0x208] ss:$20 sps:$4 sm:$0xff]   ;;  %v4069_v11 = vmul.f32 %v14013_v49, %v13980_v60  ;;  %7357 = vmatprep.subr.bf16.mxu1 %v16128_v26  ;;  %3969 = vst.msk [vmem:[#allocation3 + $0x2c4] sm:$0xf] %vm2076_vm1, %v10121_v6  ;;  %v5536_v57 = vmul.f32 %v13883_v30, %v5472_v24  ;;  %v2492_v12 = vpop.permute.xlu0 %2491 }
 0x2a5   : > { %v14017_v58 = vld [vmem:[#allocation2 + $0x9f] sm:$0xff]  ;;  %3968 = vst.msk [vmem:[#allocation3 + $0x2b0] sm:$0xf] %vm2076_vm1, %v10120_v7  ;;  %v10233_v23 = vpack.c.bf16 %v4609_v53, %v4609_v53  ;;  %3370 = vrot.lane.b32.xlu0 %v10036_v42, %s11331_s12  ;;  %7222 = vmatprep.mubr.bf16.mxu1 %v11012_v54  ;;  %v14024_v15 = vld [vmem:[#allocation2 + $0xa7] sm:$0xff]  ;;  %5803 = vst.msk [vmem:[#allocation3 + $0x114] sm:$0xf] %vm2076_vm1, %v10323_v62  ;;  %v10330_v35 = vpack.c.bf16 %v5522_v59, %v5522_v59  ;;  %v3419_v42 = vpop.permute.xlu1 %3418 }
 0x2a6   : > { %v10122_v46 = vpack.c.bf16 %v3682_v18, %v3682_v18  ;;  %4896 = vst.msk [vmem:[#allocation3 + $0x2b4] sm:$0xf] %vm2076_vm1, %v10232_v3  ;;  %v10337_v39 = vpack.c.bf16 %v5529_v34, %v5529_v34  ;;  %3372 = vrot.lane.b32.xlu1 %v10037_v20, %s11331_s12  ;;  %7223 = vmatmul.mubr.bf16.gmra.mrb[12].mxu1 %v11014_v2  ;;  %v14037_v56 = vld [vmem:[%s15917_s7 + $0x188] sm:$0xff]  ;;  %v11038_v9 = vld [vmem:[%s15914_s4 + $0xc0] sm:$0xff]   ;;  %v14050_v50 = vld [vmem:[%s15917_s7 + $0x190] sm:$0xff] }
 0x2a7   : > { %4897 = vst.msk [vmem:[#allocation3 + $0x2c8] sm:$0xf] %vm2076_vm1, %v10233_v23  ;;  %v10344_v45 = vpack.c.bf16 %v5536_v57, %v5536_v57  ;;  %v10156_v40 = vpack.c.bf16 %v13978_v63, %v13978_v63  ;;  %v4996_v5 = vmul.f32 %v14037_v56, %v14017_v58  ;;  %7358 = vmatpush1.bf16.msra.mxu1 %v11034_v55  ;;  %5810 = vst.msk [vmem:[#allocation3 + $0x1a0] sm:$0xf] %vm2076_vm1, %v10330_v35  ;;  %v2141_v32 = vld [vmem:[#allocation2 + $0x51] sm:$0xff]  ;;  %v2142_v4 = vld [vmem:[#allocation2 + $0x59] sm:$0xff] }
 0x2a8   : > { %3970 = vst.msk [vmem:[#allocation3 + $0x2d8] sm:$0xf] %vm2076_vm1, %v10122_v46  ;;  %5817 = vst.msk [vmem:[#allocation3 + $0x22c] sm:$0xf] %vm2076_vm1, %v10337_v39  ;;  %v10157_v61 = vpack.c.bf16 %v4069_v11, %v4069_v11  ;;  %v4997_v27 = vmul.f32 %v14050_v50, %v14024_v15  ;;  %7359 = vmatprep.subr.bf16.mxu1 %v16128_v26  ;;  %v11042_v28 = vld [vmem:[%s15914_s4 + $0xc8] sm:$0xff]   ;;  %v3421_v22 = vpop.permute.xlu0 %3420  ;;  %v14065_v63 = vld [vmem:[%s15917_s7 + $0x40] sm:$0xff] }
 0x2a9   : > { %2628 = vst.msk [vmem:[#allocation3 + $0x258] sm:$0xf] %vm2597_vm2, %v2490_v0  ;;  %2629 = vst.msk [vmem:[#allocation3 + $0x26c] sm:$0xf] %vm2597_vm2, %v2492_v12  ;;  %4314 = vrot.lane.b32.xlu0 %v10156_v40, %s11331_s12  ;;  %v10268_v47 = vpack.c.bf16 %v4996_v5, %v4996_v5  ;;  %v11017_v20 = vld [vmem:[#allocation3 + $0x230] ss:$20 sps:$4 sm:$0xff]   ;;  %v2205_v37 = vmul.f32 %v14065_v63, %v2141_v32  ;;  %v2494_v18 = vpop.permute.xlu1 %2493 }
 0x2aa   : > { %5824 = vst.msk [vmem:[#allocation3 + $0x2b8] sm:$0xf] %vm2076_vm1, %v10344_v45  ;;  %4316 = vrot.lane.b32.xlu1 %v10157_v61, %s11331_s12  ;;  %v11015_v8 = vld [vmem:[#allocation3 + $0x234] ss:$20 sps:$4 sm:$0xff]   ;;  %v10269_v38 = vpack.c.bf16 %v4997_v27, %v4997_v27  ;;  %v3071_v7 = vld [vmem:[#allocation2 + $0x5f] sm:$0xff] }
 0x2ab   : > { %3556 = vst.msk [vmem:[#allocation3 + $0x25c] sm:$0xf] %vm2597_vm2, %v3419_v42  ;;  %7360 = vmatpush1.bf16.msra.mxu1 %v11038_v9  ;;  %3557 = vst.msk [vmem:[#allocation3 + $0x270] sm:$0xf] %vm2597_vm2, %v3421_v22  ;;  %v14072_v24 = vld [vmem:[%s15917_s7 + $0x48] sm:$0xff]  ;;  %v3070_v55 = vld [vmem:[#allocation2 + $0x57] sm:$0xff]  ;;  %7230 = vmatprep.mubr.bf16.mxu1 %v11015_v8  ;;  %v9926_v59 = vpack.c.bf16 %v2205_v37, %v2205_v37 }
 0x2ac   : > { %v2206_v13 = vmul.f32 %v14072_v24, %v2142_v4  ;;  %7361 = vmatprep.subr.bf16.mxu1 %v16128_v26  ;;  %v3619_v6 = vld [vmem:[#allocation2 + $0x180] sm:$0xff]  ;;  %v3620_v62 = vld [vmem:[#allocation2 + $0x188] sm:$0xff]  ;;  %2630 = vst.msk [vmem:[#allocation3 + $0x280] sm:$0xf] %vm2597_vm2, %v2494_v18  ;;  %v2496_v3 = vpop.permute.xlu0 %2495  ;;  %v14084_v34 = vld [vmem:[%s15917_s7 + $0xb0] sm:$0xff] }
 0x2ad   : > { %5242 = vrot.lane.b32.xlu0 %v10268_v47, %s11331_s12  ;;  %v4546_v53 = vld [vmem:[#allocation2 + $0x17e] sm:$0xff]  ;;  %v3683_v21 = vmul.f32 %v13857_v10, %v3619_v6  ;;  %v4547_v2 = vld [vmem:[#allocation2 + $0x186] sm:$0xff]  ;;  %v3134_v11 = vmul.f32 %v14084_v34, %v3070_v55  ;;  %v11046_v23 = vld [vmem:[%s15914_s4 + $0xd0] sm:$0xff]   ;;  %v3684_v57 = vmul.f32 %v13871_v43, %v3620_v62  ;;  %2631 = vst.msk [vmem:[#allocation3 + $0x294] sm:$0xf] %vm2597_vm2, %v2496_v3  ;;  %v3423_v27 = vpop.permute.xlu1 %3422 }
 0x2ae   : > { %5244 = vrot.lane.b32.xlu1 %v10269_v38, %s11331_s12  ;;  %7231 = vmatmul.mubr.bf16.gmra.mrb[16].mxu1 %v11017_v20  ;;  %v4610_v54 = vmul.f32 %v13828_v17, %v4546_v53  ;;  %v4611_v46 = vmul.f32 %v13877_v19, %v4547_v2  ;;  %v9927_v35 = vpack.c.bf16 %v2206_v13, %v2206_v13  ;;  %v14096_v39 = vld [vmem:[%s15917_s7 + $0xb8] sm:$0xff]  ;;  %v14099_v45 = vld [vmem:[#allocation2 + $0xa9] sm:$0xff]  ;;  %v14151_v62 = vld [vmem:[%s15917_s7 + $0x1a0] sm:$0xff] }
 0x2af   : > { %7362 = vmatpush1.bf16.msra.mxu1 %v11042_v28  ;;  %v3135_v0 = vmul.f32 %v14096_v39, %v3071_v7  ;;  %v10123_v12 = vpack.c.bf16 %v3683_v21, %v3683_v21  ;;  %v14103_v5 = vld [vmem:[#allocation2 + $0xb1] sm:$0xff]  ;;  %v10124_v61 = vpack.c.bf16 %v3684_v57, %v3684_v57  ;;  %3558 = vst.msk [vmem:[#allocation3 + $0x284] sm:$0xf] %vm2597_vm2, %v3423_v27  ;;  %v14115_v47 = vld [vmem:[%s15917_s7 + $0x128] sm:$0xff] }
 0x2b0   : > { %7363 = vmatprep.subr.bf16.mxu1 %v16128_v26  ;;  %v10234_v40 = vpack.c.bf16 %v4610_v54, %v4610_v54  ;;  %v10235_v9 = vpack.c.bf16 %v4611_v46, %v4611_v46  ;;  %v11049_v32 = vld [vmem:[%s15914_s4 + $0xd8] sm:$0xff]   ;;  %v3425_v4 = vpop.permute.xlu0 %3424  ;;  %v10038_v42 = vpack.c.bf16 %v3134_v11, %v3134_v11  ;;  %v4070_v8 = vmul.f32 %v14115_v47, %v14099_v45  ;;  %v14125_v37 = vld [vmem:[%s15917_s7 + $0x130] sm:$0xff]  ;;  %v11052_v54 = vld [vmem:[%s15914_s4 + $0xe0] sm:$0xff]  }
 0x2b1   : > { %2445 = vrot.lane.b32.xlu0 %v9926_v59, %s11331_s12  ;;  %3971 = vst.msk [vmem:[#allocation3 + $0x2ec] sm:$0xf] %vm2076_vm1, %v10123_v12  ;;  %v11021_v22 = vld [vmem:[#allocation3 + $0x258] ss:$20 sps:$4 sm:$0xff]   ;;  %3972 = vst.msk [vmem:[#allocation3 + $0x300] sm:$0xf] %vm2076_vm1, %v10124_v61  ;;  %v10039_v20 = vpack.c.bf16 %v3135_v0, %v3135_v0  ;;  %v4071_v38 = vmul.f32 %v14125_v37, %v14103_v5  ;;  %v2498_v7 = vpop.permute.xlu1 %2497 }
 0x2b2   : > { %2447 = vrot.lane.b32.xlu1 %v9927_v35, %s11331_s12  ;;  %4898 = vst.msk [vmem:[#allocation3 + $0x2dc] sm:$0xf] %vm2076_vm1, %v10234_v40  ;;  %v11019_v28 = vld [vmem:[#allocation3 + $0x25c] ss:$20 sps:$4 sm:$0xff]   ;;  %4899 = vst.msk [vmem:[#allocation3 + $0x2f0] sm:$0xf] %vm2076_vm1, %v10235_v9  ;;  %v10158_v53 = vpack.c.bf16 %v4070_v8, %v4070_v8 }
 0x2b3   : > { %7364 = vmatpush1.bf16.msra.mxu1 %v11046_v23  ;;  %3559 = vst.msk [vmem:[#allocation3 + $0x298] sm:$0xf] %vm2597_vm2, %v3425_v4  ;;  %v14129_v13 = vld [vmem:[#allocation2 + $0xaf] sm:$0xff]  ;;  %7238 = vmatprep.mubr.bf16.mxu1 %v11019_v28  ;;  %v14133_v55 = vld [vmem:[#allocation2 + $0xb7] sm:$0xff]  ;;  %2632 = vst.msk [vmem:[#allocation3 + $0x2a8] sm:$0xf] %vm2597_vm2, %v2498_v7  ;;  %v10159_v2 = vpack.c.bf16 %v4071_v38, %v4071_v38 }
 0x2b4   : > { %7365 = vmatprep.subr.bf16.mxu1 %v16128_v26  ;;  %v2500_v6 = vpop.permute.xlu0 %2499  ;;  %v14140_v18 = vld [vmem:[%s15917_s7 + $0x198] sm:$0xff]  ;;  %v4999_v3 = vmul.f32 %v14151_v62, %v14133_v55  ;;  %v2143_v59 = vld [vmem:[#allocation2 + $0x61] sm:$0xff]  ;;  %v2144_v11 = vld [vmem:[#allocation2 + $0x69] sm:$0xff] }
 0x2b5   : > { %3374 = vrot.lane.b32.xlu0 %v10038_v42, %s11331_s12  ;;  %v4998_v21 = vmul.f32 %v14140_v18, %v14129_v13  ;;  %2633 = vst.msk [vmem:[#allocation3 + $0x2bc] sm:$0xf] %vm2597_vm2, %v2500_v6  ;;  %v3427_v23 = vpop.permute.xlu1 %3426  ;;  %v11055_v46 = vld [vmem:[%s15914_s4 + $0xe8] sm:$0xff]   ;;  %v3622_v57 = vld [vmem:[#allocation2 + $0x198] sm:$0xff]  ;;  %v11025_v40 = vld [vmem:[#allocation3 + $0x280] ss:$20 sps:$4 sm:$0xff]  }
 0x2b6   : > { %3376 = vrot.lane.b32.xlu1 %v10039_v20, %s11331_s12  ;;  %7239 = vmatmul.mubr.bf16.gmra.mrb[20].mxu1 %v11021_v22  ;;  %3560 = vst.msk [vmem:[#allocation3 + $0x2ac] sm:$0xf] %vm2597_vm2, %v3427_v23  ;;  %v14165_v9 = vld [vmem:[%s15917_s7 + $0x50] sm:$0xff]  ;;  %v3686_v27 = vmul.f32 %v13913_v1, %v3622_v57  ;;  %v14173_v4 = vld [vmem:[%s15917_s7 + $0x58] sm:$0xff]  ;;  %v3072_v28 = vld [vmem:[#allocation2 + $0x67] sm:$0xff] }
 0x2b7   : > { %7366 = vmatpush1.bf16.msra.mxu1 %v11049_v32  ;;  %v10270_v0 = vpack.c.bf16 %v4998_v21, %v4998_v21  ;;  %v2207_v61 = vmul.f32 %v14165_v9, %v2143_v59  ;;  %v10271_v32 = vpack.c.bf16 %v4999_v3, %v4999_v3  ;;  %v2208_v42 = vmul.f32 %v14173_v4, %v2144_v11  ;;  %v3073_v22 = vld [vmem:[#allocation2 + $0x6f] sm:$0xff]  ;;  %v14179_v38 = vld [vmem:[#allocation2 + $0xb9] sm:$0xff] }
 0x2b8   : > { %7367 = vmatprep.subr.bf16.mxu1 %v16128_v26  ;;  %v3429_v35 = vpop.permute.xlu0 %3428  ;;  %v10126_v8 = vpack.c.bf16 %v3686_v27, %v3686_v27  ;;  %v11058_v7 = vld [vmem:[%s15914_s4 + $0xf0] sm:$0xff]   ;;  %v14188_v21 = vld [vmem:[%s15917_s7 + $0xc0] sm:$0xff]  ;;  %v14210_v27 = vld [vmem:[%s15917_s7 + $0x138] sm:$0xff] }
 0x2b9   : > { %4318 = vrot.lane.b32.xlu0 %v10158_v53, %s11331_s12  ;;  %3561 = vst.msk [vmem:[#allocation3 + $0x2c0] sm:$0xf] %vm2597_vm2, %v3429_v35  ;;  %v2502_v20 = vpop.permute.xlu1 %2501  ;;  %v9928_v53 = vpack.c.bf16 %v2207_v61, %v2207_v61  ;;  %v3621_v59 = vld [vmem:[#allocation2 + $0x190] sm:$0xff]  ;;  %v9929_v57 = vpack.c.bf16 %v2208_v42, %v2208_v42  ;;  %v11063_v42 = vld [vmem:[%s15914_s4 + $0xf8] sm:$0xff]  }
 0x2ba   : > { %4320 = vrot.lane.b32.xlu1 %v10159_v2, %s11331_s12  ;;  %v11023_v12 = vld [vmem:[#allocation3 + $0x284] ss:$20 sps:$4 sm:$0xff]   ;;  %2634 = vst.msk [vmem:[#allocation3 + $0x2d0] sm:$0xf] %vm2597_vm2, %v2502_v20  ;;  %v14194_v2 = vld [vmem:[%s15917_s7 + $0xc8] sm:$0xff]  ;;  %v3685_v35 = vmul.f32 %v13900_v41, %v3621_v59 }
 0x2bb   : > { %7368 = vmatpush1.bf16.msra.mxu1 %v11052_v54  ;;  %7246 = vmatprep.mubr.bf16.mxu1 %v11023_v12  ;;  %v3136_v54 = vmul.f32 %v14188_v21, %v3072_v28  ;;  %16129 = vst [vmem:[#allocation25_spill] sm:$0xff] %v14194_v2  ;;  %v3137_v3 = vmul.f32 %v14194_v2, %v3073_v22  ;;  %v4548_v11 = vld [vmem:[#allocation2 + $0x18e] sm:$0xff]  ;;  %v4549_v23 = vld [vmem:[#allocation2 + $0x196] sm:$0xff]  ;;  %3974 = vst.msk [vmem:[#allocation3 + $0x328] sm:$0xf] %vm2076_vm1, %v10126_v8 }
 0x2bc   : > { %7369 = vmatprep.subr.bf16.mxu1 %v16128_v26  ;;  %v2504_v6 = vpop.permute.xlu0 %2503  ;;  %v4613_v12 = vmul.f32 %v13928_v16, %v4549_v23  ;;  %v11081_v28 = vld [vmem:[%s15914_s4 + $0x100] sm:$0xff]   ;;  %v10125_v22 = vpack.c.bf16 %v3685_v35, %v3685_v35 }
 0x2bd   : > { %5246 = vrot.lane.b32.xlu0 %v10270_v0, %s11331_s12  ;;  %2635 = vst.msk [vmem:[#allocation3 + $0x2e4] sm:$0xf] %vm2597_vm2, %v2504_v6  ;;  %v4612_v0 = vmul.f32 %v13894_v31, %v4548_v11  ;;  %v3431_v61 = vpop.permute.xlu1 %3430  ;;  %v11029_v11 = vld [vmem:[#allocation3 + $0x2a8] ss:$20 sps:$4 sm:$0xff]   ;;  %v10041_v23 = vpack.c.bf16 %v3137_v3, %v3137_v3  ;;  %10454 = vmatprep.subr.bf16.mxu0 %v11081_v28 }
 0x2be   : > { %5248 = vrot.lane.b32.xlu1 %v10271_v32, %s11331_s12  ;;  %7247 = vmatmul.mubr.bf16.gmra.mrb[24].mxu1 %v11025_v40  ;;  %v4009_v40 = vld [vmem:[#allocation2 + $0xc1] sm:$0xff]  ;;  %v4072_v32 = vmul.f32 %v14210_v27, %v14179_v38  ;;  %v10237_v20 = vpack.c.bf16 %v4613_v12, %v4613_v12  ;;  %3562 = vst.msk [vmem:[#allocation3 + $0x2d4] sm:$0xf] %vm2597_vm2, %v3431_v61 }
 0x2bf   : > { %7370 = vmatpush1.bf16.msra.mxu1 %v11055_v46  ;;  %v14204_v46 = vld [vmem:[#allocation2 + $0xbf] sm:$0xff]  ;;  %v10236_v8 = vpack.c.bf16 %v4612_v0, %v4612_v0  ;;  %3973 = vst.msk [vmem:[#allocation3 + $0x314] sm:$0xf] %vm2076_vm1, %v10125_v22  ;;  %v4937_v3 = vld [vmem:[#allocation2 + $0xc7] sm:$0xff]  ;;  %10455 = vmatpush3.bf16.msra.mxu0 %v11081_v28 }
 0x2c0   : > { %7371 = vmatprep.subr.bf16.mxu1 %v16128_v26  ;;  %v3433_v6 = vpop.permute.xlu0 %3432  ;;  %v11027_v59 = vld [vmem:[#allocation3 + $0x2ac] ss:$20 sps:$4 sm:$0xff]   ;;  %4901 = vst.msk [vmem:[#allocation3 + $0x318] sm:$0xf] %vm2076_vm1, %v10237_v20  ;;  %v10160_v22 = vpack.c.bf16 %v4072_v32, %v4072_v32 }
 0x2c1   : > { %2449 = vrot.lane.b32.xlu0 %v9928_v53, %s11331_s12  ;;  %v10040_v53 = vpack.c.bf16 %v3136_v54, %v3136_v54  ;;  %3563 = vst.msk [vmem:[#allocation3 + $0x2e8] sm:$0xf] %vm2597_vm2, %v3433_v6  ;;  %v4550_v54 = vld [vmem:[#allocation2 + $0x19e] sm:$0xff]  ;;  %v4551_v35 = vld [vmem:[#allocation2 + $0x1a6] sm:$0xff]  ;;  %7254 = vmatprep.mubr.bf16.mxu1 %v11027_v59  ;;  %v2508_v61 = vpop.permute.xlu1 %2507 }
 0x2c2   : > { %2451 = vrot.lane.b32.xlu1 %v9929_v57, %s11331_s12  ;;  %v14225_v57 = vld [vmem:[%s15917_s7 + $0x140] sm:$0xff]  ;;  %4900 = vst.msk [vmem:[#allocation3 + $0x304] sm:$0xf] %vm2076_vm1, %v10236_v8  ;;  %v4614_v12 = vmul.f32 %v13934_v36, %v4550_v54  ;;  %v14240_v8 = vld [vmem:[%s15917_s7 + $0x1a8] sm:$0xff]  ;;  %v3624_v6 = vld [vmem:[#allocation2 + $0x1b8] sm:$0xff] }
 0x2c3   : > { %7372 = vmatpush1.bf16.msra.mxu1 %v11058_v7  ;;  %16130 = vst [vmem:[#allocation27_spill] sm:$0xff] %v14225_v57  ;;  %v4073_v2 = vmul.f32 %v14225_v57, %v4009_v40  ;;  %v3623_v7 = vld [vmem:[#allocation2 + $0x1a0] sm:$0xff]  ;;  %v5479_v40 = vld [vmem:[#allocation2 + $0x1a8] sm:$0xff]  ;;  %v5000_v20 = vmul.f32 %v14240_v8, %v14204_v46  ;;  %2637 = vst.msk [vmem:[#allocation3 + $0x30c] sm:$0xf] %vm2597_vm2, %v2508_v61 }
 0x2c4   : > { %7373 = vmatprep.subr.bf16.mxu1 %v16128_v26  ;;  %v3687_v0 = vmul.f32 %v13964_v51, %v3623_v7  ;;  %v4615_v26 = vmul.f32 %v13987_v14, %v4551_v35  ;;  %v2506_v59 = vpop.permute.xlu0 %2505  ;;  %v14250_v54 = vld [vmem:[%s15917_s7 + $0x1b0] sm:$0xff] }
 0x2c5   : > { %3378 = vrot.lane.b32.xlu0 %v10040_v53, %s11331_s12  ;;  %v5543_v53 = vmul.f32 %v13883_v30, %v5479_v40  ;;  %2636 = vst.msk [vmem:[#allocation3 + $0x2f8] sm:$0xf] %vm2597_vm2, %v2506_v59  ;;  %v10161_v32 = vpack.c.bf16 %v4073_v2, %v4073_v2  ;;  %16131 = vst [vmem:[#allocation6_spill] sm:$0xff] %v14250_v54  ;;  %v5001_v35 = vmul.f32 %v14250_v54, %v4937_v3  ;;  %v2145_v57 = vld [vmem:[#allocation2 + $0x71] sm:$0xff]  ;;  %v14256_v30 = vld [vmem:[%s15917_s7 + $0xe0] sm:$0xff]  ;;  %v3437_v2 = vpop.permute.xlu1 %3436 }
 0x2c6   : > { %3380 = vrot.lane.b32.xlu1 %v10041_v23, %s11331_s12  ;;  %7255 = vmatmul.mubr.bf16.gmra.mrb[28].mxu1 %v11029_v11  ;;  %v10127_v7 = vpack.c.bf16 %v3687_v0, %v3687_v0  ;;  %v10238_v23 = vpack.c.bf16 %v4614_v12, %v4614_v12  ;;  %v10239_v11 = vpack.c.bf16 %v4615_v26, %v4615_v26  ;;  %v2146_v0 = vld [vmem:[#allocation2 + $0x79] sm:$0xff]  ;;  %v11033_v61 = vld [vmem:[#allocation3 + $0x2d0] ss:$20 sps:$4 sm:$0xff]  }
 0x2c7   : > { %7374 = vmatpush1.bf16.msra.mxu1 %v11063_v42  ;;  %v3688_v42 = vmul.f32 %v14256_v30, %v3624_v6  ;;  %v10351_v28 = vpack.c.bf16 %v5543_v53, %v5543_v53  ;;  %3565 = vst.msk [vmem:[#allocation3 + $0x310] sm:$0xf] %vm2597_vm2, %v3437_v2  ;;  %v10272_v26 = vpack.c.bf16 %v5000_v20, %v5000_v20  ;;  %v3075_v20 = vld [vmem:[#allocation2 + $0x7f] sm:$0xff]  ;;  %v4010_v2 = vld [vmem:[#allocation2 + $0xc9] sm:$0xff] }
 0x2c8   : > { %3975 = vst.msk [vmem:[#allocation3 + $0x33c] sm:$0xf] %vm2076_vm1, %v10127_v7  ;;  %4902 = vst.msk [vmem:[#allocation3 + $0x32c] sm:$0xf] %vm2076_vm1, %v10238_v23  ;;  %v3435_v12 = vpop.permute.xlu0 %3434  ;;  %v11031_v40 = vld [vmem:[#allocation3 + $0x2d4] ss:$20 sps:$4 sm:$0xff]   ;;  %v10273_v53 = vpack.c.bf16 %v5001_v35, %v5001_v35  ;;  %v2210_v59 = vmul.f32 %v13845_v33, %v2146_v0  ;;  %v3139_v0 = vmul.f32 %v13864_v48, %v3075_v20 }
 0x2c9   : > { %4322 = vrot.lane.b32.xlu0 %v10160_v22, %s11331_s12  ;;  %4903 = vst.msk [vmem:[#allocation3 + $0x340] sm:$0xf] %vm2076_vm1, %v10239_v11  ;;  %v10128_v3 = vpack.c.bf16 %v3688_v42, %v3688_v42  ;;  %5831 = vst.msk [vmem:[#allocation3 + $0x344] sm:$0xf] %vm2076_vm1, %v10351_v28  ;;  %v14269_v22 = vld [vmem:[%s15917_s7 + $0x60] sm:$0xff]  ;;  %v3074_v7 = vld [vmem:[#allocation2 + $0x77] sm:$0xff]  ;;  %7262 = vmatprep.mubr.bf16.mxu1 %v11031_v40  ;;  %v2512_v23 = vpop.permute.xlu1 %2511 }
 0x2ca   : > { %4324 = vrot.lane.b32.xlu1 %v10161_v32, %s11331_s12  ;;  %v2209_v6 = vmul.f32 %v14269_v22, %v2145_v57  ;;  %3564 = vst.msk [vmem:[#allocation3 + $0x2fc] sm:$0xf] %vm2597_vm2, %v3435_v12  ;;  %2639 = vst.msk [vmem:[#allocation3 + $0x334] sm:$0xf] %vm2597_vm2, %v2512_v23  ;;  %v14281_v32 = vld [vmem:[%s15917_s7 + $0xd0] sm:$0xff]  ;;  %v3625_v35 = vld [vmem:[#allocation2 + $0x1c0] sm:$0xff]  ;;  %v9931_v28 = vpack.c.bf16 %v2210_v59, %v2210_v59 }
 0x2cb   : > { %3976 = vst.msk [vmem:[#allocation3 + $0x350] sm:$0xf] %vm2076_vm1, %v10128_v3  ;;  %v3138_v33 = vmul.f32 %v14281_v32, %v3074_v7  ;;  %v4552_v42 = vld [vmem:[#allocation2 + $0x1be] sm:$0xff]  ;;  %v3689_v3 = vmul.f32 %v14003_v44, %v3625_v35  ;;  %v4553_v7 = vld [vmem:[#allocation2 + $0x1c6] sm:$0xff] }
 0x2cc   : > { %v2510_v11 = vpop.permute.xlu0 %2509  ;;  %v9930_v57 = vpack.c.bf16 %v2209_v6, %v2209_v6  ;;  %v4616_v12 = vmul.f32 %v13997_v25, %v4552_v42  ;;  %v11037_v20 = vld [vmem:[#allocation3 + $0x2f8] ss:$20 sps:$4 sm:$0xff]   ;;  %v11291_v35 = vld [vmem:[%s15917_s7] sm:$0xff] }
 0x2cd   : > { %5250 = vrot.lane.b32.xlu0 %v10272_v26, %s11331_s12  ;;  %2638 = vst.msk [vmem:[#allocation3 + $0x320] sm:$0xf] %vm2597_vm2, %v2510_v11  ;;  %v4011_v26 = vld [vmem:[#allocation2 + $0xe1] sm:$0xff]  ;;  %v3441_v40 = vpop.permute.xlu1 %3440  ;;  %v10129_v6 = vpack.c.bf16 %v3689_v3, %v3689_v3  ;;  %v10042_v23 = vpack.c.bf16 %v3138_v33, %v3138_v33  ;;  %v10043_v3 = vpack.c.bf16 %v3139_v0, %v3139_v0 }
 0x2ce   : > { %5252 = vrot.lane.b32.xlu1 %v10273_v53, %s11331_s12  ;;  %7263 = vmatmul.mubr.bf16.gmra.mrb[32].mxu1 %v11033_v61  ;;  %v1739_v61 = vld [vmem:[#allocation2 + $0x90] sm:$0xff]  ;;  %v10240_v53 = vpack.c.bf16 %v4616_v12, %v4616_v12  ;;  %3567 = vst.msk [vmem:[#allocation3 + $0x338] sm:$0xf] %vm2597_vm2, %v3441_v40  ;;  %v14294_v11 = vld [vmem:[%s15917_s7 + $0x148] sm:$0xff]  ;;  %v4075_v33 = vmul.f32 %v13974_v29, %v4011_v26 }
 0x2cf   : > { %16132 = vst [vmem:[#allocation7_spill] sm:$0xff] %v14294_v11  ;;  %v1802_v42 = vmul.f32 %v11291_v35, %v1739_v61  ;;  %v4938_v12 = vld [vmem:[#allocation2 + $0xcf] sm:$0xff]  ;;  %3977 = vst.msk [vmem:[#allocation3 + $0x364] sm:$0xf] %vm2076_vm1, %v10129_v6  ;;  %v14315_v6 = vld [vmem:[%s15917_s7 + $0x1b8] sm:$0xff] }
 0x2d0   : > { %v3439_v59 = vpop.permute.xlu0 %3438  ;;  %4904 = vst.msk [vmem:[#allocation3 + $0x354] sm:$0xf] %vm2076_vm1, %v10240_v53  ;;  %v3626_v40 = vld [vmem:[#allocation2 + $0x1c8] sm:$0xff]  ;;  %v5002_v53 = vmul.f32 %v14315_v6, %v4938_v12 }
 0x2d1   : > { %2453 = vrot.lane.b32.xlu0 %v9930_v57, %s11331_s12  ;;  %v11035_v48 = vld [vmem:[#allocation3 + $0x2fc] ss:$20 sps:$4 sm:$0xff]   ;;  %v4074_v57 = vmul.f32 %v14294_v11, %v4010_v2  ;;  %3566 = vst.msk [vmem:[#allocation3 + $0x324] sm:$0xf] %vm2597_vm2, %v3439_v59  ;;  %v4939_v2 = vld [vmem:[#allocation2 + $0xe7] sm:$0xff]  ;;  %v9876_v54 = vpack.c.bf16 %v1802_v42, %v1802_v42  ;;  %v3690_v61 = vmul.f32 %v13857_v10, %v3626_v40 }
 0x2d2   : > { %2455 = vrot.lane.b32.xlu1 %v9931_v28, %s11331_s12  ;;  %v4617_v28 = vmul.f32 %v13828_v17, %v4553_v7  ;;  %7270 = vmatprep.mubr.bf16.mxu1 %v11035_v48  ;;  %v2516_v17 = vpop.permute.xlu1 %2515  ;;  %v11090_v29 = vld [vmem:[%s15914_s4 + $0x108] sm:$0xff]   ;;  %v10163_v7 = vpack.c.bf16 %v4075_v33, %v4075_v33  ;;  %v5003_v59 = vmul.f32 %v14037_v56, %v4939_v2  ;;  %v11293_v56 = vld [vmem:[%s15917_s7 + $0x38] sm:$0xff]  ;;  %v3627_v33 = vld [vmem:[#allocation2 + $0x1d0] sm:$0xff] }
 0x2d3   : > { %2641 = vst.msk [vmem:[#allocation3 + $0x35c] sm:$0xf] %vm2597_vm2, %v2516_v17  ;;  %v10162_v26 = vpack.c.bf16 %v4074_v57, %v4074_v57  ;;  %v10130_v10 = vpack.c.bf16 %v3690_v61, %v3690_v61  ;;  %10456 = vmatprep.subr.bf16.mxu0 %v11090_v29  ;;  %v4554_v12 = vld [vmem:[#allocation2 + $0x1ce] sm:$0xff]  ;;  %v3691_v40 = vmul.f32 %v13871_v43, %v3627_v33 }
 0x2d4   : > { %v10241_v11 = vpack.c.bf16 %v4617_v28, %v4617_v28  ;;  %v2514_v0 = vpop.permute.xlu0 %2513  ;;  %2091 = vst.msk [vmem:[#allocation3 + $0x118] sm:$0xf] %vm2076_vm1, %v9876_v54  ;;  %10457 = vmatpush3.bf16.msra.mxu0 %v11090_v29  ;;  %v11041_v57 = vld [vmem:[#allocation3 + $0x320] ss:$20 sps:$4 sm:$0xff]   ;;  %v10275_v42 = vpack.c.bf16 %v5003_v59, %v5003_v59  ;;  %v2212_v28 = vmul.f32 %v14065_v63, %v13944_v52  ;;  %v11294_v29 = vld [vmem:[%s15917_s7 + $0xa8] sm:$0xff] }
 0x2d5   : > { %3382 = vrot.lane.b32.xlu0 %v10042_v23, %s11331_s12  ;;  %2640 = vst.msk [vmem:[#allocation3 + $0x348] sm:$0xf] %vm2597_vm2, %v2514_v0  ;;  %v2147_v23 = vld [vmem:[#allocation2 + $0x91] sm:$0xff]  ;;  %v4618_v2 = vmul.f32 %v13877_v19, %v4554_v12  ;;  %v10131_v63 = vpack.c.bf16 %v3691_v40, %v3691_v40  ;;  %v3141_v43 = vmul.f32 %v14084_v34, %v14017_v58  ;;  %v4012_v19 = vld [vmem:[#allocation2 + $0xe9] sm:$0xff] }
 0x2d6   : > { %3384 = vrot.lane.b32.xlu1 %v10043_v3, %s11331_s12  ;;  %7271 = vmatmul.mubr.bf16.gmra.mrb[36].mxu1 %v11037_v20  ;;  %4905 = vst.msk [vmem:[#allocation3 + $0x368] sm:$0xf] %vm2076_vm1, %v10241_v11  ;;  %3978 = vst.msk [vmem:[#allocation3 + $0x378] sm:$0xf] %vm2076_vm1, %v10130_v10  ;;  %v10274_v20 = vpack.c.bf16 %v5002_v53, %v5002_v53  ;;  %v2211_v35 = vmul.f32 %v11293_v56, %v2147_v23  ;;  %v3076_v3 = vld [vmem:[#allocation2 + $0x97] sm:$0xff] }
 0x2d7   : > { %v3445_v48 = vpop.permute.xlu1 %3444  ;;  %v3140_v52 = vmul.f32 %v11294_v29, %v3076_v3  ;;  %v10242_v0 = vpack.c.bf16 %v4618_v2, %v4618_v2  ;;  %v9933_v53 = vpack.c.bf16 %v2212_v28, %v2212_v28  ;;  %v4013_v10 = vld [vmem:[#allocation2 + $0xf1] sm:$0xff]  ;;  %3979 = vst.msk [vmem:[#allocation3 + $0x38c] sm:$0xf] %vm2076_vm1, %v10131_v63  ;;  %v3629_v2 = vld [vmem:[#allocation2 + $0x1e0] sm:$0xff] }
 0x2d8   : > { %3569 = vst.msk [vmem:[#allocation3 + $0x360] sm:$0xf] %vm2597_vm2, %v3445_v48  ;;  %v3443_v54 = vpop.permute.xlu0 %3442  ;;  %v11039_v11 = vld [vmem:[#allocation3 + $0x324] ss:$20 sps:$4 sm:$0xff]   ;;  %v9932_v17 = vpack.c.bf16 %v2211_v35, %v2211_v35  ;;  %v14349_v34 = vpop.f32.mrb[112].mxu0 }
 0x2d9   : > { %4326 = vrot.lane.b32.xlu0 %v10162_v26, %s11331_s12  ;;  %3568 = vst.msk [vmem:[#allocation3 + $0x34c] sm:$0xf] %vm2597_vm2, %v3443_v54  ;;  %7278 = vmatprep.mubr.bf16.mxu1 %v11039_v11  ;;  %v10044_v59 = vpack.c.bf16 %v3140_v52, %v3140_v52  ;;  %v4076_v54 = vmul.f32 %v14013_v49, %v4012_v19  ;;  %v7122_v56 = vpop.f32.mrb[113].mxu0  ;;  %v4941_v35 = vld [vmem:[#allocation2 + $0xf7] sm:$0xff] }
 0x2da   : > { %4328 = vrot.lane.b32.xlu1 %v10163_v7, %s11331_s12  ;;  %4906 = vst.msk [vmem:[#allocation3 + $0x37c] sm:$0xf] %vm2076_vm1, %v10242_v0  ;;  %v4077_v11 = vmul.f32 %v14115_v47, %v4013_v10  ;;  %v4555_v49 = vld [vmem:[#allocation2 + $0x1d6] sm:$0xff]  ;;  %v5005_v29 = vmul.f32 %v14140_v18, %v4941_v35  ;;  %v3693_v52 = vmul.f32 %v13913_v1, %v3629_v2  ;;  %v3632_v35 = vld [vmem:[#allocation2 + $0x208] sm:$0xff] }
 0x2db   : > { %v3628_v28 = vld [vmem:[#allocation2 + $0x1d8] sm:$0xff]  ;;  %v10164_v33 = vpack.c.bf16 %v4076_v54, %v4076_v54  ;;  %v4619_v47 = vmul.f32 %v13894_v31, %v4555_v49  ;;  %v11097_v31 = vld [vmem:[%s15914_s4 + $0x110] sm:$0xff]   ;;  %v2213_v1 = vmul.f32 %v14072_v24, %v13980_v60 }
 0x2dc   : > { %v2518_v61 = vpop.permute.xlu0 %2517  ;;  %v11045_v48 = vld [vmem:[#allocation3 + $0x348] ss:$20 sps:$4 sm:$0xff]   ;;  %v3692_v40 = vmul.f32 %v13900_v41, %v3628_v28  ;;  %v10133_v41 = vpack.c.bf16 %v3693_v52, %v3693_v52  ;;  %v10277_v54 = vpack.c.bf16 %v5005_v29, %v5005_v29  ;;  %10458 = vmatprep.subr.bf16.mxu0 %v11097_v31 }
 0x2dd   : > { %5254 = vrot.lane.b32.xlu0 %v10274_v20, %s11331_s12  ;;  %2642 = vst.msk [vmem:[#allocation3 + $0x370] sm:$0xf] %vm2597_vm2, %v2518_v61  ;;  %v10045_v20 = vpack.c.bf16 %v3141_v43, %v3141_v43  ;;  %v4556_v61 = vld [vmem:[#allocation2 + $0x1de] sm:$0xff]  ;;  %v10243_v0 = vpack.c.bf16 %v4619_v47, %v4619_v47  ;;  %v3630_v43 = vld [vmem:[#allocation2 + $0x1e8] sm:$0xff]  ;;  %10459 = vmatpush3.bf16.msra.mxu0 %v11097_v31 }
 0x2de   : > { %5256 = vrot.lane.b32.xlu1 %v10275_v42, %s11331_s12  ;;  %7279 = vmatmul.mubr.bf16.gmra.mrb[40].mxu1 %v11041_v57  ;;  %v4940_v57 = vld [vmem:[#allocation2 + $0xef] sm:$0xff]  ;;  %v14355_v42 = vpop.f32.mrb[114].mxu0  ;;  %v4620_v63 = vmul.f32 %v13928_v16, %v4556_v61  ;;  %3981 = vst.msk [vmem:[#allocation3 + $0x3b4] sm:$0xf] %vm2076_vm1, %v10133_v41  ;;  %v9934_v28 = vpack.c.bf16 %v2213_v1, %v2213_v1  ;;  %v11297_v29 = vld [vmem:[%s15917_s7 + $0x158] sm:$0xff] }
 0x2df   : > { %v2520_v26 = vpop.permute.xlu1 %2519  ;;  %v7125_v3 = vpop.f32.mrb[115].mxu0  ;;  %v5004_v12 = vmul.f32 %v14050_v50, %v4940_v57  ;;  %4907 = vst.msk [vmem:[#allocation3 + $0x390] sm:$0xf] %vm2076_vm1, %v10243_v0  ;;  %v4560_v47 = vld [vmem:[#allocation2 + $0x20e] sm:$0xff]  ;;  %v3143_v61 = vmul.f32 %v14188_v21, %v14129_v13  ;;  %v4015_v13 = vld [vmem:[#allocation2 + $0x101] sm:$0xff]  ;;  %v4561_v41 = vld [vmem:[#allocation2 + $0x216] sm:$0xff] }
 0x2e0   : > { %2643 = vst.msk [vmem:[#allocation3 + $0x384] sm:$0xf] %vm2597_vm2, %v2520_v26  ;;  %v3447_v7 = vpop.permute.xlu0 %3446  ;;  %v11043_v23 = vld [vmem:[#allocation3 + $0x34c] ss:$20 sps:$4 sm:$0xff]   ;;  %v10132_v26 = vpack.c.bf16 %v3692_v40, %v3692_v40  ;;  %v10244_v50 = vpack.c.bf16 %v4620_v63, %v4620_v63  ;;  %v4624_v52 = vmul.f32 %v11297_v29, %v4560_v47  ;;  %v11299_v1 = vld [vmem:[%s15917_s7 + $0xf8] sm:$0xff]  ;;  %v2216_v29 = vmul.f32 %v14269_v22, %v14179_v38  ;;  %v11302_v38 = vld [vmem:[%s15917_s7 + $0x170] sm:$0xff] }
 0x2e1   : > { %2457 = vrot.lane.b32.xlu0 %v9932_v17, %s11331_s12  ;;  %3570 = vst.msk [vmem:[#allocation3 + $0x374] sm:$0xf] %vm2597_vm2, %v3447_v7  ;;  %7286 = vmatprep.mubr.bf16.mxu1 %v11043_v23  ;;  %v10165_v17 = vpack.c.bf16 %v4077_v11, %v4077_v11  ;;  %v10276_v18 = vpack.c.bf16 %v5004_v12, %v5004_v12  ;;  %v4558_v23 = vld [vmem:[#allocation2 + $0x1ee] sm:$0xff] }
 0x2e2   : > { %2459 = vrot.lane.b32.xlu1 %v9933_v53, %s11331_s12  ;;  %v4557_v53 = vld [vmem:[#allocation2 + $0x1e6] sm:$0xff]  ;;  %3980 = vst.msk [vmem:[#allocation3 + $0x3a0] sm:$0xf] %vm2076_vm1, %v10132_v26  ;;  %v3694_v7 = vmul.f32 %v13964_v51, %v3630_v43  ;;  %v2214_v11 = vmul.f32 %v14165_v9, %v14099_v45  ;;  %4908 = vst.msk [vmem:[#allocation3 + $0x3a4] sm:$0xf] %vm2076_vm1, %v10244_v50  ;;  %v4622_v51 = vmul.f32 %v13987_v14, %v4558_v23  ;;  %v5486_v14 = vld [vmem:[#allocation2 + $0x1f0] sm:$0xff] }
 0x2e3   : > { %v3449_v58 = vpop.permute.xlu1 %3448  ;;  %v4621_v16 = vmul.f32 %v13934_v36, %v4557_v53  ;;  %v14386_v45 = vmul.f32 %v14096_v39, %v14024_v15  ;;  %v3633_v12 = vld [vmem:[#allocation2 + $0x210] sm:$0xff]  ;;  %v10248_v31 = vpack.c.bf16 %v4624_v52, %v4624_v52  ;;  %v3634_v50 = vld [vmem:[#allocation2 + $0x218] sm:$0xff]  ;;  %v10047_v23 = vpack.c.bf16 %v3143_v61, %v3143_v61 }
 0x2e4   : > { %3571 = vst.msk [vmem:[#allocation3 + $0x388] sm:$0xf] %vm2597_vm2, %v3449_v58  ;;  %v10134_v57 = vpack.c.bf16 %v3694_v7, %v3694_v7  ;;  %v10246_v56 = vpack.c.bf16 %v4622_v51, %v4622_v51  ;;  %v14395_v15 = vld [vmem:[%s15917_s7 + $0x1f0] sm:$0xff]  ;;  %v9935_v2 = vpack.c.bf16 %v2214_v11, %v2214_v11  ;;  %v3635_v7 = vld [vmem:[#allocation2 + $0x220] sm:$0xff]  ;;  %v11301_v11 = vld [vmem:[%s15917_s7 + $0x168] sm:$0xff] }
 0x2e5   : > { %3386 = vrot.lane.b32.xlu0 %v10044_v59, %s11331_s12  ;;  %v3631_v59 = vld [vmem:[#allocation2 + $0x200] sm:$0xff]  ;;  %v10245_v24 = vpack.c.bf16 %v4621_v16, %v4621_v16  ;;  %v5550_v39 = vmul.f32 %v14395_v15, %v5486_v14  ;;  %v10046_v43 = vpack.c.bf16 %v14386_v45, %v14386_v45  ;;  %v3698_v16 = vmul.f32 %v11299_v1, %v3634_v50  ;;  %v11106_v52 = vld [vmem:[%s15914_s4 + $0x118] sm:$0xff]   ;;  %v11304_v1 = vld [vmem:[%s15917_s7 + $0x110] sm:$0xff] }
 0x2e6   : > { %3388 = vrot.lane.b32.xlu1 %v10045_v20, %s11331_s12  ;;  %7287 = vmatmul.mubr.bf16.gmra.mrb[44].mxu1 %v11045_v48  ;;  %v3695_v36 = vmul.f32 %v14256_v30, %v3631_v59  ;;  %v4559_v30 = vld [vmem:[#allocation2 + $0x206] sm:$0xff]  ;;  %3982 = vst.msk [vmem:[#allocation3 + $0x3c8] sm:$0xf] %vm2076_vm1, %v10134_v57  ;;  %4910 = vst.msk [vmem:[#allocation3 + $0x3cc] sm:$0xf] %vm2076_vm1, %v10246_v56  ;;  %v4562_v59 = vld [vmem:[#allocation2 + $0x21e] sm:$0xff] }
 0x2e7   : > { %4909 = vst.msk [vmem:[#allocation3 + $0x3b8] sm:$0xf] %vm2076_vm1, %v10245_v24  ;;  %v4623_v3 = vmul.f32 %v13997_v25, %v4559_v30  ;;  %v11296_v25 = vld [vmem:[%s15917_s7 + $0xf0] sm:$0xff]  ;;  %v10358_v0 = vpack.c.bf16 %v5550_v39, %v5550_v39  ;;  %4912 = vst.msk [vmem:[#allocation3 + $0x3f4] sm:$0xf] %vm2076_vm1, %v10248_v31  ;;  %v4943_v51 = vld [vmem:[#allocation2 + $0x107] sm:$0xff]  ;;  %v10138_v24 = vpack.c.bf16 %v3698_v16, %v3698_v16  ;;  %10460 = vmatprep.subr.bf16.mxu0 %v11106_v52 }
 0x2e8   : > { %v5978_v10 = vld [vmem:[#allocation3 + $0x370] sm:$0xff]  ;;  %v10135_v9 = vpack.c.bf16 %v3695_v36, %v3695_v36  ;;  %v4626_v36 = vmul.f32 %v11301_v11, %v4562_v59  ;;  %10461 = vmatpush3.bf16.msra.mxu0 %v11106_v52  ;;  %v11306_v11 = vld [vmem:[%s15917_s7 + $0x180] sm:$0xff] }
 0x2e9   : > { %4330 = vrot.lane.b32.xlu0 %v10164_v33, %s11331_s12  ;;  %v2522_v19 = vpop.permute.xlu0 %2521  ;;  %v2524_v48 = vpop.permute.xlu1 %2523  ;;  %v3696_v33 = vmul.f32 %v14003_v44, %v3632_v35  ;;  %v3697_v44 = vmul.f32 %v11296_v25, %v3633_v12  ;;  %v10247_v21 = vpack.c.bf16 %v4623_v3, %v4623_v3  ;;  %5838 = vst.msk [vmem:[#allocation3 + $0x3d0] sm:$0xf] %vm2076_vm1, %v10358_v0  ;;  %3986 = vst.msk [vmem:[#allocation3 + $0x418] sm:$0xf] %vm2076_vm1, %v10138_v24  ;;  %v16133_v0 = vld [vmem:[#allocation25_spill] sm:$0xff]  ;;  %v16134_v24 = vld [vmem:[#allocation27_spill] sm:$0xff] }
 0x2ea   : > { %4332 = vrot.lane.b32.xlu1 %v10165_v17, %s11331_s12  ;;  %2644 = vst.msk [vmem:[#allocation3 + $0x398] sm:$0xf] %vm2597_vm2, %v2522_v19  ;;  %2645 = vst.msk [vmem:[#allocation3 + $0x3ac] sm:$0xf] %vm2597_vm2, %v2524_v48  ;;  %v4014_v17 = vld [vmem:[#allocation2 + $0xf9] sm:$0xff]  ;;  %v4079_v48 = vmul.f32 %v14210_v27, %v4015_v13  ;;  %v10250_v45 = vpack.c.bf16 %v4626_v36, %v4626_v36  ;;  %v5007_v12 = vmul.f32 %v14240_v8, %v4943_v51  ;;  %v4563_v13 = vld [vmem:[#allocation2 + $0x226] sm:$0xff] }
 0x2eb   : > { %v5981_v58 = vld [vmem:[#allocation3 + $0x384] sm:$0xff]  ;;  %3983 = vst.msk [vmem:[#allocation3 + $0x3dc] sm:$0xf] %vm2076_vm1, %v10135_v9  ;;  %v10136_v63 = vpack.c.bf16 %v3696_v33, %v3696_v33  ;;  %v10137_v26 = vpack.c.bf16 %v3697_v44, %v3697_v44  ;;  %v4078_v19 = vmul.f32 %v14125_v37, %v4014_v17  ;;  %4911 = vst.msk [vmem:[#allocation3 + $0x3e0] sm:$0xf] %vm2076_vm1, %v10247_v21 }
 0x2ec   : > { %v11047_v20 = vld [vmem:[#allocation3 + $0x374] ss:$20 sps:$4 sm:$0xff]   ;;  %v9708_v60 = vcombine.low %v5978_v10, %v5981_v58  ;;  %v11300_v58 = vld [vmem:[%s15917_s7 + $0x100] sm:$0xff]  ;;  %4914 = vst.msk [vmem:[#allocation3 + $0x41c] sm:$0xf] %vm2076_vm1, %v10250_v45  ;;  %v2215_v17 = vmul.f32 %v14173_v4, %v14103_v5  ;;  %v10279_v44 = vpack.c.bf16 %v5007_v12, %v5007_v12  ;;  %v4627_v22 = vmul.f32 %v11302_v38, %v4563_v13 }
 0x2ed   : > { %5258 = vrot.lane.b32.xlu0 %v10276_v18, %s11331_s12  ;;  %7294 = vmatprep.mubr.bf16.mxu1 %v11047_v20  ;;  %v3451_v49 = vpop.permute.xlu0 %3450  ;;  %v3453_v40 = vpop.permute.xlu1 %3452  ;;  %3984 = vst.msk [vmem:[#allocation3 + $0x3f0] sm:$0xf] %vm2076_vm1, %v10136_v63  ;;  %v11298_v18 = vld [vmem:[%s15917_s7 + $0x160] sm:$0xff]  ;;  %3985 = vst.msk [vmem:[#allocation3 + $0x404] sm:$0xf] %vm2076_vm1, %v10137_v26  ;;  %v3699_v20 = vmul.f32 %v11300_v58, %v3635_v7  ;;  %v10166_v56 = vpack.c.bf16 %v4078_v19, %v4078_v19  ;;  %v3636_v21 = vld [vmem:[#allocation2 + $0x228] sm:$0xff] }
 0x2ee   : > { %5260 = vrot.lane.b32.xlu1 %v10277_v54, %s11331_s12  ;;  %7295 = vmatmul.mubr.bf16.gmra.mrb[48].mxu1 %v9708_v60  ;;  %3572 = vst.msk [vmem:[#allocation3 + $0x39c] sm:$0xf] %vm2597_vm2, %v3451_v49  ;;  %3573 = vst.msk [vmem:[#allocation3 + $0x3b0] sm:$0xf] %vm2597_vm2, %v3453_v40  ;;  %v4625_v10 = vmul.f32 %v11298_v18, %v4561_v41  ;;  %v4942_v54 = vld [vmem:[#allocation2 + $0xff] sm:$0xff]  ;;  %v14441_v49 = vpop.f32.mrb[116].mxu0  ;;  %v9936_v4 = vpack.c.bf16 %v2215_v17, %v2215_v17 }
 0x2ef   : > { %v10139_v57 = vpack.c.bf16 %v3699_v20, %v3699_v20  ;;  %v5006_v35 = vmul.f32 %v14151_v62, %v4942_v54  ;;  %v7130_v62 = vpop.f32.mrb[117].mxu0  ;;  %v3144_v26 = vmul.f32 %v16133_v0, %v14133_v55  ;;  %v4016_v31 = vld [vmem:[#allocation2 + $0x109] sm:$0xff]  ;;  %v9937_v19 = vpack.c.bf16 %v2216_v29, %v2216_v29  ;;  %v4565_v54 = vld [vmem:[#allocation2 + $0x236] sm:$0xff] }
 0x2f0   : > { %v10249_v60 = vpack.c.bf16 %v4625_v10, %v4625_v10  ;;  %v14449_v39 = vpop.f32.mrb[118].mxu0  ;;  %v11303_v41 = vld [vmem:[%s15917_s7 + $0x108] sm:$0xff]  ;;  %v3145_v55 = vmul.f32 %v14281_v32, %v14204_v46  ;;  %v5493_v58 = vld [vmem:[#allocation2 + $0x238] sm:$0xff]  ;;  %v4629_v36 = vmul.f32 %v11306_v11, %v4565_v54  ;;  %v14534_v54 = vld [vmem:[%s15917_s7 + $0x190] sm:$0xff] }
 0x2f1   : > { %2461 = vrot.lane.b32.xlu0 %v9934_v28, %s11331_s12  ;;  %v2526_v53 = vpop.permute.xlu0 %2525  ;;  %v2528_v37 = vpop.permute.xlu1 %2527  ;;  %v10167_v28 = vpack.c.bf16 %v4079_v48, %v4079_v48  ;;  %3987 = vst.msk [vmem:[#allocation3 + $0x42c] sm:$0xf] %vm2076_vm1, %v10139_v57  ;;  %v10278_v61 = vpack.c.bf16 %v5006_v35, %v5006_v35  ;;  %v3700_v50 = vmul.f32 %v11303_v41, %v3636_v21  ;;  %v4564_v7 = vld [vmem:[#allocation2 + $0x22e] sm:$0xff]  ;;  %v11305_v32 = vld [vmem:[%s15917_s7 + $0x178] sm:$0xff] }
 0x2f2   : > { %2463 = vrot.lane.b32.xlu1 %v9935_v2, %s11331_s12  ;;  %2646 = vst.msk [vmem:[#allocation3 + $0x3c0] sm:$0xf] %vm2597_vm2, %v2526_v53  ;;  %2647 = vst.msk [vmem:[#allocation3 + $0x3d4] sm:$0xf] %vm2597_vm2, %v2528_v37  ;;  %v7133_v2 = vpop.f32.mrb[119].mxu0  ;;  %v3637_v53 = vld [vmem:[#allocation2 + $0x230] sm:$0xff]  ;;  %v4628_v20 = vmul.f32 %v11305_v32, %v4564_v7  ;;  %v4080_v57 = vmul.f32 %v16134_v24, %v4016_v31  ;;  %v5557_v45 = vmul.f32 %v14395_v15, %v5493_v58 }
 0x2f3   : > { %4913 = vst.msk [vmem:[#allocation3 + $0x408] sm:$0xf] %vm2076_vm1, %v10249_v60  ;;  %v3701_v16 = vmul.f32 %v11304_v1, %v3637_v53  ;;  %v4017_v37 = vld [vmem:[#allocation2 + $0x111] sm:$0xff]  ;;  %v10140_v48 = vpack.c.bf16 %v3700_v50, %v3700_v50  ;;  %v10048_v60 = vpack.c.bf16 %v3144_v26, %v3144_v26  ;;  %v4018_v52 = vld [vmem:[#allocation2 + $0x129] sm:$0xff] }
 0x2f4   : > { %v10365_v12 = vpack.c.bf16 %v5557_v45, %v5557_v45  ;;  %v10168_v62 = vpack.c.bf16 %v4080_v57, %v4080_v57  ;;  %v4019_v21 = vld [vmem:[#allocation2 + $0x131] sm:$0xff] }
 0x2f5   : > { %3390 = vrot.lane.b32.xlu0 %v10046_v43, %s11331_s12  ;;  %v3455_v9 = vpop.permute.xlu0 %3454  ;;  %v5984_v30 = vld [vmem:[#allocation3 + $0x398] sm:$0xff]  ;;  %v5987_v3 = vld [vmem:[#allocation3 + $0x3ac] sm:$0xff]  ;;  %v10141_v46 = vpack.c.bf16 %v3701_v16, %v3701_v16  ;;  %3988 = vst.msk [vmem:[#allocation3 + $0x440] sm:$0xf] %vm2076_vm1, %v10140_v48 }
 0x2f6   : > { %3392 = vrot.lane.b32.xlu1 %v10047_v23, %s11331_s12  ;;  %3574 = vst.msk [vmem:[#allocation3 + $0x3c4] sm:$0xf] %vm2597_vm2, %v3455_v9  ;;  %v3457_v14 = vpop.permute.xlu1 %3456  ;;  %v11050_v33 = vld [vmem:[#allocation3 + $0x39c] ss:$20 sps:$4 sm:$0xff]   ;;  %v9713_v47 = vcombine.low %v5984_v30, %v5987_v3  ;;  %v10251_v23 = vpack.c.bf16 %v4627_v22, %v4627_v22  ;;  %v10253_v3 = vpack.c.bf16 %v4629_v36, %v4629_v36  ;;  %v14516_v22 = vld [vmem:[%s15917_s7 + $0x120] sm:$0xff]  ;;  %v14527_v16 = vld [vmem:[%s15917_s7 + $0x188] sm:$0xff] }
 0x2f7   : > { %3575 = vst.msk [vmem:[#allocation3 + $0x3d8] sm:$0xf] %vm2597_vm2, %v3457_v14  ;;  %7302 = vmatprep.mubr.bf16.mxu1 %v11050_v33  ;;  %v16135_v30 = vld [vmem:[#allocation7_spill] sm:$0xff]  ;;  %v4944_v14 = vld [vmem:[#allocation2 + $0x10f] sm:$0xff]  ;;  %v4083_v41 = vmul.f32 %v14516_v22, %v4019_v21 }
 0x2f8   : > { %7303 = vmatmul.mubr.bf16.gmra.mrb[52].mxu1 %v9713_v47  ;;  %4915 = vst.msk [vmem:[#allocation3 + $0x430] sm:$0xf] %vm2076_vm1, %v10251_v23  ;;  %v4081_v35 = vmul.f32 %v16135_v30, %v4017_v37  ;;  %3989 = vst.msk [vmem:[#allocation3 + $0x454] sm:$0xf] %vm2076_vm1, %v10141_v46  ;;  %v4945_v33 = vld [vmem:[#allocation2 + $0x117] sm:$0xff]  ;;  %v4946_v50 = vld [vmem:[#allocation2 + $0x12f] sm:$0xff] }
 0x2f9   : > { %4334 = vrot.lane.b32.xlu0 %v10166_v56, %s11331_s12  ;;  %v2532_v40 = vpop.permute.xlu0 %2531  ;;  %v10049_v56 = vpack.c.bf16 %v3145_v55, %v3145_v55  ;;  %4917 = vst.msk [vmem:[#allocation3 + $0x458] sm:$0xf] %vm2076_vm1, %v10253_v3  ;;  %5845 = vst.msk [vmem:[#allocation3 + $0x45c] sm:$0xf] %vm2076_vm1, %v10365_v12  ;;  %v5009_v29 = vmul.f32 %v14315_v6, %v4945_v33  ;;  %v5010_v7 = vmul.f32 %v14527_v16, %v4946_v50  ;;  %v4020_v46 = vld [vmem:[#allocation2 + $0x139] sm:$0xff] }
 0x2fa   : > { %4336 = vrot.lane.b32.xlu1 %v10167_v28, %s11331_s12  ;;  %2649 = vst.msk [vmem:[#allocation3 + $0x3fc] sm:$0xf] %vm2597_vm2, %v2532_v40  ;;  %v2530_v25 = vpop.permute.xlu1 %2529  ;;  %v10252_v28 = vpack.c.bf16 %v4628_v20, %v4628_v20  ;;  %v16136_v40 = vld [vmem:[#allocation6_spill] sm:$0xff]  ;;  %v10169_v17 = vpack.c.bf16 %v4081_v35, %v4081_v35  ;;  %v10171_v37 = vpack.c.bf16 %v4083_v41, %v4083_v41  ;;  %v4021_v20 = vld [vmem:[#allocation2 + $0x141] sm:$0xff]  ;;  %v14559_v12 = vld [vmem:[%s15917_s7 + $0x198] sm:$0xff] }
 0x2fb   : > { %2648 = vst.msk [vmem:[#allocation3 + $0x3e8] sm:$0xf] %vm2597_vm2, %v2530_v25  ;;  %v5008_v2 = vmul.f32 %v16136_v40, %v4944_v14  ;;  %v10281_v38 = vpack.c.bf16 %v5009_v29, %v5009_v29  ;;  %v10282_v36 = vpack.c.bf16 %v5010_v7, %v5010_v7  ;;  %v4948_v35 = vld [vmem:[#allocation2 + $0x13f] sm:$0xff]  ;;  %v4949_v14 = vld [vmem:[#allocation2 + $0x147] sm:$0xff]  ;;  %v4950_v41 = vld [vmem:[#allocation2 + $0x14f] sm:$0xff] }
 0x2fc   : > { %4916 = vst.msk [vmem:[#allocation3 + $0x444] sm:$0xf] %vm2076_vm1, %v10252_v28  ;;  %v4951_v50 = vld [vmem:[#allocation2 + $0x157] sm:$0xff] }
 0x2fd   : > { %5262 = vrot.lane.b32.xlu0 %v10278_v61, %s11331_s12  ;;  %v3461_v5 = vpop.permute.xlu0 %3460  ;;  %v5990_v63 = vld [vmem:[#allocation3 + $0x3c0] sm:$0xff] }
 0x2fe   : > { %5264 = vrot.lane.b32.xlu1 %v10279_v44, %s11331_s12  ;;  %3577 = vst.msk [vmem:[#allocation3 + $0x400] sm:$0xf] %vm2597_vm2, %v3461_v5  ;;  %v3459_v43 = vpop.permute.xlu1 %3458  ;;  %v5993_v18 = vld [vmem:[#allocation3 + $0x3d4] sm:$0xff] }
 0x2ff   : > { %v11053_v10 = vld [vmem:[#allocation3 + $0x3c4] ss:$20 sps:$4 sm:$0xff]   ;;  %3576 = vst.msk [vmem:[#allocation3 + $0x3ec] sm:$0xf] %vm2597_vm2, %v3459_v43  ;;  %v9718_v59 = vcombine.low %v5990_v63, %v5993_v18 }
 0x300   : > { %7310 = vmatprep.mubr.bf16.mxu1 %v11053_v10  ;;  %v14507_v63 = vld [vmem:[%s15917_s7 + $0x118] sm:$0xff]  ;;  %v14511_v31 = vpop.f32.mrb[120].mxu0 }
 0x301   : > { %2465 = vrot.lane.b32.xlu0 %v9936_v4, %s11331_s12  ;;  %v2534_v51 = vpop.permute.xlu0 %2533  ;;  %7311 = vmatmul.mubr.bf16.gmra.mrb[56].mxu1 %v9718_v59  ;;  %v10280_v4 = vpack.c.bf16 %v5008_v2, %v5008_v2  ;;  %v4082_v0 = vmul.f32 %v14507_v63, %v4018_v52  ;;  %v7138_v53 = vpop.f32.mrb[121].mxu0  ;;  %v4947_v43 = vld [vmem:[#allocation2 + $0x137] sm:$0xff] }
 0x302   : > { %2467 = vrot.lane.b32.xlu1 %v9937_v19, %s11331_s12  ;;  %2650 = vst.msk [vmem:[#allocation3 + $0x410] sm:$0xf] %vm2597_vm2, %v2534_v51  ;;  %v2536_v9 = vpop.permute.xlu1 %2535  ;;  %v14522_v19 = vpop.f32.mrb[122].mxu0  ;;  %v5011_v58 = vmul.f32 %v14534_v54, %v4947_v43  ;;  %v14543_v51 = vld [vmem:[%s15917_s7 + $0x128] sm:$0xff]  ;;  %v4023_v52 = vld [vmem:[#allocation2 + $0x151] sm:$0xff] }
 0x303   : > { %2651 = vst.msk [vmem:[#allocation3 + $0x424] sm:$0xf] %vm2597_vm2, %v2536_v9  ;;  %v7141_v10 = vpop.f32.mrb[123].mxu0  ;;  %v10170_v55 = vpack.c.bf16 %v4082_v0, %v4082_v0  ;;  %v14550_v9 = vld [vmem:[%s15917_s7 + $0x130] sm:$0xff] }
 0x304   : > { %v10283_v45 = vpack.c.bf16 %v5011_v58, %v5011_v58 }
 0x305   : > { %3394 = vrot.lane.b32.xlu0 %v10048_v60, %s11331_s12  ;;  %v3463_v15 = vpop.permute.xlu0 %3462  ;;  %v5999_v47 = vld [vmem:[#allocation3 + $0x3fc] sm:$0xff]  ;;  %v4084_v60 = vmul.f32 %v14543_v51, %v4020_v46 }
 0x306   : > { %3396 = vrot.lane.b32.xlu1 %v10049_v56, %s11331_s12  ;;  %3578 = vst.msk [vmem:[#allocation3 + $0x414] sm:$0xf] %vm2597_vm2, %v3463_v15  ;;  %v3465_v61 = vpop.permute.xlu1 %3464  ;;  %v5996_v25 = vld [vmem:[#allocation3 + $0x3e8] sm:$0xff]  ;;  %v4085_v56 = vmul.f32 %v14550_v9, %v4021_v20  ;;  %v5012_v15 = vmul.f32 %v14559_v12, %v4948_v35  ;;  %v5853_v35 = vld [vmem:[#allocation3 + $0x30] sm:$0xff] }
 0x307   : > { %v11056_v44 = vld [vmem:[#allocation3 + $0x3ec] ss:$20 sps:$4 sm:$0xff]   ;;  %3579 = vst.msk [vmem:[#allocation3 + $0x428] sm:$0xf] %vm2597_vm2, %v3465_v61  ;;  %v9723_v13 = vcombine.low %v5996_v25, %v5999_v47  ;;  %v10172_v3 = vpack.c.bf16 %v4084_v60, %v4084_v60  ;;  %v4953_v60 = vld [vmem:[#allocation2 + $0x177] sm:$0xff] }
 0x308   : > { %7318 = vmatprep.mubr.bf16.mxu1 %v11056_v44  ;;  %v10173_v47 = vpack.c.bf16 %v4085_v56, %v4085_v56  ;;  %v4022_v44 = vld [vmem:[#allocation2 + $0x149] sm:$0xff] }
 0x309   : > { %4338 = vrot.lane.b32.xlu0 %v10168_v62, %s11331_s12  ;;  %v2538_v5 = vpop.permute.xlu0 %2537  ;;  %7319 = vmatmul.mubr.bf16.gmra.mrb[60].mxu1 %v9723_v13  ;;  %v11066_v13 = vld [vmem:[#allocation3 + $0xc] ss:$20 sps:$4 sm:$0xff]  }
 0x30a   : > { %4340 = vrot.lane.b32.xlu1 %v10169_v17, %s11331_s12  ;;  %2652 = vst.msk [vmem:[#allocation3 + $0x438] sm:$0xf] %vm2597_vm2, %v2538_v5  ;;  %v2540_v26 = vpop.permute.xlu1 %2539  ;;  %v14566_v17 = vld [vmem:[%s15917_s7 + $0x1a0] sm:$0xff]  ;;  %v10284_v5 = vpack.c.bf16 %v5012_v15, %v5012_v15 }
 0x30b   : > { %2653 = vst.msk [vmem:[#allocation3 + $0x44c] sm:$0xf] %vm2597_vm2, %v2540_v26  ;;  %v5013_v25 = vmul.f32 %v14566_v17, %v4949_v14 }
 0x30d   : > { %5266 = vrot.lane.b32.xlu0 %v10280_v4, %s11331_s12  ;;  %v3467_v18 = vpop.permute.xlu0 %3466  ;;  %v6002_v1 = vld [vmem:[#allocation3 + $0x410] sm:$0xff]  ;;  %v4086_v4 = vmul.f32 %v14210_v27, %v4022_v44  ;;  %v10285_v26 = vpack.c.bf16 %v5013_v25, %v5013_v25  ;;  %v5014_v27 = vmul.f32 %v14240_v8, %v4950_v41 }
 0x30e   : > { %5268 = vrot.lane.b32.xlu1 %v10281_v38, %s11331_s12  ;;  %3580 = vst.msk [vmem:[#allocation3 + $0x43c] sm:$0xf] %vm2597_vm2, %v3467_v18  ;;  %v3469_v59 = vpop.permute.xlu1 %3468  ;;  %v6005_v23 = vld [vmem:[#allocation3 + $0x424] sm:$0xff]  ;;  %v4087_v38 = vmul.f32 %v16134_v24, %v4023_v52  ;;  %v5015_v24 = vmul.f32 %v16136_v40, %v4951_v50 }
 0x30f   : > { %v11059_v48 = vld [vmem:[#allocation3 + $0x414] ss:$20 sps:$4 sm:$0xff]   ;;  %3581 = vst.msk [vmem:[#allocation3 + $0x450] sm:$0xf] %vm2597_vm2, %v3469_v59  ;;  %v9728_v32 = vcombine.low %v6002_v1, %v6005_v23  ;;  %v10174_v43 = vpack.c.bf16 %v4086_v4, %v4086_v4  ;;  %v4024_v59 = vld [vmem:[#allocation2 + $0x159] sm:$0xff]  ;;  %v10286_v46 = vpack.c.bf16 %v5014_v27, %v5014_v27 }
 0x310   : > { %7326 = vmatprep.mubr.bf16.mxu1 %v11059_v48  ;;  %v4025_v48 = vld [vmem:[#allocation2 + $0x171] sm:$0xff]  ;;  %v10287_v20 = vpack.c.bf16 %v5015_v24, %v5015_v24  ;;  %v4954_v52 = vld [vmem:[#allocation2 + $0x17f] sm:$0xff]  ;;  %v4028_v27 = vld [vmem:[#allocation2 + $0x189] sm:$0xff] }
 0x311   : > { %4342 = vrot.lane.b32.xlu0 %v10170_v55, %s11331_s12  ;;  %v2442_v11 = vpop.permute.xlu0 %2441  ;;  %7327 = vmatmul.mubr.bf16.gmra.mrb[64].mxu1 %v9728_v32  ;;  %v10175_v55 = vpack.c.bf16 %v4087_v38, %v4087_v38  ;;  %v11069_v8 = vld [vmem:[#allocation3 + $0x34] ss:$20 sps:$4 sm:$0xff]   ;;  %v4088_v32 = vmul.f32 %v16135_v30, %v4024_v59  ;;  %v5018_v38 = vmul.f32 %v14534_v54, %v4954_v52  ;;  %v5874_v52 = vld [vmem:[#allocation3 + $0xbc] sm:$0xff] }
 0x312   : > { %4344 = vrot.lane.b32.xlu1 %v10171_v37, %s11331_s12  ;;  %2604 = vst.msk [vmem:[#allocation3 + $0x78] sm:$0xf] %vm2597_vm2, %v2442_v11  ;;  %v2444_v57 = vpop.permute.xlu1 %2443  ;;  %v11064_v37 = vld [vmem:[#allocation3 + $0x8] ss:$20 sps:$4 sm:$0xff]   ;;  %v4089_v11 = vmul.f32 %v14507_v63, %v4025_v48 }
 0x313   : > { %2605 = vst.msk [vmem:[#allocation3 + $0x8c] sm:$0xf] %vm2597_vm2, %v2444_v57  ;;  %v5856_v57 = vld [vmem:[#allocation3 + $0x44] sm:$0xff]  ;;  %v10176_v56 = vpack.c.bf16 %v4088_v32, %v4088_v32  ;;  %v10290_v59 = vpack.c.bf16 %v5018_v38, %v5018_v38  ;;  %v4957_v32 = vld [vmem:[#allocation2 + $0x197] sm:$0xff] }
 0x314   : > { %v9605_v15 = vcombine.low %v5853_v35, %v5856_v57  ;;  %v4030_v35 = vld [vmem:[#allocation2 + $0x199] sm:$0xff] }
 0x315   : > { %5270 = vrot.lane.b32.xlu0 %v10282_v36, %s11331_s12  ;;  %v6008_v33 = vld [vmem:[#allocation3 + $0x438] sm:$0xff] }
 0x316   : > { %5272 = vrot.lane.b32.xlu1 %v10283_v45, %s11331_s12  ;;  %v6011_v2 = vld [vmem:[#allocation3 + $0x44c] sm:$0xff]  ;;  %v4952_v36 = vld [vmem:[#allocation2 + $0x15f] sm:$0xff] }
 0x317   : > { %v3371_v28 = vpop.permute.xlu0 %3370  ;;  %v11061_v61 = vld [vmem:[#allocation3 + $0x43c] ss:$20 sps:$4 sm:$0xff]   ;;  %v9733_v29 = vcombine.low %v6008_v33, %v6011_v2  ;;  %v5016_v30 = vmul.f32 %v14315_v6, %v4952_v36 }
 0x318   : > { %3532 = vst.msk [vmem:[#allocation3 + $0x7c] sm:$0xf] %vm2597_vm2, %v3371_v28  ;;  %v3373_v62 = vpop.permute.xlu1 %3372  ;;  %7334 = vmatprep.mubr.bf16.mxu1 %v11061_v61  ;;  %v10177_v28 = vpack.c.bf16 %v4089_v11, %v4089_v11  ;;  %v4026_v33 = vld [vmem:[#allocation2 + $0x179] sm:$0xff] }
 0x319   : > { %3533 = vst.msk [vmem:[#allocation3 + $0x90] sm:$0xf] %vm2597_vm2, %v3373_v62  ;;  %4346 = vrot.lane.b32.xlu0 %v10172_v3, %s11331_s12  ;;  %7335 = vmatmul.mubr.bf16.gmra.mrb[68].mxu1 %v9733_v29  ;;  %v5017_v3 = vmul.f32 %v14527_v16, %v4953_v60  ;;  %v4027_v62 = vld [vmem:[#allocation2 + $0x181] sm:$0xff]  ;;  %v10288_v6 = vpack.c.bf16 %v5016_v30, %v5016_v30 }
 0x31a   : > { %4348 = vrot.lane.b32.xlu1 %v10173_v47, %s11331_s12  ;;  %7375 = vmatprep.mubr.bf16.mxu1 %v11066_v13  ;;  %v11071_v47 = vld [vmem:[#allocation3 + $0x5c] ss:$20 sps:$4 sm:$0xff]   ;;  %v4090_v61 = vmul.f32 %v14516_v22, %v4026_v33  ;;  %v4091_v29 = vmul.f32 %v14543_v51, %v4027_v62  ;;  %v4955_v13 = vld [vmem:[#allocation2 + $0x187] sm:$0xff] }
 0x31b   : > { %v4315_v21 = vpop.permute.xlu0 %4314  ;;  %v10289_v44 = vpack.c.bf16 %v5017_v3, %v5017_v3  ;;  %v5865_v60 = vld [vmem:[#allocation3 + $0x80] sm:$0xff] }
 0x31c   : > { %4468 = vst.msk [vmem:[#allocation3 + $0x120] sm:$0xf] %vm2597_vm2, %v4315_v21  ;;  %v4317_v0 = vpop.permute.xlu1 %4316  ;;  %v5862_v21 = vld [vmem:[#allocation3 + $0x6c] sm:$0xff]  ;;  %v10179_v50 = vpack.c.bf16 %v4091_v29, %v4091_v29  ;;  %v14633_v62 = vld [vmem:[%s15917_s7 + $0x140] sm:$0xff] }
 0x31d   : > { %4469 = vst.msk [vmem:[#allocation3 + $0x134] sm:$0xf] %vm2597_vm2, %v4317_v0  ;;  %5274 = vrot.lane.b32.xlu0 %v10284_v5, %s11331_s12  ;;  %v5859_v5 = vld [vmem:[#allocation3 + $0x58] sm:$0xff]  ;;  %v10178_v0 = vpack.c.bf16 %v4090_v61, %v4090_v61  ;;  %v11077_v3 = vld [vmem:[#allocation3 + $0xac] ss:$20 sps:$4 sm:$0xff]  }
 0x31e   : > { %5276 = vrot.lane.b32.xlu1 %v10285_v26, %s11331_s12  ;;  %v14640_v61 = vld [vmem:[%s15917_s7 + $0x148] sm:$0xff] }
 0x31f   : > { %v5243_v53 = vpop.permute.xlu0 %5242  ;;  %v5864_v18 = vld [vmem:[#allocation3 + $0x78] sm:$0xff]  ;;  %v4959_v29 = vld [vmem:[#allocation2 + $0x1a7] sm:$0xff] }
 0x320   : > { %5396 = vst.msk [vmem:[#allocation3 + $0x124] sm:$0xf] %vm2597_vm2, %v5243_v53  ;;  %v5245_v10 = vpop.permute.xlu1 %5244  ;;  %v5867_v1 = vld [vmem:[#allocation3 + $0x8c] sm:$0xff] }
 0x321   : > { %v11067_v7 = vld [vmem:[#allocation3 + $0x7c] ss:$20 sps:$4 sm:$0xff]   ;;  %5397 = vst.msk [vmem:[#allocation3 + $0x138] sm:$0xf] %vm2597_vm2, %v5245_v10  ;;  %4350 = vrot.lane.b32.xlu0 %v10174_v43, %s11331_s12  ;;  %v9613_v23 = vcombine.low %v5864_v18, %v5867_v1  ;;  %7376 = vmatmul.mubr.bf16.vlgmr.msra.gmra.mrb[72].mxu1 %v11064_v37  ;;  %v5019_v18 = vmul.f32 %v14559_v12, %v4955_v13  ;;  %v5871_v13 = vld [vmem:[#allocation3 + $0xa8] sm:$0xff] }
 0x322   : > { %4352 = vrot.lane.b32.xlu1 %v10175_v55, %s11331_s12  ;;  %7142 = vmatprep.mubr.bf16.mxu0 %v11067_v7  ;;  %v9610_v55 = vcombine.low %v5859_v5, %v5862_v21  ;;  %v4029_v1 = vld [vmem:[#allocation2 + $0x191] sm:$0xff]  ;;  %v4092_v37 = vmul.f32 %v14550_v9, %v4028_v27  ;;  %v4032_v27 = vld [vmem:[#allocation2 + $0x1b9] sm:$0xff] }
 0x323   : > { %v2446_v58 = vpop.permute.xlu0 %2445  ;;  %7143 = vmatmul.mubr.bf16.gmra.mrb[124].mxu0 %v9613_v23  ;;  %7383 = vmatprep.mubr.bf16.mxu1 %v11069_v8  ;;  %v11075_v7 = vld [vmem:[#allocation3 + $0x84] ss:$20 sps:$4 sm:$0xff]   ;;  %v10291_v48 = vpack.c.bf16 %v5019_v18, %v5019_v18 }
 0x324   : > { %2606 = vst.msk [vmem:[#allocation3 + $0xa0] sm:$0xf] %vm2597_vm2, %v2446_v58  ;;  %v2448_v40 = vpop.permute.xlu1 %2447  ;;  %v14613_v8 = vld [vmem:[%s15917_s7 + $0x138] sm:$0xff]  ;;  %v10180_v11 = vpack.c.bf16 %v4092_v37, %v4092_v37  ;;  %v4096_v37 = vmul.f32 %v14507_v63, %v4032_v27 }
 0x325   : > { %2607 = vst.msk [vmem:[#allocation3 + $0xb4] sm:$0xf] %vm2597_vm2, %v2448_v40  ;;  %5278 = vrot.lane.b32.xlu0 %v10286_v46, %s11331_s12  ;;  %v4093_v58 = vmul.f32 %v14613_v8, %v4029_v1  ;;  %v4956_v46 = vld [vmem:[#allocation2 + $0x18f] sm:$0xff]  ;;  %v4033_v1 = vld [vmem:[#allocation2 + $0x1c1] sm:$0xff]  ;;  %v4036_v27 = vld [vmem:[#allocation2 + $0x1d9] sm:$0xff] }
 0x326   : > { %5280 = vrot.lane.b32.xlu1 %v10287_v20, %s11331_s12  ;;  %v5868_v40 = vld [vmem:[#allocation3 + $0x94] sm:$0xff]  ;;  %v5020_v36 = vmul.f32 %v14566_v17, %v4956_v46  ;;  %v4960_v46 = vld [vmem:[#allocation2 + $0x1bf] sm:$0xff] }
 0x327   : > { %v3375_v45 = vpop.permute.xlu0 %3374 }
 0x328   : > { %3534 = vst.msk [vmem:[#allocation3 + $0xa4] sm:$0xf] %vm2597_vm2, %v3375_v45  ;;  %v3377_v14 = vpop.permute.xlu1 %3376  ;;  %v10181_v45 = vpack.c.bf16 %v4093_v58, %v4093_v58  ;;  %v4097_v58 = vmul.f32 %v14516_v22, %v4033_v1  ;;  %v4037_v1 = vld [vmem:[#allocation2 + $0x1e1] sm:$0xff] }
 0x329   : > { %3535 = vst.msk [vmem:[#allocation3 + $0xb8] sm:$0xf] %vm2597_vm2, %v3377_v14  ;;  %4354 = vrot.lane.b32.xlu0 %v10176_v56, %s11331_s12  ;;  %7384 = vmatmul.mubr.bf16.gmra.mrb[76].mxu1 %v9605_v15  ;;  %v14624_v56 = vld [vmem:[%s15917_s7 + $0x1a8] sm:$0xff]  ;;  %v9615_v14 = vcombine.low %v5865_v60, %v5868_v40  ;;  %v10292_v15 = vpack.c.bf16 %v5020_v36, %v5020_v36  ;;  %v5877_v60 = vld [vmem:[#allocation3 + $0xd0] sm:$0xff] }
 0x32a   : > { %4356 = vrot.lane.b32.xlu1 %v10177_v28, %s11331_s12  ;;  %7391 = vmatprep.mubr.bf16.mxu1 %v11071_v47  ;;  %v5021_v30 = vmul.f32 %v14624_v56, %v4957_v32  ;;  %v4031_v28 = vld [vmem:[#allocation2 + $0x1a1] sm:$0xff]  ;;  %v4094_v47 = vmul.f32 %v14633_v62, %v4030_v35  ;;  %v5024_v36 = vmul.f32 %v14527_v16, %v4960_v46  ;;  %v4034_v35 = vld [vmem:[#allocation2 + $0x1c9] sm:$0xff] }
 0x32b   : > { %v4319_v2 = vpop.permute.xlu0 %4318  ;;  %v4961_v32 = vld [vmem:[#allocation2 + $0x1c7] sm:$0xff]  ;;  %v4964_v46 = vld [vmem:[#allocation2 + $0x1df] sm:$0xff] }
 0x32c   : > { %4470 = vst.msk [vmem:[#allocation3 + $0x148] sm:$0xf] %vm2597_vm2, %v4319_v2  ;;  %v4321_v25 = vpop.permute.xlu1 %4320  ;;  %v10182_v5 = vpack.c.bf16 %v4094_v47, %v4094_v47  ;;  %v5880_v40 = vld [vmem:[#allocation3 + $0xe4] sm:$0xff]  ;;  %v4098_v47 = vmul.f32 %v14543_v51, %v4034_v35 }
 0x32d   : > { %4471 = vst.msk [vmem:[#allocation3 + $0x15c] sm:$0xf] %vm2597_vm2, %v4321_v25  ;;  %5282 = vrot.lane.b32.xlu0 %v10288_v6, %s11331_s12  ;;  %v10293_v6 = vpack.c.bf16 %v5021_v30, %v5021_v30  ;;  %v4095_v25 = vmul.f32 %v14640_v61, %v4031_v28  ;;  %v5025_v30 = vmul.f32 %v14534_v54, %v4961_v32  ;;  %v4035_v28 = vld [vmem:[#allocation2 + $0x1d1] sm:$0xff]  ;;  %v4965_v32 = vld [vmem:[#allocation2 + $0x1e7] sm:$0xff] }
 0x32e   : > { %5284 = vrot.lane.b32.xlu1 %v10289_v44, %s11331_s12  ;;  %v4958_v44 = vld [vmem:[#allocation2 + $0x19f] sm:$0xff]  ;;  %v4038_v35 = vld [vmem:[#allocation2 + $0x1e9] sm:$0xff] }
 0x32f   : > { %v5247_v4 = vpop.permute.xlu0 %5246  ;;  %v5870_v26 = vld [vmem:[#allocation3 + $0xa0] sm:$0xff] }
 0x330   : > { %5398 = vst.msk [vmem:[#allocation3 + $0x14c] sm:$0xf] %vm2597_vm2, %v5247_v4  ;;  %v5249_v41 = vpop.permute.xlu1 %5248  ;;  %v5873_v53 = vld [vmem:[#allocation3 + $0xb4] sm:$0xff] }
 0x331   : > { %v11073_v43 = vld [vmem:[#allocation3 + $0xa4] ss:$20 sps:$4 sm:$0xff]   ;;  %5399 = vst.msk [vmem:[#allocation3 + $0x160] sm:$0xf] %vm2597_vm2, %v5249_v41  ;;  %4358 = vrot.lane.b32.xlu0 %v10178_v0, %s11331_s12  ;;  %v9618_v10 = vcombine.low %v5870_v26, %v5873_v53  ;;  %7392 = vmatmul.mubr.bf16.gmra.mrb[80].mxu1 %v9610_v55  ;;  %v14649_v0 = vld [vmem:[%s15917_s7 + $0x1b0] sm:$0xff]  ;;  %v10183_v41 = vpack.c.bf16 %v4095_v25, %v4095_v25 }
 0x332   : > { %4360 = vrot.lane.b32.xlu1 %v10179_v50, %s11331_s12  ;;  %7150 = vmatprep.mubr.bf16.mxu0 %v11073_v43  ;;  %v5022_v26 = vmul.f32 %v14649_v0, %v4958_v44  ;;  %v14656_v43 = vld [vmem:[%s15917_s7 + $0x1b8] sm:$0xff]  ;;  %v9620_v55 = vcombine.low %v5871_v13, %v5874_v52  ;;  %v4099_v25 = vmul.f32 %v14550_v9, %v4035_v28  ;;  %v4962_v44 = vld [vmem:[#allocation2 + $0x1cf] sm:$0xff]  ;;  %v4039_v28 = vld [vmem:[#allocation2 + $0x201] sm:$0xff] }
 0x333   : > { %v2450_v24 = vpop.permute.xlu0 %2449  ;;  %7151 = vmatmul.mubr.bf16.gmra.mrb[128].mxu0 %v9618_v10  ;;  %7399 = vmatprep.mubr.bf16.mxu1 %v11075_v7  ;;  %v5023_v18 = vmul.f32 %v14656_v43, %v4959_v29  ;;  %v11082_v7 = vld [vmem:[#allocation3 + $0xd4] ss:$20 sps:$4 sm:$0xff]   ;;  %v5883_v52 = vld [vmem:[#allocation3 + $0xf8] sm:$0xff]  ;;  %v5886_v13 = vld [vmem:[#allocation3 + $0x10c] sm:$0xff] }
 0x334   : > { %2608 = vst.msk [vmem:[#allocation3 + $0xc8] sm:$0xf] %vm2597_vm2, %v2450_v24  ;;  %v2452_v23 = vpop.permute.xlu1 %2451  ;;  %v4963_v29 = vld [vmem:[#allocation2 + $0x1d7] sm:$0xff] }
 0x335   : > { %2609 = vst.msk [vmem:[#allocation3 + $0xdc] sm:$0xf] %vm2597_vm2, %v2452_v23  ;;  %5286 = vrot.lane.b32.xlu0 %v10290_v59, %s11331_s12  ;;  %v10294_v59 = vpack.c.bf16 %v5022_v26, %v5022_v26  ;;  %v5026_v26 = vmul.f32 %v14559_v12, %v4962_v44  ;;  %v4966_v44 = vld [vmem:[#allocation2 + $0x1ef] sm:$0xff] }
 0x336   : > { %5288 = vrot.lane.b32.xlu1 %v10291_v48, %s11331_s12  ;;  %v10295_v48 = vpack.c.bf16 %v5023_v18, %v5023_v18  ;;  %v5027_v18 = vmul.f32 %v14566_v17, %v4963_v29  ;;  %v4967_v29 = vld [vmem:[#allocation2 + $0x207] sm:$0xff] }
 0x337   : > { %v3379_v20 = vpop.permute.xlu0 %3378 }
 0x338   : > { %3536 = vst.msk [vmem:[#allocation3 + $0xcc] sm:$0xf] %vm2597_vm2, %v3379_v20  ;;  %v3381_v57 = vpop.permute.xlu1 %3380 }
 0x339   : > { %3537 = vst.msk [vmem:[#allocation3 + $0xe0] sm:$0xf] %vm2597_vm2, %v3381_v57  ;;  %4362 = vrot.lane.b32.xlu0 %v10180_v11, %s11331_s12  ;;  %7400 = vmatmul.mubr.bf16.gmra.mrb[84].mxu1 %v9615_v14  ;;  %v10184_v11 = vpack.c.bf16 %v4096_v37, %v4096_v37  ;;  %v9625_v14 = vcombine.low %v5877_v60, %v5880_v40  ;;  %v5889_v40 = vld [vmem:[#allocation3 + $0x120] sm:$0xff] }
 0x33a   : > { %4364 = vrot.lane.b32.xlu1 %v10181_v45, %s11331_s12  ;;  %7407 = vmatprep.mubr.bf16.mxu1 %v11077_v3  ;;  %v10185_v45 = vpack.c.bf16 %v4097_v58, %v4097_v58  ;;  %v11084_v3 = vld [vmem:[#allocation3 + $0xfc] ss:$20 sps:$4 sm:$0xff]   ;;  %v4100_v37 = vmul.f32 %v14613_v8, %v4036_v27  ;;  %v4101_v58 = vmul.f32 %v14633_v62, %v4037_v1 }
 0x33b   : > { %v4323_v33 = vpop.permute.xlu0 %4322  ;;  %v5028_v60 = vmul.f32 %v14624_v56, %v4964_v46 }
 0x33c   : > { %4472 = vst.msk [vmem:[#allocation3 + $0x170] sm:$0xf] %vm2597_vm2, %v4323_v33  ;;  %v4325_v2 = vpop.permute.xlu1 %4324 }
 0x33d   : > { %4473 = vst.msk [vmem:[#allocation3 + $0x184] sm:$0xf] %vm2597_vm2, %v4325_v2  ;;  %5290 = vrot.lane.b32.xlu0 %v10292_v15, %s11331_s12  ;;  %v10296_v15 = vpack.c.bf16 %v5024_v36, %v5024_v36  ;;  %v10188_v36 = vpack.c.bf16 %v4100_v37, %v4100_v37 }
 0x33e   : > { %5292 = vrot.lane.b32.xlu1 %v10293_v6, %s11331_s12  ;;  %v10297_v6 = vpack.c.bf16 %v5025_v30, %v5025_v30  ;;  %v5029_v30 = vmul.f32 %v14649_v0, %v4965_v32 }
 0x33f   : > { %v5251_v21 = vpop.permute.xlu0 %5250  ;;  %v5876_v4 = vld [vmem:[#allocation3 + $0xc8] sm:$0xff] }
 0x340   : > { %5400 = vst.msk [vmem:[#allocation3 + $0x174] sm:$0xf] %vm2597_vm2, %v5251_v21  ;;  %v5253_v38 = vpop.permute.xlu1 %5252  ;;  %v5879_v50 = vld [vmem:[#allocation3 + $0xdc] sm:$0xff] }
 0x341   : > { %v11079_v53 = vld [vmem:[#allocation3 + $0xcc] ss:$20 sps:$4 sm:$0xff]   ;;  %5401 = vst.msk [vmem:[#allocation3 + $0x188] sm:$0xf] %vm2597_vm2, %v5253_v38  ;;  %4366 = vrot.lane.b32.xlu0 %v10182_v5, %s11331_s12  ;;  %v9623_v10 = vcombine.low %v5876_v4, %v5879_v50  ;;  %7408 = vmatmul.mubr.bf16.gmra.mrb[88].mxu1 %v9620_v55  ;;  %v10186_v5 = vpack.c.bf16 %v4098_v47, %v4098_v47 }
 0x342   : > { %4368 = vrot.lane.b32.xlu1 %v10183_v41, %s11331_s12  ;;  %7158 = vmatprep.mubr.bf16.mxu0 %v11079_v53  ;;  %v10187_v41 = vpack.c.bf16 %v4099_v25, %v4099_v25  ;;  %v9630_v55 = vcombine.low %v5883_v52, %v5886_v13  ;;  %v4102_v47 = vmul.f32 %v14640_v61, %v4038_v35  ;;  %v5895_v52 = vld [vmem:[#allocation3 + $0x148] sm:$0xff]  ;;  %v5898_v13 = vld [vmem:[#allocation3 + $0x15c] sm:$0xff] }
 0x343   : > { %v2454_v24 = vpop.permute.xlu0 %2453  ;;  %7159 = vmatmul.mubr.bf16.gmra.mrb[132].mxu0 %v9623_v10  ;;  %7415 = vmatprep.mubr.bf16.mxu1 %v11082_v7  ;;  %v11088_v7 = vld [vmem:[#allocation3 + $0x124] ss:$20 sps:$4 sm:$0xff]   ;;  %v4103_v25 = vmul.f32 %v14507_v63, %v4039_v28 }
 0x344   : > { %2610 = vst.msk [vmem:[#allocation3 + $0xf0] sm:$0xf] %vm2597_vm2, %v2454_v24  ;;  %v2456_v23 = vpop.permute.xlu1 %2455 }
 0x345   : > { %2611 = vst.msk [vmem:[#allocation3 + $0x104] sm:$0xf] %vm2597_vm2, %v2456_v23  ;;  %5294 = vrot.lane.b32.xlu0 %v10294_v59, %s11331_s12  ;;  %v10298_v59 = vpack.c.bf16 %v5026_v26, %v5026_v26  ;;  %v5030_v26 = vmul.f32 %v14656_v43, %v4966_v44 }
 0x346   : > { %5296 = vrot.lane.b32.xlu1 %v10295_v48, %s11331_s12  ;;  %v10299_v48 = vpack.c.bf16 %v5027_v18, %v5027_v18  ;;  %v4040_v18 = vld [vmem:[#allocation2 + $0x209] sm:$0xff] }
 0x347   : > { %v3383_v20 = vpop.permute.xlu0 %3382  ;;  %v5901_v46 = vld [vmem:[#allocation3 + $0x170] sm:$0xff] }
 0x348   : > { %3538 = vst.msk [vmem:[#allocation3 + $0xf4] sm:$0xf] %vm2597_vm2, %v3383_v20  ;;  %v3385_v57 = vpop.permute.xlu1 %3384  ;;  %v5892_v20 = vld [vmem:[#allocation3 + $0x134] sm:$0xff]  ;;  %v5904_v32 = vld [vmem:[#allocation3 + $0x184] sm:$0xff] }
 0x349   : > { %3539 = vst.msk [vmem:[#allocation3 + $0x108] sm:$0xf] %vm2597_vm2, %v3385_v57  ;;  %4370 = vrot.lane.b32.xlu0 %v10184_v11, %s11331_s12  ;;  %7416 = vmatmul.mubr.bf16.gmra.mrb[92].mxu1 %v9625_v14  ;;  %v9635_v14 = vcombine.low %v5889_v40, %v5892_v20  ;;  %v11095_v1 = vld [vmem:[#allocation3 + $0x174] ss:$20 sps:$4 sm:$0xff]  }
 0x34a   : > { %4372 = vrot.lane.b32.xlu1 %v10185_v45, %s11331_s12  ;;  %7423 = vmatprep.mubr.bf16.mxu1 %v11084_v3  ;;  %v10189_v45 = vpack.c.bf16 %v4101_v58, %v4101_v58  ;;  %v11091_v3 = vld [vmem:[#allocation3 + $0x14c] ss:$20 sps:$4 sm:$0xff]   ;;  %v4969_v58 = vld [vmem:[#allocation2 + $0x217] sm:$0xff] }
 0x34b   : > { %v4327_v33 = vpop.permute.xlu0 %4326 }
 0x34c   : > { %4474 = vst.msk [vmem:[#allocation3 + $0x198] sm:$0xf] %vm2597_vm2, %v4327_v33  ;;  %v4329_v2 = vpop.permute.xlu1 %4328 }
 0x34d   : > { %4475 = vst.msk [vmem:[#allocation3 + $0x1ac] sm:$0xf] %vm2597_vm2, %v4329_v2  ;;  %5298 = vrot.lane.b32.xlu0 %v10296_v15, %s11331_s12  ;;  %v10300_v15 = vpack.c.bf16 %v5028_v60, %v5028_v60  ;;  %v4042_v60 = vld [vmem:[#allocation2 + $0x219] sm:$0xff] }
 0x34e   : > { %5300 = vrot.lane.b32.xlu1 %v10297_v6, %s11331_s12  ;;  %v10301_v6 = vpack.c.bf16 %v5029_v30, %v5029_v30 }
 0x34f   : > { %v5255_v21 = vpop.permute.xlu0 %5254  ;;  %v5882_v4 = vld [vmem:[#allocation3 + $0xf0] sm:$0xff] }
 0x350   : > { %5402 = vst.msk [vmem:[#allocation3 + $0x19c] sm:$0xf] %vm2597_vm2, %v5255_v21  ;;  %v5257_v38 = vpop.permute.xlu1 %5256  ;;  %v5885_v50 = vld [vmem:[#allocation3 + $0x104] sm:$0xff] }
 0x351   : > { %v11086_v53 = vld [vmem:[#allocation3 + $0xf4] ss:$20 sps:$4 sm:$0xff]   ;;  %5403 = vst.msk [vmem:[#allocation3 + $0x1b0] sm:$0xf] %vm2597_vm2, %v5257_v38  ;;  %4374 = vrot.lane.b32.xlu0 %v10186_v5, %s11331_s12  ;;  %v9628_v10 = vcombine.low %v5882_v4, %v5885_v50  ;;  %7424 = vmatmul.mubr.bf16.gmra.mrb[96].mxu1 %v9630_v55  ;;  %v10190_v5 = vpack.c.bf16 %v4102_v47, %v4102_v47 }
 0x352   : > { %4376 = vrot.lane.b32.xlu1 %v10187_v41, %s11331_s12  ;;  %7166 = vmatprep.mubr.bf16.mxu0 %v11086_v53  ;;  %v10191_v41 = vpack.c.bf16 %v4103_v25, %v4103_v25  ;;  %v5031_v53 = vmul.f32 %v14527_v16, %v4967_v29  ;;  %v4041_v55 = vld [vmem:[#allocation2 + $0x211] sm:$0xff] }
 0x353   : > { %v2458_v24 = vpop.permute.xlu0 %2457  ;;  %7167 = vmatmul.mubr.bf16.gmra.mrb[136].mxu0 %v9628_v10  ;;  %7431 = vmatprep.mubr.bf16.mxu1 %v11088_v7  ;;  %v9640_v10 = vcombine.low %v5895_v52, %v5898_v13 }
 0x354   : > { %2612 = vst.msk [vmem:[#allocation3 + $0x118] sm:$0xf] %vm2597_vm2, %v2458_v24  ;;  %v2460_v23 = vpop.permute.xlu1 %2459  ;;  %v10302_v24 = vpack.c.bf16 %v5030_v26, %v5030_v26  ;;  %v10303_v37 = vpack.c.bf16 %v5031_v53, %v5031_v53 }
 0x355   : > { %2613 = vst.msk [vmem:[#allocation3 + $0x12c] sm:$0xf] %vm2597_vm2, %v2460_v23  ;;  %5302 = vrot.lane.b32.xlu0 %v10298_v59, %s11331_s12  ;;  %v4104_v59 = vmul.f32 %v14516_v22, %v4040_v18  ;;  %v4105_v23 = vmul.f32 %v14543_v51, %v4041_v55  ;;  %v5033_v51 = vmul.f32 %v14559_v12, %v4969_v58 }
 0x356   : > { %5304 = vrot.lane.b32.xlu1 %v10299_v48, %s11331_s12  ;;  %v4968_v48 = vld [vmem:[#allocation2 + $0x20f] sm:$0xff] }
 0x357   : > { %v3387_v11 = vpop.permute.xlu0 %3386  ;;  %v10192_v20 = vpack.c.bf16 %v4104_v59, %v4104_v59  ;;  %v5032_v22 = vmul.f32 %v14534_v54, %v4968_v48  ;;  %v4106_v54 = vmul.f32 %v14550_v9, %v4042_v60  ;;  %v10305_v12 = vpack.c.bf16 %v5033_v51, %v5033_v51  ;;  %v5907_v47 = vld [vmem:[#allocation3 + $0x198] sm:$0xff] }
 0x358   : > { %3540 = vst.msk [vmem:[#allocation3 + $0x11c] sm:$0xf] %vm2597_vm2, %v3387_v11  ;;  %v3389_v57 = vpop.permute.xlu1 %3388  ;;  %v11098_v30 = vld [vmem:[#allocation3 + $0x19c] ss:$20 sps:$4 sm:$0xff]  }
 0x359   : > { %3541 = vst.msk [vmem:[#allocation3 + $0x130] sm:$0xf] %vm2597_vm2, %v3389_v57  ;;  %4378 = vrot.lane.b32.xlu0 %v10188_v36, %s11331_s12  ;;  %7432 = vmatmul.mubr.bf16.gmra.mrb[100].mxu1 %v9635_v14  ;;  %v10193_v36 = vpack.c.bf16 %v4105_v23, %v4105_v23  ;;  %v9645_v57 = vcombine.low %v5901_v46, %v5904_v32 }
 0x35a   : > { %4380 = vrot.lane.b32.xlu1 %v10189_v45, %s11331_s12  ;;  %7439 = vmatprep.mubr.bf16.mxu1 %v11091_v3  ;;  %v4043_v45 = vld [vmem:[#allocation2 + $0x221] sm:$0xff]  ;;  %v10304_v14 = vpack.c.bf16 %v5032_v22, %v5032_v22  ;;  %v10194_v25 = vpack.c.bf16 %v4106_v54, %v4106_v54 }
 0x35b   : > { %v4331_v33 = vpop.permute.xlu0 %4330  ;;  %v4107_v3 = vmul.f32 %v14613_v8, %v4043_v45 }
 0x35c   : > { %4476 = vst.msk [vmem:[#allocation3 + $0x1c0] sm:$0xf] %vm2597_vm2, %v4331_v33  ;;  %v4333_v2 = vpop.permute.xlu1 %4332  ;;  %v4970_v33 = vld [vmem:[#allocation2 + $0x21f] sm:$0xff] }
 0x35d   : > { %4477 = vst.msk [vmem:[#allocation3 + $0x1d4] sm:$0xf] %vm2597_vm2, %v4333_v2  ;;  %5306 = vrot.lane.b32.xlu0 %v10300_v15, %s11331_s12  ;;  %v4971_v15 = vld [vmem:[#allocation2 + $0x227] sm:$0xff]  ;;  %v5034_v44 = vmul.f32 %v14566_v17, %v4970_v33  ;;  %v10195_v52 = vpack.c.bf16 %v4107_v3, %v4107_v3 }
 0x35e   : > { %5308 = vrot.lane.b32.xlu1 %v10301_v6, %s11331_s12  ;;  %v5910_v2 = vld [vmem:[#allocation3 + $0x1ac] sm:$0xff] }
 0x35f   : > { %v5259_v21 = vpop.permute.xlu0 %5258  ;;  %v5888_v4 = vld [vmem:[#allocation3 + $0x118] sm:$0xff]  ;;  %v9650_v26 = vcombine.low %v5907_v47, %v5910_v2 }
 0x360   : > { %5404 = vst.msk [vmem:[#allocation3 + $0x1c4] sm:$0xf] %vm2597_vm2, %v5259_v21  ;;  %v5261_v38 = vpop.permute.xlu1 %5260  ;;  %v5891_v63 = vld [vmem:[#allocation3 + $0x12c] sm:$0xff]  ;;  %v5035_v21 = vmul.f32 %v14624_v56, %v4971_v15  ;;  %v11113_v15 = vld [vmem:[#allocation3 + $0x60] ss:$20 sps:$4 sm:$0xff]  }
 0x361   : > { %v11093_v50 = vld [vmem:[#allocation3 + $0x11c] ss:$20 sps:$4 sm:$0xff]   ;;  %5405 = vst.msk [vmem:[#allocation3 + $0x1d8] sm:$0xf] %vm2597_vm2, %v5261_v38  ;;  %4382 = vrot.lane.b32.xlu0 %v10190_v5, %s11331_s12  ;;  %v9633_v27 = vcombine.low %v5888_v4, %v5891_v63  ;;  %7440 = vmatmul.mubr.bf16.gmra.mrb[104].mxu1 %v9640_v10  ;;  %v10306_v63 = vpack.c.bf16 %v5034_v44, %v5034_v44  ;;  %v11112_v33 = vld [vmem:[#allocation3 + $0x38] ss:$20 sps:$4 sm:$0xff]  }
 0x362   : > { %4384 = vrot.lane.b32.xlu1 %v10191_v41, %s11331_s12  ;;  %7174 = vmatprep.mubr.bf16.mxu0 %v11093_v50  ;;  %v4044_v5 = vld [vmem:[#allocation2 + $0x229] sm:$0xff]  ;;  %v4045_v38 = vld [vmem:[#allocation2 + $0x231] sm:$0xff]  ;;  %v10307_v53 = vpack.c.bf16 %v5035_v21, %v5035_v21 }
 0x363   : > { %v2462_v7 = vpop.permute.xlu0 %2461  ;;  %7175 = vmatmul.mubr.bf16.gmra.mrb[140].mxu0 %v9633_v27  ;;  %7447 = vmatprep.mubr.bf16.mxu1 %v11095_v1  ;;  %v4108_v50 = vmul.f32 %v14633_v62, %v4044_v5  ;;  %v4109_v18 = vmul.f32 %v14640_v61, %v4045_v38  ;;  %v4972_v27 = vld [vmem:[#allocation2 + $0x22f] sm:$0xff]  ;;  %v4973_v10 = vld [vmem:[#allocation2 + $0x237] sm:$0xff] }
 0x364   : > { %2614 = vst.msk [vmem:[#allocation3 + $0x140] sm:$0xf] %vm2597_vm2, %v2462_v7  ;;  %v2464_v16 = vpop.permute.xlu1 %2463  ;;  %v5036_v62 = vmul.f32 %v14649_v0, %v4972_v27  ;;  %v5037_v61 = vmul.f32 %v14656_v43, %v4973_v10 }
 0x365   : > { %2615 = vst.msk [vmem:[#allocation3 + $0x154] sm:$0xf] %vm2597_vm2, %v2464_v16  ;;  %5310 = vrot.lane.b32.xlu0 %v10302_v24, %s11331_s12  ;;  %v10196_v24 = vpack.c.bf16 %v4108_v50, %v4108_v50  ;;  %v10197_v16 = vpack.c.bf16 %v4109_v18, %v4109_v18  ;;  %v11120_v50 = vld [vmem:[#allocation3 + $0xd8] ss:$20 sps:$4 sm:$0xff]  }
 0x366   : > { %5312 = vrot.lane.b32.xlu1 %v10303_v37, %s11331_s12  ;;  %v10308_v58 = vpack.c.bf16 %v5036_v62, %v5036_v62  ;;  %v10309_v46 = vpack.c.bf16 %v5037_v61, %v5037_v61  ;;  %v11124_v62 = vld [vmem:[#allocation3 + $0x128] ss:$20 sps:$4 sm:$0xff]  }
 0x367   : > { %v3391_v40 = vpop.permute.xlu0 %3390  ;;  %v5913_v55 = vld [vmem:[#allocation3 + $0x1c0] sm:$0xff] }
 0x368   : > { %3542 = vst.msk [vmem:[#allocation3 + $0x144] sm:$0xf] %vm2597_vm2, %v3391_v40  ;;  %v3393_v11 = vpop.permute.xlu1 %3392  ;;  %v11102_v17 = vld [vmem:[#allocation3 + $0x1c4] ss:$20 sps:$4 sm:$0xff]  }
 0x369   : > { %3543 = vst.msk [vmem:[#allocation3 + $0x158] sm:$0xf] %vm2597_vm2, %v3393_v11  ;;  %4386 = vrot.lane.b32.xlu0 %v10192_v20, %s11331_s12  ;;  %7448 = vmatmul.mubr.bf16.gmra.mrb[108].mxu1 %v9645_v57  ;;  %v5916_v1 = vld [vmem:[#allocation3 + $0x1d4] sm:$0xff]  ;;  %v11109_v57 = vld [vmem:[#allocation3 + $0x10] ss:$20 sps:$4 sm:$0xff]  }
 0x36a   : > { %4388 = vrot.lane.b32.xlu1 %v10193_v36, %s11331_s12  ;;  %7455 = vmatprep.mubr.bf16.mxu1 %v11098_v30  ;;  %v9655_v37 = vcombine.low %v5913_v55, %v5916_v1 }
 0x36b   : > { %v4335_v35 = vpop.permute.xlu0 %4334 }
 0x36c   : > { %4478 = vst.msk [vmem:[#allocation3 + $0x1e8] sm:$0xf] %vm2597_vm2, %v4335_v35  ;;  %v4337_v28 = vpop.permute.xlu1 %4336 }
 0x36d   : > { %4479 = vst.msk [vmem:[#allocation3 + $0x1fc] sm:$0xf] %vm2597_vm2, %v4337_v28  ;;  %5314 = vrot.lane.b32.xlu0 %v10304_v14, %s11331_s12 }
 0x36e   : > { %5316 = vrot.lane.b32.xlu1 %v10305_v12, %s11331_s12 }
 0x36f   : > { %v5263_v6 = vpop.permute.xlu0 %5262  ;;  %v5894_v9 = vld [vmem:[#allocation3 + $0x140] sm:$0xff] }
 0x370   : > { %5406 = vst.msk [vmem:[#allocation3 + $0x1ec] sm:$0xf] %vm2597_vm2, %v5263_v6  ;;  %v5265_v29 = vpop.permute.xlu1 %5264  ;;  %v5897_v8 = vld [vmem:[#allocation3 + $0x154] sm:$0xff] }
 0x371   : > { %v11100_v13 = vld [vmem:[#allocation3 + $0x144] ss:$20 sps:$4 sm:$0xff]   ;;  %5407 = vst.msk [vmem:[#allocation3 + $0x200] sm:$0xf] %vm2597_vm2, %v5265_v29  ;;  %4390 = vrot.lane.b32.xlu0 %v10194_v25, %s11331_s12  ;;  %v9638_v4 = vcombine.low %v5894_v9, %v5897_v8  ;;  %7456 = vmatmul.mubr.bf16.gmra.mrb[0].mxu1 %v9650_v26  ;;  %v11116_v8 = vld [vmem:[#allocation3 + $0x88] ss:$20 sps:$4 sm:$0xff]  }
 0x372   : > { %4392 = vrot.lane.b32.xlu1 %v10195_v52, %s11331_s12  ;;  %7182 = vmatprep.mubr.bf16.mxu0 %v11100_v13  ;;  %v11117_v13 = vld [vmem:[#allocation3 + $0xb0] ss:$20 sps:$4 sm:$0xff]  }
 0x373   : > { %v2466_v41 = vpop.permute.xlu0 %2465  ;;  %7183 = vmatmul.mubr.bf16.gmra.mrb[144].mxu0 %v9638_v4  ;;  %7463 = vmatprep.mubr.bf16.mxu1 %v11102_v17 }
 0x374   : > { %2616 = vst.msk [vmem:[#allocation3 + $0x168] sm:$0xf] %vm2597_vm2, %v2466_v41  ;;  %v2468_v56 = vpop.permute.xlu1 %2467 }
 0x375   : > { %2617 = vst.msk [vmem:[#allocation3 + $0x17c] sm:$0xf] %vm2597_vm2, %v2468_v56  ;;  %5318 = vrot.lane.b32.xlu0 %v10306_v63, %s11331_s12  ;;  %v11121_v56 = vld [vmem:[#allocation3 + $0x100] ss:$20 sps:$4 sm:$0xff]  }
 0x376   : > { %5320 = vrot.lane.b32.xlu1 %v10307_v53, %s11331_s12 }
 0x377   : > { %v3395_v7 = vpop.permute.xlu0 %3394  ;;  %v5919_v43 = vld [vmem:[#allocation3 + $0x1e8] sm:$0xff] }
 0x378   : > { %3544 = vst.msk [vmem:[#allocation3 + $0x16c] sm:$0xf] %vm2597_vm2, %v3395_v7  ;;  %v3397_v59 = vpop.permute.xlu1 %3396  ;;  %v11104_v23 = vld [vmem:[#allocation3 + $0x1ec] ss:$20 sps:$4 sm:$0xff]  }
 0x379   : > { %3545 = vst.msk [vmem:[#allocation3 + $0x180] sm:$0xf] %vm2597_vm2, %v3397_v59  ;;  %4394 = vrot.lane.b32.xlu0 %v10196_v24, %s11331_s12  ;;  %7464 = vmatmul.mubr.bf16.gmra.mrb[4].mxu1 %v9655_v37  ;;  %v5922_v32 = vld [vmem:[#allocation3 + $0x1fc] sm:$0xff]  ;;  %v11125_v59 = vld [vmem:[#allocation3 + $0x150] ss:$20 sps:$4 sm:$0xff]  }
 0x37a   : > { %4396 = vrot.lane.b32.xlu1 %v10197_v16, %s11331_s12  ;;  %7471 = vmatprep.mubr.bf16.mxu1 %v11104_v23  ;;  %v9660_v60 = vcombine.low %v5919_v43, %v5922_v32  ;;  %v11128_v43 = vld [vmem:[#allocation3 + $0x178] ss:$20 sps:$4 sm:$0xff]   ;;  %v11129_v32 = vld [vmem:[#allocation3 + $0x1a0] ss:$20 sps:$4 sm:$0xff]  }
 0x37b   : > { %v4339_v48 = vpop.permute.xlu0 %4338 }
 0x37c   : > { %4480 = vst.msk [vmem:[#allocation3 + $0x210] sm:$0xf] %vm2597_vm2, %v4339_v48  ;;  %v4341_v0 = vpop.permute.xlu1 %4340 }
 0x37d   : > { %4481 = vst.msk [vmem:[#allocation3 + $0x224] sm:$0xf] %vm2597_vm2, %v4341_v0  ;;  %5322 = vrot.lane.b32.xlu0 %v10308_v58, %s11331_s12 }
 0x37e   : > { %5324 = vrot.lane.b32.xlu1 %v10309_v46, %s11331_s12 }
 0x37f   : > { %v5267_v40 = vpop.permute.xlu0 %5266  ;;  %v5900_v20 = vld [vmem:[#allocation3 + $0x168] sm:$0xff] }
 0x380   : > { %5408 = vst.msk [vmem:[#allocation3 + $0x214] sm:$0xf] %vm2597_vm2, %v5267_v40  ;;  %v5269_v22 = vpop.permute.xlu1 %5268  ;;  %v5903_v11 = vld [vmem:[#allocation3 + $0x17c] sm:$0xff] }
 0x381   : > { %v11107_v36 = vld [vmem:[#allocation3 + $0x16c] ss:$20 sps:$4 sm:$0xff]   ;;  %5409 = vst.msk [vmem:[#allocation3 + $0x228] sm:$0xf] %vm2597_vm2, %v5269_v22  ;;  %v9643_v51 = vcombine.low %v5900_v20, %v5903_v11  ;;  %7472 = vmatmul.mubr.bf16.gmra.mrb[8].mxu1 %v9660_v60 }
 0x382   : > { %7190 = vmatprep.mubr.bf16.mxu0 %v11107_v36 }
 0x383   : > { %v4343_v45 = vpop.permute.xlu0 %4342  ;;  %7191 = vmatmul.mubr.bf16.gmra.mrb[148].mxu0 %v9643_v51 }
 0x384   : > { %4482 = vst.msk [vmem:[#allocation3 + $0x238] sm:$0xf] %vm2597_vm2, %v4343_v45  ;;  %v4345_v30 = vpop.permute.xlu1 %4344  ;;  %10462 = vmatprep.mubr.msk.bf16.mxu0 %vm559_vm0, %v11109_v57  ;;  %v11132_v45 = vld [vmem:[#allocation3 + $0x1c8] ss:$20 sps:$4 sm:$0xff]  }
 0x385   : > { %4483 = vst.msk [vmem:[#allocation3 + $0x24c] sm:$0xf] %vm2597_vm2, %v4345_v30  ;;  %v11133_v30 = vld [vmem:[#allocation3 + $0x1f0] ss:$20 sps:$4 sm:$0xff]  }
 0x387   : > { %v5271_v35 = vpop.permute.xlu0 %5270  ;;  %v5925_v14 = vld [vmem:[#allocation3 + $0x210] sm:$0xff] }
 0x388   : > { %5410 = vst.msk [vmem:[#allocation3 + $0x23c] sm:$0xf] %vm2597_vm2, %v5271_v35  ;;  %v5273_v54 = vpop.permute.xlu1 %5272  ;;  %v5928_v28 = vld [vmem:[#allocation3 + $0x224] sm:$0xff] }
 0x389   : > { %v11110_v12 = vld [vmem:[#allocation3 + $0x214] ss:$20 sps:$4 sm:$0xff]   ;;  %5411 = vst.msk [vmem:[#allocation3 + $0x250] sm:$0xf] %vm2597_vm2, %v5273_v54  ;;  %v9665_v3 = vcombine.low %v5925_v14, %v5928_v28 }
 0x38a   : > { %7479 = vmatprep.mubr.bf16.mxu1 %v11110_v12 }
 0x38b   : > { %v4347_v47 = vpop.permute.xlu0 %4346  ;;  %7480 = vmatmul.mubr.bf16.gmra.mrb[12].mxu1 %v9665_v3  ;;  %10463 = vmatmul.mubr.msk.bf16.vlgmr.msra.gmra.mrb[152].mxu0 %vm559_vm0, %v11112_v33 }
 0x38c   : > { %4484 = vst.msk [vmem:[#allocation3 + $0x260] sm:$0xf] %vm2597_vm2, %v4347_v47  ;;  %v4349_v2 = vpop.permute.xlu1 %4348  ;;  %10466 = vmatprep.mubr.msk.bf16.mxu0 %vm559_vm0, %v11113_v15  ;;  %v11136_v47 = vld [vmem:[#allocation3 + $0x218] ss:$20 sps:$4 sm:$0xff]  }
 0x38d   : > { %4485 = vst.msk [vmem:[#allocation3 + $0x274] sm:$0xf] %vm2597_vm2, %v4349_v2  ;;  %v11137_v2 = vld [vmem:[#allocation3 + $0x240] ss:$20 sps:$4 sm:$0xff]  }
 0x38f   : > { %v5275_v6 = vpop.permute.xlu0 %5274  ;;  %v5931_v25 = vld [vmem:[#allocation3 + $0x238] sm:$0xff] }
 0x390   : > { %5412 = vst.msk [vmem:[#allocation3 + $0x264] sm:$0xf] %vm2597_vm2, %v5275_v6  ;;  %v5277_v9 = vpop.permute.xlu1 %5276  ;;  %v5934_v44 = vld [vmem:[#allocation3 + $0x24c] sm:$0xff] }
 0x391   : > { %v11114_v29 = vld [vmem:[#allocation3 + $0x23c] ss:$20 sps:$4 sm:$0xff]   ;;  %5413 = vst.msk [vmem:[#allocation3 + $0x278] sm:$0xf] %vm2597_vm2, %v5277_v9  ;;  %v9670_v52 = vcombine.low %v5931_v25, %v5934_v44 }
 0x392   : > { %7487 = vmatprep.mubr.bf16.mxu1 %v11114_v29 }
 0x393   : > { %v4351_v21 = vpop.permute.xlu0 %4350  ;;  %7488 = vmatmul.mubr.bf16.gmra.mrb[16].mxu1 %v9670_v52  ;;  %10467 = vmatmul.mubr.msk.bf16.gmra.mrb[156].mxu0 %vm559_vm0, %v11116_v8 }
 0x394   : > { %4486 = vst.msk [vmem:[#allocation3 + $0x288] sm:$0xf] %vm2597_vm2, %v4351_v21  ;;  %v4353_v5 = vpop.permute.xlu1 %4352  ;;  %10470 = vmatprep.mubr.msk.bf16.mxu0 %vm559_vm0, %v11117_v13  ;;  %v11140_v21 = vld [vmem:[#allocation3 + $0x268] ss:$20 sps:$4 sm:$0xff]  }
 0x395   : > { %4487 = vst.msk [vmem:[#allocation3 + $0x29c] sm:$0xf] %vm2597_vm2, %v4353_v5  ;;  %v11141_v5 = vld [vmem:[#allocation3 + $0x290] ss:$20 sps:$4 sm:$0xff]  }
 0x397   : > { %v5279_v4 = vpop.permute.xlu0 %5278  ;;  %v5937_v26 = vld [vmem:[#allocation3 + $0x260] sm:$0xff] }
 0x398   : > { %5414 = vst.msk [vmem:[#allocation3 + $0x28c] sm:$0xf] %vm2597_vm2, %v5279_v4  ;;  %v5281_v38 = vpop.permute.xlu1 %5280  ;;  %v5940_v17 = vld [vmem:[#allocation3 + $0x274] sm:$0xff] }
 0x399   : > { %v11118_v41 = vld [vmem:[#allocation3 + $0x264] ss:$20 sps:$4 sm:$0xff]   ;;  %5415 = vst.msk [vmem:[#allocation3 + $0x2a0] sm:$0xf] %vm2597_vm2, %v5281_v38  ;;  %v9675_v63 = vcombine.low %v5937_v26, %v5940_v17 }
 0x39a   : > { %7495 = vmatprep.mubr.bf16.mxu1 %v11118_v41 }
 0x39b   : > { %v4355_v53 = vpop.permute.xlu0 %4354  ;;  %7496 = vmatmul.mubr.bf16.gmra.mrb[20].mxu1 %v9675_v63  ;;  %10471 = vmatmul.mubr.msk.bf16.gmra.mrb[160].mxu0 %vm559_vm0, %v11120_v50 }
 0x39c   : > { %4488 = vst.msk [vmem:[#allocation3 + $0x2b0] sm:$0xf] %vm2597_vm2, %v4355_v53  ;;  %v4357_v18 = vpop.permute.xlu1 %4356  ;;  %10474 = vmatprep.mubr.msk.bf16.mxu0 %vm559_vm0, %v11121_v56  ;;  %v11144_v53 = vld [vmem:[#allocation3 + $0x2b8] ss:$20 sps:$4 sm:$0xff]  }
 0x39d   : > { %4489 = vst.msk [vmem:[#allocation3 + $0x2c4] sm:$0xf] %vm2597_vm2, %v4357_v18  ;;  %v11145_v18 = vld [vmem:[#allocation3 + $0x2e0] ss:$20 sps:$4 sm:$0xff]  }
 0x39f   : > { %v5283_v27 = vpop.permute.xlu0 %5282  ;;  %v5943_v10 = vld [vmem:[#allocation3 + $0x288] sm:$0xff] }
 0x3a0   : > { %5416 = vst.msk [vmem:[#allocation3 + $0x2b4] sm:$0xf] %vm2597_vm2, %v5283_v27  ;;  %v5285_v55 = vpop.permute.xlu1 %5284  ;;  %v5946_v1 = vld [vmem:[#allocation3 + $0x29c] sm:$0xff] }
 0x3a1   : > { %v11122_v7 = vld [vmem:[#allocation3 + $0x28c] ss:$20 sps:$4 sm:$0xff]   ;;  %5417 = vst.msk [vmem:[#allocation3 + $0x2c8] sm:$0xf] %vm2597_vm2, %v5285_v55  ;;  %v9680_v24 = vcombine.low %v5943_v10, %v5946_v1 }
 0x3a2   : > { %7503 = vmatprep.mubr.bf16.mxu1 %v11122_v7 }
 0x3a3   : > { %v4359_v16 = vpop.permute.xlu0 %4358  ;;  %7504 = vmatmul.mubr.bf16.gmra.mrb[24].mxu1 %v9680_v24  ;;  %10475 = vmatmul.mubr.msk.bf16.gmra.mrb[164].mxu0 %vm559_vm0, %v11124_v62 }
 0x3a4   : > { %4490 = vst.msk [vmem:[#allocation3 + $0x2d8] sm:$0xf] %vm2597_vm2, %v4359_v16  ;;  %v4361_v61 = vpop.permute.xlu1 %4360  ;;  %10478 = vmatprep.mubr.msk.bf16.mxu0 %vm559_vm0, %v11125_v59  ;;  %v11148_v16 = vld [vmem:[#allocation3 + $0x308] ss:$20 sps:$4 sm:$0xff]  }
 0x3a5   : > { %4491 = vst.msk [vmem:[#allocation3 + $0x2ec] sm:$0xf] %vm2597_vm2, %v4361_v61  ;;  %v11149_v61 = vld [vmem:[#allocation3 + $0x330] ss:$20 sps:$4 sm:$0xff]  }
 0x3a7   : > { %v5287_v37 = vpop.permute.xlu0 %5286  ;;  %v5949_v23 = vld [vmem:[#allocation3 + $0x2b0] sm:$0xff] }
 0x3a8   : > { %5418 = vst.msk [vmem:[#allocation3 + $0x2dc] sm:$0xf] %vm2597_vm2, %v5287_v37  ;;  %v5289_v48 = vpop.permute.xlu1 %5288  ;;  %v5952_v58 = vld [vmem:[#allocation3 + $0x2c4] sm:$0xff] }
 0x3a9   : > { %v11126_v0 = vld [vmem:[#allocation3 + $0x2b4] ss:$20 sps:$4 sm:$0xff]   ;;  %5419 = vst.msk [vmem:[#allocation3 + $0x2f0] sm:$0xf] %vm2597_vm2, %v5289_v48  ;;  %v9685_v46 = vcombine.low %v5949_v23, %v5952_v58 }
 0x3aa   : > { %7511 = vmatprep.mubr.bf16.mxu1 %v11126_v0 }
 0x3ab   : > { %v4363_v40 = vpop.permute.xlu0 %4362  ;;  %7512 = vmatmul.mubr.bf16.gmra.mrb[28].mxu1 %v9685_v46  ;;  %10479 = vmatmul.mubr.msk.bf16.gmra.mrb[168].mxu0 %vm559_vm0, %v11128_v43 }
 0x3ac   : > { %4492 = vst.msk [vmem:[#allocation3 + $0x300] sm:$0xf] %vm2597_vm2, %v4363_v40  ;;  %v4365_v20 = vpop.permute.xlu1 %4364  ;;  %10482 = vmatprep.mubr.msk.bf16.mxu0 %vm559_vm0, %v11129_v32  ;;  %v11152_v40 = vld [vmem:[#allocation3 + $0x358] ss:$20 sps:$4 sm:$0xff]  }
 0x3ad   : > { %4493 = vst.msk [vmem:[#allocation3 + $0x314] sm:$0xf] %vm2597_vm2, %v4365_v20  ;;  %v11153_v20 = vld [vmem:[#allocation3 + $0x380] ss:$20 sps:$4 sm:$0xff]  }
 0x3af   : > { %v5291_v22 = vpop.permute.xlu0 %5290  ;;  %v5955_v11 = vld [vmem:[#allocation3 + $0x2d8] sm:$0xff] }
 0x3b0   : > { %5420 = vst.msk [vmem:[#allocation3 + $0x304] sm:$0xf] %vm2597_vm2, %v5291_v22  ;;  %v5293_v36 = vpop.permute.xlu1 %5292  ;;  %v5958_v51 = vld [vmem:[#allocation3 + $0x2ec] sm:$0xff] }
 0x3b1   : > { %v11130_v60 = vld [vmem:[#allocation3 + $0x2dc] ss:$20 sps:$4 sm:$0xff]   ;;  %5421 = vst.msk [vmem:[#allocation3 + $0x318] sm:$0xf] %vm2597_vm2, %v5293_v36  ;;  %v9690_v57 = vcombine.low %v5955_v11, %v5958_v51 }
 0x3b2   : > { %7519 = vmatprep.mubr.bf16.mxu1 %v11130_v60 }
 0x3b3   : > { %v4367_v35 = vpop.permute.xlu0 %4366  ;;  %7520 = vmatmul.mubr.bf16.gmra.mrb[32].mxu1 %v9690_v57  ;;  %10483 = vmatmul.mubr.msk.bf16.gmra.mrb[172].mxu0 %vm559_vm0, %v11132_v45 }
 0x3b4   : > { %4494 = vst.msk [vmem:[#allocation3 + $0x328] sm:$0xf] %vm2597_vm2, %v4367_v35  ;;  %v4369_v14 = vpop.permute.xlu1 %4368  ;;  %10486 = vmatprep.mubr.msk.bf16.mxu0 %vm559_vm0, %v11133_v30  ;;  %v11156_v35 = vld [vmem:[#allocation3 + $0x3a8] ss:$20 sps:$4 sm:$0xff]  }
 0x3b5   : > { %4495 = vst.msk [vmem:[#allocation3 + $0x33c] sm:$0xf] %vm2597_vm2, %v4369_v14  ;;  %v11157_v14 = vld [vmem:[#allocation3 + $0x3d0] ss:$20 sps:$4 sm:$0xff]  }
 0x3b7   : > { %v5295_v54 = vpop.permute.xlu0 %5294  ;;  %v5961_v28 = vld [vmem:[#allocation3 + $0x300] sm:$0xff] }
 0x3b8   : > { %5422 = vst.msk [vmem:[#allocation3 + $0x32c] sm:$0xf] %vm2597_vm2, %v5295_v54  ;;  %v5297_v12 = vpop.permute.xlu1 %5296  ;;  %v5964_v3 = vld [vmem:[#allocation3 + $0x314] sm:$0xff] }
 0x3b9   : > { %v11134_v33 = vld [vmem:[#allocation3 + $0x304] ss:$20 sps:$4 sm:$0xff]   ;;  %5423 = vst.msk [vmem:[#allocation3 + $0x340] sm:$0xf] %vm2597_vm2, %v5297_v12  ;;  %v9695_v15 = vcombine.low %v5961_v28, %v5964_v3 }
 0x3ba   : > { %7527 = vmatprep.mubr.bf16.mxu1 %v11134_v33 }
 0x3bb   : > { %v4371_v6 = vpop.permute.xlu0 %4370  ;;  %7528 = vmatmul.mubr.bf16.gmra.mrb[36].mxu1 %v9695_v15  ;;  %10487 = vmatmul.mubr.msk.bf16.gmra.mrb[176].mxu0 %vm559_vm0, %v11136_v47 }
 0x3bc   : > { %4496 = vst.msk [vmem:[#allocation3 + $0x350] sm:$0xf] %vm2597_vm2, %v4371_v6  ;;  %v4373_v25 = vpop.permute.xlu1 %4372  ;;  %10490 = vmatprep.mubr.msk.bf16.mxu0 %vm559_vm0, %v11137_v2  ;;  %v11160_v6 = vld [vmem:[#allocation3 + $0x3f8] ss:$20 sps:$4 sm:$0xff]  }
 0x3bd   : > { %4497 = vst.msk [vmem:[#allocation3 + $0x364] sm:$0xf] %vm2597_vm2, %v4373_v25  ;;  %v11161_v25 = vld [vmem:[#allocation3 + $0x420] ss:$20 sps:$4 sm:$0xff]  }
 0x3bf   : > { %v5299_v9 = vpop.permute.xlu0 %5298  ;;  %v5967_v44 = vld [vmem:[#allocation3 + $0x328] sm:$0xff] }
 0x3c0   : > { %5424 = vst.msk [vmem:[#allocation3 + $0x354] sm:$0xf] %vm2597_vm2, %v5299_v9  ;;  %v5301_v29 = vpop.permute.xlu1 %5300  ;;  %v5970_v52 = vld [vmem:[#allocation3 + $0x33c] sm:$0xff] }
 0x3c1   : > { %v11138_v8 = vld [vmem:[#allocation3 + $0x32c] ss:$20 sps:$4 sm:$0xff]   ;;  %5425 = vst.msk [vmem:[#allocation3 + $0x368] sm:$0xf] %vm2597_vm2, %v5301_v29  ;;  %v9700_v13 = vcombine.low %v5967_v44, %v5970_v52 }
 0x3c2   : > { %7535 = vmatprep.mubr.bf16.mxu1 %v11138_v8 }
 0x3c3   : > { %v4375_v4 = vpop.permute.xlu0 %4374  ;;  %7536 = vmatmul.mubr.bf16.gmra.mrb[40].mxu1 %v9700_v13  ;;  %10491 = vmatmul.mubr.msk.bf16.gmra.mrb[180].mxu0 %vm559_vm0, %v11140_v21  ;;  %v11165_v21 = vld [vmem:[#allocation3 + $0x448] ss:$20 sps:$4 sm:$0xff]  }
 0x3c4   : > { %4498 = vst.msk [vmem:[#allocation3 + $0x378] sm:$0xf] %vm2597_vm2, %v4375_v4  ;;  %v4377_v26 = vpop.permute.xlu1 %4376  ;;  %10494 = vmatprep.mubr.msk.bf16.mxu0 %vm559_vm0, %v11141_v5 }
 0x3c5   : > { %4499 = vst.msk [vmem:[#allocation3 + $0x38c] sm:$0xf] %vm2597_vm2, %v4377_v26 }
 0x3c7   : > { %v5303_v38 = vpop.permute.xlu0 %5302  ;;  %v5973_v17 = vld [vmem:[#allocation3 + $0x350] sm:$0xff] }
 0x3c8   : > { %5426 = vst.msk [vmem:[#allocation3 + $0x37c] sm:$0xf] %vm2597_vm2, %v5303_v38  ;;  %v5305_v41 = vpop.permute.xlu1 %5304  ;;  %v5976_v63 = vld [vmem:[#allocation3 + $0x364] sm:$0xff] }
 0x3c9   : > { %v11142_v50 = vld [vmem:[#allocation3 + $0x354] ss:$20 sps:$4 sm:$0xff]   ;;  %5427 = vst.msk [vmem:[#allocation3 + $0x390] sm:$0xf] %vm2597_vm2, %v5305_v41  ;;  %v9705_v56 = vcombine.low %v5973_v17, %v5976_v63 }
 0x3ca   : > { %7543 = vmatprep.mubr.bf16.mxu1 %v11142_v50 }
 0x3cb   : > { %v4379_v27 = vpop.permute.xlu0 %4378  ;;  %7544 = vmatmul.mubr.bf16.gmra.mrb[44].mxu1 %v9705_v56  ;;  %10495 = vmatmul.mubr.msk.bf16.gmra.mrb[184].mxu0 %vm559_vm0, %v11144_v53 }
 0x3cc   : > { %4500 = vst.msk [vmem:[#allocation3 + $0x3a0] sm:$0xf] %vm2597_vm2, %v4379_v27  ;;  %v4381_v10 = vpop.permute.xlu1 %4380  ;;  %10498 = vmatprep.mubr.msk.bf16.mxu0 %vm559_vm0, %v11145_v18 }
 0x3cd   : > { %4501 = vst.msk [vmem:[#allocation3 + $0x3b4] sm:$0xf] %vm2597_vm2, %v4381_v10 }
 0x3cf   : > { %v5307_v55 = vpop.permute.xlu0 %5306  ;;  %v5979_v1 = vld [vmem:[#allocation3 + $0x378] sm:$0xff] }
 0x3d0   : > { %5428 = vst.msk [vmem:[#allocation3 + $0x3a4] sm:$0xf] %vm2597_vm2, %v5307_v55  ;;  %v5309_v7 = vpop.permute.xlu1 %5308  ;;  %v5982_v24 = vld [vmem:[#allocation3 + $0x38c] sm:$0xff] }
 0x3d1   : > { %v11146_v62 = vld [vmem:[#allocation3 + $0x37c] ss:$20 sps:$4 sm:$0xff]   ;;  %5429 = vst.msk [vmem:[#allocation3 + $0x3b8] sm:$0xf] %vm2597_vm2, %v5309_v7  ;;  %v9710_v59 = vcombine.low %v5979_v1, %v5982_v24 }
 0x3d2   : > { %7551 = vmatprep.mubr.bf16.mxu1 %v11146_v62 }
 0x3d3   : > { %v4383_v37 = vpop.permute.xlu0 %4382  ;;  %7552 = vmatmul.mubr.bf16.gmra.mrb[48].mxu1 %v9710_v59  ;;  %10499 = vmatmul.mubr.msk.bf16.gmra.mrb[188].mxu0 %vm559_vm0, %v11148_v16 }
 0x3d4   : > { %4502 = vst.msk [vmem:[#allocation3 + $0x3c8] sm:$0xf] %vm2597_vm2, %v4383_v37  ;;  %v4385_v23 = vpop.permute.xlu1 %4384  ;;  %10502 = vmatprep.mubr.msk.bf16.mxu0 %vm559_vm0, %v11149_v61 }
 0x3d5   : > { %4503 = vst.msk [vmem:[#allocation3 + $0x3dc] sm:$0xf] %vm2597_vm2, %v4385_v23 }
 0x3d7   : > { %v5311_v48 = vpop.permute.xlu0 %5310  ;;  %v5985_v58 = vld [vmem:[#allocation3 + $0x3a0] sm:$0xff] }
 0x3d8   : > { %5430 = vst.msk [vmem:[#allocation3 + $0x3cc] sm:$0xf] %vm2597_vm2, %v5311_v48  ;;  %v5313_v0 = vpop.permute.xlu1 %5312  ;;  %v5988_v46 = vld [vmem:[#allocation3 + $0x3b4] sm:$0xff] }
 0x3d9   : > { %v11150_v43 = vld [vmem:[#allocation3 + $0x3a4] ss:$20 sps:$4 sm:$0xff]   ;;  %5431 = vst.msk [vmem:[#allocation3 + $0x3e0] sm:$0xf] %vm2597_vm2, %v5313_v0  ;;  %v9715_v32 = vcombine.low %v5985_v58, %v5988_v46 }
 0x3da   : > { %7559 = vmatprep.mubr.bf16.mxu1 %v11150_v43 }
 0x3db   : > { %v4387_v22 = vpop.permute.xlu0 %4386  ;;  %7560 = vmatmul.mubr.bf16.gmra.mrb[52].mxu1 %v9715_v32  ;;  %10503 = vmatmul.mubr.msk.bf16.gmra.mrb[192].mxu0 %vm559_vm0, %v11152_v40 }
 0x3dc   : > { %4504 = vst.msk [vmem:[#allocation3 + $0x3f0] sm:$0xf] %vm2597_vm2, %v4387_v22  ;;  %v4389_v11 = vpop.permute.xlu1 %4388  ;;  %10506 = vmatprep.mubr.msk.bf16.mxu0 %vm559_vm0, %v11153_v20 }
 0x3dd   : > { %4505 = vst.msk [vmem:[#allocation3 + $0x404] sm:$0xf] %vm2597_vm2, %v4389_v11 }
 0x3df   : > { %v5315_v36 = vpop.permute.xlu0 %5314  ;;  %v5991_v51 = vld [vmem:[#allocation3 + $0x3c8] sm:$0xff] }
 0x3e0   : > { %5432 = vst.msk [vmem:[#allocation3 + $0x3f4] sm:$0xf] %vm2597_vm2, %v5315_v36  ;;  %v5317_v60 = vpop.permute.xlu1 %5316  ;;  %v5994_v57 = vld [vmem:[#allocation3 + $0x3dc] sm:$0xff] }
 0x3e1   : > { %v11154_v45 = vld [vmem:[#allocation3 + $0x3cc] ss:$20 sps:$4 sm:$0xff]   ;;  %5433 = vst.msk [vmem:[#allocation3 + $0x408] sm:$0xf] %vm2597_vm2, %v5317_v60  ;;  %v9720_v30 = vcombine.low %v5991_v51, %v5994_v57 }
 0x3e2   : > { %7567 = vmatprep.mubr.bf16.mxu1 %v11154_v45 }
 0x3e3   : > { %v4391_v54 = vpop.permute.xlu0 %4390  ;;  %7568 = vmatmul.mubr.bf16.gmra.mrb[56].mxu1 %v9720_v30  ;;  %10507 = vmatmul.mubr.msk.bf16.gmra.mrb[196].mxu0 %vm559_vm0, %v11156_v35 }
 0x3e4   : > { %4506 = vst.msk [vmem:[#allocation3 + $0x418] sm:$0xf] %vm2597_vm2, %v4391_v54  ;;  %v4393_v28 = vpop.permute.xlu1 %4392  ;;  %10510 = vmatprep.mubr.msk.bf16.mxu0 %vm559_vm0, %v11157_v14 }
 0x3e5   : > { %4507 = vst.msk [vmem:[#allocation3 + $0x42c] sm:$0xf] %vm2597_vm2, %v4393_v28 }
 0x3e7   : > { %v5319_v12 = vpop.permute.xlu0 %5318  ;;  %v5997_v3 = vld [vmem:[#allocation3 + $0x3f0] sm:$0xff] }
 0x3e8   : > { %5434 = vst.msk [vmem:[#allocation3 + $0x41c] sm:$0xf] %vm2597_vm2, %v5319_v12  ;;  %v5321_v33 = vpop.permute.xlu1 %5320  ;;  %v6000_v15 = vld [vmem:[#allocation3 + $0x404] sm:$0xff] }
 0x3e9   : > { %v11158_v47 = vld [vmem:[#allocation3 + $0x3f4] ss:$20 sps:$4 sm:$0xff]   ;;  %5435 = vst.msk [vmem:[#allocation3 + $0x430] sm:$0xf] %vm2597_vm2, %v5321_v33  ;;  %v9725_v2 = vcombine.low %v5997_v3, %v6000_v15 }
 0x3ea   : > { %7575 = vmatprep.mubr.bf16.mxu1 %v11158_v47 }
 0x3eb   : > { %v4395_v9 = vpop.permute.xlu0 %4394  ;;  %7576 = vmatmul.mubr.bf16.gmra.mrb[60].mxu1 %v9725_v2  ;;  %10511 = vmatmul.mubr.msk.bf16.gmra.mrb[200].mxu0 %vm559_vm0, %v11160_v6 }
 0x3ec   : > { %4508 = vst.msk [vmem:[#allocation3 + $0x440] sm:$0xf] %vm2597_vm2, %v4395_v9  ;;  %v4397_v44 = vpop.permute.xlu1 %4396  ;;  %10514 = vmatprep.mubr.msk.bf16.mxu0 %vm559_vm0, %v11161_v25  ;;  %v11164_v13 = vld [vmem:[#allocation3 + $0x418] ss:$20 sps:$4 sm:$0xff]  }
 0x3ed   : > { %4509 = vst.msk [vmem:[#allocation3 + $0x454] sm:$0xf] %vm2597_vm2, %v4397_v44 }
 0x3ef   : > { %v5323_v29 = vpop.permute.xlu0 %5322 }
 0x3f0   : > { %5436 = vst.msk [vmem:[#allocation3 + $0x444] sm:$0xf] %vm2597_vm2, %v5323_v29  ;;  %v5325_v52 = vpop.permute.xlu1 %5324  ;;  %v11162_v8 = vld [vmem:[#allocation3 + $0x41c] ss:$20 sps:$4 sm:$0xff]  }
 0x3f1   : > { %5437 = vst.msk [vmem:[#allocation3 + $0x458] sm:$0xf] %vm2597_vm2, %v5325_v52  ;;  %7583 = vmatprep.mubr.bf16.mxu1 %v11162_v8 }
 0x3f3   : > { %7584 = vmatmul.mubr.bf16.gmra.mrb[64].mxu1 %v11164_v13  ;;  %10515 = vmatmul.mubr.msk.bf16.gmra.mrb[204].mxu0 %vm559_vm0, %v11165_v21 }
 0x3f4   : > { %v7377_v4 = vpop.f32.mrb[72].mxu1  ;;  %v11168_v27 = vld [vmem:[#allocation3 + $0x440] ss:$20 sps:$4 sm:$0xff]  }
 0x3f5   : > { %v14837_v26 = vadd.f32 %v7377_v4, %v14349_v34  ;;  %v7379_v17 = vpop.f32.mrb[73].mxu1 }
 0x3f6   : > { %v7144_v5 = vpop.f32.mrb[124].mxu0  ;;  %v7380_v63 = vpop.f32.mrb[74].mxu1 }
 0x3f7   : > { %v7146_v38 = vpop.f32.mrb[125].mxu0  ;;  %v14840_v56 = vadd.f32 %v7380_v63, %v14355_v42  ;;  %v7382_v18 = vpop.f32.mrb[75].mxu1 }
 0x3f8   : > { %v7147_v41 = vpop.f32.mrb[126].mxu0  ;;  %v11166_v50 = vld [vmem:[#allocation3 + $0x444] ss:$20 sps:$4 sm:$0xff]  }
 0x3f9   : > { %v7149_v53 = vpop.f32.mrb[127].mxu0  ;;  %7591 = vmatprep.mubr.bf16.mxu1 %v11166_v50 }
 0x3fb   : > { %7592 = vmatmul.mubr.bf16.gmra.mrb[68].mxu1 %v11168_v27 }
 0x3fc   : > { %v7385_v10 = vpop.f32.mrb[76].mxu1 }
 0x3fd   : > { %v14843_v55 = vadd.f32 %v7385_v10, %v14441_v49  ;;  %v7387_v1 = vpop.f32.mrb[77].mxu1 }
 0x3fe   : > { %v7388_v34 = vpop.f32.mrb[78].mxu1 }
 0x3ff   : > { %v14846_v7 = vadd.f32 %v7388_v34, %v14449_v39  ;;  %v7390_v24 = vpop.f32.mrb[79].mxu1 }
 0x404   : > { %v7393_v59 = vpop.f32.mrb[80].mxu1 }
 0x405   : > { %v14849_v42 = vadd.f32 %v7393_v59, %v14511_v31  ;;  %v7395_v61 = vpop.f32.mrb[81].mxu1 }
 0x406   : > { %v7152_v62 = vpop.f32.mrb[128].mxu0  ;;  %v7396_v23 = vpop.f32.mrb[82].mxu1 }
 0x407   : > { %v7154_v16 = vpop.f32.mrb[129].mxu0  ;;  %v14852_v48 = vadd.f32 %v7396_v23, %v14522_v19  ;;  %v7398_v58 = vpop.f32.mrb[83].mxu1 }
 0x408   : > { %v7155_v37 = vpop.f32.mrb[130].mxu0 }
 0x409   : > { %v7157_v49 = vpop.f32.mrb[131].mxu0 }
 0x40c   : > { %v7401_v0 = vpop.f32.mrb[84].mxu1 }
 0x40d   : > { %v14854_v46 = vadd.f32 %v7401_v0, %v7144_v5  ;;  %v7403_v39 = vpop.f32.mrb[85].mxu1 }
 0x40e   : > { %v7404_v43 = vpop.f32.mrb[86].mxu1 }
 0x40f   : > { %v14856_v32 = vadd.f32 %v7404_v43, %v7147_v41  ;;  %v7406_v40 = vpop.f32.mrb[87].mxu1 }
 0x414   : > { %v7409_v31 = vpop.f32.mrb[88].mxu1 }
 0x415   : > { %v14858_v22 = vadd.f32 %v7409_v31, %v7152_v62  ;;  %v7411_v36 = vpop.f32.mrb[89].mxu1 }
 0x416   : > { %v7160_v20 = vpop.f32.mrb[132].mxu0  ;;  %v7412_v60 = vpop.f32.mrb[90].mxu1 }
 0x417   : > { %v7162_v11 = vpop.f32.mrb[133].mxu0  ;;  %v14860_v19 = vadd.f32 %v7412_v60, %v7155_v37  ;;  %v7414_v45 = vpop.f32.mrb[91].mxu1 }
 0x418   : > { %v7163_v51 = vpop.f32.mrb[134].mxu0 }
 0x419   : > { %v7165_v57 = vpop.f32.mrb[135].mxu0 }
 0x41c   : > { %v7417_v30 = vpop.f32.mrb[92].mxu1 }
 0x41d   : > { %v14862_v35 = vadd.f32 %v7417_v30, %v7160_v20  ;;  %v7419_v14 = vpop.f32.mrb[93].mxu1 }
 0x41e   : > { %v7420_v54 = vpop.f32.mrb[94].mxu1 }
 0x41f   : > { %v14864_v28 = vadd.f32 %v7420_v54, %v7163_v51  ;;  %v7422_v12 = vpop.f32.mrb[95].mxu1 }
 0x424   : > { %v7425_v33 = vpop.f32.mrb[96].mxu1 }
 0x425   : > { %v7427_v2 = vpop.f32.mrb[97].mxu1 }
 0x426   : > { %v7168_v3 = vpop.f32.mrb[136].mxu0  ;;  %v7428_v25 = vpop.f32.mrb[98].mxu1 }
 0x427   : > { %v14866_v15 = vadd.f32 %v7425_v33, %v7168_v3  ;;  %v7170_v47 = vpop.f32.mrb[137].mxu0  ;;  %v7430_v29 = vpop.f32.mrb[99].mxu1 }
 0x428   : > { %v7171_v6 = vpop.f32.mrb[138].mxu0  ;;  %v14899_v47 = vld [vmem:[%s15915_s5] ss:$0 sm:$0xff] }
 0x429   : > { %v14868_v9 = vadd.f32 %v7428_v25, %v7171_v6  ;;  %v7173_v44 = vpop.f32.mrb[139].mxu0 }
 0x42a   : > { %v14905_v44 = vld [vmem:[%s15916_s6] ss:$0 sm:$0xff] }
 0x42c   : > { %v7433_v52 = vpop.f32.mrb[100].mxu1 }
 0x42d   : > { %v7435_v8 = vpop.f32.mrb[101].mxu1 }
 0x42e   : > { %v7436_v13 = vpop.f32.mrb[102].mxu1 }
 0x42f   : > { %v7438_v21 = vpop.f32.mrb[103].mxu1 }
 0x434   : > { %v7441_v4 = vpop.f32.mrb[104].mxu1 }
 0x435   : > { %v7443_v41 = vpop.f32.mrb[105].mxu1 }
 0x436   : > { %v7176_v5 = vpop.f32.mrb[140].mxu0  ;;  %v7444_v50 = vpop.f32.mrb[106].mxu1 }
 0x437   : > { %v14870_v38 = vadd.f32 %v7433_v52, %v7176_v5  ;;  %v7178_v17 = vpop.f32.mrb[141].mxu0  ;;  %v7446_v27 = vpop.f32.mrb[107].mxu1 }
 0x438   : > { %v7179_v63 = vpop.f32.mrb[142].mxu0 }
 0x439   : > { %v14872_v53 = vadd.f32 %v7436_v13, %v7179_v63  ;;  %v7181_v18 = vpop.f32.mrb[143].mxu0 }
 0x43c   : > { %v7449_v10 = vpop.f32.mrb[108].mxu1 }
 0x43d   : > { %v7451_v1 = vpop.f32.mrb[109].mxu1 }
 0x43e   : > { %v7452_v34 = vpop.f32.mrb[110].mxu1 }
 0x43f   : > { %v7454_v24 = vpop.f32.mrb[111].mxu1 }
 0x444   : > { %v14874_v59 = vpop.f32.mrb[0].mxu1 }
 0x445   : > { %v7459_v37 = vpop.f32.mrb[1].mxu1 }
 0x446   : > { %v7184_v62 = vpop.f32.mrb[144].mxu0  ;;  %v14878_v49 = vpop.f32.mrb[2].mxu1 }
 0x447   : > { %v14876_v16 = vadd.f32 %v7441_v4, %v7184_v62  ;;  %v7186_v61 = vpop.f32.mrb[145].mxu0  ;;  %v7462_v39 = vpop.f32.mrb[3].mxu1 }
 0x448   : > { %v7187_v23 = vpop.f32.mrb[146].mxu0 }
 0x449   : > { %v14880_v58 = vadd.f32 %v7444_v50, %v7187_v23  ;;  %v7189_v0 = vpop.f32.mrb[147].mxu0 }
 0x44c   : > { %v14882_v43 = vpop.f32.mrb[4].mxu1 }
 0x44d   : > { %v7467_v40 = vpop.f32.mrb[5].mxu1 }
 0x44e   : > { %v14884_v20 = vpop.f32.mrb[6].mxu1 }
 0x44f   : > { %v7470_v31 = vpop.f32.mrb[7].mxu1 }
 0x454   : > { %v14886_v36 = vpop.f32.mrb[8].mxu1 }
 0x455   : > { %v7475_v57 = vpop.f32.mrb[9].mxu1 }
 0x456   : > { %v7192_v11 = vpop.f32.mrb[148].mxu0  ;;  %v14890_v30 = vpop.f32.mrb[10].mxu1 }
 0x457   : > { %v14888_v51 = vadd.f32 %v7449_v10, %v7192_v11  ;;  %v7194_v60 = vpop.f32.mrb[149].mxu0  ;;  %v7478_v12 = vpop.f32.mrb[11].mxu1 }
 0x458   : > { %v7195_v45 = vpop.f32.mrb[150].mxu0 }
 0x459   : > { %v14892_v14 = vadd.f32 %v7452_v34, %v7195_v45  ;;  %v7197_v54 = vpop.f32.mrb[151].mxu0 }
 0x45e   : > { %v14894_v3 = vpop.f32.mrb[12].mxu1  ;;  %v10464_v33 = vpop.f32.mrb[152].mxu0 }
 0x45f   : > { %v7643_v2 = vadd.f32 %v10464_v33, %v14843_v55  ;;  %v7483_v6 = vpop.f32.mrb[13].mxu1  ;;  %v7634_v25 = vpop.f32.mrb[153].mxu0 }
 0x460   : > { %v7635_v29 = vadd.f32 %v7634_v25, %v14837_v26  ;;  %v14908_v52 = vpop.f32.mrb[14].mxu1  ;;  %v10465_v8 = vpop.f32.mrb[154].mxu0 }
 0x461   : > { %v7866_v13 = vmul.f32 %v14899_v47, %v7643_v2  ;;  %v7646_v21 = vadd.f32 %v10465_v8, %v14846_v7  ;;  %v7486_v5 = vpop.f32.mrb[15].mxu1  ;;  %v7637_v4 = vpop.f32.mrb[155].mxu0 }
 0x462   : > { %v7864_v55 = vmul.f32 %v14899_v47, %v7635_v29  ;;  %v7638_v17 = vadd.f32 %v7637_v4, %v14840_v56 }
 0x463   : > { %v14915_v41 = vadd.f32 %v14905_v44, %v7866_v13  ;;  %v7867_v63 = vmul.f32 %v14899_v47, %v7646_v21 }
 0x464   : > { %v14919_v26 = vadd.f32 %v14905_v44, %v7864_v55  ;;  %v7865_v50 = vmul.f32 %v14899_v47, %v7638_v17 }
 0x465   : > { %v14923_v18 = vadd.f32 %v14905_v44, %v7867_v63  ;;  %v16000_v56 = vmax.f32 %v14915_v41, 0.0 }
 0x466   : > { %v14926_v7 = vadd.f32 %v14905_v44, %v7865_v50  ;;  %v14928_v27 = vpop.f32.mrb[16].mxu1  ;;  %v10468_v10 = vpop.f32.mrb[156].mxu0  ;;  %v15994_v61 = vmax.f32 %v14919_v26, 0.0 }
 0x467   : > { %v16001_v1 = vmax.f32 %v14923_v18, 0.0  ;;  %v7659_v34 = vadd.f32 %v10468_v10, %v14854_v46  ;;  %v7491_v24 = vpop.f32.mrb[17].mxu1  ;;  %v7650_v62 = vpop.f32.mrb[157].mxu0 }
 0x468   : > { %v15995_v37 = vmax.f32 %v14926_v7, 0.0  ;;  %v7651_v23 = vadd.f32 %v7650_v62, %v14849_v42  ;;  %v14936_v0 = vpop.f32.mrb[18].mxu1  ;;  %v10469_v39 = vpop.f32.mrb[158].mxu0 }
 0x469   : > { %v10660_v40 = vpack.i.bf16 %v16001_v1, %v16000_v56  ;;  %v7870_v31 = vmul.f32 %v14899_v47, %v7659_v34  ;;  %v7662_v46 = vadd.f32 %v10469_v39, %v14856_v32  ;;  %v7494_v11 = vpop.f32.mrb[19].mxu1  ;;  %v7653_v60 = vpop.f32.mrb[159].mxu0 }
 0x46a   : > { %v10655_v57 = vpack.i.bf16 %v15995_v37, %v15994_v61  ;;  %v7868_v42 = vmul.f32 %v14899_v47, %v7651_v23  ;;  %v7654_v45 = vadd.f32 %v7653_v60, %v14852_v48 }
 0x46b   : > { %v14951_v54 = vadd.f32 %v14905_v44, %v7870_v31  ;;  %v7871_v12 = vmul.f32 %v14899_v47, %v7662_v46  ;;  %10661 = vrot.lane.b32.xlu1 %v10660_v40, %s11331_s12 }
 0x46c   : > { %v14956_v32 = vadd.f32 %v14905_v44, %v7868_v42  ;;  %v7869_v33 = vmul.f32 %v14899_v47, %v7654_v45  ;;  %10656 = vrot.lane.b32.xlu0 %v10655_v57, %s11331_s12 }
 0x46d   : > { %v14961_v2 = vadd.f32 %v14905_v44, %v7871_v12  ;;  %v15988_v29 = vmax.f32 %v14951_v54, 0.0 }
 0x46e   : > { %v14964_v6 = vadd.f32 %v14905_v44, %v7869_v33  ;;  %v14966_v48 = vpop.f32.mrb[20].mxu1  ;;  %v10472_v25 = vpop.f32.mrb[160].mxu0  ;;  %v15982_v4 = vmax.f32 %v14956_v32, 0.0 }
 0x46f   : > { %v15989_v8 = vmax.f32 %v14961_v2, 0.0  ;;  %v7675_v13 = vadd.f32 %v10472_v25, %v14862_v35  ;;  %v7499_v21 = vpop.f32.mrb[21].mxu1  ;;  %v7666_v5 = vpop.f32.mrb[161].mxu0 }
 0x470   : > { %v15983_v55 = vmax.f32 %v14964_v6, 0.0  ;;  %v7667_v17 = vadd.f32 %v7666_v5, %v14858_v22  ;;  %v14974_v63 = vpop.f32.mrb[22].mxu1  ;;  %v10473_v50 = vpop.f32.mrb[162].mxu0 }
 0x471   : > { %v10670_v10 = vpack.i.bf16 %v15989_v8, %v15988_v29  ;;  %v7874_v34 = vmul.f32 %v14899_v47, %v7675_v13  ;;  %v7678_v35 = vadd.f32 %v10473_v50, %v14864_v28  ;;  %v7502_v24 = vpop.f32.mrb[23].mxu1  ;;  %v7669_v62 = vpop.f32.mrb[163].mxu0 }
 0x472   : > { %v10665_v23 = vpack.i.bf16 %v15983_v55, %v15982_v4  ;;  %v7872_v22 = vmul.f32 %v14899_v47, %v7667_v17  ;;  %v7670_v39 = vadd.f32 %v7669_v62, %v14860_v19 }
 0x473   : > { %v14989_v40 = vadd.f32 %v14905_v44, %v7874_v34  ;;  %v7875_v31 = vmul.f32 %v14899_v47, %v7678_v35  ;;  %10671 = vrot.lane.b32.xlu1 %v10670_v10, %s11331_s12 }
 0x474   : > { %v14994_v28 = vadd.f32 %v14905_v44, %v7872_v22  ;;  %v7873_v46 = vmul.f32 %v14899_v47, %v7670_v39  ;;  %10666 = vrot.lane.b32.xlu0 %v10665_v23, %s11331_s12 }
 0x475   : > { %v14999_v11 = vadd.f32 %v14905_v44, %v7875_v31  ;;  %v15976_v42 = vmax.f32 %v14989_v40, 0.0 }
 0x476   : > { %v15002_v60 = vadd.f32 %v14905_v44, %v7873_v46  ;;  %v15004_v19 = vpop.f32.mrb[24].mxu1  ;;  %v10476_v57 = vpop.f32.mrb[164].mxu0  ;;  %v15970_v13 = vmax.f32 %v14994_v28, 0.0 }
 0x477   : > { %v15977_v45 = vmax.f32 %v14999_v11, 0.0  ;;  %v7691_v12 = vadd.f32 %v10476_v57, %v14870_v38  ;;  %v7507_v33 = vpop.f32.mrb[25].mxu1  ;;  %v7682_v25 = vpop.f32.mrb[165].mxu0 }
 0x478   : > { %v15971_v21 = vmax.f32 %v15002_v60, 0.0  ;;  %v7683_v5 = vadd.f32 %v7682_v25, %v14866_v15  ;;  %v15012_v17 = vpop.f32.mrb[26].mxu1  ;;  %v10477_v50 = vpop.f32.mrb[166].mxu0 }
 0x479   : > { %v10680_v10 = vpack.i.bf16 %v15977_v45, %v15976_v42  ;;  %v7878_v34 = vmul.f32 %v14899_v47, %v7691_v12  ;;  %v7694_v38 = vadd.f32 %v10477_v50, %v14872_v53  ;;  %v7510_v35 = vpop.f32.mrb[27].mxu1  ;;  %v7685_v24 = vpop.f32.mrb[167].mxu0 }
 0x47a   : > { %v10675_v62 = vpack.i.bf16 %v15971_v21, %v15970_v13  ;;  %v7876_v15 = vmul.f32 %v14899_v47, %v7683_v5  ;;  %v7686_v23 = vadd.f32 %v7685_v24, %v14868_v9 }
 0x47b   : > { %v15027_v22 = vadd.f32 %v14905_v44, %v7878_v34  ;;  %v7879_v39 = vmul.f32 %v14899_v47, %v7694_v38  ;;  %10681 = vrot.lane.b32.xlu1 %v10680_v10, %s11331_s12 }
 0x47c   : > { %v15032_v53 = vadd.f32 %v14905_v44, %v7876_v15  ;;  %v7877_v31 = vmul.f32 %v14899_v47, %v7686_v23  ;;  %10676 = vrot.lane.b32.xlu0 %v10675_v62, %s11331_s12 }
 0x47d   : > { %v15037_v46 = vadd.f32 %v14905_v44, %v7879_v39  ;;  %v15966_v33 = vmax.f32 %v15027_v22, 0.0 }
 0x47e   : > { %v15040_v57 = vadd.f32 %v14905_v44, %v7877_v31  ;;  %v15042_v9 = vpop.f32.mrb[28].mxu1  ;;  %v10480_v12 = vpop.f32.mrb[168].mxu0  ;;  %v15967_v34 = vmax.f32 %v15032_v53, 0.0 }
 0x47f   : > { %v15969_v25 = vmax.f32 %v15037_v46, 0.0  ;;  %v7707_v5 = vadd.f32 %v10480_v12, %v14888_v51  ;;  %v7515_v50 = vpop.f32.mrb[29].mxu1  ;;  %v7698_v10 = vpop.f32.mrb[169].mxu0 }
 0x480   : > { %v15968_v38 = vmax.f32 %v15040_v57, 0.0  ;;  %v7699_v35 = vadd.f32 %v7698_v10, %v14876_v16  ;;  %v15050_v24 = vpop.f32.mrb[30].mxu1  ;;  %v10481_v62 = vpop.f32.mrb[170].mxu0 }
 0x481   : > { %v10690_v15 = vpack.i.bf16 %v15969_v25, %v15966_v33  ;;  %v7882_v23 = vmul.f32 %v14899_v47, %v7707_v5  ;;  %v7710_v51 = vadd.f32 %v10481_v62, %v14892_v14  ;;  %v7518_v39 = vpop.f32.mrb[31].mxu1  ;;  %v7701_v31 = vpop.f32.mrb[171].mxu0 }
 0x482   : > { %v10685_v12 = vpack.i.bf16 %v15968_v38, %v15967_v34  ;;  %v7880_v16 = vmul.f32 %v14899_v47, %v7699_v35  ;;  %v7702_v50 = vadd.f32 %v7701_v31, %v14880_v58 }
 0x483   : > { %v15065_v10 = vadd.f32 %v14905_v44, %v7882_v23  ;;  %v7883_v33 = vmul.f32 %v14899_v47, %v7710_v51  ;;  %10691 = vrot.lane.b32.xlu1 %v10690_v15, %s11331_s12 }
 0x484   : > { %v15070_v14 = vadd.f32 %v14905_v44, %v7880_v16  ;;  %v7881_v5 = vmul.f32 %v14899_v47, %v7702_v50  ;;  %10686 = vrot.lane.b32.xlu0 %v10685_v12, %s11331_s12 }
 0x485   : > { %v15075_v62 = vadd.f32 %v14905_v44, %v7883_v33  ;;  %v15972_v51 = vmax.f32 %v15065_v10, 0.0 }
 0x486   : > { %v15078_v35 = vadd.f32 %v14905_v44, %v7881_v5  ;;  %v15080_v58 = vpop.f32.mrb[32].mxu1  ;;  %v10484_v23 = vpop.f32.mrb[172].mxu0  ;;  %v15973_v50 = vmax.f32 %v15070_v14, 0.0 }
 0x487   : > { %v15975_v15 = vmax.f32 %v15075_v62, 0.0  ;;  %v7723_v39 = vadd.f32 %v10484_v23, %v14882_v43  ;;  %v7523_v31 = vpop.f32.mrb[33].mxu1  ;;  %v7714_v16 = vpop.f32.mrb[173].mxu0 }
 0x488   : > { %v15974_v12 = vmax.f32 %v15078_v35, 0.0  ;;  %v7715_v33 = vadd.f32 %v7714_v16, %v14874_v59  ;;  %v15088_v34 = vpop.f32.mrb[34].mxu1  ;;  %v10485_v5 = vpop.f32.mrb[174].mxu0 }
 0x489   : > { %v10700_v38 = vpack.i.bf16 %v15975_v15, %v15972_v51  ;;  %v7886_v25 = vmul.f32 %v14899_v47, %v7723_v39  ;;  %v7726_v43 = vadd.f32 %v10485_v5, %v14884_v20  ;;  %v7526_v23 = vpop.f32.mrb[35].mxu1  ;;  %v7717_v31 = vpop.f32.mrb[175].mxu0 }
 0x48a   : > { %v10695_v13 = vpack.i.bf16 %v15974_v12, %v15973_v50  ;;  %v7884_v59 = vmul.f32 %v14899_v47, %v7715_v33  ;;  %v7718_v16 = vadd.f32 %v7717_v31, %v14878_v49 }
 0x48b   : > { %v15103_v21 = vadd.f32 %v14905_v44, %v7886_v25  ;;  %v7887_v51 = vmul.f32 %v14899_v47, %v7726_v43  ;;  %10701 = vrot.lane.b32.xlu1 %v10700_v38, %s11331_s12 }
 0x48c   : > { %v15108_v20 = vadd.f32 %v14905_v44, %v7884_v59  ;;  %v7885_v39 = vmul.f32 %v14899_v47, %v7718_v16  ;;  %10696 = vrot.lane.b32.xlu0 %v10695_v13, %s11331_s12 }
 0x48d   : > { %v15113_v5 = vadd.f32 %v14905_v44, %v7887_v51  ;;  %v15978_v43 = vmax.f32 %v15103_v21, 0.0 }
 0x48e   : > { %v15116_v33 = vadd.f32 %v14905_v44, %v7885_v39  ;;  %v15118_v49 = vpop.f32.mrb[36].mxu1  ;;  %v10488_v25 = vpop.f32.mrb[176].mxu0  ;;  %v15979_v16 = vmax.f32 %v15108_v20, 0.0 }
 0x48f   : > { %v15981_v38 = vmax.f32 %v15113_v5, 0.0  ;;  %v7739_v23 = vadd.f32 %v10488_v25, %v14894_v3  ;;  %v7531_v31 = vpop.f32.mrb[37].mxu1  ;;  %v7730_v59 = vpop.f32.mrb[177].mxu0 }
 0x490   : > { %v15980_v13 = vmax.f32 %v15116_v33, 0.0  ;;  %v7731_v51 = vadd.f32 %v7730_v59, %v14886_v36  ;;  %v15126_v50 = vpop.f32.mrb[38].mxu1  ;;  %v10489_v39 = vpop.f32.mrb[178].mxu0 }
 0x491   : > { %v10710_v12 = vpack.i.bf16 %v15981_v38, %v15978_v43  ;;  %v7890_v15 = vmul.f32 %v14899_v47, %v7739_v23  ;;  %v7742_v3 = vadd.f32 %v10489_v39, %v14908_v52  ;;  %v7534_v25 = vpop.f32.mrb[39].mxu1  ;;  %v7733_v31 = vpop.f32.mrb[179].mxu0 }
 0x492   : > { %v10705_v42 = vpack.i.bf16 %v15980_v13, %v15979_v16  ;;  %v7888_v36 = vmul.f32 %v14899_v47, %v7731_v51  ;;  %v7734_v59 = vadd.f32 %v7733_v31, %v14890_v30 }
 0x493   : > { %v15141_v45 = vadd.f32 %v14905_v44, %v7890_v15  ;;  %v7891_v43 = vmul.f32 %v14899_v47, %v7742_v3  ;;  %10711 = vrot.lane.b32.xlu1 %v10710_v12, %s11331_s12 }
 0x494   : > { %v15146_v52 = vadd.f32 %v14905_v44, %v7888_v36  ;;  %v7889_v23 = vmul.f32 %v14899_v47, %v7734_v59  ;;  %10706 = vrot.lane.b32.xlu0 %v10705_v42, %s11331_s12 }
 0x495   : > { %v15151_v39 = vadd.f32 %v14905_v44, %v7891_v43  ;;  %v15984_v3 = vmax.f32 %v15141_v45, 0.0 }
 0x496   : > { %v15154_v51 = vadd.f32 %v14905_v44, %v7889_v23  ;;  %v15156_v30 = vpop.f32.mrb[40].mxu1  ;;  %v10492_v15 = vpop.f32.mrb[180].mxu0  ;;  %v15985_v59 = vmax.f32 %v15146_v52, 0.0 }
 0x497   : > { %v15987_v12 = vmax.f32 %v15151_v39, 0.0  ;;  %v7755_v25 = vadd.f32 %v10492_v15, %v14966_v48  ;;  %v7539_v31 = vpop.f32.mrb[41].mxu1  ;;  %v7746_v36 = vpop.f32.mrb[181].mxu0 }
 0x498   : > { %v15986_v42 = vmax.f32 %v15154_v51, 0.0  ;;  %v7747_v43 = vadd.f32 %v7746_v36, %v14928_v27  ;;  %v15164_v16 = vpop.f32.mrb[42].mxu1  ;;  %v10493_v23 = vpop.f32.mrb[182].mxu0 }
 0x499   : > { %v10720_v13 = vpack.i.bf16 %v15987_v12, %v15984_v3  ;;  %v7894_v38 = vmul.f32 %v14899_v47, %v7755_v25  ;;  %v7758_v48 = vadd.f32 %v10493_v23, %v14974_v63  ;;  %v7542_v15 = vpop.f32.mrb[43].mxu1  ;;  %v7749_v31 = vpop.f32.mrb[183].mxu0 }
 0x49a   : > { %v10715_v4 = vpack.i.bf16 %v15986_v42, %v15985_v59  ;;  %v7892_v27 = vmul.f32 %v14899_v47, %v7747_v43  ;;  %v7750_v36 = vadd.f32 %v7749_v31, %v14936_v0 }
 0x49b   : > { %v15179_v55 = vadd.f32 %v14905_v44, %v7894_v38  ;;  %v7895_v3 = vmul.f32 %v14899_v47, %v7758_v48  ;;  %10721 = vrot.lane.b32.xlu1 %v10720_v13, %s11331_s12 }
 0x49c   : > { %v15184_v63 = vadd.f32 %v14905_v44, %v7892_v27  ;;  %v7893_v25 = vmul.f32 %v14899_v47, %v7750_v36  ;;  %10716 = vrot.lane.b32.xlu0 %v10715_v4, %s11331_s12 }
 0x49d   : > { %v15189_v23 = vadd.f32 %v14905_v44, %v7895_v3  ;;  %v15990_v15 = vmax.f32 %v15179_v55, 0.0 }
 0x49e   : > { %v15192_v43 = vadd.f32 %v14905_v44, %v7893_v25  ;;  %v7545_v0 = vpop.f32.mrb[44].mxu1  ;;  %v10496_v38 = vpop.f32.mrb[184].mxu0  ;;  %v15991_v36 = vmax.f32 %v15184_v63, 0.0 }
 0x49f   : > { %v15993_v48 = vmax.f32 %v15189_v23, 0.0  ;;  %v7771_v13 = vadd.f32 %v10496_v38, %v15042_v9  ;;  %v7547_v31 = vpop.f32.mrb[45].mxu1  ;;  %v7762_v27 = vpop.f32.mrb[185].mxu0 }
 0x4a0   : > { %v15992_v4 = vmax.f32 %v15192_v43, 0.0  ;;  %v7763_v3 = vadd.f32 %v7762_v27, %v15004_v19  ;;  %v7548_v59 = vpop.f32.mrb[46].mxu1  ;;  %v10497_v42 = vpop.f32.mrb[186].mxu0 }
 0x4a1   : > { %v10730_v25 = vpack.i.bf16 %v15993_v48, %v15990_v15  ;;  %v7898_v12 = vmul.f32 %v14899_v47, %v7771_v13  ;;  %v7774_v29 = vadd.f32 %v10497_v42, %v15050_v24  ;;  %v7550_v9 = vpop.f32.mrb[47].mxu1  ;;  %v7765_v38 = vpop.f32.mrb[187].mxu0 }
 0x4a2   : > { %v10725_v31 = vpack.i.bf16 %v15992_v4, %v15991_v36  ;;  %v7896_v19 = vmul.f32 %v14899_v47, %v7763_v3  ;;  %v7766_v27 = vadd.f32 %v7765_v38, %v15012_v17 }
 0x4a3   : > { %v15213_v8 = vadd.f32 %v14905_v44, %v7898_v12  ;;  %v7899_v15 = vmul.f32 %v14899_v47, %v7774_v29  ;;  %10731 = vrot.lane.b32.xlu1 %v10730_v25, %s11331_s12 }
 0x4a4   : > { %v15218_v24 = vadd.f32 %v14905_v44, %v7896_v19  ;;  %v7897_v42 = vmul.f32 %v14899_v47, %v7766_v27  ;;  %10726 = vrot.lane.b32.xlu0 %v10725_v31, %s11331_s12 }
 0x4a5   : > { %16137 = vst [vmem:[#allocation24_spill] sm:$0xff] %v15213_v8  ;;  %v15223_v13 = vadd.f32 %v14905_v44, %v7899_v15  ;;  %v15996_v29 = vmax.f32 %v15213_v8, 0.0 }
 0x4a6   : > { %v15226_v3 = vadd.f32 %v14905_v44, %v7897_v42  ;;  %v15228_v17 = vpop.f32.mrb[48].mxu1  ;;  %v10500_v12 = vpop.f32.mrb[188].mxu0  ;;  %v15998_v27 = vmax.f32 %v15218_v24, 0.0 }
 0x4a7   : > { %v15997_v25 = vmax.f32 %v15223_v13, 0.0  ;;  %v7787_v9 = vadd.f32 %v10500_v12, %v15118_v49  ;;  %v7555_v38 = vpop.f32.mrb[49].mxu1  ;;  %v7778_v19 = vpop.f32.mrb[189].mxu0 }
 0x4a8   : > { %v15999_v31 = vmax.f32 %v15226_v3, 0.0  ;;  %v7779_v15 = vadd.f32 %v7778_v19, %v15080_v58  ;;  %v15236_v36 = vpop.f32.mrb[50].mxu1  ;;  %v10501_v42 = vpop.f32.mrb[190].mxu0 }
 0x4a9   : > { %v10740_v4 = vpack.i.bf16 %v15997_v25, %v15996_v29  ;;  %v7902_v48 = vmul.f32 %v14899_v47, %v7787_v9  ;;  %v7790_v49 = vadd.f32 %v10501_v42, %v15126_v50  ;;  %v7558_v12 = vpop.f32.mrb[51].mxu1  ;;  %v7781_v38 = vpop.f32.mrb[191].mxu0 }
 0x4aa   : > { %v10735_v61 = vpack.i.bf16 %v15999_v31, %v15998_v27  ;;  %v7900_v58 = vmul.f32 %v14899_v47, %v7779_v15  ;;  %v7782_v19 = vadd.f32 %v7781_v38, %v15088_v34 }
 0x4ab   : > { %v15251_v37 = vadd.f32 %v14905_v44, %v7902_v48  ;;  %v7903_v29 = vmul.f32 %v14899_v47, %v7790_v49  ;;  %10741 = vrot.lane.b32.xlu1 %v10740_v4, %s11331_s12 }
 0x4ac   : > { %v15256_v50 = vadd.f32 %v14905_v44, %v7900_v58  ;;  %v7901_v9 = vmul.f32 %v14899_v47, %v7782_v19  ;;  %10736 = vrot.lane.b32.xlu0 %v10735_v61, %s11331_s12 }
 0x4ad   : > { %v15261_v42 = vadd.f32 %v14905_v44, %v7903_v29  ;;  %v16006_v12 = vmax.f32 %v15251_v37, 0.0 }
 0x4ae   : > { %v15264_v15 = vadd.f32 %v14905_v44, %v7901_v9  ;;  %v7561_v34 = vpop.f32.mrb[52].mxu1  ;;  %v10504_v48 = vpop.f32.mrb[192].mxu0  ;;  %v16004_v25 = vmax.f32 %v15256_v50, 0.0 }
 0x4af   : > { %16138 = vst [vmem:[#allocation26_spill] sm:$0xff] %v15261_v42  ;;  %v16003_v49 = vmax.f32 %v15261_v42, 0.0  ;;  %v7803_v4 = vadd.f32 %v10504_v48, %v7545_v0  ;;  %v7563_v38 = vpop.f32.mrb[53].mxu1  ;;  %v7794_v58 = vpop.f32.mrb[193].mxu0 }
 0x4b0   : > { %v16005_v19 = vmax.f32 %v15264_v15, 0.0  ;;  %v7795_v61 = vadd.f32 %v7794_v58, %v15156_v30  ;;  %v7564_v29 = vpop.f32.mrb[54].mxu1  ;;  %v10505_v27 = vpop.f32.mrb[194].mxu0 }
 0x4b1   : > { %v10750_v9 = vpack.i.bf16 %v16003_v49, %v16006_v12  ;;  %v7906_v31 = vmul.f32 %v14899_v47, %v7803_v4  ;;  %v7806_v56 = vadd.f32 %v10505_v27, %v7548_v59  ;;  %v7566_v1 = vpop.f32.mrb[55].mxu1  ;;  %v7797_v0 = vpop.f32.mrb[195].mxu0 }
 0x4b2   : > { %v10745_v48 = vpack.i.bf16 %v16005_v19, %v16004_v25  ;;  %v7904_v38 = vmul.f32 %v14899_v47, %v7795_v61  ;;  %v7798_v30 = vadd.f32 %v7797_v0, %v15164_v16 }
 0x4b3   : > { %v15283_v58 = vadd.f32 %v14905_v44, %v7906_v31  ;;  %v7907_v8 = vmul.f32 %v14899_v47, %v7806_v56  ;;  %10751 = vrot.lane.b32.xlu1 %v10750_v9, %s11331_s12 }
 0x4b4   : > { %v15288_v59 = vadd.f32 %v14905_v44, %v7904_v38  ;;  %v7905_v1 = vmul.f32 %v14899_v47, %v7798_v30  ;;  %10746 = vrot.lane.b32.xlu0 %v10745_v48, %s11331_s12 }
 0x4b5   : > { %16139 = vst [vmem:[#allocation8_spill] sm:$0xff] %v15283_v58  ;;  %v15293_v27 = vadd.f32 %v14905_v44, %v7907_v8  ;;  %v16011_v61 = vmax.f32 %v15283_v58, 0.0 }
 0x4b6   : > { %v15296_v4 = vadd.f32 %v14905_v44, %v7905_v1  ;;  %v7569_v16 = vpop.f32.mrb[56].mxu1  ;;  %v10508_v31 = vpop.f32.mrb[196].mxu0  ;;  %v16010_v49 = vmax.f32 %v15288_v59, 0.0 }
 0x4b7   : > { %v16012_v56 = vmax.f32 %v15293_v27, 0.0  ;;  %v7819_v9 = vadd.f32 %v10508_v31, %v7561_v34  ;;  %v7571_v0 = vpop.f32.mrb[57].mxu1  ;;  %v7810_v38 = vpop.f32.mrb[197].mxu0 }
 0x4b8   : > { %16140 = vst [vmem:[#allocation9_spill] sm:$0xff] %v15296_v4  ;;  %v16009_v30 = vmax.f32 %v15296_v4, 0.0  ;;  %v7811_v48 = vadd.f32 %v7810_v38, %v15228_v17  ;;  %v7572_v8 = vpop.f32.mrb[58].mxu1  ;;  %v10509_v25 = vpop.f32.mrb[198].mxu0 }
 0x4b9   : > { %v10760_v1 = vpack.i.bf16 %v16012_v56, %v16011_v61  ;;  %v7910_v19 = vmul.f32 %v14899_v47, %v7819_v9  ;;  %v7822_v12 = vadd.f32 %v10509_v25, %v7564_v29  ;;  %v7574_v42 = vpop.f32.mrb[59].mxu1  ;;  %v7813_v34 = vpop.f32.mrb[199].mxu0 }
 0x4ba   : > { %v10755_v31 = vpack.i.bf16 %v16009_v30, %v16010_v49  ;;  %v7908_v0 = vmul.f32 %v14899_v47, %v7811_v48  ;;  %v7814_v17 = vadd.f32 %v7813_v34, %v15236_v36 }
 0x4bb   : > { %v15315_v38 = vadd.f32 %v14905_v44, %v7910_v19  ;;  %v7911_v58 = vmul.f32 %v14899_v47, %v7822_v12  ;;  %10761 = vrot.lane.b32.xlu1 %v10760_v1, %s11331_s12 }
 0x4bc   : > { %v15320_v25 = vadd.f32 %v14905_v44, %v7908_v0  ;;  %v7909_v42 = vmul.f32 %v14899_v47, %v7814_v17  ;;  %10756 = vrot.lane.b32.xlu0 %v10755_v31, %s11331_s12 }
 0x4bd   : > { %v15325_v29 = vadd.f32 %v14905_v44, %v7911_v58  ;;  %v16014_v48 = vmax.f32 %v15315_v38, 0.0 }
 0x4be   : > { %16141 = vst [vmem:[#allocation10_spill] sm:$0xff] %v15320_v25  ;;  %v15328_v9 = vadd.f32 %v14905_v44, %v7909_v42  ;;  %v7577_v36 = vpop.f32.mrb[60].mxu1  ;;  %v10512_v19 = vpop.f32.mrb[200].mxu0  ;;  %v16015_v30 = vmax.f32 %v15320_v25, 0.0 }
 0x4bf   : > { %v16017_v12 = vmax.f32 %v15325_v29, 0.0  ;;  %v7835_v1 = vadd.f32 %v10512_v19, %v7577_v36  ;;  %v7579_v34 = vpop.f32.mrb[61].mxu1  ;;  %v7826_v0 = vpop.f32.mrb[201].mxu0 }
 0x4c0   : > { %16142 = vst [vmem:[#allocation11_spill] sm:$0xff] %v15328_v9  ;;  %v16016_v17 = vmax.f32 %v15328_v9, 0.0  ;;  %v7827_v31 = vadd.f32 %v7826_v0, %v7569_v16  ;;  %v7580_v49 = vpop.f32.mrb[62].mxu1  ;;  %v10513_v58 = vpop.f32.mrb[202].mxu0 }
 0x4c1   : > { %v10770_v42 = vpack.i.bf16 %v16017_v12, %v16014_v48  ;;  %v7838_v61 = vadd.f32 %v10513_v58, %v7580_v49  ;;  %v7582_v56 = vpop.f32.mrb[63].mxu1  ;;  %v7829_v4 = vpop.f32.mrb[203].mxu0 }
 0x4c2   : > { %v10765_v36 = vpack.i.bf16 %v16016_v17, %v16015_v30  ;;  %v7912_v19 = vmul.f32 %v14899_v47, %v7827_v31  ;;  %v7830_v34 = vadd.f32 %v7829_v4, %v7572_v8 }
 0x4c3   : > { %10771 = vrot.lane.b32.xlu1 %v10770_v42, %s11331_s12  ;;  %v7915_v49 = vmul.f32 %v14899_v47, %v7838_v61 }
 0x4c4   : > { %v15345_v16 = vadd.f32 %v14905_v44, %v7912_v19  ;;  %v7913_v0 = vmul.f32 %v14899_v47, %v7830_v34  ;;  %10766 = vrot.lane.b32.xlu0 %v10765_v36, %s11331_s12 }
 0x4c5   : > { %v15356_v36 = vadd.f32 %v14905_v44, %v7915_v49  ;;  %v7914_v49 = vmul.f32 %v14899_v47, %v7835_v1 }
 0x4c6   : > { %16143 = vst [vmem:[#allocation12_spill] sm:$0xff] %v15345_v16  ;;  %v15351_v56 = vadd.f32 %v14905_v44, %v7913_v0  ;;  %v7585_v58 = vpop.f32.mrb[64].mxu1  ;;  %v10516_v48 = vpop.f32.mrb[204].mxu0  ;;  %v16021_v4 = vmax.f32 %v15345_v16, 0.0 }
 0x4c7   : > { %v7587_v30 = vpop.f32.mrb[65].mxu1  ;;  %v7842_v17 = vpop.f32.mrb[205].mxu0 }
 0x4c8   : > { %v16022_v8 = vmax.f32 %v15351_v56, 0.0  ;;  %v7843_v31 = vadd.f32 %v7842_v17, %v7585_v58  ;;  %v7588_v42 = vpop.f32.mrb[66].mxu1  ;;  %v10517_v19 = vpop.f32.mrb[206].mxu0  ;;  %v16023_v17 = vmax.f32 %v15356_v36, 0.0 }
 0x4c9   : > { %v7590_v12 = vpop.f32.mrb[67].mxu1  ;;  %v7845_v34 = vpop.f32.mrb[207].mxu0 }
 0x4ca   : > { %v10775_v61 = vpack.i.bf16 %v16022_v8, %v16021_v4  ;;  %v7916_v30 = vmul.f32 %v14899_v47, %v7843_v31  ;;  %v7846_v0 = vadd.f32 %v7845_v34, %v7588_v42 }
 0x4cc   : > { %v15364_v25 = vadd.f32 %v14905_v44, %v7916_v30  ;;  %10776 = vrot.lane.b32.xlu0 %v10775_v61, %s11331_s12  ;;  %v15377_v61 = vadd.f32 %v14905_v44, %v7914_v49  ;;  %v7917_v8 = vmul.f32 %v14899_v47, %v7846_v0 }
 0x4ce   : > { %v16024_v12 = vmax.f32 %v15364_v25, 0.0  ;;  %v7593_v58 = vpop.f32.mrb[68].mxu1 }
 0x4cf   : > { %v7851_v9 = vadd.f32 %v10516_v48, %v7593_v58  ;;  %v7595_v16 = vpop.f32.mrb[69].mxu1  ;;  %v16025_v58 = vmax.f32 %v15377_v61, 0.0 }
 0x4d0   : > { %v10780_v31 = vpack.i.bf16 %v16024_v12, %v16023_v17  ;;  %v7596_v42 = vpop.f32.mrb[70].mxu1  ;;  %v16145_v12 = vmax.f32 %v14915_v41, 0.0 }
 0x4d1   : > { %v7918_v34 = vmul.f32 %v14899_v47, %v7851_v9  ;;  %v7854_v30 = vadd.f32 %v10517_v19, %v7596_v42  ;;  %v7598_v4 = vpop.f32.mrb[71].mxu1  ;;  %v15389_v9 = vadd.f32 %v14905_v44, %v7917_v8 }
 0x4d2   : > { %10781 = vrot.lane.b32.xlu0 %v10780_v31, %s11331_s12 }
 0x4d3   : > { %v7919_v48 = vmul.f32 %v14899_v47, %v7854_v30  ;;  %v15382_v1 = vadd.f32 %v14905_v44, %v7918_v34  ;;  %v16027_v0 = vmax.f32 %v15389_v9, 0.0 }
 0x4d5   : > { %v15385_v16 = vadd.f32 %v14905_v44, %v7919_v48  ;;  %v16028_v19 = vmax.f32 %v15382_v1, 0.0  ;;  %v16144_v48 = vmax.f32 %v14923_v18, 0.0 }
 0x4d7   : > { %v16026_v4 = vmax.f32 %v15385_v16, 0.0  ;;  %v10790_v49 = vpack.i.bf16 %v16028_v19, %v16027_v0  ;;  %v16147_v0 = vmax.f32 %v14919_v26, 0.0  ;;  %v16148_v26 = vmax.f32 %v14961_v2, 0.0 }
 0x4d8   : > { %v16179_v19 = vmax.f32 %v15251_v37, 0.0 }
 0x4d9   : > { %v10785_v47 = vpack.i.bf16 %v16026_v4, %v16025_v58  ;;  %v16146_v58 = vmax.f32 %v14926_v7, 0.0 }
 0x4db   : > { %10786 = vrot.lane.b32.xlu1 %v10785_v47, %s11331_s12 }
 0x4dd   : > { %v10662_v44 = vpop.permute.xlu1 %10661 }
 0x4de   : > { %v10664_v8 = vunpack.i.h.bf16 %v10662_v44  ;;  %v10663_v31 = vunpack.i.l.bf16 %v10662_v44  ;;  %v10657_v42 = vpop.permute.xlu0 %10656 }
 0x4df   : > { %v10659_v34 = vunpack.i.h.bf16 %v10657_v42  ;;  %v10658_v30 = vunpack.i.l.bf16 %v10657_v42  ;;  %10791 = vrot.lane.b32.xlu1 %v10790_v49, %s11331_s12  ;;  %s11332_s12 = smov 96  }
 0x4e0   : > { %v15406_v17 = vmax.f32 %v16144_v48, %v10664_v8  ;;  %v15410_v47 = vmax.f32 %v16145_v12, %v10663_v31  ;;  %v16149_v31 = vmax.f32 %v14951_v54, 0.0 }
 0x4e1   : > { %v15414_v4 = vmax.f32 %v16146_v58, %v10659_v34  ;;  %v15418_v44 = vmax.f32 %v16147_v0, %v10658_v30  ;;  %v16150_v30 = vmax.f32 %v14964_v6, 0.0 }
 0x4e2   : > { %v10800_v42 = vpack.i.bf16 %v15406_v17, %v15410_v47 }
 0x4e3   : > { %v10795_v18 = vpack.i.bf16 %v15414_v4, %v15418_v44 }
 0x4e4   : > { %10801 = vrot.lane.b32.xlu1 %v10800_v42, %s11332_s12  ;;  %v16151_v42 = vmax.f32 %v14956_v32, 0.0  ;;  %v16152_v32 = vmax.f32 %v14999_v11, 0.0 }
 0x4e5   : > { %v10672_v41 = vpop.permute.xlu1 %10671  ;;  %10796 = vrot.lane.b32.xlu0 %v10795_v18, %s11332_s12 }
 0x4e6   : > { %v10674_v12 = vunpack.i.h.bf16 %v10672_v41  ;;  %v10673_v7 = vunpack.i.l.bf16 %v10672_v41  ;;  %v10667_v58 = vpop.permute.xlu0 %10666 }
 0x4e7   : > { %v10669_v49 = vunpack.i.h.bf16 %v10667_v58  ;;  %v10668_v8 = vunpack.i.l.bf16 %v10667_v58 }
 0x4e8   : > { %v15428_v0 = vmax.f32 %v16148_v26, %v10674_v12  ;;  %v15432_v34 = vmax.f32 %v16149_v31, %v10673_v7  ;;  %v16153_v26 = vmax.f32 %v14989_v40, 0.0 }
 0x4e9   : > { %v15436_v48 = vmax.f32 %v16150_v30, %v10669_v49  ;;  %v15440_v18 = vmax.f32 %v16151_v42, %v10668_v8  ;;  %v16154_v30 = vmax.f32 %v15002_v60, 0.0 }
 0x4ea   : > { %v10810_v41 = vpack.i.bf16 %v15428_v0, %v15432_v34 }
 0x4eb   : > { %v10805_v2 = vpack.i.bf16 %v15436_v48, %v15440_v18 }
 0x4ec   : > { %10811 = vrot.lane.b32.xlu1 %v10810_v41, %s11332_s12  ;;  %v16155_v41 = vmax.f32 %v14994_v28, 0.0  ;;  %v16156_v28 = vmax.f32 %v15037_v46, 0.0 }
 0x4ed   : > { %v10682_v12 = vpop.permute.xlu1 %10681  ;;  %10806 = vrot.lane.b32.xlu0 %v10805_v2, %s11332_s12 }
 0x4ee   : > { %v10684_v54 = vunpack.i.h.bf16 %v10682_v12  ;;  %v10683_v7 = vunpack.i.l.bf16 %v10682_v12  ;;  %v10677_v6 = vpop.permute.xlu0 %10676 }
 0x4ef   : > { %v10679_v58 = vunpack.i.h.bf16 %v10677_v6  ;;  %v10678_v49 = vunpack.i.l.bf16 %v10677_v6 }
 0x4f0   : > { %v15450_v8 = vmax.f32 %v16152_v32, %v10684_v54  ;;  %v15454_v31 = vmax.f32 %v16153_v26, %v10683_v7  ;;  %v16157_v32 = vmax.f32 %v15027_v22, 0.0 }
 0x4f1   : > { %v15458_v42 = vmax.f32 %v16154_v30, %v10679_v58  ;;  %v15462_v2 = vmax.f32 %v16155_v41, %v10678_v49  ;;  %v16158_v30 = vmax.f32 %v15040_v57, 0.0 }
 0x4f2   : > { %v10820_v12 = vpack.i.bf16 %v15450_v8, %v15454_v31 }
 0x4f3   : > { %v10815_v11 = vpack.i.bf16 %v15458_v42, %v15462_v2 }
 0x4f4   : > { %10821 = vrot.lane.b32.xlu1 %v10820_v12, %s11332_s12  ;;  %v16159_v12 = vmax.f32 %v15032_v53, 0.0  ;;  %v16160_v53 = vmax.f32 %v15075_v62, 0.0 }
 0x4f5   : > { %v10692_v54 = vpop.permute.xlu1 %10691  ;;  %10816 = vrot.lane.b32.xlu0 %v10815_v11, %s11332_s12 }
 0x4f6   : > { %v10694_v40 = vunpack.i.h.bf16 %v10692_v54  ;;  %v10693_v7 = vunpack.i.l.bf16 %v10692_v54  ;;  %v10687_v60 = vpop.permute.xlu0 %10686 }
 0x4f7   : > { %v10689_v6 = vunpack.i.h.bf16 %v10687_v60  ;;  %v10688_v58 = vunpack.i.l.bf16 %v10687_v60 }
 0x4f8   : > { %v15472_v49 = vmax.f32 %v16156_v28, %v10694_v40  ;;  %v15476_v26 = vmax.f32 %v16157_v32, %v10693_v7  ;;  %v16161_v28 = vmax.f32 %v15065_v10, 0.0 }
 0x4f9   : > { %v15480_v41 = vmax.f32 %v16158_v30, %v10689_v6  ;;  %v15484_v11 = vmax.f32 %v16159_v12, %v10688_v58  ;;  %v16162_v30 = vmax.f32 %v15078_v35, 0.0 }
 0x4fa   : > { %v10830_v54 = vpack.i.bf16 %v15472_v49, %v15476_v26 }
 0x4fb   : > { %v10825_v46 = vpack.i.bf16 %v15480_v41, %v15484_v11 }
 0x4fc   : > { %10831 = vrot.lane.b32.xlu1 %v10830_v54, %s11332_s12  ;;  %v16163_v54 = vmax.f32 %v15070_v14, 0.0  ;;  %v16164_v14 = vmax.f32 %v15113_v5, 0.0 }
 0x4fd   : > { %v10702_v40 = vpop.permute.xlu1 %10701  ;;  %10826 = vrot.lane.b32.xlu0 %v10825_v46, %s11332_s12 }
 0x4fe   : > { %v10704_v22 = vunpack.i.h.bf16 %v10702_v40  ;;  %v10703_v7 = vunpack.i.l.bf16 %v10702_v40  ;;  %v10697_v57 = vpop.permute.xlu0 %10696 }
 0x4ff   : > { %v10699_v60 = vunpack.i.h.bf16 %v10697_v57  ;;  %v10698_v6 = vunpack.i.l.bf16 %v10697_v57 }
 0x500   : > { %v15494_v58 = vmax.f32 %v16160_v53, %v10704_v22  ;;  %v15498_v32 = vmax.f32 %v16161_v28, %v10703_v7  ;;  %v16165_v53 = vmax.f32 %v15103_v21, 0.0 }
 0x501   : > { %v15502_v12 = vmax.f32 %v16162_v30, %v10699_v60  ;;  %v15506_v46 = vmax.f32 %v16163_v54, %v10698_v6  ;;  %v16166_v30 = vmax.f32 %v15116_v33, 0.0 }
 0x502   : > { %v10840_v40 = vpack.i.bf16 %v15494_v58, %v15498_v32 }
 0x503   : > { %v10835_v62 = vpack.i.bf16 %v15502_v12, %v15506_v46 }
 0x504   : > { %10841 = vrot.lane.b32.xlu1 %v10840_v40, %s11332_s12  ;;  %v16167_v40 = vmax.f32 %v15108_v20, 0.0  ;;  %v16168_v20 = vmax.f32 %v15151_v39, 0.0 }
 0x505   : > { %v10712_v22 = vpop.permute.xlu1 %10711  ;;  %10836 = vrot.lane.b32.xlu0 %v10835_v62, %s11332_s12 }
 0x506   : > { %v10714_v10 = vunpack.i.h.bf16 %v10712_v22  ;;  %v10713_v7 = vunpack.i.l.bf16 %v10712_v22  ;;  %v10707_v35 = vpop.permute.xlu0 %10706 }
 0x507   : > { %v10709_v57 = vunpack.i.h.bf16 %v10707_v35  ;;  %v10708_v60 = vunpack.i.l.bf16 %v10707_v35 }
 0x508   : > { %v15516_v6 = vmax.f32 %v16164_v14, %v10714_v10  ;;  %v15520_v28 = vmax.f32 %v16165_v53, %v10713_v7  ;;  %v16169_v14 = vmax.f32 %v15141_v45, 0.0 }
 0x509   : > { %v15524_v54 = vmax.f32 %v16166_v30, %v10709_v57  ;;  %v15528_v62 = vmax.f32 %v16167_v40, %v10708_v60  ;;  %v16170_v30 = vmax.f32 %v15154_v51, 0.0 }
 0x50a   : > { %v10850_v22 = vpack.i.bf16 %v15516_v6, %v15520_v28 }
 0x50b   : > { %v10845_v5 = vpack.i.bf16 %v15524_v54, %v15528_v62 }
 0x50c   : > { %10851 = vrot.lane.b32.xlu1 %v10850_v22, %s11332_s12  ;;  %v16171_v22 = vmax.f32 %v15146_v52, 0.0  ;;  %v16172_v52 = vmax.f32 %v15189_v23, 0.0 }
 0x50d   : > { %v10722_v10 = vpop.permute.xlu1 %10721  ;;  %10846 = vrot.lane.b32.xlu0 %v10845_v5, %s11332_s12 }
 0x50e   : > { %v10724_v21 = vunpack.i.h.bf16 %v10722_v10  ;;  %v10723_v7 = vunpack.i.l.bf16 %v10722_v10  ;;  %v10717_v33 = vpop.permute.xlu0 %10716 }
 0x50f   : > { %v10719_v35 = vunpack.i.h.bf16 %v10717_v33  ;;  %v10718_v57 = vunpack.i.l.bf16 %v10717_v33 }
 0x510   : > { %v15538_v60 = vmax.f32 %v16168_v20, %v10724_v21  ;;  %v15542_v53 = vmax.f32 %v16169_v14, %v10723_v7  ;;  %v16173_v20 = vmax.f32 %v15179_v55, 0.0 }
 0x511   : > { %v15546_v40 = vmax.f32 %v16170_v30, %v10719_v35  ;;  %v15550_v5 = vmax.f32 %v16171_v22, %v10718_v57  ;;  %v16174_v30 = vmax.f32 %v15192_v43, 0.0 }
 0x513   : > { %v10855_v10 = vpack.i.bf16 %v15542_v53, %v15546_v40  ;;  %v10860_v39 = vpack.i.bf16 %v15538_v60, %v15550_v5 }
 0x515   : > { %v10732_v21 = vpop.permute.xlu1 %10731  ;;  %10856 = vrot.lane.b32.xlu1 %v10855_v10, %s11332_s12  ;;  %10861 = vrot.lane.b32.xlu0 %v10860_v39, %s11332_s12  ;;  %v16175_v10 = vmax.f32 %v15184_v63, 0.0  ;;  %v16177_v63 = vmax.f32 %v15218_v24, 0.0 }
 0x516   : > { %v10734_v45 = vunpack.i.h.bf16 %v10732_v21  ;;  %v10733_v7 = vunpack.i.l.bf16 %v10732_v21  ;;  %v10727_v51 = vpop.permute.xlu0 %10726 }
 0x517   : > { %v10729_v33 = vunpack.i.h.bf16 %v10727_v51  ;;  %v10728_v35 = vunpack.i.l.bf16 %v10727_v51  ;;  %v16176_v51 = vmax.f32 %v15226_v3, 0.0 }
 0x518   : > { %v15560_v57 = vmax.f32 %v16172_v52, %v10734_v45  ;;  %v15564_v14 = vmax.f32 %v16173_v20, %v10733_v7 }
 0x519   : > { %v15568_v22 = vmax.f32 %v16174_v30, %v10729_v33  ;;  %v15572_v39 = vmax.f32 %v16175_v10, %v10728_v35 }
 0x51a   : > { %v10870_v21 = vpack.i.bf16 %v15560_v57, %v15564_v14 }
 0x51b   : > { %v10865_v23 = vpack.i.bf16 %v15568_v22, %v15572_v39 }
 0x51c   : > { %10871 = vrot.lane.b32.xlu1 %v10870_v21, %s11332_s12 }
 0x51d   : > { %10866 = vrot.lane.b32.xlu0 %v10865_v23, %s11332_s12  ;;  %v10742_v43 = vpop.permute.xlu1 %10741 }
 0x51e   : > { %v10737_v55 = vpop.permute.xlu0 %10736  ;;  %v10744_v20 = vunpack.i.h.bf16 %v10742_v43 }
 0x51f   : > { %v10739_v45 = vunpack.i.h.bf16 %v10737_v55  ;;  %v10738_v7 = vunpack.i.l.bf16 %v10737_v55 }
 0x521   : > { %v15582_v33 = vmax.f32 %v16176_v51, %v10739_v45  ;;  %v15586_v35 = vmax.f32 %v16177_v63, %v10738_v7  ;;  %v16181_v45 = vmax.f32 %v15223_v13, 0.0  ;;  %v16183_v7 = vmax.f32 %v15264_v15, 0.0 }
 0x522   : > { %v16185_v63 = vmax.f32 %v15256_v50, 0.0  ;;  %v16186_v50 = vmax.f32 %v15293_v27, 0.0 }
 0x523   : > { %16178 = vst [vmem:[#allocation13_spill] sm:$0xff] %v15586_v35  ;;  %v10875_v52 = vpack.i.bf16 %v15582_v33, %v15586_v35  ;;  %v15597_v24 = vmax.f32 %v16181_v45, %v10744_v20  ;;  %v16187_v45 = vld [vmem:[#allocation8_spill] sm:$0xff] }
 0x525   : > { %v10752_v30 = vpop.permute.xlu1 %10751  ;;  %10876 = vrot.lane.b32.xlu0 %v10875_v52, %s11332_s12  ;;  %16182 = vst [vmem:[#allocation15_spill] sm:$0xff] %v15597_v24 }
 0x526   : > { %v10753_v10 = vunpack.i.l.bf16 %v10752_v30  ;;  %v10747_v21 = vpop.permute.xlu0 %10746 }
 0x527   : > { %v10749_v23 = vunpack.i.h.bf16 %v10747_v21  ;;  %v10748_v55 = vunpack.i.l.bf16 %v10747_v21 }
 0x528   : > { %v15593_v3 = vmax.f32 %v16179_v19, %v10753_v10  ;;  %v10754_v19 = vunpack.i.h.bf16 %v10752_v30  ;;  %v16189_v30 = vld [vmem:[#allocation26_spill] sm:$0xff] }
 0x529   : > { %v15601_v51 = vmax.f32 %v16183_v7, %v10749_v23  ;;  %v15605_v35 = vmax.f32 %v16185_v63, %v10748_v55  ;;  %v16188_v7 = vmax.f32 %v16187_v45, 0.0 }
 0x52a   : > { %16180 = vst [vmem:[#allocation14_spill] sm:$0xff] %v15593_v3 }
 0x52b   : > { %16184 = vst [vmem:[#allocation16_spill] sm:$0xff] %v15601_v51  ;;  %v10885_v52 = vpack.i.bf16 %v15593_v3, %v15601_v51  ;;  %v10880_v37 = vpack.i.bf16 %v15605_v35, %v15597_v24  ;;  %v10743_v51 = vunpack.i.l.bf16 %v10742_v43  ;;  %v16190_v3 = vmax.f32 %v16189_v30, 0.0  ;;  %v16195_v43 = vld [vmem:[#allocation24_spill] sm:$0xff] }
 0x52d   : > { %v10762_v10 = vpop.permute.xlu1 %10761  ;;  %10881 = vrot.lane.b32.xlu1 %v10880_v37, %s11332_s12  ;;  %10886 = vrot.lane.b32.xlu0 %v10885_v52, %s11332_s12  ;;  %v15623_v24 = vmax.f32 %v16190_v3, %v10754_v19  ;;  %v16192_v52 = vmax.f32 %v15288_v59, 0.0 }
 0x52e   : > { %v10764_v13 = vunpack.i.h.bf16 %v10762_v10  ;;  %v10763_v15 = vunpack.i.l.bf16 %v10762_v10  ;;  %v10757_v20 = vpop.permute.xlu0 %10756 }
 0x52f   : > { %v10759_v21 = vunpack.i.h.bf16 %v10757_v20  ;;  %v10758_v23 = vunpack.i.l.bf16 %v10757_v20  ;;  %16191 = vst [vmem:[#allocation18_spill] sm:$0xff] %v15623_v24  ;;  %v16193_v20 = vld [vmem:[#allocation9_spill] sm:$0xff] }
 0x530   : > { %v15615_v55 = vmax.f32 %v16186_v50, %v10764_v13  ;;  %v15619_v63 = vmax.f32 %v16188_v7, %v10763_v15  ;;  %v16194_v27 = vmax.f32 %v16193_v20, 0.0  ;;  %v16196_v50 = vmax.f32 %v16195_v43, 0.0 }
 0x531   : > { %v15627_v37 = vmax.f32 %v16192_v52, %v10758_v23  ;;  %v16197_v52 = vmax.f32 %v15325_v29, 0.0 }
 0x532   : > { %v10900_v10 = vpack.i.bf16 %v15615_v55, %v15619_v63  ;;  %v15633_v13 = vmax.f32 %v16194_v27, %v10759_v21  ;;  %v15640_v3 = vmax.f32 %v16196_v50, %v10743_v51  ;;  %v16201_v51 = vld [vmem:[#allocation11_spill] sm:$0xff] }
 0x533   : > { %v10890_v15 = vpack.i.bf16 %v15627_v37, %v15623_v24  ;;  %v16202_v43 = vmax.f32 %v16201_v51, 0.0 }
 0x534   : > { %10901 = vrot.lane.b32.xlu0 %v10900_v10, %s11332_s12  ;;  %v10895_v7 = vpack.i.bf16 %v15633_v13, %v15640_v3  ;;  %v16199_v10 = vmax.f32 %v15315_v38, 0.0 }
 0x535   : > { %v10772_v19 = vpop.permute.xlu1 %10771  ;;  %10891 = vrot.lane.b32.xlu1 %v10890_v15, %s11332_s12  ;;  %v16204_v15 = vld [vmem:[#allocation10_spill] sm:$0xff] }
 0x536   : > { %v10774_v59 = vunpack.i.h.bf16 %v10772_v19  ;;  %v10773_v23 = vunpack.i.l.bf16 %v10772_v19  ;;  %v10767_v45 = vpop.permute.xlu0 %10766  ;;  %v16205_v19 = vmax.f32 %v16204_v15, 0.0 }
 0x537   : > { %v10769_v21 = vunpack.i.h.bf16 %v10767_v45  ;;  %v10768_v30 = vunpack.i.l.bf16 %v10767_v45 }
 0x538   : > { %v15647_v20 = vmax.f32 %v16197_v52, %v10774_v59  ;;  %v15651_v27 = vmax.f32 %v16199_v10, %v10773_v23 }
 0x539   : > { %v15655_v50 = vmax.f32 %v16202_v43, %v10769_v21  ;;  %v15659_v24 = vmax.f32 %v16205_v19, %v10768_v30  ;;  %10896 = vrot.lane.b32.xlu1 %v10895_v7, %s11332_s12  ;;  %v16207_v7 = vmax.f32 %v15351_v56, 0.0  ;;  %v16208_v19 = vld [vmem:[#allocation12_spill] sm:$0xff]  ;;  %v16213_v56 = vmax.f32 %v15356_v36, 0.0 }
 0x53a   : > { %16198 = vst [vmem:[#allocation19_spill] sm:$0xff] %v15647_v20  ;;  %16200 = vst [vmem:[#allocation21_spill] sm:$0xff] %v15651_v27  ;;  %v10910_v45 = vpack.i.bf16 %v15647_v20, %v15651_v27  ;;  %v16209_v27 = vmax.f32 %v16208_v19, 0.0 }
 0x53b   : > { %16203 = vst [vmem:[#allocation22_spill] sm:$0xff] %v15655_v50  ;;  %16206 = vst [vmem:[#allocation28_spill] sm:$0xff] %v15659_v24  ;;  %v10905_v29 = vpack.i.bf16 %v15655_v50, %v15659_v24  ;;  %v16211_v50 = vmax.f32 %v15377_v61, 0.0  ;;  %v16214_v61 = vmax.f32 %v15382_v1, 0.0 }
 0x53c   : > { %10911 = vrot.lane.b32.xlu0 %v10910_v45, %s11332_s12  ;;  %v16210_v45 = vmax.f32 %v15385_v16, 0.0 }
 0x53d   : > { %10906 = vrot.lane.b32.xlu1 %v10905_v29, %s11332_s12 }
 0x53e   : > { %v10777_v38 = vpop.permute.xlu0 %10776 }
 0x53f   : > { %v10779_v23 = vunpack.i.h.bf16 %v10777_v38  ;;  %v10778_v21 = vunpack.i.l.bf16 %v10777_v38 }
 0x541   : > { %v15670_v15 = vmax.f32 %v16207_v7, %v10779_v23  ;;  %v15674_v24 = vmax.f32 %v16209_v27, %v10778_v21 }
 0x544   : > { %v10782_v59 = vpop.permute.xlu0 %10781 }
 0x545   : > { %v10784_v52 = vunpack.i.h.bf16 %v10782_v59  ;;  %v10783_v10 = vunpack.i.l.bf16 %v10782_v59  ;;  %v16212_v59 = vmax.f32 %v15364_v25, 0.0  ;;  %v16215_v25 = vmax.f32 %v15389_v9, 0.0 }
 0x547   : > { %v15686_v20 = vmax.f32 %v16212_v59, %v10784_v52  ;;  %v15690_v23 = vmax.f32 %v16213_v56, %v10783_v10 }
 0x549   : > { %v10925_v36 = vpack.i.bf16 %v15686_v20, %v15690_v23 }
 0x54d   : > { %v10787_v30 = vpop.permute.xlu1 %10786 }
 0x54e   : > { %v10789_v51 = vunpack.i.h.bf16 %v10787_v30  ;;  %v10788_v43 = vunpack.i.l.bf16 %v10787_v30 }
 0x550   : > { %v15678_v29 = vmax.f32 %v16210_v45, %v10789_v51  ;;  %v15682_v38 = vmax.f32 %v16211_v50, %v10788_v43 }
 0x551   : > { %v10792_v30 = vpop.permute.xlu1 %10791 }
 0x552   : > { %v10915_v27 = vpack.i.bf16 %v15682_v38, %v15670_v15  ;;  %v10920_v16 = vpack.i.bf16 %v15678_v29, %v15674_v24  ;;  %v10794_v21 = vunpack.i.h.bf16 %v10792_v30  ;;  %v10793_v51 = vunpack.i.l.bf16 %v10792_v30 }
 0x554   : > { %v15698_v50 = vmax.f32 %v16214_v61, %v10794_v21  ;;  %v15702_v52 = vmax.f32 %v16215_v25, %v10793_v51  ;;  %10916 = vrot.lane.b32.xlu1 %v10915_v27, %s11332_s12  ;;  %10921 = vrot.lane.b32.xlu0 %v10920_v16, %s11332_s12 }
 0x556   : > { %v10930_v10 = vpack.i.bf16 %v15698_v50, %v15702_v52  ;;  %v10802_v43 = vpop.permute.xlu1 %10801 }
 0x557   : > { %v10804_v7 = vunpack.i.h.bf16 %v10802_v43  ;;  %v10803_v1 = vunpack.i.l.bf16 %v10802_v43  ;;  %v10797_v19 = vpop.permute.xlu0 %10796 }
 0x558   : > { %v10799_v45 = vunpack.i.h.bf16 %v10797_v19  ;;  %v10798_v59 = vunpack.i.l.bf16 %v10797_v19  ;;  %10931 = vrot.lane.b32.xlu1 %v10930_v10, %s11332_s12  ;;  %10926 = vrot.lane.b32.xlu0 %v10925_v36, %s11332_s12 }
 0x559   : > { %v8546_v9 = vmax.f32 %v15406_v17, %v10804_v7  ;;  %v8545_v56 = vmax.f32 %v15410_v47, %v10803_v1  ;;  %v8841_v1 = vld [vmem:[%s15719_s17 + $0x18] sm:$0x1] }
 0x55a   : > { %v8544_v30 = vmax.f32 %v15414_v4, %v10799_v45  ;;  %v8543_v27 = vmax.f32 %v15418_v44, %v10798_v59 }
 0x55b   : > { %v10369_v16 = vpack.c.bf16 %v8546_v9, %v8546_v9  ;;  %v10368_v21 = vpack.c.bf16 %v8545_v56, %v8545_v56 }
 0x55c   : > { %v10367_v17 = vpack.c.bf16 %v8544_v30, %v8544_v30  ;;  %v10366_v51 = vpack.c.bf16 %v8543_v27, %v8543_v27 }
 0x55d   : > { %8835 = vst.msk [vmem:[%s15719_s17 + $0xc] sm:$0xf] %vm8831_vm3, %v10369_v16  ;;  %8834 = vst.msk [vmem:[%s15719_s17 + $0x8] sm:$0xf] %vm8831_vm3, %v10368_v21 }
 0x55e   : > { %8833 = vst.msk [vmem:[%s15719_s17 + $0x4] sm:$0xf] %vm8831_vm3, %v10367_v17  ;;  %8832 = vst.msk [vmem:[%s15719_s17] sm:$0xf] %vm8831_vm3, %v10366_v51  ;;  %v10812_v47 = vpop.permute.xlu1 %10811 }
 0x55f   : > { %v10814_v4 = vunpack.i.h.bf16 %v10812_v47  ;;  %v10813_v61 = vunpack.i.l.bf16 %v10812_v47  ;;  %v10807_v44 = vpop.permute.xlu0 %10806 }
 0x560   : > { %v10809_v25 = vunpack.i.h.bf16 %v10807_v44  ;;  %v10808_v36 = vunpack.i.l.bf16 %v10807_v44 }
 0x561   : > { %v8550_v10 = vmax.f32 %v15428_v0, %v10814_v4  ;;  %v8549_v43 = vmax.f32 %v15432_v34, %v10813_v61 }
 0x562   : > { %v8548_v19 = vmax.f32 %v15436_v48, %v10809_v25  ;;  %v8547_v45 = vmax.f32 %v15440_v18, %v10808_v36 }
 0x563   : > { %v10373_v59 = vpack.c.bf16 %v8550_v10, %v8550_v10  ;;  %v10372_v9 = vpack.c.bf16 %v8549_v43, %v8549_v43 }
 0x564   : > { %v10371_v56 = vpack.c.bf16 %v8548_v19, %v8548_v19  ;;  %v10370_v30 = vpack.c.bf16 %v8547_v45, %v8547_v45 }
 0x565   : > { %8844 = vst.msk [vmem:[%s15719_s17 + $0x1c] sm:$0xf] %vm8831_vm3, %v10373_v59  ;;  %v8842_v0 = vsel %vm15733_vm6, %v10372_v9, %v8841_v1 }
 0x566   : > { %8843 = vst [vmem:[%s15719_s17 + $0x18] sm:$0x1] %v8842_v0  ;;  %8837 = vst.msk [vmem:[%s15719_s17 + $0x14] sm:$0xf] %vm8831_vm3, %v10371_v56  ;;  %v10822_v34 = vpop.permute.xlu1 %10821 }
 0x567   : > { %8836 = vst.msk [vmem:[%s15719_s17 + $0x10] sm:$0xf] %vm8831_vm3, %v10370_v30  ;;  %v10824_v48 = vunpack.i.h.bf16 %v10822_v34  ;;  %v10823_v18 = vunpack.i.l.bf16 %v10822_v34  ;;  %v10817_v27 = vpop.permute.xlu0 %10816  ;;  %v8850_v30 = vld [vmem:[%s15719_s17 + $0x34] sm:$0x1] }
 0x568   : > { %v10819_v16 = vunpack.i.h.bf16 %v10817_v27  ;;  %v10818_v21 = vunpack.i.l.bf16 %v10817_v27 }
 0x569   : > { %v8554_v17 = vmax.f32 %v15450_v8, %v10824_v48  ;;  %v8553_v51 = vmax.f32 %v15454_v31, %v10823_v18 }
 0x56a   : > { %v8552_v47 = vmax.f32 %v15458_v42, %v10819_v16  ;;  %v8551_v4 = vmax.f32 %v15462_v2, %v10818_v21 }
 0x56b   : > { %v10377_v61 = vpack.c.bf16 %v8554_v17, %v8554_v17  ;;  %v10376_v44 = vpack.c.bf16 %v8553_v51, %v8553_v51 }
 0x56c   : > { %v10375_v25 = vpack.c.bf16 %v8552_v47, %v8552_v47  ;;  %v10374_v36 = vpack.c.bf16 %v8551_v4, %v8551_v4 }
 0x56d   : > { %8848 = vst.msk [vmem:[%s15719_s17 + $0x2c] sm:$0xf] %vm8831_vm3, %v10377_v61  ;;  %8847 = vst.msk [vmem:[%s15719_s17 + $0x28] sm:$0xf] %vm8831_vm3, %v10376_v44 }
 0x56e   : > { %8846 = vst.msk [vmem:[%s15719_s17 + $0x24] sm:$0xf] %vm8831_vm3, %v10375_v25  ;;  %8845 = vst.msk [vmem:[%s15719_s17 + $0x20] sm:$0xf] %vm8831_vm3, %v10374_v36  ;;  %v10832_v8 = vpop.permute.xlu1 %10831 }
 0x56f   : > { %v10834_v31 = vunpack.i.h.bf16 %v10832_v8  ;;  %v10833_v42 = vunpack.i.l.bf16 %v10832_v8  ;;  %v10827_v2 = vpop.permute.xlu0 %10826 }
 0x570   : > { %v10829_v10 = vunpack.i.h.bf16 %v10827_v2  ;;  %v10828_v43 = vunpack.i.l.bf16 %v10827_v2 }
 0x571   : > { %v8558_v1 = vmax.f32 %v15472_v49, %v10834_v31  ;;  %v8557_v19 = vmax.f32 %v15476_v26, %v10833_v42 }
 0x572   : > { %v8556_v45 = vmax.f32 %v15480_v41, %v10829_v10  ;;  %v8555_v59 = vmax.f32 %v15484_v11, %v10828_v43 }
 0x573   : > { %v10381_v9 = vpack.c.bf16 %v8558_v1, %v8558_v1  ;;  %v10380_v56 = vpack.c.bf16 %v8557_v19, %v8557_v19  ;;  %v8859_v1 = vld [vmem:[%s15719_s17 + $0x50] sm:$0x1] }
 0x574   : > { %v10379_v0 = vpack.c.bf16 %v8556_v45, %v8556_v45  ;;  %v10378_v34 = vpack.c.bf16 %v8555_v59, %v8555_v59 }
 0x575   : > { %8854 = vst.msk [vmem:[%s15719_s17 + $0x3c] sm:$0xf] %vm8831_vm3, %v10381_v9  ;;  %8853 = vst.msk [vmem:[%s15719_s17 + $0x38] sm:$0xf] %vm8831_vm3, %v10380_v56 }
 0x576   : > { %v8851_v48 = vsel %vm15733_vm6, %v10379_v0, %v8850_v30  ;;  %8849 = vst.msk [vmem:[%s15719_s17 + $0x30] sm:$0xf] %vm8831_vm3, %v10378_v34  ;;  %v10842_v49 = vpop.permute.xlu1 %10841 }
 0x577   : > { %8852 = vst [vmem:[%s15719_s17 + $0x34] sm:$0x1] %v8851_v48  ;;  %v10844_v26 = vunpack.i.h.bf16 %v10842_v49  ;;  %v10843_v41 = vunpack.i.l.bf16 %v10842_v49  ;;  %v10837_v11 = vpop.permute.xlu0 %10836  ;;  %v8868_v49 = vld [vmem:[%s15719_s17 + $0x6c] sm:$0x1] }
 0x578   : > { %v10839_v18 = vunpack.i.h.bf16 %v10837_v11  ;;  %v10838_v27 = vunpack.i.l.bf16 %v10837_v11 }
 0x579   : > { %v8562_v16 = vmax.f32 %v15494_v58, %v10844_v26  ;;  %v8561_v21 = vmax.f32 %v15498_v32, %v10843_v41 }
 0x57a   : > { %v8560_v17 = vmax.f32 %v15502_v12, %v10839_v18  ;;  %v8559_v51 = vmax.f32 %v15506_v46, %v10838_v27 }
 0x57b   : > { %v10385_v47 = vpack.c.bf16 %v8562_v16, %v8562_v16  ;;  %v10384_v4 = vpack.c.bf16 %v8561_v21, %v8561_v21 }
 0x57c   : > { %v10383_v61 = vpack.c.bf16 %v8560_v17, %v8560_v17  ;;  %v10382_v44 = vpack.c.bf16 %v8559_v51, %v8559_v51 }
 0x57d   : > { %8858 = vst.msk [vmem:[%s15719_s17 + $0x4c] sm:$0xf] %vm8831_vm3, %v10385_v47  ;;  %8857 = vst.msk [vmem:[%s15719_s17 + $0x48] sm:$0xf] %vm8831_vm3, %v10384_v4 }
 0x57e   : > { %8856 = vst.msk [vmem:[%s15719_s17 + $0x44] sm:$0xf] %vm8831_vm3, %v10383_v61  ;;  %8855 = vst.msk [vmem:[%s15719_s17 + $0x40] sm:$0xf] %vm8831_vm3, %v10382_v44  ;;  %v10852_v58 = vpop.permute.xlu1 %10851 }
 0x57f   : > { %v10854_v32 = vunpack.i.h.bf16 %v10852_v58  ;;  %v10853_v12 = vunpack.i.l.bf16 %v10852_v58  ;;  %v10847_v46 = vpop.permute.xlu0 %10846 }
 0x580   : > { %v10849_v25 = vunpack.i.h.bf16 %v10847_v46  ;;  %v10848_v36 = vunpack.i.l.bf16 %v10847_v46 }
 0x581   : > { %v8566_v8 = vmax.f32 %v15516_v6, %v10854_v32  ;;  %v8565_v31 = vmax.f32 %v15520_v28, %v10853_v12 }
 0x582   : > { %v8564_v42 = vmax.f32 %v15524_v54, %v10849_v25  ;;  %v8563_v2 = vmax.f32 %v15528_v62, %v10848_v36 }
 0x583   : > { %v10389_v10 = vpack.c.bf16 %v8566_v8, %v8566_v8  ;;  %v10388_v43 = vpack.c.bf16 %v8565_v31, %v8565_v31 }
 0x584   : > { %v10387_v19 = vpack.c.bf16 %v8564_v42, %v8564_v42  ;;  %v10386_v45 = vpack.c.bf16 %v8563_v2, %v8563_v2 }
 0x585   : > { %8864 = vst.msk [vmem:[%s15719_s17 + $0x5c] sm:$0xf] %vm8831_vm3, %v10389_v10  ;;  %8863 = vst.msk [vmem:[%s15719_s17 + $0x58] sm:$0xf] %vm8831_vm3, %v10388_v43 }
 0x586   : > { %8862 = vst.msk [vmem:[%s15719_s17 + $0x54] sm:$0xf] %vm8831_vm3, %v10387_v19  ;;  %v8860_v6 = vsel %vm15733_vm6, %v10386_v45, %v8859_v1  ;;  %v16219_v1 = vld [vmem:[#allocation15_spill] sm:$0xff]  ;;  %v16220_v45 = vld [vmem:[#allocation14_spill] sm:$0xff] }
 0x587   : > { %8861 = vst [vmem:[%s15719_s17 + $0x50] sm:$0x1] %v8860_v6  ;;  %v10857_v28 = vpop.permute.xlu1 %10856  ;;  %v10862_v54 = vpop.permute.xlu0 %10861 }
 0x588   : > { %v10859_v62 = vunpack.i.h.bf16 %v10857_v28  ;;  %v10858_v59 = vunpack.i.l.bf16 %v10857_v28  ;;  %v10864_v9 = vunpack.i.h.bf16 %v10862_v54  ;;  %v10863_v56 = vunpack.i.l.bf16 %v10862_v54  ;;  %v16221_v28 = vld [vmem:[#allocation16_spill] sm:$0xff] }
 0x58a   : > { %v8569_v30 = vmax.f32 %v15542_v53, %v10859_v62  ;;  %v8568_v0 = vmax.f32 %v15546_v40, %v10858_v59  ;;  %v8570_v34 = vmax.f32 %v15538_v60, %v10864_v9  ;;  %v8567_v48 = vmax.f32 %v15550_v5, %v10863_v56 }
 0x58c   : > { %v10392_v26 = vpack.c.bf16 %v8569_v30, %v8569_v30  ;;  %v10391_v41 = vpack.c.bf16 %v8568_v0, %v8568_v0  ;;  %v10393_v11 = vpack.c.bf16 %v8570_v34, %v8570_v34  ;;  %v10390_v18 = vpack.c.bf16 %v8567_v48, %v8567_v48 }
 0x58e   : > { %8867 = vst.msk [vmem:[%s15719_s17 + $0x68] sm:$0xf] %vm8831_vm3, %v10392_v26  ;;  %8866 = vst.msk [vmem:[%s15719_s17 + $0x64] sm:$0xf] %vm8831_vm3, %v10391_v41  ;;  %v8869_v27 = vsel %vm15733_vm6, %v10393_v11, %v8868_v49  ;;  %v10872_v53 = vpop.permute.xlu1 %10871 }
 0x58f   : > { %8865 = vst.msk [vmem:[%s15719_s17 + $0x60] sm:$0xf] %vm8831_vm3, %v10390_v18  ;;  %8870 = vst [vmem:[%s15719_s17 + $0x6c] sm:$0x1] %v8869_v27  ;;  %v10874_v60 = vunpack.i.h.bf16 %v10872_v53  ;;  %v10873_v40 = vunpack.i.l.bf16 %v10872_v53  ;;  %v10867_v5 = vpop.permute.xlu0 %10866  ;;  %v16222_v18 = vld [vmem:[#allocation18_spill] sm:$0xff] }
 0x590   : > { %v10869_v16 = vunpack.i.h.bf16 %v10867_v5  ;;  %v10868_v21 = vunpack.i.l.bf16 %v10867_v5 }
 0x591   : > { %v8574_v17 = vmax.f32 %v15560_v57, %v10874_v60  ;;  %v8573_v51 = vmax.f32 %v15564_v14, %v10873_v40 }
 0x592   : > { %v8572_v47 = vmax.f32 %v15568_v22, %v10869_v16  ;;  %v8571_v4 = vmax.f32 %v15572_v39, %v10868_v21  ;;  %v16218_v39 = vld [vmem:[#allocation13_spill] sm:$0xff] }
 0x593   : > { %v10397_v61 = vpack.c.bf16 %v8574_v17, %v8574_v17  ;;  %v10396_v44 = vpack.c.bf16 %v8573_v51, %v8573_v51  ;;  %v8877_v51 = vld [vmem:[%s15719_s17 + $0x88] sm:$0x1] }
 0x594   : > { %v10395_v58 = vpack.c.bf16 %v8572_v47, %v8572_v47  ;;  %v10394_v32 = vpack.c.bf16 %v8571_v4, %v8571_v4  ;;  %v8886_v47 = vld [vmem:[%s15719_s17 + $0xa4] sm:$0x1] }
 0x595   : > { %8874 = vst.msk [vmem:[%s15719_s17 + $0x7c] sm:$0xf] %vm8831_vm3, %v10397_v61  ;;  %8873 = vst.msk [vmem:[%s15719_s17 + $0x78] sm:$0xf] %vm8831_vm3, %v10396_v44 }
 0x596   : > { %8872 = vst.msk [vmem:[%s15719_s17 + $0x74] sm:$0xf] %vm8831_vm3, %v10395_v58  ;;  %8871 = vst.msk [vmem:[%s15719_s17 + $0x70] sm:$0xf] %vm8831_vm3, %v10394_v32 }
 0x597   : > { %v10877_v57 = vpop.permute.xlu0 %10876 }
 0x598   : > { %v10879_v14 = vunpack.i.h.bf16 %v10877_v57  ;;  %v10878_v12 = vunpack.i.l.bf16 %v10877_v57 }
 0x59a   : > { %v8576_v22 = vmax.f32 %v15582_v33, %v10879_v14  ;;  %v8575_v46 = vmax.f32 %v16218_v39, %v10878_v12  ;;  %v16223_v12 = vld [vmem:[#allocation19_spill] sm:$0xff] }
 0x59c   : > { %v10399_v25 = vpack.c.bf16 %v8576_v22, %v8576_v22  ;;  %v10398_v36 = vpack.c.bf16 %v8575_v46, %v8575_v46  ;;  %v16224_v22 = vld [vmem:[#allocation21_spill] sm:$0xff] }
 0x59e   : > { %8876 = vst.msk [vmem:[%s15719_s17 + $0x84] sm:$0xf] %vm8831_vm3, %v10399_v25  ;;  %8875 = vst.msk [vmem:[%s15719_s17 + $0x80] sm:$0xf] %vm8831_vm3, %v10398_v36  ;;  %v16225_v25 = vld [vmem:[#allocation22_spill] sm:$0xff] }
 0x59f   : > { %v10882_v8 = vpop.permute.xlu1 %10881  ;;  %v10887_v31 = vpop.permute.xlu0 %10886 }
 0x5a0   : > { %v10884_v42 = vunpack.i.h.bf16 %v10882_v8  ;;  %v10883_v2 = vunpack.i.l.bf16 %v10882_v8  ;;  %v10889_v10 = vunpack.i.h.bf16 %v10887_v31  ;;  %v10888_v43 = vunpack.i.l.bf16 %v10887_v31  ;;  %v16226_v8 = vld [vmem:[#allocation28_spill] sm:$0xff] }
 0x5a2   : > { %v8579_v33 = vmax.f32 %v15605_v35, %v10884_v42  ;;  %v8578_v19 = vmax.f32 %v16219_v1, %v10883_v2  ;;  %v8581_v6 = vmax.f32 %v16220_v45, %v10889_v10  ;;  %v8580_v54 = vmax.f32 %v16221_v28, %v10888_v43 }
 0x5a4   : > { %v10402_v62 = vpack.c.bf16 %v8579_v33, %v8579_v33  ;;  %v10401_v59 = vpack.c.bf16 %v8578_v19, %v8578_v19  ;;  %v10404_v9 = vpack.c.bf16 %v8581_v6, %v8581_v6  ;;  %v10403_v56 = vpack.c.bf16 %v8580_v54, %v8580_v54 }
 0x5a6   : > { %8881 = vst.msk [vmem:[%s15719_s17 + $0x90] sm:$0xf] %vm8831_vm3, %v10402_v62  ;;  %8880 = vst.msk [vmem:[%s15719_s17 + $0x8c] sm:$0xf] %vm8831_vm3, %v10401_v59  ;;  %v10902_v30 = vpop.permute.xlu0 %10901 }
 0x5a7   : > { %8883 = vst.msk [vmem:[%s15719_s17 + $0x98] sm:$0xf] %vm8831_vm3, %v10404_v9  ;;  %8882 = vst.msk [vmem:[%s15719_s17 + $0x94] sm:$0xf] %vm8831_vm3, %v10403_v56  ;;  %v10904_v35 = vunpack.i.h.bf16 %v10902_v30  ;;  %v10903_v0 = vunpack.i.l.bf16 %v10902_v30  ;;  %v10892_v34 = vpop.permute.xlu1 %10891  ;;  %v8895_v56 = vld [vmem:[%s15719_s17 + $0xc0] sm:$0x1] }
 0x5a8   : > { %v10894_v48 = vunpack.i.h.bf16 %v10892_v34  ;;  %v10893_v49 = vunpack.i.l.bf16 %v10892_v34  ;;  %v8904_v30 = vld [vmem:[%s15719_s17 + $0xdc] sm:$0x1] }
 0x5a9   : > { %v8586_v26 = vmax.f32 %v15615_v55, %v10904_v35  ;;  %v8585_v41 = vmax.f32 %v15619_v63, %v10903_v0 }
 0x5aa   : > { %v8583_v11 = vmax.f32 %v15627_v37, %v10894_v48  ;;  %v8582_v27 = vmax.f32 %v16222_v18, %v10893_v49 }
 0x5ab   : > { %v10409_v53 = vpack.c.bf16 %v8586_v26, %v8586_v26  ;;  %v10408_v60 = vpack.c.bf16 %v8585_v41, %v8585_v41  ;;  %v10897_v40 = vpop.permute.xlu1 %10896 }
 0x5ac   : > { %v10406_v5 = vpack.c.bf16 %v8583_v11, %v8583_v11  ;;  %v10405_v16 = vpack.c.bf16 %v8582_v27, %v8582_v27  ;;  %v10899_v21 = vunpack.i.h.bf16 %v10897_v40  ;;  %v10898_v17 = vunpack.i.l.bf16 %v10897_v40 }
 0x5ad   : > { %8890 = vst.msk [vmem:[%s15719_s17 + $0xac] sm:$0xf] %vm8831_vm3, %v10409_v53  ;;  %8889 = vst.msk [vmem:[%s15719_s17 + $0xa8] sm:$0xf] %vm8831_vm3, %v10408_v60 }
 0x5ae   : > { %8885 = vst.msk [vmem:[%s15719_s17 + $0xa0] sm:$0xf] %vm8831_vm3, %v10406_v5  ;;  %8884 = vst.msk [vmem:[%s15719_s17 + $0x9c] sm:$0xf] %vm8831_vm3, %v10405_v16  ;;  %v8584_v55 = vmax.f32 %v15633_v13, %v10899_v21  ;;  %v8577_v63 = vmax.f32 %v15640_v3, %v10898_v17  ;;  %v10912_v37 = vpop.permute.xlu0 %10911 }
 0x5af   : > { %v10914_v4 = vunpack.i.h.bf16 %v10912_v37  ;;  %v10913_v61 = vunpack.i.l.bf16 %v10912_v37  ;;  %v10907_v44 = vpop.permute.xlu1 %10906 }
 0x5b0   : > { %v10407_v58 = vpack.c.bf16 %v8584_v55, %v8584_v55  ;;  %v10400_v32 = vpack.c.bf16 %v8577_v63, %v8577_v63  ;;  %v10909_v57 = vunpack.i.h.bf16 %v10907_v44  ;;  %v10908_v14 = vunpack.i.l.bf16 %v10907_v44 }
 0x5b1   : > { %v8590_v13 = vmax.f32 %v16223_v12, %v10914_v4  ;;  %v8589_v3 = vmax.f32 %v16224_v22, %v10913_v61 }
 0x5b2   : > { %v8887_v39 = vsel %vm15733_vm6, %v10407_v58, %v8886_v47  ;;  %v8878_v46 = vsel %vm15733_vm6, %v10400_v32, %v8877_v51  ;;  %v8588_v36 = vmax.f32 %v16225_v25, %v10909_v57  ;;  %v8587_v31 = vmax.f32 %v16226_v8, %v10908_v14 }
 0x5b3   : > { %8888 = vst [vmem:[%s15719_s17 + $0xa4] sm:$0x1] %v8887_v39  ;;  %8879 = vst [vmem:[%s15719_s17 + $0x88] sm:$0x1] %v8878_v46  ;;  %v10413_v42 = vpack.c.bf16 %v8590_v13, %v8590_v13  ;;  %v10412_v2 = vpack.c.bf16 %v8589_v3, %v8589_v3 }
 0x5b4   : > { %v10411_v10 = vpack.c.bf16 %v8588_v36, %v8588_v36  ;;  %v10410_v43 = vpack.c.bf16 %v8587_v31, %v8587_v31 }
 0x5b5   : > { %8894 = vst.msk [vmem:[%s15719_s17 + $0xbc] sm:$0xf] %vm8831_vm3, %v10413_v42  ;;  %8893 = vst.msk [vmem:[%s15719_s17 + $0xb8] sm:$0xf] %vm8831_vm3, %v10412_v2 }
 0x5b6   : > { %8892 = vst.msk [vmem:[%s15719_s17 + $0xb4] sm:$0xf] %vm8831_vm3, %v10411_v10  ;;  %8891 = vst.msk [vmem:[%s15719_s17 + $0xb0] sm:$0xf] %vm8831_vm3, %v10410_v43 }
 0x5c6   : > { %v10917_v33 = vpop.permute.xlu1 %10916  ;;  %v10922_v1 = vpop.permute.xlu0 %10921 }
 0x5c7   : > { %v10919_v19 = vunpack.i.h.bf16 %v10917_v33  ;;  %v10918_v45 = vunpack.i.l.bf16 %v10917_v33  ;;  %v10924_v6 = vunpack.i.h.bf16 %v10922_v1  ;;  %v10923_v28 = vunpack.i.l.bf16 %v10922_v1 }
 0x5c9   : > { %v8593_v54 = vmax.f32 %v15682_v38, %v10919_v19  ;;  %v8592_v62 = vmax.f32 %v15670_v15, %v10918_v45  ;;  %v8598_v59 = vmax.f32 %v15678_v29, %v10924_v6  ;;  %v8591_v9 = vmax.f32 %v15674_v24, %v10923_v28 }
 0x5ca   : > { %v10932_v35 = vpop.permute.xlu1 %10931  ;;  %v10927_v0 = vpop.permute.xlu0 %10926 }
 0x5cb   : > { %v10416_v34 = vpack.c.bf16 %v8593_v54, %v8593_v54  ;;  %v10415_v48 = vpack.c.bf16 %v8592_v62, %v8592_v62  ;;  %v10421_v49 = vpack.c.bf16 %v8598_v59, %v8598_v59  ;;  %v10414_v26 = vpack.c.bf16 %v8591_v9, %v8591_v9 }
 0x5cc   : > { %v10934_v41 = vunpack.i.h.bf16 %v10932_v35  ;;  %v10933_v38 = vunpack.i.l.bf16 %v10932_v35  ;;  %v10929_v11 = vunpack.i.h.bf16 %v10927_v0  ;;  %v10928_v15 = vunpack.i.l.bf16 %v10927_v0 }
 0x5cd   : > { %8899 = vst.msk [vmem:[%s15719_s17 + $0xc8] sm:$0xf] %vm8831_vm3, %v10416_v34  ;;  %8898 = vst.msk [vmem:[%s15719_s17 + $0xc4] sm:$0xf] %vm8831_vm3, %v10415_v48  ;;  %v8905_v24 = vsel %vm15733_vm6, %v10421_v49, %v8904_v30  ;;  %v8896_v29 = vsel %vm15733_vm6, %v10414_v26, %v8895_v56 }
 0x5ce   : > { %8906 = vst [vmem:[%s15719_s17 + $0xdc] sm:$0x1] %v8905_v24  ;;  %8897 = vst [vmem:[%s15719_s17 + $0xc0] sm:$0x1] %v8896_v29  ;;  %v8597_v18 = vmax.f32 %v15698_v50, %v10934_v41  ;;  %v8596_v27 = vmax.f32 %v15702_v52, %v10933_v38  ;;  %v8595_v53 = vmax.f32 %v15686_v20, %v10929_v11 }
 0x5cf   : > { %v8594_v60 = vmax.f32 %v15690_v23, %v10928_v15 }
 0x5d0   : > { %v10420_v40 = vpack.c.bf16 %v8597_v18, %v8597_v18  ;;  %v10419_v5 = vpack.c.bf16 %v8596_v27, %v8596_v27  ;;  %v10418_v16 = vpack.c.bf16 %v8595_v53, %v8595_v53 }
 0x5d1   : > { %v10417_v21 = vpack.c.bf16 %v8594_v60, %v8594_v60 }
 0x5d2   : > { %8903 = vst.msk [vmem:[%s15719_s17 + $0xd8] sm:$0xf] %vm8831_vm3, %v10420_v40  ;;  %8902 = vst.msk [vmem:[%s15719_s17 + $0xd4] sm:$0xf] %vm8831_vm3, %v10419_v5 }
 0x5d3   : > { %8901 = vst.msk [vmem:[%s15719_s17 + $0xd0] sm:$0xf] %vm8831_vm3, %v10418_v16  ;;  %8900 = vst.msk [vmem:[%s15719_s17 + $0xcc] sm:$0xf] %vm8831_vm3, %v10417_v21 }
 0x5d4 PF: > { %s18_s27 = sadd.s32 1, %s11327_s27  }
 0x5d5   : > { %p15_p4 = scmp.ge.s32.totalorder %s18_s27, 4  }
 0x5d7   :  { %17 = sbr.rel (!%p15_p4) target bundleno = 1 (0x1), region = 90 }

</bundles_post_ra>
